<compile_context>
chip_gen: v7x
topology: tpu7x:2x2x1
jax: 0.10.0
libtpu: 0.0.40
codegen_flags: <defaults>
</compile_context>

<pallas_src>
import functools

import jax
import jax.numpy as jnp
from jax.experimental import pallas as pl
from jax.experimental.pallas import tpu as pltpu

NEG_SLOPE = 0.01              # nn.LeakyReLU() default
BN_EPS = 1e-5
NUM_CLASSES = 3
HEAD_LANE_PAD = 128           # lane-dense padded fc output width
ACT_DTYPE = jnp.bfloat16      # inter-layer activation / matmul-input dtype
VMEM_LIMIT = 32 * 1024 * 1024

# (channels, stride of the first block) for layer1..layer4.
LAYER_CFG = ((64, 1), (128, 2), (256, 2), (512, 2))


def _leaky_relu(x):
    return jnp.where(x >= 0, x, NEG_SLOPE * x)


# ----------------------------------------------------------------------------
# Pallas kernels
# ----------------------------------------------------------------------------
def _conv_shifted(src_ref, w_ref, l_out, k_eff):
    """sum_q  src_ref[q : q+l_out, :] @ w_ref[q]   (bf16 in, f32 accumulate)."""
    c_out = w_ref.shape[-1]
    acc = jnp.zeros((l_out, c_out), jnp.float32)
    for q in range(k_eff):                       # unrolled, k_eff <= 4
        acc += jnp.dot(src_ref[pl.ds(q, l_out), :], w_ref[q],
                       preferred_element_type=jnp.float32)
    return acc


def _stem_kernel(x_ref, w_ref, b_ref, o_ref, *, k_eff):
    """Conv1d(6->64, K=7, s=2, pad=3) + folded BN + LeakyReLU."""
    l_out, _ = o_ref.shape
    acc = _conv_shifted(x_ref, w_ref, l_out, k_eff)
    o_ref[...] = _leaky_relu(acc + b_ref[...]).astype(o_ref.dtype)


def _block_body(x_ref, w1_ref, b1_ref, w2_ref, b2_ref, o_ref, hpad_ref,
                shortcut, k1):
    l_mid, _ = o_ref.shape
    # conv1 + bn1 + LeakyReLU
    h = _leaky_relu(_conv_shifted(x_ref, w1_ref, l_mid, k1) + b1_ref[...])
    # stash h zero-padded by one row on each side in VMEM scratch for conv2
    hpad_ref[...] = jnp.zeros(hpad_ref.shape, hpad_ref.dtype)
    hpad_ref[pl.ds(1, l_mid), :] = h.astype(hpad_ref.dtype)
    # conv2 + bn2 + residual add + LeakyReLU
    acc = _conv_shifted(hpad_ref, w2_ref, l_mid, 3)
    o_ref[...] = _leaky_relu(acc + b2_ref[...] + shortcut).astype(o_ref.dtype)


def _block_kernel_id(x_ref, w1_ref, b1_ref, w2_ref, b2_ref, o_ref, hpad_ref,
                     *, k1, q_sc):
    """BasicBlock with identity shortcut (stride 1, cin == cout)."""
    l_mid = o_ref.shape[0]
    shortcut = x_ref[pl.ds(q_sc, l_mid), :].astype(jnp.float32)
    _block_body(x_ref, w1_ref, b1_ref, w2_ref, b2_ref, o_ref, hpad_ref,
                shortcut, k1)


def _block_kernel_down(x_ref, w1_ref, b1_ref, w2_ref, b2_ref, wd_ref, bd_ref,
                       o_ref, hpad_ref, *, k1, q_sc):
    """BasicBlock with 1x1-conv + BN downsample shortcut."""
    l_mid = o_ref.shape[0]
    shortcut = (jnp.dot(x_ref[pl.ds(q_sc, l_mid), :], wd_ref[...],
                        preferred_element_type=jnp.float32) + bd_ref[...])
    _block_body(x_ref, w1_ref, b1_ref, w2_ref, b2_ref, o_ref, hpad_ref,
                shortcut, k1)


def _head_kernel(x_ref, w_ref, b_ref, o_ref):
    """AdaptiveAvgPool1d(1) + Linear; output lane-padded to 128."""
    feat = jnp.mean(x_ref[...].astype(jnp.float32), axis=1)          # (N, C)
    o_ref[...] = (jnp.dot(feat, w_ref[...],
                          preferred_element_type=jnp.float32) + b_ref[...])


# ----------------------------------------------------------------------------
# Pallas wrappers
# ----------------------------------------------------------------------------
def _space_to_depth_pad(x, stride, pad):
    """Zero-pad along L and fold the conv stride into the channel dim:
    (N, L, C) -> (N, (L+2*pad)/s, s*C).  Contiguous reshape, free in XLA."""
    n, l, c = x.shape
    xp = jnp.pad(x, ((0, 0), (pad, pad), (0, 0)))
    lp = l + 2 * pad
    extra = (-lp) % stride
    if extra:
        xp = jnp.pad(xp, ((0, 0), (0, extra), (0, 0)))
        lp += extra
    if stride == 1:
        return xp
    return xp.reshape(n, lp // stride, stride * c)


def _conv_bn_specs(r_in, c1, k_eff, c_out):
    return [
        pl.BlockSpec((None, r_in, c1), lambda i: (i, 0, 0)),     # x (per batch)
        pl.BlockSpec((k_eff, c1, c_out), lambda i: (0, 0, 0)),   # weight
        pl.BlockSpec((1, c_out), lambda i: (0, 0)),              # bias
    ]


def stem_forward(x, p):
    n, l, c = x.shape
    w, b = p["w_eff"], p["bias"]
    k_eff, c1, c_out = w.shape
    stride, pad, k = 2, 3, 7
    cin_p = c1 // stride
    x = x.astype(ACT_DTYPE)
    if cin_p > c:                       # sublane-friendly channel padding (6->8)
        x = jnp.pad(x, ((0, 0), (0, 0), (0, cin_p - c)))
    xr = _space_to_depth_pad(x, stride, pad)
    r_in = xr.shape[1]
    l_out = (l + 2 * pad - k) // stride + 1
    return pl.pallas_call(
        functools.partial(_stem_kernel, k_eff=k_eff),
        out_shape=jax.ShapeDtypeStruct((n, l_out, c_out), ACT_DTYPE),
        grid=(n,),
        in_specs=_conv_bn_specs(r_in, c1, k_eff, c_out),
        out_specs=pl.BlockSpec((None, l_out, c_out), lambda i: (i, 0, 0)),
        compiler_params=pltpu.CompilerParams(
            dimension_semantics=("parallel",),
            vmem_limit_bytes=VMEM_LIMIT),
    )(xr, w, b.reshape(1, c_out))


def block_forward(x, p, stride):
    n, l, _ = x.shape
    pad = 1
    w1, b1 = p["conv1"]["w_eff"], p["conv1"]["bias"]
    w2, b2 = p["conv2"]["w_eff"], p["conv2"]["bias"]
    k1, c1, c_out = w1.shape
    l_mid = (l + 2 * pad - 3) // stride + 1

    xr = _space_to_depth_pad(x.astype(ACT_DTYPE), stride, pad)
    r_in = xr.shape[1]

    in_specs = _conv_bn_specs(r_in, c1, k1, c_out) + [
        pl.BlockSpec((3, c_out, c_out), lambda i: (0, 0, 0)),    # w2
        pl.BlockSpec((1, c_out), lambda i: (0, 0)),              # b2
    ]
    args = [xr, w1, b1.reshape(1, c_out), w2, b2.reshape(1, c_out)]

    if "down_w" in p:
        q_sc = pad // stride            # channel offset (pad % s) baked into down_w
        kernel = functools.partial(_block_kernel_down, k1=k1, q_sc=q_sc)
        in_specs += [
            pl.BlockSpec((c1, c_out), lambda i: (0, 0)),         # down_w
            pl.BlockSpec((1, c_out), lambda i: (0, 0)),          # down_b
        ]
        args += [p["down_w"], p["down_b"].reshape(1, c_out)]
    else:                               # identity shortcut: x[l] == x_pad[l + pad]
        q_sc = pad
        kernel = functools.partial(_block_kernel_id, k1=k1, q_sc=q_sc)

    return pl.pallas_call(
        kernel,
        out_shape=jax.ShapeDtypeStruct((n, l_mid, c_out), ACT_DTYPE),
        grid=(n,),
        in_specs=in_specs,
        out_specs=pl.BlockSpec((None, l_mid, c_out), lambda i: (i, 0, 0)),
        scratch_shapes=[pltpu.VMEM((l_mid + 2, c_out), ACT_DTYPE)],
        compiler_params=pltpu.CompilerParams(
            dimension_semantics=("parallel",),
            vmem_limit_bytes=VMEM_LIMIT),
    )(*args)


def head_forward(x, w_fc, b_fc):
    n, l, c = x.shape
    p_out = w_fc.shape[1]
    y = pl.pallas_call(
        _head_kernel,
        out_shape=jax.ShapeDtypeStruct((n, p_out), jnp.float32),
        grid=(1,),
        in_specs=[
            pl.BlockSpec((n, l, c), lambda i: (0, 0, 0)),
            pl.BlockSpec((c, p_out), lambda i: (0, 0)),
            pl.BlockSpec((1, p_out), lambda i: (0, 0)),
        ],
        out_specs=pl.BlockSpec((n, p_out), lambda i: (0, 0)),
        compiler_params=pltpu.CompilerParams(
            dimension_semantics=("arbitrary",),
            vmem_limit_bytes=VMEM_LIMIT),
    )(x, w_fc, b_fc)
    return y[:, :NUM_CLASSES]


def resnet1d_forward(x, params):
    """x: (N, L, 6) -> logits (N, 3)."""
    h = stem_forward(x, params["stem"])
    for li, (_, stride0) in enumerate(LAYER_CFG):
        for bi, blk in enumerate(params[f"layer{li + 1}"]):
            h = block_forward(h, blk, stride0 if bi == 0 else 1)
    return head_forward(h, params["fc_w"], params["fc_b"])


# ----------------------------------------------------------------------------
# Deterministic parameter init + packing (BN folded, bf16, space-to-depth)
# ----------------------------------------------------------------------------
def init_conv_bn(key, cin, cout, k):
    """PyTorch-layout conv weight + inference-mode BN folded to scale/bias."""
    kw, kg, kb, km, kv = jax.random.split(key, 5)
    w = jax.random.normal(kw, (cout, cin, k), jnp.float32) / jnp.sqrt(cin * k)
    gamma = 1.0 + 0.1 * jax.random.normal(kg, (cout,), jnp.float32)
    beta = 0.1 * jax.random.normal(kb, (cout,), jnp.float32)
    mean = 0.1 * jax.random.normal(km, (cout,), jnp.float32)
    var = 1.0 + 0.1 * jax.random.uniform(kv, (cout,), jnp.float32)
    scale = gamma / jnp.sqrt(var + BN_EPS)
    bias = beta - mean * scale
    return {"w": w, "scale": scale, "bias": bias}


def _pack_conv(p, stride, cin_pad_to=None):
    """Fold BN scale into the weight and re-layout for the space-to-depth
    shifted-matmul conv: (Cout, Cin, K) -> (ceil(K/s), s*Cin, Cout) with the
    original tap q*s+r stored at channel slot r*Cin + ci of shift q."""
    w, scale = p["w"], p["scale"]
    cout, cin, k = w.shape
    wf = w * scale[:, None, None]
    if cin_pad_to is not None and cin_pad_to > cin:
        wf = jnp.pad(wf, ((0, 0), (0, cin_pad_to - cin), (0, 0)))
        cin = cin_pad_to
    k_eff = -(-k // stride)
    wf = jnp.pad(wf, ((0, 0), (0, 0), (0, k_eff * stride - k)))
    wf = wf.reshape(cout, cin, k_eff, stride)
    w_eff = jnp.transpose(wf, (2, 3, 1, 0)).reshape(k_eff, stride * cin, cout)
    return {"w_eff": w_eff.astype(ACT_DTYPE), "bias": p["bias"]}


def _pack_downsample(p, stride, pad):
    """1x1/stride-s downsample conv as one (s*Cin, Cout) matrix acting on the
    same padded / space-to-depth input as conv1 (channel offset pad % s baked in)."""
    w, scale = p["w"], p["scale"]                       # (cout, cin, 1)
    cout, cin, _ = w.shape
    wd = jnp.transpose((w * scale[:, None, None])[:, :, 0])        # (cin, cout)
    r0 = pad % stride
    w_eff = jnp.zeros((stride * cin, cout), jnp.float32)
    w_eff = w_eff.at[r0 * cin:(r0 + 1) * cin, :].set(wd)
    return w_eff.astype(ACT_DTYPE), p["bias"]


def init_block(key, cin, cout, stride):
    k1, k2, k3 = jax.random.split(key, 3)
    p = {"conv1": _pack_conv(init_conv_bn(k1, cin, cout, 3), stride),
         "conv2": _pack_conv(init_conv_bn(k2, cout, cout, 3), 1)}
    if stride != 1 or cin != cout:
        dw, db = _pack_downsample(init_conv_bn(k3, cin, cout, 1), stride, pad=1)
        p["down_w"], p["down_b"] = dw, db
    return p


def init_params(key, layers=(1, 1, 1, 1)):
    keys = jax.random.split(key, 6)
    # stem: Conv1d(6, 64, 7, stride=2, padding=3); Cin padded 6 -> 8.
    params = {"stem": _pack_conv(init_conv_bn(keys[0], 6, 64, 7), stride=2,
                                 cin_pad_to=8)}
    inch = 64
    for li, ((ch, stride0), nblocks) in enumerate(zip(LAYER_CFG, layers)):
        bkeys = jax.random.split(keys[1 + li], nblocks)
        blocks = []
        for bi in range(nblocks):
            stride = stride0 if bi == 0 else 1
            blocks.append(init_block(bkeys[bi], inch, ch, stride))
            inch = ch
        params[f"layer{li + 1}"] = blocks
    kfw, kfb = jax.random.split(keys[5], 2)
    w_fc = jax.random.normal(kfw, (512, NUM_CLASSES), jnp.float32) / jnp.sqrt(512.0)
    b_fc = 0.1 * jax.random.normal(kfb, (NUM_CLASSES,), jnp.float32)
    # lane-pad the 3-wide fc head to 128 output lanes (sliced back after kernel)
    params["fc_w"] = (jnp.zeros((512, HEAD_LANE_PAD), jnp.float32)
                      .at[:, :NUM_CLASSES].set(w_fc))
    params["fc_b"] = (jnp.zeros((1, HEAD_LANE_PAD), jnp.float32)
                      .at[:, :NUM_CLASSES].set(b_fc))
    return params


# ----------------------------------------------------------------------------
if __name__ == "__main__":
    key = jax.random.PRNGKey(0)
    pkey, xkey = jax.random.split(key)

    params = init_params(pkey, layers=(1, 1, 1, 1))

    # Input matches the PyTorch forward's expectation of (N, L, C=6)
    # (it transposes to (N, 6, L) before the first Conv1d).
    x = jax.random.normal(xkey, (2, 64, 6), jnp.float32)

    fwd = jax.jit(resnet1d_forward)
    out = jax.block_until_ready(fwd(x, params))

    assert out.shape == (2, NUM_CLASSES), out.shape
    assert bool(jnp.all(jnp.isfinite(out)))
    print("KERNEL_OK")
</pallas_src>

<mosaic_0001>
module attributes {stable_mosaic.version = 11 : i64} {
  func.func @_stem_kernel(%arg0: i32, %arg1: memref<1x35x16xbf16, #tpu.memory_space<vmem>>, %arg2: memref<4x16x64xbf16, #tpu.memory_space<vmem>>, %arg3: memref<1x64xf32, #tpu.memory_space<vmem>>, %arg4: memref<1x32x64xbf16, #tpu.memory_space<vmem>>) attributes {dimension_semantics = [#tpu.dimension_semantics<parallel>], iteration_bounds = array<i64: 2>, scalar_prefetch = 0 : i64, scratch_operands = 0 : i64, tpu.core_type = #tpu.core_type<tc>, window_params = [{transform_indices = @transform_0, window_bounds = array<i64: 1, 35, 16>}, {pipeline_mode = #tpu.pipeline_mode<synchronous>, transform_indices = @transform_1, window_bounds = array<i64: 4, 16, 64>}, {pipeline_mode = #tpu.pipeline_mode<synchronous>, transform_indices = @transform_2, window_bounds = array<i64: 1, 64>}, {transform_indices = @transform_3, window_bounds = array<i64: 1, 32, 64>}]} {
    %cst = arith.constant 0.000000e+00 : f32
    %0 = vector.broadcast %cst : f32 to vector<32x64xf32>
    %c0 = arith.constant 0 : index
    %c0_0 = arith.constant 0 : index
    %c0_1 = arith.constant 0 : index
    %1 = vector.load %arg1[%c0, %c0_0, %c0_1] : memref<1x35x16xbf16, #tpu.memory_space<vmem>>, vector<1x32x16xbf16>
    %2 = vector.shape_cast %1 : vector<1x32x16xbf16> to vector<32x16xbf16>
    %c0_2 = arith.constant 0 : index
    %c0_3 = arith.constant 0 : index
    %c0_4 = arith.constant 0 : index
    %3 = vector.load %arg2[%c0_2, %c0_3, %c0_4] : memref<4x16x64xbf16, #tpu.memory_space<vmem>>, vector<1x16x64xbf16>
    %4 = vector.shape_cast %3 : vector<1x16x64xbf16> to vector<16x64xbf16>
    %cst_5 = arith.constant dense<0.000000e+00> : vector<32x64xf32>
    %5 = tpu.matmul %2, %4, %cst_5 {dimension_numbers = #tpu.dot_dimension_numbers<[1], [0], [0], [1], [0, 0, 1, 1], [], []>} : vector<32x16xbf16>, vector<16x64xbf16>, vector<32x64xf32> -> vector<32x64xf32>
    %6 = arith.addf %0, %5 : vector<32x64xf32>
    %c0_6 = arith.constant 0 : index
    %c1 = arith.constant 1 : index
    %c0_7 = arith.constant 0 : index
    %7 = vector.load %arg1[%c0_6, %c1, %c0_7] : memref<1x35x16xbf16, #tpu.memory_space<vmem>>, vector<1x32x16xbf16>
    %8 = vector.shape_cast %7 : vector<1x32x16xbf16> to vector<32x16xbf16>
    %c1_8 = arith.constant 1 : index
    %c0_9 = arith.constant 0 : index
    %c0_10 = arith.constant 0 : index
    %9 = vector.load %arg2[%c1_8, %c0_9, %c0_10] : memref<4x16x64xbf16, #tpu.memory_space<vmem>>, vector<1x16x64xbf16>
    %10 = vector.shape_cast %9 : vector<1x16x64xbf16> to vector<16x64xbf16>
    %cst_11 = arith.constant dense<0.000000e+00> : vector<32x64xf32>
    %11 = tpu.matmul %8, %10, %cst_11 {dimension_numbers = #tpu.dot_dimension_numbers<[1], [0], [0], [1], [0, 0, 1, 1], [], []>} : vector<32x16xbf16>, vector<16x64xbf16>, vector<32x64xf32> -> vector<32x64xf32>
    %12 = arith.addf %6, %11 : vector<32x64xf32>
    %c0_12 = arith.constant 0 : index
    %c2 = arith.constant 2 : index
    %c0_13 = arith.constant 0 : index
    %13 = vector.load %arg1[%c0_12, %c2, %c0_13] : memref<1x35x16xbf16, #tpu.memory_space<vmem>>, vector<1x32x16xbf16>
    %14 = vector.shape_cast %13 : vector<1x32x16xbf16> to vector<32x16xbf16>
    %c2_14 = arith.constant 2 : index
    %c0_15 = arith.constant 0 : index
    %c0_16 = arith.constant 0 : index
    %15 = vector.load %arg2[%c2_14, %c0_15, %c0_16] : memref<4x16x64xbf16, #tpu.memory_space<vmem>>, vector<1x16x64xbf16>
    %16 = vector.shape_cast %15 : vector<1x16x64xbf16> to vector<16x64xbf16>
    %cst_17 = arith.constant dense<0.000000e+00> : vector<32x64xf32>
    %17 = tpu.matmul %14, %16, %cst_17 {dimension_numbers = #tpu.dot_dimension_numbers<[1], [0], [0], [1], [0, 0, 1, 1], [], []>} : vector<32x16xbf16>, vector<16x64xbf16>, vector<32x64xf32> -> vector<32x64xf32>
    %18 = arith.addf %12, %17 : vector<32x64xf32>
    %c0_18 = arith.constant 0 : index
    %c3 = arith.constant 3 : index
    %c0_19 = arith.constant 0 : index
    %19 = vector.load %arg1[%c0_18, %c3, %c0_19] : memref<1x35x16xbf16, #tpu.memory_space<vmem>>, vector<1x32x16xbf16>
    %20 = vector.shape_cast %19 : vector<1x32x16xbf16> to vector<32x16xbf16>
    %c3_20 = arith.constant 3 : index
    %c0_21 = arith.constant 0 : index
    %c0_22 = arith.constant 0 : index
    %21 = vector.load %arg2[%c3_20, %c0_21, %c0_22] : memref<4x16x64xbf16, #tpu.memory_space<vmem>>, vector<1x16x64xbf16>
    %22 = vector.shape_cast %21 : vector<1x16x64xbf16> to vector<16x64xbf16>
    %cst_23 = arith.constant dense<0.000000e+00> : vector<32x64xf32>
    %23 = tpu.matmul %20, %22, %cst_23 {dimension_numbers = #tpu.dot_dimension_numbers<[1], [0], [0], [1], [0, 0, 1, 1], [], []>} : vector<32x16xbf16>, vector<16x64xbf16>, vector<32x64xf32> -> vector<32x64xf32>
    %24 = arith.addf %18, %23 : vector<32x64xf32>
    %c0_24 = arith.constant 0 : index
    %c0_25 = arith.constant 0 : index
    %25 = vector.load %arg3[%c0_24, %c0_25] : memref<1x64xf32, #tpu.memory_space<vmem>>, vector<1x64xf32>
    %26 = vector.broadcast %25 : vector<1x64xf32> to vector<32x64xf32>
    %27 = arith.addf %24, %26 : vector<32x64xf32>
    %cst_26 = arith.constant 0.000000e+00 : f32
    %28 = vector.broadcast %cst_26 : f32 to vector<32x64xf32>
    %29 = arith.cmpf oge, %27, %28 : vector<32x64xf32>
    %cst_27 = arith.constant 0.00999999977 : f32
    %30 = vector.broadcast %cst_27 : f32 to vector<32x64xf32>
    %31 = arith.mulf %30, %27 : vector<32x64xf32>
    %32 = arith.select %29, %27, %31 : vector<32x64xi1>, vector<32x64xf32>
    %33 = arith.truncf %32 : vector<32x64xf32> to vector<32x64xbf16>
    %c0_28 = arith.constant 0 : index
    %c0_29 = arith.constant 0 : index
    %c0_30 = arith.constant 0 : index
    %34 = vector.load %arg4[%c0_28, %c0_29, %c0_30] : memref<1x32x64xbf16, #tpu.memory_space<vmem>>, vector<1x32x64xbf16>
    %35 = vector.shape_cast %34 : vector<1x32x64xbf16> to vector<32x64xbf16>
    %36 = vector.shape_cast %33 : vector<32x64xbf16> to vector<1x32x64xbf16>
    tpu.vector_store %arg4[%c0_28, %c0_29, %c0_30], %36 {strides = array<i32>} : memref<1x32x64xbf16, #tpu.memory_space<vmem>>, vector<1x32x64xbf16>,
    return
  }
  func.func @transform_0(%arg0: i32) -> (i32, i32, i32) {
    %c0_i32 = arith.constant 0 : i32
    %c0_i32_0 = arith.constant 0 : i32
    %c0_i32_1 = arith.constant 0 : i32
    return %arg0, %c0_i32, %c0_i32_0 : i32, i32, i32
  }
  func.func @transform_1(%arg0: i32) -> (i32, i32, i32) {
    %c0_i32 = arith.constant 0 : i32
    %c0_i32_0 = arith.constant 0 : i32
    %c0_i32_1 = arith.constant 0 : i32
    %c0_i32_2 = arith.constant 0 : i32
    return %c0_i32, %c0_i32_0, %c0_i32_1 : i32, i32, i32
  }
  func.func @transform_2(%arg0: i32) -> (i32, i32) {
    %c0_i32 = arith.constant 0 : i32
    %c0_i32_0 = arith.constant 0 : i32
    %c0_i32_1 = arith.constant 0 : i32
    return %c0_i32, %c0_i32_0 : i32, i32
  }
  func.func @transform_3(%arg0: i32) -> (i32, i32, i32) {
    %c0_i32 = arith.constant 0 : i32
    %c0_i32_0 = arith.constant 0 : i32
    %c0_i32_1 = arith.constant 0 : i32
    return %arg0, %c0_i32, %c0_i32_0 : i32, i32, i32
  }
}

module attributes {stable_mosaic.version = 11 : i64} {
  func.func @_block_kernel_id(%arg0: i32, %arg1: memref<1x34x64xbf16, #tpu.memory_space<vmem>>, %arg2: memref<3x64x64xbf16, #tpu.memory_space<vmem>>, %arg3: memref<1x64xf32, #tpu.memory_space<vmem>>, %arg4: memref<3x64x64xbf16, #tpu.memory_space<vmem>>, %arg5: memref<1x64xf32, #tpu.memory_space<vmem>>, %arg6: memref<1x32x64xbf16, #tpu.memory_space<vmem>>, %arg7: memref<34x64xbf16, #tpu.memory_space<vmem>>) attributes {dimension_semantics = [#tpu.dimension_semantics<parallel>], iteration_bounds = array<i64: 2>, scalar_prefetch = 0 : i64, scratch_operands = 1 : i64, tpu.core_type = #tpu.core_type<tc>, window_params = [{transform_indices = @transform_0, window_bounds = array<i64: 1, 34, 64>}, {pipeline_mode = #tpu.pipeline_mode<synchronous>, transform_indices = @transform_1, window_bounds = array<i64: 3, 64, 64>}, {pipeline_mode = #tpu.pipeline_mode<synchronous>, transform_indices = @transform_2, window_bounds = array<i64: 1, 64>}, {pipeline_mode = #tpu.pipeline_mode<synchronous>, transform_indices = @transform_3, window_bounds = array<i64: 3, 64, 64>}, {pipeline_mode = #tpu.pipeline_mode<synchronous>, transform_indices = @transform_4, window_bounds = array<i64: 1, 64>}, {transform_indices = @transform_5, window_bounds = array<i64: 1, 32, 64>}]} {
    %c0 = arith.constant 0 : index
    %c1 = arith.constant 1 : index
    %c0_0 = arith.constant 0 : index
    %0 = vector.load %arg1[%c0, %c1, %c0_0] : memref<1x34x64xbf16, #tpu.memory_space<vmem>>, vector<1x32x64xbf16>
    %1 = vector.shape_cast %0 : vector<1x32x64xbf16> to vector<32x64xbf16>
    %2 = arith.extf %1 : vector<32x64xbf16> to vector<32x64xf32>
    %cst = arith.constant 0.000000e+00 : f32
    %3 = vector.broadcast %cst : f32 to vector<32x64xf32>
    %c0_1 = arith.constant 0 : index
    %c0_2 = arith.constant 0 : index
    %c0_3 = arith.constant 0 : index
    %4 = vector.load %arg1[%c0_1, %c0_2, %c0_3] : memref<1x34x64xbf16, #tpu.memory_space<vmem>>, vector<1x32x64xbf16>
    %5 = vector.shape_cast %4 : vector<1x32x64xbf16> to vector<32x64xbf16>
    %c0_4 = arith.constant 0 : index
    %c0_5 = arith.constant 0 : index
    %c0_6 = arith.constant 0 : index
    %6 = vector.load %arg2[%c0_4, %c0_5, %c0_6] : memref<3x64x64xbf16, #tpu.memory_space<vmem>>, vector<1x64x64xbf16>
    %7 = vector.shape_cast %6 : vector<1x64x64xbf16> to vector<64x64xbf16>
    %cst_7 = arith.constant dense<0.000000e+00> : vector<32x64xf32>
    %8 = tpu.matmul %5, %7, %cst_7 {dimension_numbers = #tpu.dot_dimension_numbers<[1], [0], [0], [1], [0, 0, 1, 1], [], []>} : vector<32x64xbf16>, vector<64x64xbf16>, vector<32x64xf32> -> vector<32x64xf32>
    %9 = arith.addf %3, %8 : vector<32x64xf32>
    %c0_8 = arith.constant 0 : index
    %c1_9 = arith.constant 1 : index
    %c0_10 = arith.constant 0 : index
    %10 = vector.load %arg1[%c0_8, %c1_9, %c0_10] : memref<1x34x64xbf16, #tpu.memory_space<vmem>>, vector<1x32x64xbf16>
    %11 = vector.shape_cast %10 : vector<1x32x64xbf16> to vector<32x64xbf16>
    %c1_11 = arith.constant 1 : index
    %c0_12 = arith.constant 0 : index
    %c0_13 = arith.constant 0 : index
    %12 = vector.load %arg2[%c1_11, %c0_12, %c0_13] : memref<3x64x64xbf16, #tpu.memory_space<vmem>>, vector<1x64x64xbf16>
    %13 = vector.shape_cast %12 : vector<1x64x64xbf16> to vector<64x64xbf16>
    %cst_14 = arith.constant dense<0.000000e+00> : vector<32x64xf32>
    %14 = tpu.matmul %11, %13, %cst_14 {dimension_numbers = #tpu.dot_dimension_numbers<[1], [0], [0], [1], [0, 0, 1, 1], [], []>} : vector<32x64xbf16>, vector<64x64xbf16>, vector<32x64xf32> -> vector<32x64xf32>
    %15 = arith.addf %9, %14 : vector<32x64xf32>
    %c0_15 = arith.constant 0 : index
    %c2 = arith.constant 2 : index
    %c0_16 = arith.constant 0 : index
    %16 = vector.load %arg1[%c0_15, %c2, %c0_16] : memref<1x34x64xbf16, #tpu.memory_space<vmem>>, vector<1x32x64xbf16>
    %17 = vector.shape_cast %16 : vector<1x32x64xbf16> to vector<32x64xbf16>
    %c2_17 = arith.constant 2 : index
    %c0_18 = arith.constant 0 : index
    %c0_19 = arith.constant 0 : index
    %18 = vector.load %arg2[%c2_17, %c0_18, %c0_19] : memref<3x64x64xbf16, #tpu.memory_space<vmem>>, vector<1x64x64xbf16>
    %19 = vector.shape_cast %18 : vector<1x64x64xbf16> to vector<64x64xbf16>
    %cst_20 = arith.constant dense<0.000000e+00> : vector<32x64xf32>
    %20 = tpu.matmul %17, %19, %cst_20 {dimension_numbers = #tpu.dot_dimension_numbers<[1], [0], [0], [1], [0, 0, 1, 1], [], []>} : vector<32x64xbf16>, vector<64x64xbf16>, vector<32x64xf32> -> vector<32x64xf32>
    %21 = arith.addf %15, %20 : vector<32x64xf32>
    %c0_21 = arith.constant 0 : index
    %c0_22 = arith.constant 0 : index
    %22 = vector.load %arg3[%c0_21, %c0_22] : memref<1x64xf32, #tpu.memory_space<vmem>>, vector<1x64xf32>
    %23 = vector.broadcast %22 : vector<1x64xf32> to vector<32x64xf32>
    %24 = arith.addf %21, %23 : vector<32x64xf32>
    %cst_23 = arith.constant 0.000000e+00 : f32
    %25 = vector.broadcast %cst_23 : f32 to vector<32x64xf32>
    %26 = arith.cmpf oge, %24, %25 : vector<32x64xf32>
    %cst_24 = arith.constant 0.00999999977 : f32
    %27 = vector.broadcast %cst_24 : f32 to vector<32x64xf32>
    %28 = arith.mulf %27, %24 : vector<32x64xf32>
    %29 = arith.select %26, %24, %28 : vector<32x64xi1>, vector<32x64xf32>
    %cst_25 = arith.constant 0.000000e+00 : bf16
    %30 = vector.broadcast %cst_25 : bf16 to vector<34x64xbf16>
    %c0_26 = arith.constant 0 : index
    %c0_27 = arith.constant 0 : index
    %31 = vector.load %arg7[%c0_26, %c0_27] : memref<34x64xbf16, #tpu.memory_space<vmem>>, vector<34x64xbf16>
    tpu.vector_store %arg7[%c0_26, %c0_27], %30 {strides = array<i32>} : memref<34x64xbf16, #tpu.memory_space<vmem>>, vector<34x64xbf16>,
    %32 = arith.truncf %29 : vector<32x64xf32> to vector<32x64xbf16>
    %c1_28 = arith.constant 1 : index
    %c0_29 = arith.constant 0 : index
    %33 = vector.load %arg7[%c1_28, %c0_29] : memref<34x64xbf16, #tpu.memory_space<vmem>>, vector<32x64xbf16>
    tpu.vector_store %arg7[%c1_28, %c0_29], %32 {strides = array<i32>} : memref<34x64xbf16, #tpu.memory_space<vmem>>, vector<32x64xbf16>,
    %cst_30 = arith.constant 0.000000e+00 : f32
    %34 = vector.broadcast %cst_30 : f32 to vector<32x64xf32>
    %c0_31 = arith.constant 0 : index
    %c0_32 = arith.constant 0 : index
    %35 = vector.load %arg7[%c0_31, %c0_32] : memref<34x64xbf16, #tpu.memory_space<vmem>>, vector<32x64xbf16>
    %c0_33 = arith.constant 0 : index
    %c0_34 = arith.constant 0 : index
    %c0_35 = arith.constant 0 : index
    %36 = vector.load %arg4[%c0_33, %c0_34, %c0_35] : memref<3x64x64xbf16, #tpu.memory_space<vmem>>, vector<1x64x64xbf16>
    %37 = vector.shape_cast %36 : vector<1x64x64xbf16> to vector<64x64xbf16>
    %cst_36 = arith.constant dense<0.000000e+00> : vector<32x64xf32>
    %38 = tpu.matmul %35, %37, %cst_36 {dimension_numbers = #tpu.dot_dimension_numbers<[1], [0], [0], [1], [0, 0, 1, 1], [], []>} : vector<32x64xbf16>, vector<64x64xbf16>, vector<32x64xf32> -> vector<32x64xf32>
    %39 = arith.addf %34, %38 : vector<32x64xf32>
    %c1_37 = arith.constant 1 : index
    %c0_38 = arith.constant 0 : index
    %40 = vector.load %arg7[%c1_37, %c0_38] : memref<34x64xbf16, #tpu.memory_space<vmem>>, vector<32x64xbf16>
    %c1_39 = arith.constant 1 : index
    %c0_40 = arith.constant 0 : index
    %c0_41 = arith.constant 0 : index
    %41 = vector.load %arg4[%c1_39, %c0_40, %c0_41] : memref<3x64x64xbf16, #tpu.memory_space<vmem>>, vector<1x64x64xbf16>
    %42 = vector.shape_cast %41 : vector<1x64x64xbf16> to vector<64x64xbf16>
    %cst_42 = arith.constant dense<0.000000e+00> : vector<32x64xf32>
    %43 = tpu.matmul %40, %42, %cst_42 {dimension_numbers = #tpu.dot_dimension_numbers<[1], [0], [0], [1], [0, 0, 1, 1], [], []>} : vector<32x64xbf16>, vector<64x64xbf16>, vector<32x64xf32> -> vector<32x64xf32>
    %44 = arith.addf %39, %43 : vector<32x64xf32>
    %c2_43 = arith.constant 2 : index
    %c0_44 = arith.constant 0 : index
    %45 = vector.load %arg7[%c2_43, %c0_44] : memref<34x64xbf16, #tpu.memory_space<vmem>>, vector<32x64xbf16>
    %c2_45 = arith.constant 2 : index
    %c0_46 = arith.constant 0 : index
    %c0_47 = arith.constant 0 : index
    %46 = vector.load %arg4[%c2_45, %c0_46, %c0_47] : memref<3x64x64xbf16, #tpu.memory_space<vmem>>, vector<1x64x64xbf16>
    %47 = vector.shape_cast %46 : vector<1x64x64xbf16> to vector<64x64xbf16>
    %cst_48 = arith.constant dense<0.000000e+00> : vector<32x64xf32>
    %48 = tpu.matmul %45, %47, %cst_48 {dimension_numbers = #tpu.dot_dimension_numbers<[1], [0], [0], [1], [0, 0, 1, 1], [], []>} : vector<32x64xbf16>, vector<64x64xbf16>, vector<32x64xf32> -> vector<32x64xf32>
    %49 = arith.addf %44, %48 : vector<32x64xf32>
    %c0_49 = arith.constant 0 : index
    %c0_50 = arith.constant 0 : index
    %50 = vector.load %arg5[%c0_49, %c0_50] : memref<1x64xf32, #tpu.memory_space<vmem>>, vector<1x64xf32>
    %51 = vector.broadcast %50 : vector<1x64xf32> to vector<32x64xf32>
    %52 = arith.addf %49, %51 : vector<32x64xf32>
    %53 = arith.addf %52, %2 : vector<32x64xf32>
    %cst_51 = arith.constant 0.000000e+00 : f32
    %54 = vector.broadcast %cst_51 : f32 to vector<32x64xf32>
    %55 = arith.cmpf oge, %53, %54 : vector<32x64xf32>
    %cst_52 = arith.constant 0.00999999977 : f32
    %56 = vector.broadcast %cst_52 : f32 to vector<32x64xf32>
    %57 = arith.mulf %56, %53 : vector<32x64xf32>
    %58 = arith.select %55, %53, %57 : vector<32x64xi1>, vector<32x64xf32>
    %59 = arith.truncf %58 : vector<32x64xf32> to vector<32x64xbf16>
    %c0_53 = arith.constant 0 : index
    %c0_54 = arith.constant 0 : index
    %c0_55 = arith.constant 0 : index
    %60 = vector.load %arg6[%c0_53, %c0_54, %c0_55] : memref<1x32x64xbf16, #tpu.memory_space<vmem>>, vector<1x32x64xbf16>
    %61 = vector.shape_cast %60 : vector<1x32x64xbf16> to vector<32x64xbf16>
    %62 = vector.shape_cast %59 : vector<32x64xbf16> to vector<1x32x64xbf16>
    tpu.vector_store %arg6[%c0_53, %c0_54, %c0_55], %62 {strides = array<i32>} : memref<1x32x64xbf16, #tpu.memory_space<vmem>>, vector<1x32x64xbf16>,
    return
  }
  func.func @transform_0(%arg0: i32) -> (i32, i32, i32) {
    %c0_i32 = arith.constant 0 : i32
    %c0_i32_0 = arith.constant 0 : i32
    %c0_i32_1 = arith.constant 0 : i32
    return %arg0, %c0_i32, %c0_i32_0 : i32, i32, i32
  }
  func.func @transform_1(%arg0: i32) -> (i32, i32, i32) {
    %c0_i32 = arith.constant 0 : i32
    %c0_i32_0 = arith.constant 0 : i32
    %c0_i32_1 = arith.constant 0 : i32
    %c0_i32_2 = arith.constant 0 : i32
    return %c0_i32, %c0_i32_0, %c0_i32_1 : i32, i32, i32
  }
  func.func @transform_2(%arg0: i32) -> (i32, i32) {
    %c0_i32 = arith.constant 0 : i32
    %c0_i32_0 = arith.constant 0 : i32
    %c0_i32_1 = arith.constant 0 : i32
    return %c0_i32, %c0_i32_0 : i32, i32
  }
  func.func @transform_3(%arg0: i32) -> (i32, i32, i32) {
    %c0_i32 = arith.constant 0 : i32
    %c0_i32_0 = arith.constant 0 : i32
    %c0_i32_1 = arith.constant 0 : i32
    %c0_i32_2 = arith.constant 0 : i32
    return %c0_i32, %c0_i32_0, %c0_i32_1 : i32, i32, i32
  }
  func.func @transform_4(%arg0: i32) -> (i32, i32) {
    %c0_i32 = arith.constant 0 : i32
    %c0_i32_0 = arith.constant 0 : i32
    %c0_i32_1 = arith.constant 0 : i32
    return %c0_i32, %c0_i32_0 : i32, i32
  }
  func.func @transform_5(%arg0: i32) -> (i32, i32, i32) {
    %c0_i32 = arith.constant 0 : i32
    %c0_i32_0 = arith.constant 0 : i32
    %c0_i32_1 = arith.constant 0 : i32
    return %arg0, %c0_i32, %c0_i32_0 : i32, i32, i32
  }
}

module attributes {stable_mosaic.version = 11 : i64} {
  func.func @_block_kernel_down(%arg0: i32, %arg1: memref<1x17x128xbf16, #tpu.memory_space<vmem>>, %arg2: memref<2x128x128xbf16, #tpu.memory_space<vmem>>, %arg3: memref<1x128xf32, #tpu.memory_space<vmem>>, %arg4: memref<3x128x128xbf16, #tpu.memory_space<vmem>>, %arg5: memref<1x128xf32, #tpu.memory_space<vmem>>, %arg6: memref<128x128xbf16, #tpu.memory_space<vmem>>, %arg7: memref<1x128xf32, #tpu.memory_space<vmem>>, %arg8: memref<1x16x128xbf16, #tpu.memory_space<vmem>>, %arg9: memref<18x128xbf16, #tpu.memory_space<vmem>>) attributes {dimension_semantics = [#tpu.dimension_semantics<parallel>], iteration_bounds = array<i64: 2>, scalar_prefetch = 0 : i64, scratch_operands = 1 : i64, tpu.core_type = #tpu.core_type<tc>, window_params = [{transform_indices = @transform_0, window_bounds = array<i64: 1, 17, 128>}, {pipeline_mode = #tpu.pipeline_mode<synchronous>, transform_indices = @transform_1, window_bounds = array<i64: 2, 128, 128>}, {pipeline_mode = #tpu.pipeline_mode<synchronous>, transform_indices = @transform_2, window_bounds = array<i64: 1, 128>}, {pipeline_mode = #tpu.pipeline_mode<synchronous>, transform_indices = @transform_3, window_bounds = array<i64: 3, 128, 128>}, {pipeline_mode = #tpu.pipeline_mode<synchronous>, transform_indices = @transform_4, window_bounds = array<i64: 1, 128>}, {pipeline_mode = #tpu.pipeline_mode<synchronous>, transform_indices = @transform_5, window_bounds = array<i64: 128, 128>}, {pipeline_mode = #tpu.pipeline_mode<synchronous>, transform_indices = @transform_6, window_bounds = array<i64: 1, 128>}, {transform_indices = @transform_7, window_bounds = array<i64: 1, 16, 128>}]} {
    %c0 = arith.constant 0 : index
    %c0_0 = arith.constant 0 : index
    %c0_1 = arith.constant 0 : index
    %0 = vector.load %arg1[%c0, %c0_0, %c0_1] : memref<1x17x128xbf16, #tpu.memory_space<vmem>>, vector<1x16x128xbf16>
    %1 = vector.shape_cast %0 : vector<1x16x128xbf16> to vector<16x128xbf16>
    %c0_2 = arith.constant 0 : index
    %c0_3 = arith.constant 0 : index
    %2 = vector.load %arg6[%c0_2, %c0_3] : memref<128x128xbf16, #tpu.memory_space<vmem>>, vector<128x128xbf16>
    %cst = arith.constant dense<0.000000e+00> : vector<16x128xf32>
    %3 = tpu.matmul %1, %2, %cst {dimension_numbers = #tpu.dot_dimension_numbers<[1], [0], [0], [1], [0, 0, 1, 1], [], []>} : vector<16x128xbf16>, vector<128x128xbf16>, vector<16x128xf32> -> vector<16x128xf32>
    %c0_4 = arith.constant 0 : index
    %c0_5 = arith.constant 0 : index
    %4 = vector.load %arg7[%c0_4, %c0_5] : memref<1x128xf32, #tpu.memory_space<vmem>>, vector<1x128xf32>
    %5 = vector.broadcast %4 : vector<1x128xf32> to vector<16x128xf32>
    %6 = arith.addf %3, %5 : vector<16x128xf32>
    %cst_6 = arith.constant 0.000000e+00 : f32
    %7 = vector.broadcast %cst_6 : f32 to vector<16x128xf32>
    %c0_7 = arith.constant 0 : index
    %c0_8 = arith.constant 0 : index
    %c0_9 = arith.constant 0 : index
    %8 = vector.load %arg1[%c0_7, %c0_8, %c0_9] : memref<1x17x128xbf16, #tpu.memory_space<vmem>>, vector<1x16x128xbf16>
    %9 = vector.shape_cast %8 : vector<1x16x128xbf16> to vector<16x128xbf16>
    %c0_10 = arith.constant 0 : index
    %c0_11 = arith.constant 0 : index
    %c0_12 = arith.constant 0 : index
    %10 = vector.load %arg2[%c0_10, %c0_11, %c0_12] : memref<2x128x128xbf16, #tpu.memory_space<vmem>>, vector<1x128x128xbf16>
    %11 = vector.shape_cast %10 : vector<1x128x128xbf16> to vector<128x128xbf16>
    %cst_13 = arith.constant dense<0.000000e+00> : vector<16x128xf32>
    %12 = tpu.matmul %9, %11, %cst_13 {dimension_numbers = #tpu.dot_dimension_numbers<[1], [0], [0], [1], [0, 0, 1, 1], [], []>} : vector<16x128xbf16>, vector<128x128xbf16>, vector<16x128xf32> -> vector<16x128xf32>
    %13 = arith.addf %7, %12 : vector<16x128xf32>
    %c0_14 = arith.constant 0 : index
    %c1 = arith.constant 1 : index
    %c0_15 = arith.constant 0 : index
    %14 = vector.load %arg1[%c0_14, %c1, %c0_15] : memref<1x17x128xbf16, #tpu.memory_space<vmem>>, vector<1x16x128xbf16>
    %15 = vector.shape_cast %14 : vector<1x16x128xbf16> to vector<16x128xbf16>
    %c1_16 = arith.constant 1 : index
    %c0_17 = arith.constant 0 : index
    %c0_18 = arith.constant 0 : index
    %16 = vector.load %arg2[%c1_16, %c0_17, %c0_18] : memref<2x128x128xbf16, #tpu.memory_space<vmem>>, vector<1x128x128xbf16>
    %17 = vector.shape_cast %16 : vector<1x128x128xbf16> to vector<128x128xbf16>
    %cst_19 = arith.constant dense<0.000000e+00> : vector<16x128xf32>
    %18 = tpu.matmul %15, %17, %cst_19 {dimension_numbers = #tpu.dot_dimension_numbers<[1], [0], [0], [1], [0, 0, 1, 1], [], []>} : vector<16x128xbf16>, vector<128x128xbf16>, vector<16x128xf32> -> vector<16x128xf32>
    %19 = arith.addf %13, %18 : vector<16x128xf32>
    %c0_20 = arith.constant 0 : index
    %c0_21 = arith.constant 0 : index
    %20 = vector.load %arg3[%c0_20, %c0_21] : memref<1x128xf32, #tpu.memory_space<vmem>>, vector<1x128xf32>
    %21 = vector.broadcast %20 : vector<1x128xf32> to vector<16x128xf32>
    %22 = arith.addf %19, %21 : vector<16x128xf32>
    %cst_22 = arith.constant 0.000000e+00 : f32
    %23 = vector.broadcast %cst_22 : f32 to vector<16x128xf32>
    %24 = arith.cmpf oge, %22, %23 : vector<16x128xf32>
    %cst_23 = arith.constant 0.00999999977 : f32
    %25 = vector.broadcast %cst_23 : f32 to vector<16x128xf32>
    %26 = arith.mulf %25, %22 : vector<16x128xf32>
    %27 = arith.select %24, %22, %26 : vector<16x128xi1>, vector<16x128xf32>
    %cst_24 = arith.constant 0.000000e+00 : bf16
    %28 = vector.broadcast %cst_24 : bf16 to vector<18x128xbf16>
    %c0_25 = arith.constant 0 : index
    %c0_26 = arith.constant 0 : index
    %29 = vector.load %arg9[%c0_25, %c0_26] : memref<18x128xbf16, #tpu.memory_space<vmem>>, vector<18x128xbf16>
    tpu.vector_store %arg9[%c0_25, %c0_26], %28 {strides = array<i32>} : memref<18x128xbf16, #tpu.memory_space<vmem>>, vector<18x128xbf16>,
    %30 = arith.truncf %27 : vector<16x128xf32> to vector<16x128xbf16>
    %c1_27 = arith.constant 1 : index
    %c0_28 = arith.constant 0 : index
    %31 = vector.load %arg9[%c1_27, %c0_28] : memref<18x128xbf16, #tpu.memory_space<vmem>>, vector<16x128xbf16>
    tpu.vector_store %arg9[%c1_27, %c0_28], %30 {strides = array<i32>} : memref<18x128xbf16, #tpu.memory_space<vmem>>, vector<16x128xbf16>,
    %cst_29 = arith.constant 0.000000e+00 : f32
    %32 = vector.broadcast %cst_29 : f32 to vector<16x128xf32>
    %c0_30 = arith.constant 0 : index
    %c0_31 = arith.constant 0 : index
    %33 = vector.load %arg9[%c0_30, %c0_31] : memref<18x128xbf16, #tpu.memory_space<vmem>>, vector<16x128xbf16>
    %c0_32 = arith.constant 0 : index
    %c0_33 = arith.constant 0 : index
    %c0_34 = arith.constant 0 : index
    %34 = vector.load %arg4[%c0_32, %c0_33, %c0_34] : memref<3x128x128xbf16, #tpu.memory_space<vmem>>, vector<1x128x128xbf16>
    %35 = vector.shape_cast %34 : vector<1x128x128xbf16> to vector<128x128xbf16>
    %cst_35 = arith.constant dense<0.000000e+00> : vector<16x128xf32>
    %36 = tpu.matmul %33, %35, %cst_35 {dimension_numbers = #tpu.dot_dimension_numbers<[1], [0], [0], [1], [0, 0, 1, 1], [], []>} : vector<16x128xbf16>, vector<128x128xbf16>, vector<16x128xf32> -> vector<16x128xf32>
    %37 = arith.addf %32, %36 : vector<16x128xf32>
    %c1_36 = arith.constant 1 : index
    %c0_37 = arith.constant 0 : index
    %38 = vector.load %arg9[%c1_36, %c0_37] : memref<18x128xbf16, #tpu.memory_space<vmem>>, vector<16x128xbf16>
    %c1_38 = arith.constant 1 : index
    %c0_39 = arith.constant 0 : index
    %c0_40 = arith.constant 0 : index
    %39 = vector.load %arg4[%c1_38, %c0_39, %c0_40] : memref<3x128x128xbf16, #tpu.memory_space<vmem>>, vector<1x128x128xbf16>
    %40 = vector.shape_cast %39 : vector<1x128x128xbf16> to vector<128x128xbf16>
    %cst_41 = arith.constant dense<0.000000e+00> : vector<16x128xf32>
    %41 = tpu.matmul %38, %40, %cst_41 {dimension_numbers = #tpu.dot_dimension_numbers<[1], [0], [0], [1], [0, 0, 1, 1], [], []>} : vector<16x128xbf16>, vector<128x128xbf16>, vector<16x128xf32> -> vector<16x128xf32>
    %42 = arith.addf %37, %41 : vector<16x128xf32>
    %c2 = arith.constant 2 : index
    %c0_42 = arith.constant 0 : index
    %43 = vector.load %arg9[%c2, %c0_42] : memref<18x128xbf16, #tpu.memory_space<vmem>>, vector<16x128xbf16>
    %c2_43 = arith.constant 2 : index
    %c0_44 = arith.constant 0 : index
    %c0_45 = arith.constant 0 : index
    %44 = vector.load %arg4[%c2_43, %c0_44, %c0_45] : memref<3x128x128xbf16, #tpu.memory_space<vmem>>, vector<1x128x128xbf16>
    %45 = vector.shape_cast %44 : vector<1x128x128xbf16> to vector<128x128xbf16>
    %cst_46 = arith.constant dense<0.000000e+00> : vector<16x128xf32>
    %46 = tpu.matmul %43, %45, %cst_46 {dimension_numbers = #tpu.dot_dimension_numbers<[1], [0], [0], [1], [0, 0, 1, 1], [], []>} : vector<16x128xbf16>, vector<128x128xbf16>, vector<16x128xf32> -> vector<16x128xf32>
    %47 = arith.addf %42, %46 : vector<16x128xf32>
    %c0_47 = arith.constant 0 : index
    %c0_48 = arith.constant 0 : index
    %48 = vector.load %arg5[%c0_47, %c0_48] : memref<1x128xf32, #tpu.memory_space<vmem>>, vector<1x128xf32>
    %49 = vector.broadcast %48 : vector<1x128xf32> to vector<16x128xf32>
    %50 = arith.addf %47, %49 : vector<16x128xf32>
    %51 = arith.addf %50, %6 : vector<16x128xf32>
    %cst_49 = arith.constant 0.000000e+00 : f32
    %52 = vector.broadcast %cst_49 : f32 to vector<16x128xf32>
    %53 = arith.cmpf oge, %51, %52 : vector<16x128xf32>
    %cst_50 = arith.constant 0.00999999977 : f32
    %54 = vector.broadcast %cst_50 : f32 to vector<16x128xf32>
    %55 = arith.mulf %54, %51 : vector<16x128xf32>
    %56 = arith.select %53, %51, %55 : vector<16x128xi1>, vector<16x128xf32>
    %57 = arith.truncf %56 : vector<16x128xf32> to vector<16x128xbf16>
    %c0_51 = arith.constant 0 : index
    %c0_52 = arith.constant 0 : index
    %c0_53 = arith.constant 0 : index
    %58 = vector.load %arg8[%c0_51, %c0_52, %c0_53] : memref<1x16x128xbf16, #tpu.memory_space<vmem>>, vector<1x16x128xbf16>
    %59 = vector.shape_cast %58 : vector<1x16x128xbf16> to vector<16x128xbf16>
    %60 = vector.shape_cast %57 : vector<16x128xbf16> to vector<1x16x128xbf16>
    tpu.vector_store %arg8[%c0_51, %c0_52, %c0_53], %60 {strides = array<i32>} : memref<1x16x128xbf16, #tpu.memory_space<vmem>>, vector<1x16x128xbf16>,
    return
  }
  func.func @transform_0(%arg0: i32) -> (i32, i32, i32) {
    %c0_i32 = arith.constant 0 : i32
    %c0_i32_0 = arith.constant 0 : i32
    %c0_i32_1 = arith.constant 0 : i32
    return %arg0, %c0_i32, %c0_i32_0 : i32, i32, i32
  }
  func.func @transform_1(%arg0: i32) -> (i32, i32, i32) {
    %c0_i32 = arith.constant 0 : i32
    %c0_i32_0 = arith.constant 0 : i32
    %c0_i32_1 = arith.constant 0 : i32
    %c0_i32_2 = arith.constant 0 : i32
    return %c0_i32, %c0_i32_0, %c0_i32_1 : i32, i32, i32
  }
  func.func @transform_2(%arg0: i32) -> (i32, i32) {
    %c0_i32 = arith.constant 0 : i32
    %c0_i32_0 = arith.constant 0 : i32
    %c0_i32_1 = arith.constant 0 : i32
    return %c0_i32, %c0_i32_0 : i32, i32
  }
  func.func @transform_3(%arg0: i32) -> (i32, i32, i32) {
    %c0_i32 = arith.constant 0 : i32
    %c0_i32_0 = arith.constant 0 : i32
    %c0_i32_1 = arith.constant 0 : i32
    %c0_i32_2 = arith.constant 0 : i32
    return %c0_i32, %c0_i32_0, %c0_i32_1 : i32, i32, i32
  }
  func.func @transform_4(%arg0: i32) -> (i32, i32) {
    %c0_i32 = arith.constant 0 : i32
    %c0_i32_0 = arith.constant 0 : i32
    %c0_i32_1 = arith.constant 0 : i32
    return %c0_i32, %c0_i32_0 : i32, i32
  }
  func.func @transform_5(%arg0: i32) -> (i32, i32) {
    %c0_i32 = arith.constant 0 : i32
    %c0_i32_0 = arith.constant 0 : i32
    %c0_i32_1 = arith.constant 0 : i32
    return %c0_i32, %c0_i32_0 : i32, i32
  }
  func.func @transform_6(%arg0: i32) -> (i32, i32) {
    %c0_i32 = arith.constant 0 : i32
    %c0_i32_0 = arith.constant 0 : i32
    %c0_i32_1 = arith.constant 0 : i32
    return %c0_i32, %c0_i32_0 : i32, i32
  }
  func.func @transform_7(%arg0: i32) -> (i32, i32, i32) {
    %c0_i32 = arith.constant 0 : i32
    %c0_i32_0 = arith.constant 0 : i32
    %c0_i32_1 = arith.constant 0 : i32
    return %arg0, %c0_i32, %c0_i32_0 : i32, i32, i32
  }
}

module attributes {stable_mosaic.version = 11 : i64} {
  func.func @_block_kernel_down(%arg0: i32, %arg1: memref<1x9x256xbf16, #tpu.memory_space<vmem>>, %arg2: memref<2x256x256xbf16, #tpu.memory_space<vmem>>, %arg3: memref<1x256xf32, #tpu.memory_space<vmem>>, %arg4: memref<3x256x256xbf16, #tpu.memory_space<vmem>>, %arg5: memref<1x256xf32, #tpu.memory_space<vmem>>, %arg6: memref<256x256xbf16, #tpu.memory_space<vmem>>, %arg7: memref<1x256xf32, #tpu.memory_space<vmem>>, %arg8: memref<1x8x256xbf16, #tpu.memory_space<vmem>>, %arg9: memref<10x256xbf16, #tpu.memory_space<vmem>>) attributes {dimension_semantics = [#tpu.dimension_semantics<parallel>], iteration_bounds = array<i64: 2>, scalar_prefetch = 0 : i64, scratch_operands = 1 : i64, tpu.core_type = #tpu.core_type<tc>, window_params = [{transform_indices = @transform_0, window_bounds = array<i64: 1, 9, 256>}, {pipeline_mode = #tpu.pipeline_mode<synchronous>, transform_indices = @transform_1, window_bounds = array<i64: 2, 256, 256>}, {pipeline_mode = #tpu.pipeline_mode<synchronous>, transform_indices = @transform_2, window_bounds = array<i64: 1, 256>}, {pipeline_mode = #tpu.pipeline_mode<synchronous>, transform_indices = @transform_3, window_bounds = array<i64: 3, 256, 256>}, {pipeline_mode = #tpu.pipeline_mode<synchronous>, transform_indices = @transform_4, window_bounds = array<i64: 1, 256>}, {pipeline_mode = #tpu.pipeline_mode<synchronous>, transform_indices = @transform_5, window_bounds = array<i64: 256, 256>}, {pipeline_mode = #tpu.pipeline_mode<synchronous>, transform_indices = @transform_6, window_bounds = array<i64: 1, 256>}, {transform_indices = @transform_7, window_bounds = array<i64: 1, 8, 256>}]} {
    %c0 = arith.constant 0 : index
    %c0_0 = arith.constant 0 : index
    %c0_1 = arith.constant 0 : index
    %0 = vector.load %arg1[%c0, %c0_0, %c0_1] : memref<1x9x256xbf16, #tpu.memory_space<vmem>>, vector<1x8x256xbf16>
    %1 = vector.shape_cast %0 : vector<1x8x256xbf16> to vector<8x256xbf16>
    %c0_2 = arith.constant 0 : index
    %c0_3 = arith.constant 0 : index
    %2 = vector.load %arg6[%c0_2, %c0_3] : memref<256x256xbf16, #tpu.memory_space<vmem>>, vector<256x256xbf16>
    %cst = arith.constant dense<0.000000e+00> : vector<8x256xf32>
    %3 = tpu.matmul %1, %2, %cst {dimension_numbers = #tpu.dot_dimension_numbers<[1], [0], [0], [1], [0, 0, 1, 1], [], []>} : vector<8x256xbf16>, vector<256x256xbf16>, vector<8x256xf32> -> vector<8x256xf32>
    %c0_4 = arith.constant 0 : index
    %c0_5 = arith.constant 0 : index
    %4 = vector.load %arg7[%c0_4, %c0_5] : memref<1x256xf32, #tpu.memory_space<vmem>>, vector<1x256xf32>
    %5 = vector.broadcast %4 : vector<1x256xf32> to vector<8x256xf32>
    %6 = arith.addf %3, %5 : vector<8x256xf32>
    %cst_6 = arith.constant 0.000000e+00 : f32
    %7 = vector.broadcast %cst_6 : f32 to vector<8x256xf32>
    %c0_7 = arith.constant 0 : index
    %c0_8 = arith.constant 0 : index
    %c0_9 = arith.constant 0 : index
    %8 = vector.load %arg1[%c0_7, %c0_8, %c0_9] : memref<1x9x256xbf16, #tpu.memory_space<vmem>>, vector<1x8x256xbf16>
    %9 = vector.shape_cast %8 : vector<1x8x256xbf16> to vector<8x256xbf16>
    %c0_10 = arith.constant 0 : index
    %c0_11 = arith.constant 0 : index
    %c0_12 = arith.constant 0 : index
    %10 = vector.load %arg2[%c0_10, %c0_11, %c0_12] : memref<2x256x256xbf16, #tpu.memory_space<vmem>>, vector<1x256x256xbf16>
    %11 = vector.shape_cast %10 : vector<1x256x256xbf16> to vector<256x256xbf16>
    %cst_13 = arith.constant dense<0.000000e+00> : vector<8x256xf32>
    %12 = tpu.matmul %9, %11, %cst_13 {dimension_numbers = #tpu.dot_dimension_numbers<[1], [0], [0], [1], [0, 0, 1, 1], [], []>} : vector<8x256xbf16>, vector<256x256xbf16>, vector<8x256xf32> -> vector<8x256xf32>
    %13 = arith.addf %7, %12 : vector<8x256xf32>
    %c0_14 = arith.constant 0 : index
    %c1 = arith.constant 1 : index
    %c0_15 = arith.constant 0 : index
    %14 = vector.load %arg1[%c0_14, %c1, %c0_15] : memref<1x9x256xbf16, #tpu.memory_space<vmem>>, vector<1x8x256xbf16>
    %15 = vector.shape_cast %14 : vector<1x8x256xbf16> to vector<8x256xbf16>
    %c1_16 = arith.constant 1 : index
    %c0_17 = arith.constant 0 : index
    %c0_18 = arith.constant 0 : index
    %16 = vector.load %arg2[%c1_16, %c0_17, %c0_18] : memref<2x256x256xbf16, #tpu.memory_space<vmem>>, vector<1x256x256xbf16>
    %17 = vector.shape_cast %16 : vector<1x256x256xbf16> to vector<256x256xbf16>
    %cst_19 = arith.constant dense<0.000000e+00> : vector<8x256xf32>
    %18 = tpu.matmul %15, %17, %cst_19 {dimension_numbers = #tpu.dot_dimension_numbers<[1], [0], [0], [1], [0, 0, 1, 1], [], []>} : vector<8x256xbf16>, vector<256x256xbf16>, vector<8x256xf32> -> vector<8x256xf32>
    %19 = arith.addf %13, %18 : vector<8x256xf32>
    %c0_20 = arith.constant 0 : index
    %c0_21 = arith.constant 0 : index
    %20 = vector.load %arg3[%c0_20, %c0_21] : memref<1x256xf32, #tpu.memory_space<vmem>>, vector<1x256xf32>
    %21 = vector.broadcast %20 : vector<1x256xf32> to vector<8x256xf32>
    %22 = arith.addf %19, %21 : vector<8x256xf32>
    %cst_22 = arith.constant 0.000000e+00 : f32
    %23 = vector.broadcast %cst_22 : f32 to vector<8x256xf32>
    %24 = arith.cmpf oge, %22, %23 : vector<8x256xf32>
    %cst_23 = arith.constant 0.00999999977 : f32
    %25 = vector.broadcast %cst_23 : f32 to vector<8x256xf32>
    %26 = arith.mulf %25, %22 : vector<8x256xf32>
    %27 = arith.select %24, %22, %26 : vector<8x256xi1>, vector<8x256xf32>
    %cst_24 = arith.constant 0.000000e+00 : bf16
    %28 = vector.broadcast %cst_24 : bf16 to vector<10x256xbf16>
    %c0_25 = arith.constant 0 : index
    %c0_26 = arith.constant 0 : index
    %29 = vector.load %arg9[%c0_25, %c0_26] : memref<10x256xbf16, #tpu.memory_space<vmem>>, vector<10x256xbf16>
    tpu.vector_store %arg9[%c0_25, %c0_26], %28 {strides = array<i32>} : memref<10x256xbf16, #tpu.memory_space<vmem>>, vector<10x256xbf16>,
    %30 = arith.truncf %27 : vector<8x256xf32> to vector<8x256xbf16>
    %c1_27 = arith.constant 1 : index
    %c0_28 = arith.constant 0 : index
    %31 = vector.load %arg9[%c1_27, %c0_28] : memref<10x256xbf16, #tpu.memory_space<vmem>>, vector<8x256xbf16>
    tpu.vector_store %arg9[%c1_27, %c0_28], %30 {strides = array<i32>} : memref<10x256xbf16, #tpu.memory_space<vmem>>, vector<8x256xbf16>,
    %cst_29 = arith.constant 0.000000e+00 : f32
    %32 = vector.broadcast %cst_29 : f32 to vector<8x256xf32>
    %c0_30 = arith.constant 0 : index
    %c0_31 = arith.constant 0 : index
    %33 = vector.load %arg9[%c0_30, %c0_31] : memref<10x256xbf16, #tpu.memory_space<vmem>>, vector<8x256xbf16>
    %c0_32 = arith.constant 0 : index
    %c0_33 = arith.constant 0 : index
    %c0_34 = arith.constant 0 : index
    %34 = vector.load %arg4[%c0_32, %c0_33, %c0_34] : memref<3x256x256xbf16, #tpu.memory_space<vmem>>, vector<1x256x256xbf16>
    %35 = vector.shape_cast %34 : vector<1x256x256xbf16> to vector<256x256xbf16>
    %cst_35 = arith.constant dense<0.000000e+00> : vector<8x256xf32>
    %36 = tpu.matmul %33, %35, %cst_35 {dimension_numbers = #tpu.dot_dimension_numbers<[1], [0], [0], [1], [0, 0, 1, 1], [], []>} : vector<8x256xbf16>, vector<256x256xbf16>, vector<8x256xf32> -> vector<8x256xf32>
    %37 = arith.addf %32, %36 : vector<8x256xf32>
    %c1_36 = arith.constant 1 : index
    %c0_37 = arith.constant 0 : index
    %38 = vector.load %arg9[%c1_36, %c0_37] : memref<10x256xbf16, #tpu.memory_space<vmem>>, vector<8x256xbf16>
    %c1_38 = arith.constant 1 : index
    %c0_39 = arith.constant 0 : index
    %c0_40 = arith.constant 0 : index
    %39 = vector.load %arg4[%c1_38, %c0_39, %c0_40] : memref<3x256x256xbf16, #tpu.memory_space<vmem>>, vector<1x256x256xbf16>
    %40 = vector.shape_cast %39 : vector<1x256x256xbf16> to vector<256x256xbf16>
    %cst_41 = arith.constant dense<0.000000e+00> : vector<8x256xf32>
    %41 = tpu.matmul %38, %40, %cst_41 {dimension_numbers = #tpu.dot_dimension_numbers<[1], [0], [0], [1], [0, 0, 1, 1], [], []>} : vector<8x256xbf16>, vector<256x256xbf16>, vector<8x256xf32> -> vector<8x256xf32>
    %42 = arith.addf %37, %41 : vector<8x256xf32>
    %c2 = arith.constant 2 : index
    %c0_42 = arith.constant 0 : index
    %43 = vector.load %arg9[%c2, %c0_42] : memref<10x256xbf16, #tpu.memory_space<vmem>>, vector<8x256xbf16>
    %c2_43 = arith.constant 2 : index
    %c0_44 = arith.constant 0 : index
    %c0_45 = arith.constant 0 : index
    %44 = vector.load %arg4[%c2_43, %c0_44, %c0_45] : memref<3x256x256xbf16, #tpu.memory_space<vmem>>, vector<1x256x256xbf16>
    %45 = vector.shape_cast %44 : vector<1x256x256xbf16> to vector<256x256xbf16>
    %cst_46 = arith.constant dense<0.000000e+00> : vector<8x256xf32>
    %46 = tpu.matmul %43, %45, %cst_46 {dimension_numbers = #tpu.dot_dimension_numbers<[1], [0], [0], [1], [0, 0, 1, 1], [], []>} : vector<8x256xbf16>, vector<256x256xbf16>, vector<8x256xf32> -> vector<8x256xf32>
    %47 = arith.addf %42, %46 : vector<8x256xf32>
    %c0_47 = arith.constant 0 : index
    %c0_48 = arith.constant 0 : index
    %48 = vector.load %arg5[%c0_47, %c0_48] : memref<1x256xf32, #tpu.memory_space<vmem>>, vector<1x256xf32>
    %49 = vector.broadcast %48 : vector<1x256xf32> to vector<8x256xf32>
    %50 = arith.addf %47, %49 : vector<8x256xf32>
    %51 = arith.addf %50, %6 : vector<8x256xf32>
    %cst_49 = arith.constant 0.000000e+00 : f32
    %52 = vector.broadcast %cst_49 : f32 to vector<8x256xf32>
    %53 = arith.cmpf oge, %51, %52 : vector<8x256xf32>
    %cst_50 = arith.constant 0.00999999977 : f32
    %54 = vector.broadcast %cst_50 : f32 to vector<8x256xf32>
    %55 = arith.mulf %54, %51 : vector<8x256xf32>
    %56 = arith.select %53, %51, %55 : vector<8x256xi1>, vector<8x256xf32>
    %57 = arith.truncf %56 : vector<8x256xf32> to vector<8x256xbf16>
    %c0_51 = arith.constant 0 : index
    %c0_52 = arith.constant 0 : index
    %c0_53 = arith.constant 0 : index
    %58 = vector.load %arg8[%c0_51, %c0_52, %c0_53] : memref<1x8x256xbf16, #tpu.memory_space<vmem>>, vector<1x8x256xbf16>
    %59 = vector.shape_cast %58 : vector<1x8x256xbf16> to vector<8x256xbf16>
    %60 = vector.shape_cast %57 : vector<8x256xbf16> to vector<1x8x256xbf16>
    tpu.vector_store %arg8[%c0_51, %c0_52, %c0_53], %60 {strides = array<i32>} : memref<1x8x256xbf16, #tpu.memory_space<vmem>>, vector<1x8x256xbf16>,
    return
  }
  func.func @transform_0(%arg0: i32) -> (i32, i32, i32) {
    %c0_i32 = arith.constant 0 : i32
    %c0_i32_0 = arith.constant 0 : i32
    %c0_i32_1 = arith.constant 0 : i32
    return %arg0, %c0_i32, %c0_i32_0 : i32, i32, i32
  }
  func.func @transform_1(%arg0: i32) -> (i32, i32, i32) {
    %c0_i32 = arith.constant 0 : i32
    %c0_i32_0 = arith.constant 0 : i32
    %c0_i32_1 = arith.constant 0 : i32
    %c0_i32_2 = arith.constant 0 : i32
    return %c0_i32, %c0_i32_0, %c0_i32_1 : i32, i32, i32
  }
  func.func @transform_2(%arg0: i32) -> (i32, i32) {
    %c0_i32 = arith.constant 0 : i32
    %c0_i32_0 = arith.constant 0 : i32
    %c0_i32_1 = arith.constant 0 : i32
    return %c0_i32, %c0_i32_0 : i32, i32
  }
  func.func @transform_3(%arg0: i32) -> (i32, i32, i32) {
    %c0_i32 = arith.constant 0 : i32
    %c0_i32_0 = arith.constant 0 : i32
    %c0_i32_1 = arith.constant 0 : i32
    %c0_i32_2 = arith.constant 0 : i32
    return %c0_i32, %c0_i32_0, %c0_i32_1 : i32, i32, i32
  }
  func.func @transform_4(%arg0: i32) -> (i32, i32) {
    %c0_i32 = arith.constant 0 : i32
    %c0_i32_0 = arith.constant 0 : i32
    %c0_i32_1 = arith.constant 0 : i32
    return %c0_i32, %c0_i32_0 : i32, i32
  }
  func.func @transform_5(%arg0: i32) -> (i32, i32) {
    %c0_i32 = arith.constant 0 : i32
    %c0_i32_0 = arith.constant 0 : i32
    %c0_i32_1 = arith.constant 0 : i32
    return %c0_i32, %c0_i32_0 : i32, i32
  }
  func.func @transform_6(%arg0: i32) -> (i32, i32) {
    %c0_i32 = arith.constant 0 : i32
    %c0_i32_0 = arith.constant 0 : i32
    %c0_i32_1 = arith.constant 0 : i32
    return %c0_i32, %c0_i32_0 : i32, i32
  }
  func.func @transform_7(%arg0: i32) -> (i32, i32, i32) {
    %c0_i32 = arith.constant 0 : i32
    %c0_i32_0 = arith.constant 0 : i32
    %c0_i32_1 = arith.constant 0 : i32
    return %arg0, %c0_i32, %c0_i32_0 : i32, i32, i32
  }
}

module attributes {stable_mosaic.version = 11 : i64} {
  func.func @_block_kernel_down(%arg0: i32, %arg1: memref<1x5x512xbf16, #tpu.memory_space<vmem>>, %arg2: memref<2x512x512xbf16, #tpu.memory_space<vmem>>, %arg3: memref<1x512xf32, #tpu.memory_space<vmem>>, %arg4: memref<3x512x512xbf16, #tpu.memory_space<vmem>>, %arg5: memref<1x512xf32, #tpu.memory_space<vmem>>, %arg6: memref<512x512xbf16, #tpu.memory_space<vmem>>, %arg7: memref<1x512xf32, #tpu.memory_space<vmem>>, %arg8: memref<1x4x512xbf16, #tpu.memory_space<vmem>>, %arg9: memref<6x512xbf16, #tpu.memory_space<vmem>>) attributes {dimension_semantics = [#tpu.dimension_semantics<parallel>], iteration_bounds = array<i64: 2>, scalar_prefetch = 0 : i64, scratch_operands = 1 : i64, tpu.core_type = #tpu.core_type<tc>, window_params = [{transform_indices = @transform_0, window_bounds = array<i64: 1, 5, 512>}, {pipeline_mode = #tpu.pipeline_mode<synchronous>, transform_indices = @transform_1, window_bounds = array<i64: 2, 512, 512>}, {pipeline_mode = #tpu.pipeline_mode<synchronous>, transform_indices = @transform_2, window_bounds = array<i64: 1, 512>}, {pipeline_mode = #tpu.pipeline_mode<synchronous>, transform_indices = @transform_3, window_bounds = array<i64: 3, 512, 512>}, {pipeline_mode = #tpu.pipeline_mode<synchronous>, transform_indices = @transform_4, window_bounds = array<i64: 1, 512>}, {pipeline_mode = #tpu.pipeline_mode<synchronous>, transform_indices = @transform_5, window_bounds = array<i64: 512, 512>}, {pipeline_mode = #tpu.pipeline_mode<synchronous>, transform_indices = @transform_6, window_bounds = array<i64: 1, 512>}, {transform_indices = @transform_7, window_bounds = array<i64: 1, 4, 512>}]} {
    %c0 = arith.constant 0 : index
    %c0_0 = arith.constant 0 : index
    %c0_1 = arith.constant 0 : index
    %0 = vector.load %arg1[%c0, %c0_0, %c0_1] : memref<1x5x512xbf16, #tpu.memory_space<vmem>>, vector<1x4x512xbf16>
    %1 = vector.shape_cast %0 : vector<1x4x512xbf16> to vector<4x512xbf16>
    %c0_2 = arith.constant 0 : index
    %c0_3 = arith.constant 0 : index
    %2 = vector.load %arg6[%c0_2, %c0_3] : memref<512x512xbf16, #tpu.memory_space<vmem>>, vector<512x512xbf16>
    %cst = arith.constant dense<0.000000e+00> : vector<4x512xf32>
    %3 = tpu.matmul %1, %2, %cst {dimension_numbers = #tpu.dot_dimension_numbers<[1], [0], [0], [1], [0, 0, 1, 1], [], []>} : vector<4x512xbf16>, vector<512x512xbf16>, vector<4x512xf32> -> vector<4x512xf32>
    %c0_4 = arith.constant 0 : index
    %c0_5 = arith.constant 0 : index
    %4 = vector.load %arg7[%c0_4, %c0_5] : memref<1x512xf32, #tpu.memory_space<vmem>>, vector<1x512xf32>
    %5 = vector.broadcast %4 : vector<1x512xf32> to vector<4x512xf32>
    %6 = arith.addf %3, %5 : vector<4x512xf32>
    %cst_6 = arith.constant 0.000000e+00 : f32
    %7 = vector.broadcast %cst_6 : f32 to vector<4x512xf32>
    %c0_7 = arith.constant 0 : index
    %c0_8 = arith.constant 0 : index
    %c0_9 = arith.constant 0 : index
    %8 = vector.load %arg1[%c0_7, %c0_8, %c0_9] : memref<1x5x512xbf16, #tpu.memory_space<vmem>>, vector<1x4x512xbf16>
    %9 = vector.shape_cast %8 : vector<1x4x512xbf16> to vector<4x512xbf16>
    %c0_10 = arith.constant 0 : index
    %c0_11 = arith.constant 0 : index
    %c0_12 = arith.constant 0 : index
    %10 = vector.load %arg2[%c0_10, %c0_11, %c0_12] : memref<2x512x512xbf16, #tpu.memory_space<vmem>>, vector<1x512x512xbf16>
    %11 = vector.shape_cast %10 : vector<1x512x512xbf16> to vector<512x512xbf16>
    %cst_13 = arith.constant dense<0.000000e+00> : vector<4x512xf32>
    %12 = tpu.matmul %9, %11, %cst_13 {dimension_numbers = #tpu.dot_dimension_numbers<[1], [0], [0], [1], [0, 0, 1, 1], [], []>} : vector<4x512xbf16>, vector<512x512xbf16>, vector<4x512xf32> -> vector<4x512xf32>
    %13 = arith.addf %7, %12 : vector<4x512xf32>
    %c0_14 = arith.constant 0 : index
    %c1 = arith.constant 1 : index
    %c0_15 = arith.constant 0 : index
    %14 = vector.load %arg1[%c0_14, %c1, %c0_15] : memref<1x5x512xbf16, #tpu.memory_space<vmem>>, vector<1x4x512xbf16>
    %15 = vector.shape_cast %14 : vector<1x4x512xbf16> to vector<4x512xbf16>
    %c1_16 = arith.constant 1 : index
    %c0_17 = arith.constant 0 : index
    %c0_18 = arith.constant 0 : index
    %16 = vector.load %arg2[%c1_16, %c0_17, %c0_18] : memref<2x512x512xbf16, #tpu.memory_space<vmem>>, vector<1x512x512xbf16>
    %17 = vector.shape_cast %16 : vector<1x512x512xbf16> to vector<512x512xbf16>
    %cst_19 = arith.constant dense<0.000000e+00> : vector<4x512xf32>
    %18 = tpu.matmul %15, %17, %cst_19 {dimension_numbers = #tpu.dot_dimension_numbers<[1], [0], [0], [1], [0, 0, 1, 1], [], []>} : vector<4x512xbf16>, vector<512x512xbf16>, vector<4x512xf32> -> vector<4x512xf32>
    %19 = arith.addf %13, %18 : vector<4x512xf32>
    %c0_20 = arith.constant 0 : index
    %c0_21 = arith.constant 0 : index
    %20 = vector.load %arg3[%c0_20, %c0_21] : memref<1x512xf32, #tpu.memory_space<vmem>>, vector<1x512xf32>
    %21 = vector.broadcast %20 : vector<1x512xf32> to vector<4x512xf32>
    %22 = arith.addf %19, %21 : vector<4x512xf32>
    %cst_22 = arith.constant 0.000000e+00 : f32
    %23 = vector.broadcast %cst_22 : f32 to vector<4x512xf32>
    %24 = arith.cmpf oge, %22, %23 : vector<4x512xf32>
    %cst_23 = arith.constant 0.00999999977 : f32
    %25 = vector.broadcast %cst_23 : f32 to vector<4x512xf32>
    %26 = arith.mulf %25, %22 : vector<4x512xf32>
    %27 = arith.select %24, %22, %26 : vector<4x512xi1>, vector<4x512xf32>
    %cst_24 = arith.constant 0.000000e+00 : bf16
    %28 = vector.broadcast %cst_24 : bf16 to vector<6x512xbf16>
    %c0_25 = arith.constant 0 : index
    %c0_26 = arith.constant 0 : index
    %29 = vector.load %arg9[%c0_25, %c0_26] : memref<6x512xbf16, #tpu.memory_space<vmem>>, vector<6x512xbf16>
    tpu.vector_store %arg9[%c0_25, %c0_26], %28 {strides = array<i32>} : memref<6x512xbf16, #tpu.memory_space<vmem>>, vector<6x512xbf16>,
    %30 = arith.truncf %27 : vector<4x512xf32> to vector<4x512xbf16>
    %c1_27 = arith.constant 1 : index
    %c0_28 = arith.constant 0 : index
    %31 = vector.load %arg9[%c1_27, %c0_28] : memref<6x512xbf16, #tpu.memory_space<vmem>>, vector<4x512xbf16>
    tpu.vector_store %arg9[%c1_27, %c0_28], %30 {strides = array<i32>} : memref<6x512xbf16, #tpu.memory_space<vmem>>, vector<4x512xbf16>,
    %cst_29 = arith.constant 0.000000e+00 : f32
    %32 = vector.broadcast %cst_29 : f32 to vector<4x512xf32>
    %c0_30 = arith.constant 0 : index
    %c0_31 = arith.constant 0 : index
    %33 = vector.load %arg9[%c0_30, %c0_31] : memref<6x512xbf16, #tpu.memory_space<vmem>>, vector<4x512xbf16>
    %c0_32 = arith.constant 0 : index
    %c0_33 = arith.constant 0 : index
    %c0_34 = arith.constant 0 : index
    %34 = vector.load %arg4[%c0_32, %c0_33, %c0_34] : memref<3x512x512xbf16, #tpu.memory_space<vmem>>, vector<1x512x512xbf16>
    %35 = vector.shape_cast %34 : vector<1x512x512xbf16> to vector<512x512xbf16>
    %cst_35 = arith.constant dense<0.000000e+00> : vector<4x512xf32>
    %36 = tpu.matmul %33, %35, %cst_35 {dimension_numbers = #tpu.dot_dimension_numbers<[1], [0], [0], [1], [0, 0, 1, 1], [], []>} : vector<4x512xbf16>, vector<512x512xbf16>, vector<4x512xf32> -> vector<4x512xf32>
    %37 = arith.addf %32, %36 : vector<4x512xf32>
    %c1_36 = arith.constant 1 : index
    %c0_37 = arith.constant 0 : index
    %38 = vector.load %arg9[%c1_36, %c0_37] : memref<6x512xbf16, #tpu.memory_space<vmem>>, vector<4x512xbf16>
    %c1_38 = arith.constant 1 : index
    %c0_39 = arith.constant 0 : index
    %c0_40 = arith.constant 0 : index
    %39 = vector.load %arg4[%c1_38, %c0_39, %c0_40] : memref<3x512x512xbf16, #tpu.memory_space<vmem>>, vector<1x512x512xbf16>
    %40 = vector.shape_cast %39 : vector<1x512x512xbf16> to vector<512x512xbf16>
    %cst_41 = arith.constant dense<0.000000e+00> : vector<4x512xf32>
    %41 = tpu.matmul %38, %40, %cst_41 {dimension_numbers = #tpu.dot_dimension_numbers<[1], [0], [0], [1], [0, 0, 1, 1], [], []>} : vector<4x512xbf16>, vector<512x512xbf16>, vector<4x512xf32> -> vector<4x512xf32>
    %42 = arith.addf %37, %41 : vector<4x512xf32>
    %c2 = arith.constant 2 : index
    %c0_42 = arith.constant 0 : index
    %43 = vector.load %arg9[%c2, %c0_42] : memref<6x512xbf16, #tpu.memory_space<vmem>>, vector<4x512xbf16>
    %c2_43 = arith.constant 2 : index
    %c0_44 = arith.constant 0 : index
    %c0_45 = arith.constant 0 : index
    %44 = vector.load %arg4[%c2_43, %c0_44, %c0_45] : memref<3x512x512xbf16, #tpu.memory_space<vmem>>, vector<1x512x512xbf16>
    %45 = vector.shape_cast %44 : vector<1x512x512xbf16> to vector<512x512xbf16>
    %cst_46 = arith.constant dense<0.000000e+00> : vector<4x512xf32>
    %46 = tpu.matmul %43, %45, %cst_46 {dimension_numbers = #tpu.dot_dimension_numbers<[1], [0], [0], [1], [0, 0, 1, 1], [], []>} : vector<4x512xbf16>, vector<512x512xbf16>, vector<4x512xf32> -> vector<4x512xf32>
    %47 = arith.addf %42, %46 : vector<4x512xf32>
    %c0_47 = arith.constant 0 : index
    %c0_48 = arith.constant 0 : index
    %48 = vector.load %arg5[%c0_47, %c0_48] : memref<1x512xf32, #tpu.memory_space<vmem>>, vector<1x512xf32>
    %49 = vector.broadcast %48 : vector<1x512xf32> to vector<4x512xf32>
    %50 = arith.addf %47, %49 : vector<4x512xf32>
    %51 = arith.addf %50, %6 : vector<4x512xf32>
    %cst_49 = arith.constant 0.000000e+00 : f32
    %52 = vector.broadcast %cst_49 : f32 to vector<4x512xf32>
    %53 = arith.cmpf oge, %51, %52 : vector<4x512xf32>
    %cst_50 = arith.constant 0.00999999977 : f32
    %54 = vector.broadcast %cst_50 : f32 to vector<4x512xf32>
    %55 = arith.mulf %54, %51 : vector<4x512xf32>
    %56 = arith.select %53, %51, %55 : vector<4x512xi1>, vector<4x512xf32>
    %57 = arith.truncf %56 : vector<4x512xf32> to vector<4x512xbf16>
    %c0_51 = arith.constant 0 : index
    %c0_52 = arith.constant 0 : index
    %c0_53 = arith.constant 0 : index
    %58 = vector.load %arg8[%c0_51, %c0_52, %c0_53] : memref<1x4x512xbf16, #tpu.memory_space<vmem>>, vector<1x4x512xbf16>
    %59 = vector.shape_cast %58 : vector<1x4x512xbf16> to vector<4x512xbf16>
    %60 = vector.shape_cast %57 : vector<4x512xbf16> to vector<1x4x512xbf16>
    tpu.vector_store %arg8[%c0_51, %c0_52, %c0_53], %60 {strides = array<i32>} : memref<1x4x512xbf16, #tpu.memory_space<vmem>>, vector<1x4x512xbf16>,
    return
  }
  func.func @transform_0(%arg0: i32) -> (i32, i32, i32) {
    %c0_i32 = arith.constant 0 : i32
    %c0_i32_0 = arith.constant 0 : i32
    %c0_i32_1 = arith.constant 0 : i32
    return %arg0, %c0_i32, %c0_i32_0 : i32, i32, i32
  }
  func.func @transform_1(%arg0: i32) -> (i32, i32, i32) {
    %c0_i32 = arith.constant 0 : i32
    %c0_i32_0 = arith.constant 0 : i32
    %c0_i32_1 = arith.constant 0 : i32
    %c0_i32_2 = arith.constant 0 : i32
    return %c0_i32, %c0_i32_0, %c0_i32_1 : i32, i32, i32
  }
  func.func @transform_2(%arg0: i32) -> (i32, i32) {
    %c0_i32 = arith.constant 0 : i32
    %c0_i32_0 = arith.constant 0 : i32
    %c0_i32_1 = arith.constant 0 : i32
    return %c0_i32, %c0_i32_0 : i32, i32
  }
  func.func @transform_3(%arg0: i32) -> (i32, i32, i32) {
    %c0_i32 = arith.constant 0 : i32
    %c0_i32_0 = arith.constant 0 : i32
    %c0_i32_1 = arith.constant 0 : i32
    %c0_i32_2 = arith.constant 0 : i32
    return %c0_i32, %c0_i32_0, %c0_i32_1 : i32, i32, i32
  }
  func.func @transform_4(%arg0: i32) -> (i32, i32) {
    %c0_i32 = arith.constant 0 : i32
    %c0_i32_0 = arith.constant 0 : i32
    %c0_i32_1 = arith.constant 0 : i32
    return %c0_i32, %c0_i32_0 : i32, i32
  }
  func.func @transform_5(%arg0: i32) -> (i32, i32) {
    %c0_i32 = arith.constant 0 : i32
    %c0_i32_0 = arith.constant 0 : i32
    %c0_i32_1 = arith.constant 0 : i32
    return %c0_i32, %c0_i32_0 : i32, i32
  }
  func.func @transform_6(%arg0: i32) -> (i32, i32) {
    %c0_i32 = arith.constant 0 : i32
    %c0_i32_0 = arith.constant 0 : i32
    %c0_i32_1 = arith.constant 0 : i32
    return %c0_i32, %c0_i32_0 : i32, i32
  }
  func.func @transform_7(%arg0: i32) -> (i32, i32, i32) {
    %c0_i32 = arith.constant 0 : i32
    %c0_i32_0 = arith.constant 0 : i32
    %c0_i32_1 = arith.constant 0 : i32
    return %arg0, %c0_i32, %c0_i32_0 : i32, i32, i32
  }
}

module attributes {stable_mosaic.version = 11 : i64} {
  func.func @_head_kernel(%arg0: i32, %arg1: memref<2x4x512xbf16, #tpu.memory_space<vmem>>, %arg2: memref<512x128xf32, #tpu.memory_space<vmem>>, %arg3: memref<1x128xf32, #tpu.memory_space<vmem>>, %arg4: memref<2x128xf32, #tpu.memory_space<vmem>>) attributes {dimension_semantics = [#tpu.dimension_semantics<arbitrary>], iteration_bounds = array<i64: 1>, scalar_prefetch = 0 : i64, scratch_operands = 0 : i64, tpu.core_type = #tpu.core_type<tc>, window_params = [{pipeline_mode = #tpu.pipeline_mode<synchronous>, transform_indices = @transform_0, window_bounds = array<i64: 2, 4, 512>}, {pipeline_mode = #tpu.pipeline_mode<synchronous>, transform_indices = @transform_1, window_bounds = array<i64: 512, 128>}, {pipeline_mode = #tpu.pipeline_mode<synchronous>, transform_indices = @transform_2, window_bounds = array<i64: 1, 128>}, {pipeline_mode = #tpu.pipeline_mode<synchronous>, transform_indices = @transform_3, window_bounds = array<i64: 2, 128>}]} {
    %c0 = arith.constant 0 : index
    %c0_0 = arith.constant 0 : index
    %c0_1 = arith.constant 0 : index
    %0 = vector.load %arg1[%c0, %c0_0, %c0_1] : memref<2x4x512xbf16, #tpu.memory_space<vmem>>, vector<2x4x512xbf16>
    %1 = arith.extf %0 : vector<2x4x512xbf16> to vector<2x4x512xf32>
    %cst = arith.constant dense<0.000000e+00> : vector<2x512xf32>
    %2 = vector.multi_reduction <add>, %1, %cst [1] : vector<2x4x512xf32> to vector<2x512xf32>
    %cst_2 = arith.constant 4.000000e+00 : f32
    %3 = vector.broadcast %cst_2 : f32 to vector<2x512xf32>
    %4 = arith.divf %2, %3 : vector<2x512xf32>
    %c0_3 = arith.constant 0 : index
    %c0_4 = arith.constant 0 : index
    %5 = vector.load %arg2[%c0_3, %c0_4] : memref<512x128xf32, #tpu.memory_space<vmem>>, vector<512x128xf32>
    %cst_5 = arith.constant dense<0.000000e+00> : vector<2x128xf32>
    %6 = tpu.matmul %4, %5, %cst_5 {dimension_numbers = #tpu.dot_dimension_numbers<[1], [0], [0], [1], [0, 0, 1, 1], [], []>} : vector<2x512xf32>, vector<512x128xf32>, vector<2x128xf32> -> vector<2x128xf32>
    %c0_6 = arith.constant 0 : index
    %c0_7 = arith.constant 0 : index
    %7 = vector.load %arg3[%c0_6, %c0_7] : memref<1x128xf32, #tpu.memory_space<vmem>>, vector<1x128xf32>
    %8 = vector.broadcast %7 : vector<1x128xf32> to vector<2x128xf32>
    %9 = arith.addf %6, %8 : vector<2x128xf32>
    %c0_8 = arith.constant 0 : index
    %c0_9 = arith.constant 0 : index
    %10 = vector.load %arg4[%c0_8, %c0_9] : memref<2x128xf32, #tpu.memory_space<vmem>>, vector<2x128xf32>
    tpu.vector_store %arg4[%c0_8, %c0_9], %9 {strides = array<i32>} : memref<2x128xf32, #tpu.memory_space<vmem>>, vector<2x128xf32>,
    return
  }
  func.func @transform_0(%arg0: i32) -> (i32, i32, i32) {
    %c0_i32 = arith.constant 0 : i32
    %c0_i32_0 = arith.constant 0 : i32
    %c0_i32_1 = arith.constant 0 : i32
    %c0_i32_2 = arith.constant 0 : i32
    return %c0_i32, %c0_i32_0, %c0_i32_1 : i32, i32, i32
  }
  func.func @transform_1(%arg0: i32) -> (i32, i32) {
    %c0_i32 = arith.constant 0 : i32
    %c0_i32_0 = arith.constant 0 : i32
    %c0_i32_1 = arith.constant 0 : i32
    return %c0_i32, %c0_i32_0 : i32, i32
  }
  func.func @transform_2(%arg0: i32) -> (i32, i32) {
    %c0_i32 = arith.constant 0 : i32
    %c0_i32_0 = arith.constant 0 : i32
    %c0_i32_1 = arith.constant 0 : i32
    return %c0_i32, %c0_i32_0 : i32, i32
  }
  func.func @transform_3(%arg0: i32) -> (i32, i32) {
    %c0_i32 = arith.constant 0 : i32
    %c0_i32_0 = arith.constant 0 : i32
    %c0_i32_1 = arith.constant 0 : i32
    return %c0_i32, %c0_i32_0 : i32, i32
  }
}

</mosaic_0001>

<bundles_post_ra>
// kernel: resnet1d_forward.6
= control target key start
LH: loop header
LB: loop body
LE: loop exit
PB: predicated region body
PF: predicated region fallthrough
CT: control target
= control target key end

     0   :  { %8 = vsyncpa [#allocation3], 0  ;;  %s1002_s0 = inlined_call_operand.vmem [shape: bf16[2,35,16], index: 0, kind: input, shape index: {}]   ;;  %s1003_s1 = inlined_call_operand.hbm [shape: bf16[4,16,64], index: 1, kind: input, shape index: {}]   ;;  %s1004_s2 = inlined_call_operand.hbm [shape: f32[1,64], index: 2, kind: input, shape index: {}]   ;;  %s1005_s3 = inlined_call_operand.vmem [shape: bf16[2,32,64], index: 3, kind: output, shape index: {}]  }
   0x1   :  { %9 = vsyncpa [#allocation5], 0  ;;  %s884_s12 = smov 0  }
   0x2 LB: > { %s890_s13 = sadd.s32 4294967295, %s858_s12   ;;  %p660_p0 = scmp.ge.s32.totalorder %s858_s12, 1  ;;  %s858_s12 = sphi %s884_s12, %s15_s12  }
   0x3   : > { %p114_p1 = scmp.lt.s32.totalorder %s858_s12, 3  ;;  %s860_s14 = smov [#allocation2]  }
   0x4   : > { %s126_s15 = sshll.u32 %s860_s14, 4  ;;  %p1006_p3 = scmp.eq.s32.totalorder %s890_s13, 0  ;;  %s127_s15 = int_to_ptr.vmem [resolvable:$true] %s126_s15 }
   0x5   : > { %p894_p2 = pnand %p660_p0, %p114_p1  ;;  %s861_s17 = smov [#allocation4]  }
   0x6   : > { %s140_s18 = sshll.u32 %s861_s17, 4  ;;  %s788_s22 = scalar_lea.hbm %s1003_s1, 512  ;;  %s907_s18 = int_to_ptr.vmem [resolvable:$true] %s140_s18 }
   0x7   : > { %s1008_s16 = scalar_select %p894_p2, 1, 0 }
   0x8   : > { %p756_p4 = pneg %p894_p2  ;;  %p789_p6 = scmp.ne.s32.totalorder %s1003_s1, %s788_s22 }
   0x9   : > { %p795_p10 = scmp.lt.u32.totalorder %s788_s22, %s1003_s1 }
   0xa   : > { %p903_p5 = pnand %p1006_p3, %p756_p4 }
   0xc   : > { %p790_p7 = pneg %p903_p5 }
   0xe   : > { %p791_p8 = pnand %p790_p7, %p789_p6 }
  0x10   : > { %p792_p9 = pneg %p791_p8 }
  0x12   : > { %p797_p11 = pnand %p795_p10, %p792_p9 }
  0x14   : > { %800 = shalt.err (!%p797_p11)
}
  0x15   : > { %s801_s27 = scalar_lea.vmem %s127_s15, 512  ;;  %p809_p1 = scmp.lt.s32.totalorder %s127_s15, %s127_s15 }
  0x16   : > { %p802_p12 = scmp.ne.s32.totalorder %s127_s15, %s801_s27  ;;  %p810_p4 = scmp.lt.s32.totalorder %s801_s27, %s801_s27 }
  0x18   : > { %p804_p13 = pnand %p802_p12, %p790_p7  ;;  %p811_p3 = por %p810_p4, %p809_p1 }
  0x1a   : > { %p805_p0 = pneg %p804_p13 }
  0x1c   : > { %p812_p2 = pnand %p811_p3, %p805_p0 }
  0x1e   : > { %815 = shalt.err (!%p812_p2)
}
  0x1f   : > { %s862_s28 = smov 64   ;;  %s863_s29 = smov 4  }
  0x20   : > { %759 = dma.hbm_to_vmem [thread:$0]  (!%p903_p5), %s1003_s1, 512, %s127_s15, [#allocation3], %s862_s28, %s862_s28, %s863_s29  }
  0x21   : > { %s816_s7 = scalar_lea.hbm %s1004_s2, 16 }
  0x22   : > { %p817_p6 = scmp.ne.s32.totalorder %s1004_s2, %s816_s7  ;;  %p823_p8 = scmp.lt.u32.totalorder %s816_s7, %s1004_s2 }
  0x24   : > { %p819_p2 = pnand %p817_p6, %p790_p7 }
  0x26   : > { %p820_p3 = pneg %p819_p2 }
  0x28   : > { %p825_p9 = pnand %p823_p8, %p820_p3 }
  0x2a   : > { %828 = shalt.err (!%p825_p9)
}
  0x2b   : > { %s829_s14 = scalar_lea.vmem %s907_s18, 16  ;;  %s836_s15 = scalar_lea.vmem %s907_s18, 32 }
  0x2c   : > { %p830_p10 = scmp.ne.s32.totalorder %s907_s18, %s829_s14  ;;  %p837_p13 = scmp.lt.s32.totalorder %s907_s18, %s907_s18 }
  0x2d   : > { %p838_p0 = scmp.lt.s32.totalorder %s836_s15, %s829_s14 }
  0x2e   : > { %p832_p11 = pnand %p830_p10, %p790_p7 }
  0x2f   : > { %p839_p1 = por %p838_p0, %p837_p13 }
  0x30   : > { %p833_p12 = pneg %p832_p11 }
  0x32   : > { %p840_p4 = pnand %p839_p1, %p833_p12 }
  0x34   : > { %843 = shalt.err (!%p840_p4)
}
  0x35   : > { %762 = dma.hbm_to_vmem [thread:$0]  (!%p903_p5), %s1004_s2, 16, %s907_s18, [#allocation5]  }
  0x36   : > { %p1010_p6 = scmp.ne.s32.totalorder %s1008_s16, 0 }
  0x37   : > { %p1011_p7 = scmp.eq.s32.totalorder (!%p1010_p6), %s890_s13, 0 }
  0x38   : > { %161 = sbr.rel (%p1010_p6) target bundleno = 323 (0x143), region = 32 }
  0x3f   : > { %849 = dma.done.wait (%p1011_p7), [#allocation3], 512   ;;  %p1012_p2 = pmov %p1011_p7 }
  0x41   : > { %851 = vsyncadd (%p1012_p2), [#allocation3], 4294966784  ;;  %p1013_p3 = pmov %p1012_p2 }
  0x42   : > { %p1014_p8 = pmov %p1012_p2 }
  0x43   : > { %853 = dma.done.wait (%p1013_p3), [#allocation5], 16  }
  0x44   : > { %855 = vsyncadd (%p1014_p8), [#allocation5], 4294967280  ;;  %p189_p9 = scmp.lt.s32.totalorder %s890_s13, 1  ;;  %v779_v0 = vld [vmem:[#allocation2 + $0x10] sm:$0xff]   ;;  %v780_v1 = vld [vmem:[#allocation2 + $0x8] sm:$0xff]   ;;  %vm250_vm0 = vcmask 130048  }
  0x45   : > { %vm223_vm1 = vsmask.f32 7424  ;;  %723 = vmatprep.subr.bf16.mxu0 %v779_v0  ;;  %711 = vmatprep.subr.bf16.mxu1 %v780_v1  ;;  %vm372_vm2 = vcmask 1046528   ;;  %v785_v8 = vld [vmem:[#allocation2] sm:$0xff]   ;;  %v786_v13 = vld [vmem:[#allocation2 + $0x18] sm:$0xff]   ;;  %vm576_vm6 = vcmask 519168  }
  0x46   : > { %s1016_s13 = smov (!%p189_p9, %s890_s13), 1  ;;  %724 = vmatpush3.bf16.msra.mxu0 %v779_v0  ;;  %712 = vmatpush3.bf16.msra.mxu1 %v780_v1  ;;  %vm450_vm3 = vsmask.f32 6400  ;;  %v687_v49 = vld [vmem:[#allocation4] ss:$0 sm:$0xff] }
  0x47   : > { %s747_s16 = smul.u32 20, %s1016_s13  ;;  %717 = vmatprep.subr.bf16.mxu1 %v785_v8  ;;  %729 = vmatprep.subr.bf16.mxu0 %v786_v13  ;;  %s694_s22 = sshll.u32 %s1016_s13, 4 }
  0x48   : > { %s198_s25 = scalar_lea.vmem %s1005_s3, %s694_s22 }
  0x49   : > { %s975_s21 = scalar_lea.vmem %s1002_s0, %s747_s16 }
  0x4a   : > { %v201_v2 = vld [vmem:[%s975_s21 + $0x4] sm:$0xf]  ;;  %v781_v3 = vld [vmem:[%s975_s21 + $0x8] sm:$0xff]   ;;  %v365_v4 = vld [vmem:[%s975_s21] sm:$0xe] }
  0x4b   : > { %v679_v5 = vcombine.low %v365_v4, %v201_v2  ;;  %v783_v6 = vld [vmem:[%s975_s21 + $0x10] ss:$0 sps:$4 sm:$0x11]   ;;  %v200_v7 = vld [vmem:[%s975_s21] sm:$0xf]  ;;  %v374_v9 = vrot.slane %v781_v3, 1 }
  0x4c   : > { %v670_v10 = vcombine.low %v200_v7, %v201_v2  ;;  %v232_v11 = vshll.u32 %v781_v3, 16  ;;  %v236_v12 = vshrl.u32 %v781_v3, 16  ;;  %v376_v15 = vrot.slane %v783_v6, 1  ;;  %v787_v28 = vld [vmem:[%s975_s21 + $0x10] ss:$0 sps:$4 sm:$0x33]  }
  0x4d   : > { %v373_v14 = vrot.slane %v679_v5, 1  ;;  %v240_v22 = vshll.u32 %v783_v6, 16  ;;  %v452_v23 = vshrl.u32 %v679_v5, 16  ;;  %v455_v26 = vshll.u32 %v679_v5, 16 }
  0x4e   : > { %v225_v16 = vshrl.u32 %v670_v10, 16  ;;  %v227_v17 = vshll.u32 %v670_v10, 16  ;;  %v234_v18 = vrot.slane %v232_v11, 1  ;;  %v460_v19 = vrot.slane %v232_v11, 2 }
  0x4f   : > { %v375_v20 = vsel %vm372_vm2, %v373_v14, %v374_v9  ;;  %v377_v21 = vsel %vm372_vm2, %v374_v9, %v376_v15  ;;  %v459_v27 = vrot.slane %v236_v12, 1  ;;  %v242_v29 = vrot.slane %v240_v22, 1 }
  0x50   : > { %725 = vmatprep.mubr.msk.bf16.mxu0 %vm250_vm0, %v375_v20  ;;  %v229_v24 = vrot.slane %v227_v17, 1  ;;  %v238_v25 = vor.u32 %v236_v12, %v234_v18  ;;  %v454_v30 = vrot.slane %v452_v23, 1  ;;  %v457_v32 = vrot.slane %v455_v26, 2 }
  0x51   : > { %726 = vmatmul.mubr.msk.bf16.vlgmr.msra.gmra.mrb[0].mxu0 %vm250_vm0, %v377_v21  ;;  %v461_v33 = vor.u32 %v460_v19, %v459_v27  ;;  %v464_v34 = vshrl.u32 %v787_v28, 16  ;;  %v467_v36 = vshll.u32 %v787_v28, 16 }
  0x52   : > { %v230_v31 = vor.u32 %v229_v24, %v225_v16  ;;  %730 = vmatpush3.bf16.msra.mxu0 %v786_v13  ;;  %v243_v35 = vsel %vm223_vm1, %v238_v25, %v242_v29  ;;  %v458_v38 = vor.u32 %v457_v32, %v454_v30 }
  0x53   : > { %v466_v39 = vrot.slane %v464_v34, 1  ;;  %v469_v40 = vrot.slane %v467_v36, 2 }
  0x54   : > { %v235_v37 = vsel %vm223_vm1, %v230_v31, %v234_v18  ;;  %v462_v41 = vsel %vm450_vm3, %v458_v38, %v461_v33 }
  0x55   : > { %713 = vmatprep.mubr.msk.bf16.mxu1 %vm250_vm0, %v235_v37  ;;  %731 = vmatprep.mubr.msk.bf16.mxu0 %vm250_vm0, %v462_v41  ;;  %v470_v42 = vor.u32 %v469_v40, %v466_v39 }
  0x56   : > { %714 = vmatmul.mubr.msk.bf16.vlgmr.msra.gmra.mrb[0].mxu1 %vm250_vm0, %v243_v35 }
  0x57   : > { %718 = vmatpush3.bf16.msra.mxu1 %v785_v8  ;;  %719 = vmatprep.mubr.msk.bf16.mxu1 %vm250_vm0, %v670_v10  ;;  %v471_v43 = vsel %vm450_vm3, %v461_v33, %v470_v42 }
  0x5d   : > { %732 = vmatmul.mubr.msk.bf16.vlgmr.msra.gmra.mrb[0].mxu0 %vm250_vm0, %v471_v43 }
  0x62   : > { %720 = vmatmul.mubr.msk.bf16.vlgmr.msra.gmra.mrb[0].mxu1 %vm250_vm0, %v781_v3 }
 0x130   : > { %v733_v44 = vpop.f32.mrb[0].mxu0 }
 0x131   : > { %v518_v45 = vpop.f32.mrb[1].mxu0 }
 0x132   : > { %v734_v46 = vpop.f32.mrb[2].mxu0 }
 0x133   : > { %v521_v47 = vpop.f32.mrb[3].mxu0 }
 0x135   : > { %v721_v48 = vpop.f32.mrb[0].mxu1 }
 0x136   : > { %v735_v50 = vadd.f32 %v733_v44, %v721_v48  ;;  %v350_v51 = vpop.f32.mrb[1].mxu1 }
 0x137   : > { %v736_v52 = vadd.f32 %v518_v45, %v350_v51  ;;  %v722_v53 = vpop.f32.mrb[2].mxu1 }
 0x138   : > { %v546_v54 = vadd.f32 %v735_v50, %v687_v49  ;;  %v737_v55 = vadd.f32 %v734_v46, %v722_v53  ;;  %v353_v56 = vpop.f32.mrb[3].mxu1 }
 0x139   : > { %v544_v57 = vadd.f32 %v736_v52, %v687_v49  ;;  %v738_v58 = vadd.f32 %v521_v47, %v353_v56 }
 0x13a   : > { %vm550_vm4 = vcmp.ge.f32.partialorder %v546_v54, 0.0  ;;  %v554_v59 = vmul.f32 0.01, %v546_v54  ;;  %v547_v60 = vadd.f32 %v737_v55, %v687_v49 }
 0x13b   : > { %vm548_vm5 = vcmp.ge.f32.partialorder %v544_v57, 0.0  ;;  %v552_v61 = vmul.f32 0.01, %v544_v57  ;;  %v545_v62 = vadd.f32 %v738_v58, %v687_v49 }
 0x13c   : > { %v558_v63 = vsel %vm550_vm4, %v546_v54, %v554_v59  ;;  %vm551_vm7 = vcmp.ge.f32.partialorder %v547_v60, 0.0  ;;  %v555_v0 = vmul.f32 0.01, %v547_v60 }
 0x13d   : > { %v697_v1 = vpack.c.bf16 %v558_v63, %v558_v63  ;;  %v556_v2 = vsel %vm548_vm5, %v544_v57, %v552_v61  ;;  %vm549_vm8 = vcmp.ge.f32.partialorder %v545_v62, 0.0  ;;  %v553_v3 = vmul.f32 0.01, %v545_v62 }
 0x13e   : > { %v695_v4 = vpack.c.bf16 %v556_v2, %v556_v2  ;;  %v559_v5 = vsel %vm551_vm7, %v547_v60, %v555_v0 }
 0x13f   : > { %579 = vst.msk [vmem:[%s198_s25 + $0x8] sm:$0xf] %vm576_vm6, %v697_v1  ;;  %v698_v6 = vpack.c.bf16 %v559_v5, %v559_v5  ;;  %v557_v7 = vsel %vm549_vm8, %v545_v62, %v553_v3 }
 0x140   : > { %577 = vst.msk [vmem:[%s198_s25] sm:$0xf] %vm576_vm6, %v695_v4  ;;  %v696_v8 = vpack.c.bf16 %v557_v7, %v557_v7 }
 0x141   : > { %580 = vst.msk [vmem:[%s198_s25 + $0xc] sm:$0xf] %vm576_vm6, %v698_v6 }
 0x142   : > { %578 = vst.msk [vmem:[%s198_s25 + $0x4] sm:$0xf] %vm576_vm6, %v696_v8 }
 0x143 PF: > { %s15_s12 = sadd.s32 1, %s858_s12  }
 0x144   : > { %p12_p5 = scmp.ge.s32.totalorder %s15_s12, 4  }
 0x146   :  { %14 = sbr.rel (!%p12_p5) target bundleno = 2 (0x2), region = 74 }
 0x14d   :  { %602 = vsyncpa [#allocation3], 1 }
 0x14e   :  { %604 = vsyncpa [#allocation3 + $0x1], 1 }
 0x14f   :  { %605 = vsyncpa [#allocation5], 1 }

// kernel: resnet1d_forward.7
= control target key start
LH: loop header
LB: loop body
LE: loop exit
PB: predicated region body
PF: predicated region fallthrough
CT: control target
= control target key end

     0   :  { %10 = vsyncpa [#allocation4], 0  ;;  %s1878_s0 = inlined_call_operand.vmem [shape: bf16[2,34,64], index: 0, kind: input, shape index: {}]   ;;  %s1879_s1 = inlined_call_operand.hbm [shape: bf16[3,64,64], index: 1, kind: input, shape index: {}]   ;;  %s1880_s2 = inlined_call_operand.hbm [shape: f32[1,64], index: 2, kind: input, shape index: {}]   ;;  %s1881_s3 = inlined_call_operand.hbm [shape: bf16[3,64,64], index: 3, kind: input, shape index: {}]   ;;  %s1882_s4 = inlined_call_operand.hbm [shape: f32[1,64], index: 4, kind: input, shape index: {}]   ;;  %s1883_s5 = inlined_call_operand.vmem [shape: bf16[2,32,64], index: 5, kind: output, shape index: {}]  }
   0x1   :  { %11 = vsyncpa [#allocation6], 0 }
   0x2   :  { %12 = vsyncpa [#allocation9], 0  ;;  %s1634_s18 = smov 0  }
   0x3 LB: > { %s1597_s19 = smov [#allocation5]   ;;  %s1640_s21 = sadd.s32 4294967295, %s1595_s18   ;;  %s1595_s18 = sphi %s1634_s18, %s18_s18  }
   0x4   : > { %s185_s20 = sshll.u32 %s1597_s19, 4  ;;  %p1176_p0 = scmp.ge.s32.totalorder %s1595_s18, 1  ;;  %s1645_s20 = int_to_ptr.vmem [resolvable:$true] %s185_s20 }
   0x5   : > { %p159_p1 = scmp.lt.s32.totalorder %s1595_s18, 3  ;;  %p1884_p2 = scmp.eq.s32.totalorder %s1640_s21, 0 }
   0x6   : > { %s1598_s23 = smov [#allocation3]   ;;  %s1599_s26 = smov [#allocation7]  }
   0x7   : > { %p1647_p3 = pnand %p1176_p0, %p159_p1  ;;  %s171_s24 = sshll.u32 %s1598_s23, 4  ;;  %s1653_s24 = int_to_ptr.vmem [resolvable:$true] %s171_s24 }
   0x8   : > { %s195_s27 = sshll.u32 %s1599_s26, 4  ;;  %s1600_s28 = smov [#allocation8]   ;;  %s1661_s27 = int_to_ptr.vmem [resolvable:$true] %s195_s27 }
   0x9   : > { %s1886_s22 = scalar_select %p1647_p3, 1, 0 }
   0xa   : > { %p1396_p4 = pneg %p1647_p3  ;;  %s1663_s29 = sshll.u32 %s1600_s28, 4  ;;  %s210_s29 = int_to_ptr.vmem [resolvable:$true] %s1663_s29 }
   0xb   : > { %s1465_s7 = scalar_lea.hbm %s1880_s2, 16 }
   0xc   : > { %p1657_p5 = pnand %p1884_p2, %p1396_p4  ;;  %p1466_p6 = scmp.ne.s32.totalorder %s1880_s2, %s1465_s7 }
   0xd   : > { %p1472_p10 = scmp.lt.u32.totalorder %s1465_s7, %s1880_s2 }
   0xe   : > { %p1673_p7 = pneg %p1657_p5 }
  0x10   : > { %p1468_p8 = pnand %p1673_p7, %p1466_p6 }
  0x12   : > { %p1469_p9 = pneg %p1468_p8 }
  0x14   : > { %p1474_p11 = pnand %p1472_p10, %p1469_p9 }
  0x16   : > { %1477 = shalt.err (!%p1474_p11)
}
  0x17   : > { %s1478_s13 = scalar_lea.vmem %s1645_s20, 16  ;;  %s1485_s14 = scalar_lea.vmem %s1645_s20, 32 }
  0x18   : > { %p1479_p12 = scmp.ne.s32.totalorder %s1645_s20, %s1478_s13  ;;  %p1486_p1 = scmp.lt.s32.totalorder %s1645_s20, %s1645_s20 }
  0x19   : > { %p1487_p4 = scmp.lt.s32.totalorder %s1485_s14, %s1478_s13 }
  0x1a   : > { %p1481_p13 = pnand %p1479_p12, %p1673_p7 }
  0x1b   : > { %p1488_p6 = por %p1487_p4, %p1486_p1 }
  0x1c   : > { %p1482_p0 = pneg %p1481_p13 }
  0x1e   : > { %p1489_p8 = pnand %p1488_p6, %p1482_p0 }
  0x20   : > { %1492 = shalt.err (!%p1489_p8)
}
  0x21   : > { %1402 = dma.hbm_to_vmem [thread:$0]  (!%p1657_p5), %s1880_s2, 16, %s1645_s20, [#allocation6]  }
  0x22   : > { %s1493_s23 = scalar_lea.hbm %s1879_s1, 1536 }
  0x23   : > { %p1494_p9 = scmp.ne.s32.totalorder %s1879_s1, %s1493_s23  ;;  %p1500_p12 = scmp.lt.u32.totalorder %s1493_s23, %s1879_s1 }
  0x25   : > { %p1496_p10 = pnand %p1494_p9, %p1673_p7 }
  0x27   : > { %p1497_p11 = pneg %p1496_p10 }
  0x29   : > { %p1502_p13 = pnand %p1500_p12, %p1497_p11 }
  0x2b   : > { %1505 = shalt.err (!%p1502_p13)
}
  0x2c   : > { %s1506_s20 = scalar_lea.vmem %s1653_s24, 1536  ;;  %p1514_p6 = scmp.lt.s32.totalorder %s1653_s24, %s1653_s24 }
  0x2d   : > { %p1507_p0 = scmp.ne.s32.totalorder %s1653_s24, %s1506_s20  ;;  %p1515_p8 = scmp.lt.s32.totalorder %s1506_s20, %s1506_s20 }
  0x2f   : > { %p1509_p1 = pnand %p1507_p0, %p1673_p7  ;;  %p1516_p9 = por %p1515_p8, %p1514_p6 }
  0x31   : > { %p1510_p4 = pneg %p1509_p1 }
  0x33   : > { %p1517_p10 = pnand %p1516_p9, %p1510_p4 }
  0x35   : > { %1520 = shalt.err (!%p1517_p10)
}
  0x36   : > { %s1601_s7 = smov 64   ;;  %s1602_s8 = smov 4  }
  0x37   : > { %1399 = dma.hbm_to_vmem [thread:$0]  (!%p1657_p5), %s1879_s1, 1536, %s1653_s24, [#allocation4], %s1601_s7, %s1601_s7, %s1602_s8  }
  0x38   : > { %s1521_s14 = scalar_lea.hbm %s1881_s3, 1536 }
  0x39   : > { %p1522_p11 = scmp.ne.s32.totalorder %s1881_s3, %s1521_s14  ;;  %p1528_p0 = scmp.lt.u32.totalorder %s1521_s14, %s1881_s3 }
  0x3b   : > { %p1524_p12 = pnand %p1522_p11, %p1673_p7 }
  0x3d   : > { %p1525_p13 = pneg %p1524_p12 }
  0x3f   : > { %p1530_p1 = pnand %p1528_p0, %p1525_p13 }
  0x41   : > { %1533 = shalt.err (!%p1530_p1)
}
  0x42   : > { %s1534_s24 = scalar_lea.vmem %s1661_s27, 1536  ;;  %p1542_p9 = scmp.lt.s32.totalorder %s1661_s27, %s1661_s27 }
  0x43   : > { %p1535_p4 = scmp.ne.s32.totalorder %s1661_s27, %s1534_s24  ;;  %p1543_p10 = scmp.lt.s32.totalorder %s1534_s24, %s1534_s24 }
  0x45   : > { %p1537_p6 = pnand %p1535_p4, %p1673_p7  ;;  %p1544_p11 = por %p1543_p10, %p1542_p9 }
  0x47   : > { %p1538_p8 = pneg %p1537_p6 }
  0x49   : > { %p1545_p12 = pnand %p1544_p11, %p1538_p8 }
  0x4b   : > { %1548 = shalt.err (!%p1545_p12)
}
  0x4c   : > { %1405 = dma.hbm_to_vmem [thread:$0]  (!%p1657_p5), %s1881_s3, 1536, %s1661_s27, [#allocation6], %s1601_s7, %s1601_s7, %s1602_s8  }
  0x4d   : > { %s1549_s6 = scalar_lea.hbm %s1882_s4, 16 }
  0x4e   : > { %p1550_p13 = scmp.ne.s32.totalorder %s1882_s4, %s1549_s6  ;;  %p1556_p4 = scmp.lt.u32.totalorder %s1549_s6, %s1882_s4 }
  0x50   : > { %p1552_p0 = pnand %p1550_p13, %p1673_p7 }
  0x52   : > { %p1553_p1 = pneg %p1552_p0 }
  0x54   : > { %p1558_p6 = pnand %p1556_p4, %p1553_p1 }
  0x56   : > { %1561 = shalt.err (!%p1558_p6)
}
  0x57   : > { %s1562_s13 = scalar_lea.vmem %s210_s29, 16  ;;  %s1569_s27 = scalar_lea.vmem %s210_s29, 32 }
  0x58   : > { %p1563_p8 = scmp.ne.s32.totalorder %s210_s29, %s1562_s13  ;;  %p1570_p11 = scmp.lt.s32.totalorder %s210_s29, %s210_s29 }
  0x59   : > { %p1571_p12 = scmp.lt.s32.totalorder %s1569_s27, %s1562_s13 }
  0x5a   : > { %p1565_p9 = pnand %p1563_p8, %p1673_p7 }
  0x5b   : > { %p1572_p2 = por %p1571_p12, %p1570_p11 }
  0x5c   : > { %p1566_p10 = pneg %p1565_p9 }
  0x5e   : > { %p1573_p3 = pnand %p1572_p2, %p1566_p10 }
  0x60   : > { %1576 = shalt.err (!%p1573_p3)
}
  0x61   : > { %1408 = dma.hbm_to_vmem [thread:$0]  (!%p1657_p5), %s1882_s4, 16, %s210_s29, [#allocation9]  }
  0x62   : > { %p1889_p13 = scmp.ne.s32.totalorder %s1886_s22, 0 }
  0x63   : > { %p1890_p0 = scmp.eq.s32.totalorder (!%p1889_p13), %s1640_s21, 0 }
  0x64   : > { %230 = sbr.rel (%p1889_p13) target bundleno = 667 (0x29b), region = 40 }
  0x6b   : > { %1582 = dma.done.wait (%p1890_p0), [#allocation4], 1536   ;;  %p1891_p7 = pmov %p1890_p0 }
  0x6c   : > { %p1892_p1 = pmov %p1890_p0 }
  0x6d   : > { %1584 = vsyncadd (%p1891_p7), [#allocation4], 4294965760 }
  0x6e   : > { %1586 = dma.done.wait (%p1892_p1), [#allocation6], 1552   ;;  %p1893_p2 = pmov %p1890_p0 }
  0x6f   : > { %p1894_p3 = pmov %p1890_p0 }
  0x70   : > { %1588 = vsyncadd (%p1893_p2), [#allocation6], 4294965744 }
  0x71   : > { %1590 = dma.done.wait (%p1894_p3), [#allocation9], 16   ;;  %p1895_p5 = pmov %p1890_p0 }
  0x72   : > { %p270_p4 = scmp.lt.s32.totalorder %s1640_s21, 1  ;;  %v1432_v0 = vld [vmem:[#allocation3 + $0x20] sm:$0xff]   ;;  %v1433_v1 = vld [vmem:[#allocation3 + $0x28] sm:$0xff]   ;;  %v1434_v2 = vld [vmem:[#allocation3 + $0x30] sm:$0xff]   ;;  %vm321_vm0 = vsmask.f32 7424 }
  0x73   : > { %1592 = vsyncadd (%p1895_p5), [#allocation9], 4294967280  ;;  %1291 = vmatprep.subr.bf16.mxu0 %v1432_v0  ;;  %v1435_v8 = vld [vmem:[#allocation3 + $0x38] sm:$0xff]   ;;  %vm366_vm1 = vcmask 523264   ;;  %v1438_v19 = vld [vmem:[#allocation3] sm:$0xff]   ;;  %vm512_vm2 = vcmask 1046528  }
  0x74   : > { %s1901_s21 = smov (!%p270_p4, %s1640_s21), 1  ;;  %1292 = vmatpush3.bf16.msra.mxu0 %v1432_v0  ;;  %v1440_v23 = vld [vmem:[#allocation3 + $0x8] sm:$0xff]   ;;  %v1441_v24 = vld [vmem:[#allocation3 + $0x10] sm:$0xff]   ;;  %v1442_v26 = vld [vmem:[#allocation3 + $0x18] sm:$0xff]   ;;  %vm624_vm3 = vcmask 519168   ;;  %v1603_v37 = vmov 0  }
  0x75   : > { %s1379_s22 = smul.u32 20, %s1901_s21  ;;  %1293 = vmatprep.subr.bf16.mxu0 %v1433_v1  ;;  %v1443_v28 = vld [vmem:[#allocation3 + $0x40] sm:$0xff]   ;;  %v1444_v31 = vld [vmem:[#allocation3 + $0x48] sm:$0xff]   ;;  %v1445_v33 = vld [vmem:[#allocation3 + $0x50] sm:$0xff]   ;;  %625 = vst.msk [vmem:[#allocation2] sm:$0xf] %vm624_vm3, %v1603_v37 }
  0x76   : > { %v1446_v34 = vld [vmem:[#allocation3 + $0x58] sm:$0xff]   ;;  %626 = vst.msk [vmem:[#allocation2 + $0x4] sm:$0xf] %vm624_vm3, %v1603_v37  ;;  %627 = vst.msk [vmem:[#allocation2 + $0x8] sm:$0xf] %vm624_vm3, %v1603_v37  ;;  %vm629_vm4 = vcmask 516096  }
  0x77   : > { %s1782_s10 = scalar_lea.vmem %s1878_s0, %s1379_s22  ;;  %628 = vst.msk [vmem:[#allocation2 + $0xc] sm:$0xf] %vm624_vm3, %v1603_v37  ;;  %v1448_v38 = vld [vmem:[#allocation7 + $0x20] sm:$0xff]   ;;  %v1449_v39 = vld [vmem:[#allocation7 + $0x28] sm:$0xff]   ;;  %v1450_v40 = vld [vmem:[#allocation7 + $0x30] sm:$0xff]   ;;  %s1246_s14 = sshll.u32 %s1901_s21, 4 }
  0x78   : > { %v1785_v3 = vld [vmem:[%s1782_s10] sm:$0xf]  ;;  %v1788_v4 = vld [vmem:[%s1782_s10 + $0x4] sm:$0xf]  ;;  %v1791_v5 = vld [vmem:[%s1782_s10 + $0x8] sm:$0xff]   ;;  %1294 = vmatpush3.bf16.msra.mxu0 %v1433_v1  ;;  %1327 = vmatprep.subr.bf16.mxu1 %v1448_v38  ;;  %s279_s17 = scalar_lea.vmem %s1883_s5, %s1246_s14 }
  0x79   : > { %v1190_v6 = vcombine.low %v1785_v3, %v1788_v4  ;;  %v1796_v7 = vld [vmem:[%s1782_s10 + $0x10] sm:$0x1]  ;;  %v330_v11 = vshll.u32 %v1791_v5, 16  ;;  %v334_v12 = vshrl.u32 %v1791_v5, 16  ;;  %1295 = vmatprep.subr.bf16.mxu0 %v1434_v2  ;;  %v499_v25 = vld [vmem:[%s1782_s10] sm:$0xe]  ;;  %1328 = vmatpush3.bf16.msra.mxu1 %v1448_v38 }
  0x7a   : > { %v1192_v13 = vcombine.low %v1796_v7, %v1796_v7  ;;  %v1205_v27 = vcombine.low %v499_v25, %v1788_v4  ;;  %v514_v30 = vrot.slane %v1791_v5, 1  ;;  %630 = vst.msk [vmem:[#allocation2 + $0x10] sm:$0x1] %vm629_vm4, %v1603_v37  ;;  %1329 = vmatprep.subr.bf16.mxu1 %v1449_v39  ;;  %v1451_v41 = vld [vmem:[#allocation7 + $0x38] sm:$0xff]   ;;  %v1821_v42 = vld [vmem:[#allocation7] sm:$0xff]  }
  0x7b   : > { %v323_v9 = vshrl.u32 %v1190_v6, 16  ;;  %v325_v10 = vshll.u32 %v1190_v6, 16  ;;  %v332_v15 = vrot.slane %v330_v11, 1  ;;  %v1212_v43 = vld [vmem:[#allocation5] ss:$0 sm:$0xff] }
  0x7c   : > { %v338_v16 = vshll.u32 %v1192_v13, 16  ;;  %1296 = vmatpush3.bf16.msra.mxu0 %v1434_v2  ;;  %v513_v29 = vrot.slane %v1205_v27, 1  ;;  %v516_v35 = vrot.slane %v1192_v13, 1  ;;  %vm687_vm9 = vsmask.f32 7938 }
  0x7d   : > { %v327_v14 = vrot.slane %v325_v10, 1  ;;  %v336_v18 = vor.u32 %v334_v12, %v332_v15  ;;  %1297 = vmatprep.subr.bf16.mxu0 %v1435_v8  ;;  %1330 = vmatpush3.bf16.msra.mxu1 %v1449_v39  ;;  %vm643_vm10 = vsmask.f32 256  ;;  %vm644_vm11 = vsmask.f32 4368  ;;  %vm1825_vm12 = vmand %vm624_vm3, %vm687_vm9 }
  0x7e   : > { %v340_v20 = vrot.slane %v338_v16, 1  ;;  %v515_v32 = vsel %vm512_vm2, %v513_v29, %v514_v30  ;;  %v517_v36 = vsel %vm512_vm2, %v514_v30, %v516_v35  ;;  %1331 = vmatprep.subr.bf16.mxu1 %v1450_v40  ;;  %v689_v13 = vld [vmem:[#allocation2] sm:$0xf]  ;;  %vm1830_vm13 = vmor %vm643_vm10, %vm644_vm11 }
  0x7f   : > { %v328_v17 = vor.u32 %v327_v14, %v323_v9  ;;  %vm696_vm14 = vmand %vm629_vm4, %vm643_vm10 }
  0x80   : > { %1298 = vmatpush3.bf16.msra.mxu0 %v1435_v8  ;;  %v341_v22 = vsel %vm321_vm0, %v336_v18, %v340_v20 }
  0x81   : > { %v333_v21 = vsel %vm321_vm0, %v328_v17, %v332_v15  ;;  %1303 = vmatprep.subr.bf16.mxu0 %v1438_v19  ;;  %1332 = vmatpush3.bf16.msra.mxu1 %v1450_v40  ;;  %v697_v18 = vld [vmem:[#allocation2 + $0x10] sm:$0x1] }
  0x82   : > { %1299 = vmatprep.mubr.msk.bf16.mxu0 %vm366_vm1, %v333_v21  ;;  %1333 = vmatprep.subr.bf16.mxu1 %v1451_v41 }
  0x83   : > { %1300 = vmatmul.mubr.msk.bf16.vlgmr.msra.gmra.mrb[0].mxu0 %vm366_vm1, %v341_v22 }
  0x84   : > { %1304 = vmatpush3.bf16.msra.mxu0 %v1438_v19  ;;  %1311 = vmatprep.mubr.msk.bf16.mxu0 %vm366_vm1, %v1190_v6 }
  0x85   : > { %1305 = vmatprep.subr.bf16.mxu0 %v1440_v23  ;;  %1334 = vmatpush3.bf16.msra.mxu1 %v1451_v41 }
  0x86   : > { %1339 = vmatprep.subr.bf16.mxu1 %v1821_v42 }
  0x88   : > { %1306 = vmatpush3.bf16.msra.mxu0 %v1440_v23 }
  0x89   : > { %1307 = vmatprep.subr.bf16.mxu0 %v1441_v24 }
  0x8c   : > { %1308 = vmatpush3.bf16.msra.mxu0 %v1441_v24 }
  0x8d   : > { %1309 = vmatprep.subr.bf16.mxu0 %v1442_v26 }
  0x90   : > { %1310 = vmatpush3.bf16.msra.mxu0 %v1442_v26 }
  0x91   : > { %1315 = vmatprep.subr.bf16.mxu0 %v1443_v28 }
  0x93   : > { %1312 = vmatmul.mubr.msk.bf16.vlgmr.msra.gmra.mrb[0].mxu0 %vm366_vm1, %v1791_v5 }
  0x94   : > { %1316 = vmatpush3.bf16.msra.mxu0 %v1443_v28  ;;  %1323 = vmatprep.mubr.msk.bf16.mxu0 %vm366_vm1, %v515_v32 }
  0x95   : > { %1317 = vmatprep.subr.bf16.mxu0 %v1444_v31 }
  0x98   : > { %1318 = vmatpush3.bf16.msra.mxu0 %v1444_v31 }
  0x99   : > { %1319 = vmatprep.subr.bf16.mxu0 %v1445_v33 }
  0x9c   : > { %1320 = vmatpush3.bf16.msra.mxu0 %v1445_v33 }
  0x9d   : > { %1321 = vmatprep.subr.bf16.mxu0 %v1446_v34 }
  0xa0   : > { %1322 = vmatpush3.bf16.msra.mxu0 %v1446_v34 }
  0xa3   : > { %1324 = vmatmul.mubr.msk.bf16.vlgmr.msra.gmra.mrb[0].mxu0 %vm366_vm1, %v517_v36 }
 0x176   : > { %v1325_v44 = vpop.f32.mrb[0].mxu0 }
 0x177   : > { %v610_v45 = vadd.f32 %v1325_v44, %v1212_v43  ;;  %v582_v46 = vpop.f32.mrb[1].mxu0 }
 0x178   : > { %v608_v47 = vadd.f32 %v1212_v43, %v582_v46  ;;  %v1326_v48 = vpop.f32.mrb[2].mxu0 }
 0x179   : > { %vm614_vm5 = vcmp.ge.f32.partialorder %v610_v45, 0.0  ;;  %v618_v49 = vmul.f32 0.01, %v610_v45  ;;  %v611_v50 = vadd.f32 %v1326_v48, %v1212_v43  ;;  %v585_v51 = vpop.f32.mrb[3].mxu0 }
 0x17a   : > { %vm612_vm6 = vcmp.ge.f32.partialorder %v608_v47, 0.0  ;;  %v616_v52 = vmul.f32 0.01, %v608_v47  ;;  %v609_v53 = vadd.f32 %v1212_v43, %v585_v51 }
 0x17b   : > { %v622_v54 = vsel %vm614_vm5, %v610_v45, %v618_v49  ;;  %vm615_vm7 = vcmp.ge.f32.partialorder %v611_v50, 0.0  ;;  %v619_v55 = vmul.f32 0.01, %v611_v50 }
 0x17c   : > { %v1249_v56 = vpack.c.bf16 %v622_v54, %v622_v54  ;;  %v620_v57 = vsel %vm612_vm6, %v608_v47, %v616_v52  ;;  %vm613_vm8 = vcmp.ge.f32.partialorder %v609_v53, 0.0  ;;  %v617_v58 = vmul.f32 0.01, %v609_v53  ;;  %v1457_v52 = vld [vmem:[#allocation7 + $0x10] sm:$0xff]  }
 0x17d   : > { %v1247_v59 = vpack.c.bf16 %v620_v57, %v620_v57  ;;  %v623_v60 = vsel %vm615_vm7, %v611_v50, %v619_v55  ;;  %v1456_v50 = vld [vmem:[#allocation7 + $0x8] sm:$0xff]  }
 0x17e   : > { %v664_v61 = vshrl.u32 %v1249_v56, 16  ;;  %v1250_v62 = vpack.c.bf16 %v623_v60, %v623_v60  ;;  %v621_v63 = vsel %vm613_vm8, %v609_v53, %v617_v58  ;;  %v667_v12 = vshll.u32 %v1249_v56, 16  ;;  %v1458_v53 = vld [vmem:[#allocation7 + $0x18] sm:$0xff]   ;;  %v1459_v56 = vld [vmem:[#allocation7 + $0x40] sm:$0xff]   ;;  %v1462_v60 = vld [vmem:[#allocation7 + $0x50] sm:$0xff]  }
 0x17f   : > { %v647_v0 = vshrl.u32 %v1247_v59, 16  ;;  %v1248_v1 = vpack.c.bf16 %v621_v63, %v621_v63  ;;  %v650_v9 = vshll.u32 %v1247_v59, 16  ;;  %v1461_v59 = vld [vmem:[#allocation7 + $0x48] sm:$0xff]  }
 0x180   : > { %v666_v2 = vrot.slane %v664_v61, 7  ;;  %v673_v6 = vshrl.u32 %v1250_v62, 16  ;;  %v676_v16 = vshll.u32 %v1250_v62, 16  ;;  %v1463_v61 = vld [vmem:[#allocation7 + $0x58] sm:$0xff]  }
 0x181   : > { %v649_v8 = vrot.slane %v647_v0, 7  ;;  %v655_v11 = vshrl.u32 %v1248_v1, 16  ;;  %v658_v20 = vshll.u32 %v1248_v1, 16  ;;  %v288_v0 = vunpack.c.l.bf16 %v1791_v5 }
 0x182   : > { %v675_v15 = vrot.slane %v673_v6, 7  ;;  %v669_v21 = vor.u32 %v667_v12, %v666_v2  ;;  %v671_v22 = vrot.slane %v666_v2, 4  ;;  %v289_v1 = vunpack.c.h.bf16 %v1791_v5 }
 0x183   : > { %v652_v17 = vor.u32 %v650_v9, %v649_v8  ;;  %v657_v19 = vrot.slane %v655_v11, 7  ;;  %v653_v25 = vrot.slane %v649_v8, 4  ;;  %v286_v2 = vunpack.c.l.bf16 %v1785_v3 }
 0x184   : > { %v678_v23 = vor.u32 %v676_v16, %v675_v15  ;;  %v680_v24 = vrot.slane %v675_v15, 4  ;;  %v287_v6 = vunpack.c.l.bf16 %v1788_v4  ;;  %v290_v8 = vunpack.c.l.bf16 %v1796_v7 }
 0x185   : > { %v690_v26 = vsel %vm1825_vm12, %v652_v17, %v689_v13  ;;  %v660_v27 = vor.u32 %v658_v20, %v657_v19  ;;  %v662_v28 = vrot.slane %v657_v19, 4  ;;  %v1032_v9 = vrot.slane %v288_v0, 1  ;;  %v1239_v13 = vld [vmem:[#allocation8] ss:$0 sm:$0xff] }
 0x186   : > { %691 = vst [vmem:[#allocation2] sm:$0xf] %v690_v26  ;;  %v679_v29 = vsel %vm1830_vm13, %v671_v22, %v678_v23  ;;  %v698_v30 = vsel %vm696_vm14, %v680_v24, %v697_v18  ;;  %v1034_v10 = vrot.slane %v289_v1, 1  ;;  %v1029_v11 = vrot.slane %v286_v2, 1 }
 0x187   : > { %694 = vst.msk [vmem:[#allocation2 + $0xc] sm:$0xf] %vm624_vm3, %v679_v29  ;;  %699 = vst [vmem:[#allocation2 + $0x10] sm:$0x1] %v698_v30  ;;  %v661_v31 = vsel %vm1830_vm13, %v653_v25, %v660_v27  ;;  %v670_v32 = vsel %vm1830_vm13, %v662_v28, %v669_v21  ;;  %v1030_v12 = vrot.slane %v287_v6, 1  ;;  %v1036_v14 = vrot.slane %v290_v8, 1 }
 0x188   : > { %692 = vst.msk [vmem:[#allocation2 + $0x4] sm:$0xf] %vm624_vm3, %v661_v31  ;;  %693 = vst.msk [vmem:[#allocation2 + $0x8] sm:$0xf] %vm624_vm3, %v670_v32  ;;  %v1035_v16 = vsel %vm512_vm2, %v1032_v9, %v1034_v10 }
 0x189   : > { %v1031_v5 = vsel %vm512_vm2, %v1029_v11, %v1030_v12  ;;  %v1037_v4 = vsel %vm512_vm2, %v1034_v10, %v1036_v14  ;;  %v1033_v22 = vsel %vm512_vm2, %v1030_v12, %v1032_v9 }
 0x18d   : > { %v700_v33 = vld [vmem:[#allocation2] sm:$0xf] }
 0x18e   : > { %v1455_v37 = vld [vmem:[#allocation2 + $0x10] ss:$0 sps:$4 sm:$0x11]   ;;  %v911_v54 = vld [vmem:[#allocation2] sm:$0xe] }
 0x18f   : > { %v701_v34 = vld [vmem:[#allocation2 + $0x4] sm:$0xf]  ;;  %v1453_v35 = vld [vmem:[#allocation2 + $0x8] sm:$0xff]   ;;  %v751_v43 = vshll.u32 %v1455_v37, 16  ;;  %v927_v62 = vrot.slane %v1455_v37, 1 }
 0x190   : > { %v1217_v36 = vcombine.low %v700_v33, %v701_v34  ;;  %v743_v38 = vshll.u32 %v1453_v35, 16  ;;  %v747_v41 = vshrl.u32 %v1453_v35, 16  ;;  %v1232_v55 = vcombine.low %v911_v54, %v701_v34 }
 0x191   : > { %v753_v48 = vrot.slane %v751_v43, 1  ;;  %v925_v58 = vrot.slane %v1453_v35, 1 }
 0x192   : > { %v738_v39 = vshll.u32 %v1217_v36, 16  ;;  %v745_v40 = vrot.slane %v743_v38, 1  ;;  %v736_v44 = vshrl.u32 %v1217_v36, 16  ;;  %v924_v57 = vrot.slane %v1232_v55, 1 }
 0x193   : > { %v928_v63 = vsel %vm512_vm2, %v925_v58, %v927_v62 }
 0x194   : > { %v740_v45 = vrot.slane %v738_v39, 1  ;;  %v749_v46 = vor.u32 %v747_v41, %v745_v40 }
 0x196   : > { %v741_v47 = vor.u32 %v740_v45, %v736_v44  ;;  %v754_v51 = vsel %vm321_vm0, %v749_v46, %v753_v48 }
 0x198   : > { %v746_v49 = vsel %vm321_vm0, %v741_v47, %v745_v40 }
 0x199   : > { %1335 = vmatprep.mubr.msk.bf16.mxu1 %vm366_vm1, %v746_v49 }
 0x19a   : > { %1336 = vmatmul.mubr.msk.bf16.vlgmr.msra.gmra.mrb[0].mxu1 %vm366_vm1, %v754_v51 }
 0x19b   : > { %1340 = vmatpush3.bf16.msra.mxu1 %v1821_v42  ;;  %1347 = vmatprep.mubr.msk.bf16.mxu1 %vm366_vm1, %v1217_v36  ;;  %v926_v42 = vsel %vm512_vm2, %v924_v57, %v925_v58 }
 0x19c   : > { %1341 = vmatprep.subr.bf16.mxu1 %v1456_v50 }
 0x19f   : > { %1342 = vmatpush3.bf16.msra.mxu1 %v1456_v50 }
 0x1a0   : > { %1343 = vmatprep.subr.bf16.mxu1 %v1457_v52 }
 0x1a3   : > { %1344 = vmatpush3.bf16.msra.mxu1 %v1457_v52 }
 0x1a4   : > { %1345 = vmatprep.subr.bf16.mxu1 %v1458_v53 }
 0x1a7   : > { %1346 = vmatpush3.bf16.msra.mxu1 %v1458_v53 }
 0x1a8   : > { %1351 = vmatprep.subr.bf16.mxu1 %v1459_v56 }
 0x1aa   : > { %1348 = vmatmul.mubr.msk.bf16.vlgmr.msra.gmra.mrb[0].mxu1 %vm366_vm1, %v1453_v35 }
 0x1ab   : > { %1352 = vmatpush3.bf16.msra.mxu1 %v1459_v56  ;;  %1359 = vmatprep.mubr.msk.bf16.mxu1 %vm366_vm1, %v926_v42 }
 0x1ac   : > { %1353 = vmatprep.subr.bf16.mxu1 %v1461_v59 }
 0x1af   : > { %1354 = vmatpush3.bf16.msra.mxu1 %v1461_v59 }
 0x1b0   : > { %1355 = vmatprep.subr.bf16.mxu1 %v1462_v60 }
 0x1b3   : > { %1356 = vmatpush3.bf16.msra.mxu1 %v1462_v60 }
 0x1b4   : > { %1357 = vmatprep.subr.bf16.mxu1 %v1463_v61 }
 0x1b7   : > { %1358 = vmatpush3.bf16.msra.mxu1 %v1463_v61 }
 0x1ba   : > { %1360 = vmatmul.mubr.msk.bf16.vlgmr.msra.gmra.mrb[0].mxu1 %vm366_vm1, %v928_v63 }
 0x28d   : > { %v1361_v15 = vpop.f32.mrb[0].mxu1 }
 0x28e   : > { %v1021_v17 = vadd.f32 %v1361_v15, %v1239_v13  ;;  %v993_v18 = vpop.f32.mrb[1].mxu1 }
 0x28f   : > { %v1019_v19 = vadd.f32 %v1239_v13, %v993_v18  ;;  %v1362_v3 = vpop.f32.mrb[2].mxu1 }
 0x290   : > { %v1044_v20 = vadd.f32 %v1035_v16, %v1021_v17  ;;  %v1022_v7 = vadd.f32 %v1362_v3, %v1239_v13  ;;  %v996_v21 = vpop.f32.mrb[3].mxu1 }
 0x291   : > { %v1042_v23 = vadd.f32 %v1031_v5, %v1019_v19  ;;  %v1020_v24 = vadd.f32 %v1239_v13, %v996_v21 }
 0x292   : > { %vm1048_vm15 = vcmp.ge.f32.partialorder %v1044_v20, 0.0  ;;  %v1052_v25 = vmul.f32 0.01, %v1044_v20  ;;  %v1045_v26 = vadd.f32 %v1037_v4, %v1022_v7 }
 0x293   : > { %vm1046_vm0 = vcmp.ge.f32.partialorder %v1042_v23, 0.0  ;;  %v1050_v27 = vmul.f32 0.01, %v1042_v23  ;;  %v1043_v28 = vadd.f32 %v1033_v22, %v1020_v24 }
 0x294   : > { %v1056_v29 = vsel %vm1048_vm15, %v1044_v20, %v1052_v25  ;;  %vm1049_vm1 = vcmp.ge.f32.partialorder %v1045_v26, 0.0  ;;  %v1053_v30 = vmul.f32 0.01, %v1045_v26 }
 0x295   : > { %v1253_v31 = vpack.c.bf16 %v1056_v29, %v1056_v29  ;;  %v1054_v32 = vsel %vm1046_vm0, %v1042_v23, %v1050_v27  ;;  %vm1047_vm4 = vcmp.ge.f32.partialorder %v1043_v28, 0.0  ;;  %v1051_v33 = vmul.f32 0.01, %v1043_v28 }
 0x296   : > { %v1251_v34 = vpack.c.bf16 %v1054_v32, %v1054_v32  ;;  %v1057_v35 = vsel %vm1049_vm1, %v1045_v26, %v1053_v30 }
 0x297   : > { %1076 = vst.msk [vmem:[%s279_s17 + $0x8] sm:$0xf] %vm624_vm3, %v1253_v31  ;;  %v1254_v36 = vpack.c.bf16 %v1057_v35, %v1057_v35  ;;  %v1055_v37 = vsel %vm1047_vm4, %v1043_v28, %v1051_v33 }
 0x298   : > { %1074 = vst.msk [vmem:[%s279_s17] sm:$0xf] %vm624_vm3, %v1251_v34  ;;  %v1252_v38 = vpack.c.bf16 %v1055_v37, %v1055_v37 }
 0x299   : > { %1077 = vst.msk [vmem:[%s279_s17 + $0xc] sm:$0xf] %vm624_vm3, %v1254_v36 }
 0x29a   : > { %1075 = vst.msk [vmem:[%s279_s17 + $0x4] sm:$0xf] %vm624_vm3, %v1252_v38 }
 0x29b PF: > { %s18_s18 = sadd.s32 1, %s1595_s18  }
 0x29c   : > { %p15_p6 = scmp.ge.s32.totalorder %s18_s18, 4  }
 0x29e   :  { %17 = sbr.rel (!%p15_p6) target bundleno = 3 (0x3), region = 91 }
 0x2a5   :  { %1099 = vsyncpa [#allocation4], 1 }
 0x2a6   :  { %1101 = vsyncpa [#allocation4 + $0x1], 1 }
 0x2a7   :  { %1102 = vsyncpa [#allocation6], 1 }
 0x2a8   :  { %1103 = vsyncpa [#allocation9], 1 }

// kernel: resnet1d_forward.8
= control target key start
LH: loop header
LB: loop body
LE: loop exit
PB: predicated region body
PF: predicated region fallthrough
CT: control target
= control target key end

     0   :  { %12 = vsyncpa [#allocation4], 0  ;;  %s2207_s0 = inlined_call_operand.vmem [shape: bf16[2,17,128], index: 0, kind: input, shape index: {}]   ;;  %s2208_s1 = inlined_call_operand.hbm [shape: bf16[2,128,128], index: 1, kind: input, shape index: {}]   ;;  %s2209_s2 = inlined_call_operand.hbm [shape: f32[1,128], index: 2, kind: input, shape index: {}]   ;;  %s2210_s3 = inlined_call_operand.hbm [shape: bf16[3,128,128], index: 3, kind: input, shape index: {}]   ;;  %s2211_s4 = inlined_call_operand.hbm [shape: f32[1,128], index: 4, kind: input, shape index: {}]   ;;  %s2212_s5 = inlined_call_operand.hbm [shape: bf16[128,128], index: 5, kind: input, shape index: {}]   ;;  %s2213_s6 = inlined_call_operand.hbm [shape: f32[1,128], index: 6, kind: input, shape index: {}]   ;;  %s2214_s7 = inlined_call_operand.vmem [shape: bf16[2,16,128], index: 7, kind: output, shape index: {}]  }
   0x1   :  { %13 = vsyncpa [#allocation6], 0 }
   0x2   :  { %14 = vsyncpa [#allocation9], 0 }
   0x3   :  { %15 = vsyncpa [#allocation12], 0  ;;  %s1925_s24 = smov 0  }
   0x4 LB: > { %s1874_s25 = smov [#allocation5]   ;;  %s1931_s27 = sadd.s32 4294967295, %s1872_s24   ;;  %s1872_s24 = sphi %s1925_s24, %s21_s24  }
   0x5   : > { %s230_s26 = sshll.u32 %s1874_s25, 4  ;;  %p1274_p0 = scmp.ge.s32.totalorder %s1872_s24, 1  ;;  %s1936_s26 = int_to_ptr.vmem [resolvable:$true] %s230_s26 }
   0x6   : > { %p204_p1 = scmp.lt.s32.totalorder %s1872_s24, 3  ;;  %p2215_p2 = scmp.eq.s32.totalorder %s1931_s27, 0 }
   0x7   : > { %s1875_s29 = smov [#allocation8]   ;;  %s1876_s8 = smov [#allocation3]  }
   0x8   : > { %p1938_p3 = pnand %p1274_p0, %p204_p1  ;;  %s254_s30 = sshll.u32 %s1875_s29, 4  ;;  %s1944_s30 = int_to_ptr.vmem [resolvable:$true] %s254_s30 }
   0x9   : > { %s216_s9 = sshll.u32 %s1876_s8, 4  ;;  %s1877_s11 = smov [#allocation7]   ;;  %s1952_s9 = int_to_ptr.vmem [resolvable:$true] %s216_s9 }
   0xa   : > { %s2217_s28 = scalar_select %p1938_p3, 1, 0 }
   0xb   : > { %p1578_p4 = pneg %p1938_p3  ;;  %s1954_s12 = sshll.u32 %s1877_s11, 4  ;;  %s241_s12 = int_to_ptr.vmem [resolvable:$true] %s1954_s12 }
   0xc   : > { %s1682_s15 = scalar_lea.hbm %s2209_s2, 16 }
   0xd   : > { %p1948_p5 = pnand %p2215_p2, %p1578_p4  ;;  %p1683_p6 = scmp.ne.s32.totalorder %s2209_s2, %s1682_s15 }
   0xe   : > { %p1689_p10 = scmp.lt.u32.totalorder %s1682_s15, %s2209_s2 }
   0xf   : > { %p1964_p7 = pneg %p1948_p5 }
  0x11   : > { %p1685_p8 = pnand %p1964_p7, %p1683_p6 }
  0x13   : > { %p1686_p9 = pneg %p1685_p8 }
  0x15   : > { %p1691_p11 = pnand %p1689_p10, %p1686_p9 }
  0x17   : > { %1694 = shalt.err (!%p1691_p11)
}
  0x18   : > { %s1695_s21 = scalar_lea.vmem %s1936_s26, 16  ;;  %s1702_s22 = scalar_lea.vmem %s1936_s26, 32 }
  0x19   : > { %p1696_p12 = scmp.ne.s32.totalorder %s1936_s26, %s1695_s21  ;;  %p1703_p1 = scmp.lt.s32.totalorder %s1936_s26, %s1936_s26 }
  0x1a   : > { %p1704_p4 = scmp.lt.s32.totalorder %s1702_s22, %s1695_s21 }
  0x1b   : > { %p1698_p13 = pnand %p1696_p12, %p1964_p7 }
  0x1c   : > { %p1705_p6 = por %p1704_p4, %p1703_p1 }
  0x1d   : > { %p1699_p0 = pneg %p1698_p13 }
  0x1f   : > { %p1706_p8 = pnand %p1705_p6, %p1699_p0 }
  0x21   : > { %1709 = shalt.err (!%p1706_p8)
}
  0x22   : > { %1584 = dma.hbm_to_vmem [thread:$0]  (!%p1948_p5), %s2209_s2, 16, %s1936_s26, [#allocation6]  }
  0x23   : > { %s1710_s11 = scalar_lea.hbm %s2211_s4, 16 }
  0x24   : > { %p1711_p9 = scmp.ne.s32.totalorder %s2211_s4, %s1710_s11  ;;  %p1717_p12 = scmp.lt.u32.totalorder %s1710_s11, %s2211_s4 }
  0x26   : > { %p1713_p10 = pnand %p1711_p9, %p1964_p7 }
  0x28   : > { %p1714_p11 = pneg %p1713_p10 }
  0x2a   : > { %p1719_p13 = pnand %p1717_p12, %p1714_p11 }
  0x2c   : > { %1722 = shalt.err (!%p1719_p13)
}
  0x2d   : > { %s1723_s26 = scalar_lea.vmem %s1944_s30, 16  ;;  %s1730_s17 = scalar_lea.vmem %s1944_s30, 32 }
  0x2e   : > { %p1724_p0 = scmp.ne.s32.totalorder %s1944_s30, %s1723_s26  ;;  %p1731_p6 = scmp.lt.s32.totalorder %s1944_s30, %s1944_s30 }
  0x2f   : > { %p1732_p8 = scmp.lt.s32.totalorder %s1730_s17, %s1723_s26 }
  0x30   : > { %p1726_p1 = pnand %p1724_p0, %p1964_p7 }
  0x31   : > { %p1733_p9 = por %p1732_p8, %p1731_p6 }
  0x32   : > { %p1727_p4 = pneg %p1726_p1 }
  0x34   : > { %p1734_p10 = pnand %p1733_p9, %p1727_p4 }
  0x36   : > { %1737 = shalt.err (!%p1734_p10)
}
  0x37   : > { %1590 = dma.hbm_to_vmem [thread:$0]  (!%p1948_p5), %s2211_s4, 16, %s1944_s30, [#allocation9]  }
  0x38   : > { %s1738_s23 = scalar_lea.hbm %s2208_s1, 2048 }
  0x39   : > { %p1739_p11 = scmp.ne.s32.totalorder %s2208_s1, %s1738_s23  ;;  %p1745_p0 = scmp.lt.u32.totalorder %s1738_s23, %s2208_s1 }
  0x3b   : > { %p1741_p12 = pnand %p1739_p11, %p1964_p7 }
  0x3d   : > { %p1742_p13 = pneg %p1741_p12 }
  0x3f   : > { %p1747_p1 = pnand %p1745_p0, %p1742_p13 }
  0x41   : > { %1750 = shalt.err (!%p1747_p1)
}
  0x42   : > { %s1751_s30 = scalar_lea.vmem %s1952_s9, 2048  ;;  %p1759_p9 = scmp.lt.s32.totalorder %s1952_s9, %s1952_s9 }
  0x43   : > { %p1752_p4 = scmp.ne.s32.totalorder %s1952_s9, %s1751_s30  ;;  %p1760_p10 = scmp.lt.s32.totalorder %s1751_s30, %s1751_s30 }
  0x45   : > { %p1754_p6 = pnand %p1752_p4, %p1964_p7  ;;  %p1761_p11 = por %p1760_p10, %p1759_p9 }
  0x47   : > { %p1755_p8 = pneg %p1754_p6 }
  0x49   : > { %p1762_p12 = pnand %p1761_p11, %p1755_p8 }
  0x4b   : > { %1765 = shalt.err (!%p1762_p12)
}
  0x4c   : > { %s1878_s13 = smov 64   ;;  %s1879_s14 = smov 4  }
  0x4d   : > { %1581 = dma.hbm_to_vmem [thread:$0]  (!%p1948_p5), %s2208_s1, 2048, %s1952_s9, [#allocation4], %s1878_s13, %s1878_s13, %s1879_s14  }
  0x4e   : > { %s1766_s19 = scalar_lea.hbm %s2210_s3, 3072 }
  0x4f   : > { %p1767_p13 = scmp.ne.s32.totalorder %s2210_s3, %s1766_s19  ;;  %p1773_p4 = scmp.lt.u32.totalorder %s1766_s19, %s2210_s3 }
  0x51   : > { %p1769_p0 = pnand %p1767_p13, %p1964_p7 }
  0x53   : > { %p1770_p1 = pneg %p1769_p0 }
  0x55   : > { %p1775_p6 = pnand %p1773_p4, %p1770_p1 }
  0x57   : > { %1778 = shalt.err (!%p1775_p6)
}
  0x58   : > { %s1779_s25 = scalar_lea.vmem %s241_s12, 3072  ;;  %p1787_p11 = scmp.lt.s32.totalorder %s241_s12, %s241_s12 }
  0x59   : > { %p1780_p8 = scmp.ne.s32.totalorder %s241_s12, %s1779_s25  ;;  %p1788_p12 = scmp.lt.s32.totalorder %s1779_s25, %s1779_s25 }
  0x5b   : > { %p1782_p9 = pnand %p1780_p8, %p1964_p7  ;;  %p1789_p2 = por %p1788_p12, %p1787_p11 }
  0x5d   : > { %p1783_p10 = pneg %p1782_p9 }
  0x5f   : > { %p1790_p3 = pnand %p1789_p2, %p1783_p10 }
  0x61   : > { %1793 = shalt.err (!%p1790_p3)
}
  0x62   : > { %1587 = dma.hbm_to_vmem [thread:$0]  (!%p1948_p5), %s2210_s3, 3072, %s241_s12, [#allocation6], %s1878_s13, %s1878_s13, %s1879_s14  }
  0x63   : > { %s1880_s8 = smov [#allocation10]   ;;  %s1881_s30 = smov [#allocation11]  }
  0x64   : > { %s264_s11 = sshll.u32 %s1880_s8, 4  ;;  %s278_s15 = sshll.u32 %s1881_s30, 4  ;;  %s265_s11 = int_to_ptr.vmem [resolvable:$true] %s264_s11  ;;  %s279_s15 = int_to_ptr.vmem [resolvable:$true] %s278_s15 }
  0x65   : > { %s1794_s17 = scalar_lea.hbm %s2212_s5, 1024 }
  0x66   : > { %p1795_p2 = scmp.ne.s32.totalorder %s2212_s5, %s1794_s17  ;;  %p1801_p0 = scmp.lt.u32.totalorder %s1794_s17, %s2212_s5 }
  0x68   : > { %p1797_p3 = pnand %p1795_p2, %p1964_p7 }
  0x6a   : > { %p1798_p13 = pneg %p1797_p3 }
  0x6c   : > { %p1803_p1 = pnand %p1801_p0, %p1798_p13 }
  0x6e   : > { %1806 = shalt.err (!%p1803_p1)
}
  0x6f   : > { %s1807_s12 = scalar_lea.vmem %s265_s11, 1024  ;;  %p1815_p9 = scmp.lt.s32.totalorder %s265_s11, %s265_s11 }
  0x70   : > { %p1808_p4 = scmp.ne.s32.totalorder %s265_s11, %s1807_s12  ;;  %p1816_p10 = scmp.lt.s32.totalorder %s1807_s12, %s1807_s12 }
  0x72   : > { %p1810_p6 = pnand %p1808_p4, %p1964_p7  ;;  %p1817_p11 = por %p1816_p10, %p1815_p9 }
  0x74   : > { %p1811_p8 = pneg %p1810_p6 }
  0x76   : > { %p1818_p12 = pnand %p1817_p11, %p1811_p8 }
  0x78   : > { %1821 = shalt.err (!%p1818_p12)
}
  0x79   : > { %1593 = dma.hbm_to_vmem [thread:$0]  (!%p1948_p5), %s2212_s5, 1024, %s265_s11, [#allocation9], %s1878_s13, %s1878_s13, %s1879_s14  }
  0x7a   : > { %s1822_s8 = scalar_lea.hbm %s2213_s6, 16 }
  0x7b   : > { %p1823_p2 = scmp.ne.s32.totalorder %s2213_s6, %s1822_s8  ;;  %p1829_p0 = scmp.lt.u32.totalorder %s1822_s8, %s2213_s6 }
  0x7d   : > { %p1825_p3 = pnand %p1823_p2, %p1964_p7 }
  0x7f   : > { %p1826_p13 = pneg %p1825_p3 }
  0x81   : > { %p1831_p1 = pnand %p1829_p0, %p1826_p13 }
  0x83   : > { %1834 = shalt.err (!%p1831_p1)
}
  0x84   : > { %s1835_s19 = scalar_lea.vmem %s279_s15, 16  ;;  %s1842_s13 = scalar_lea.vmem %s279_s15, 32 }
  0x85   : > { %p1836_p4 = scmp.ne.s32.totalorder %s279_s15, %s1835_s19  ;;  %p1843_p9 = scmp.lt.s32.totalorder %s279_s15, %s279_s15 }
  0x86   : > { %p1844_p10 = scmp.lt.s32.totalorder %s1842_s13, %s1835_s19 }
  0x87   : > { %p1838_p6 = pnand %p1836_p4, %p1964_p7 }
  0x88   : > { %p1845_p11 = por %p1844_p10, %p1843_p9 }
  0x89   : > { %p1839_p8 = pneg %p1838_p6 }
  0x8b   : > { %p1846_p12 = pnand %p1845_p11, %p1839_p8 }
  0x8d   : > { %1849 = shalt.err (!%p1846_p12)
}
  0x8e   : > { %1596 = dma.hbm_to_vmem [thread:$0]  (!%p1948_p5), %s2213_s6, 16, %s279_s15, [#allocation12]  }
  0x8f   : > { %p2220_p2 = scmp.ne.s32.totalorder %s2217_s28, 0 }
  0x90   : > { %p2221_p3 = scmp.eq.s32.totalorder (!%p2220_p2), %s1931_s27, 0 }
  0x91   : > { %299 = sbr.rel (%p2220_p2) target bundleno = 796 (0x31c), region = 48 }
  0x98   : > { %1855 = dma.done.wait (%p2221_p3), [#allocation4], 2048   ;;  %p2222_p7 = pmov %p2221_p3 }
  0x99   : > { %p2223_p13 = pmov %p2221_p3 }
  0x9a   : > { %1857 = vsyncadd (%p2222_p7), [#allocation4], 4294965248 }
  0x9b   : > { %1859 = dma.done.wait (%p2223_p13), [#allocation6], 3088   ;;  %p2224_p0 = pmov %p2221_p3 }
  0x9d   : > { %1861 = vsyncadd (%p2224_p0), [#allocation6], 4294964208  ;;  %p2225_p1 = pmov %p2224_p0 }
  0x9e   : > { %p2226_p5 = pmov %p2224_p0 }
  0x9f   : > { %1863 = dma.done.wait (%p2225_p1), [#allocation9], 1040  }
  0xa0   : > { %1865 = vsyncadd (%p2226_p5), [#allocation9], 4294966256  ;;  %p2227_p4 = pmov %p2224_p0 }
  0xa1   : > { %p2228_p6 = pmov %p2224_p0 }
  0xa2   : > { %1867 = dma.done.wait (%p2227_p4), [#allocation12], 16  }
  0xa3   : > { %1869 = vsyncadd (%p2228_p6), [#allocation12], 4294967280  ;;  %v1882_v0 = vmov 0.0   ;;  %vm1883_vm0 = vmmov 0   ;;  %p351_p8 = scmp.lt.s32.totalorder %s1931_s27, 1  ;;  %v1628_v1 = vld [vmem:[#allocation10] sm:$0xff]  }
  0xa4   : > { %1419 = vmatprep.subr.bf16.mxu1 %v1882_v0  ;;  %1435 = vmatprep.mubr.msk.bf16.mxu1 %vm1883_vm0, %v1882_v0  ;;  %v1629_v2 = vld [vmem:[#allocation10 + $0x8] sm:$0xff]   ;;  %v1630_v3 = vld [vmem:[#allocation10 + $0x10] sm:$0xff]   ;;  %v1631_v4 = vld [vmem:[#allocation10 + $0x18] sm:$0xff]   ;;  %vm526_vm1 = vsmask.f32 7424  ;;  %v1884_v37 = vmov 0  }
  0xa5   : > { %1479 = vmatprep.subr.bf16.mxu0 %v1882_v0  ;;  %1495 = vmatprep.mubr.msk.bf16.mxu0 %vm1883_vm0, %v1882_v0  ;;  %s2230_s27 = smov (!%p351_p8, %s1931_s27), 1  ;;  %v1632_v5 = vld [vmem:[#allocation10 + $0x20] sm:$0xff]   ;;  %v1633_v6 = vld [vmem:[#allocation10 + $0x28] sm:$0xff]   ;;  %v1634_v7 = vld [vmem:[#allocation10 + $0x30] sm:$0xff]   ;;  %733 = vst [vmem:[#allocation2] sm:$0xf] %v1884_v37 }
  0xa6   : > { %1420 = vmatpush3.bf16.msra.mxu1 %v1628_v1  ;;  %s1553_s28 = smul.u32 12, %s2230_s27  ;;  %v1635_v8 = vld [vmem:[#allocation10 + $0x38] sm:$0xff]   ;;  %v1638_v11 = vld [vmem:[#allocation3 + $0x48] sm:$0xff]   ;;  %v1639_v12 = vld [vmem:[#allocation3 + $0x50] sm:$0xff]   ;;  %734 = vst [vmem:[#allocation2 + $0x4] sm:$0xf] %v1884_v37 }
  0xa7   : > { %1421 = vmatprep.subr.bf16.mxu1 %v1882_v0  ;;  %v1637_v10 = vld [vmem:[#allocation3 + $0x40] sm:$0xff]   ;;  %v1640_v13 = vld [vmem:[#allocation3 + $0x58] sm:$0xff]   ;;  %v1642_v16 = vld [vmem:[#allocation3 + $0x68] sm:$0xff]   ;;  %735 = vst [vmem:[#allocation2 + $0x8] sm:$0x1] %v1884_v37  ;;  %vm765_vm4 = vcmask 1043456  }
  0xa8   : > { %s2131_s15 = scalar_lea.vmem %s2207_s0, %s1553_s28  ;;  %v1641_v14 = vld [vmem:[#allocation3 + $0x60] sm:$0xff]   ;;  %v1643_v19 = vld [vmem:[#allocation3 + $0x70] sm:$0xff]   ;;  %v1644_v23 = vld [vmem:[#allocation3 + $0x78] sm:$0xff]   ;;  %vm766_vm5 = vsmask.f32 7938  ;;  %vm772_vm8 = vcmask 1040384  }
  0xa9   : > { %v2139_v9 = vld [vmem:[%s2131_s15] sm:$0xff]   ;;  %v1646_v17 = vld [vmem:[%s2131_s15 + $0x8] ss:$0 sps:$4 sm:$0x11]   ;;  %v1647_v27 = vld [vmem:[#allocation3] sm:$0xff]   ;;  %vm1034_vm12 = vcmask 1046528  }
  0xaa   : > { %1422 = vmatpush3.bf16.msra.mxu1 %v1629_v2  ;;  %v1645_v15 = vld [vmem:[%s2131_s15] sm:$0xff]   ;;  %v535_v22 = vshll.u32 %v1646_v17, 16  ;;  %v1648_v28 = vld [vmem:[#allocation3 + $0x8] sm:$0xff]   ;;  %v1651_v31 = vld [vmem:[#allocation3 + $0x20] sm:$0xff]   ;;  %vm742_vm6 = vsmask.f32 256 }
  0xab   : > { %1423 = vmatprep.subr.bf16.mxu1 %v1882_v0  ;;  %v530_v18 = vshll.u32 %v1645_v15, 16  ;;  %v528_v20 = vshrl.u32 %v1645_v15, 16  ;;  %v1649_v29 = vld [vmem:[#allocation3 + $0x10] sm:$0xff]   ;;  %v1650_v30 = vld [vmem:[#allocation3 + $0x18] sm:$0xff]   ;;  %v1652_v32 = vld [vmem:[#allocation3 + $0x28] sm:$0xff]   ;;  %s1355_s20 = sshll.u32 %s2230_s27, 3 }
  0xac   : > { %v537_v25 = vrot.slane %v535_v22, 1  ;;  %v1653_v33 = vld [vmem:[#allocation3 + $0x30] sm:$0xff]   ;;  %v1654_v34 = vld [vmem:[#allocation3 + $0x38] sm:$0xff]   ;;  %v1655_v35 = vld [vmem:[#allocation7 + $0x40] sm:$0xff]   ;;  %vm743_vm7 = vsmask.f32 4368  ;;  %s360_s12 = scalar_lea.vmem %s2214_s7, %s1355_s20 }
  0xad   : > { %v532_v21 = vrot.slane %v530_v18, 1  ;;  %1480 = vmatpush3.bf16.msra.mxu0 %v1655_v35  ;;  %v1656_v36 = vld [vmem:[#allocation7 + $0x48] sm:$0xff]   ;;  %v1657_v38 = vld [vmem:[#allocation7 + $0x50] sm:$0xff]   ;;  %v1658_v39 = vld [vmem:[#allocation7 + $0x58] sm:$0xff]  }
  0xae   : > { %1424 = vmatpush3.bf16.msra.mxu1 %v1630_v3  ;;  %1481 = vmatprep.subr.bf16.mxu0 %v1882_v0  ;;  %v1659_v40 = vld [vmem:[#allocation7 + $0x60] sm:$0xff]   ;;  %v1660_v41 = vld [vmem:[#allocation7 + $0x68] sm:$0xff]   ;;  %v1661_v42 = vld [vmem:[#allocation7 + $0x70] sm:$0xff]  }
  0xaf   : > { %1425 = vmatprep.subr.bf16.mxu1 %v1882_v0  ;;  %v533_v24 = vor.u32 %v532_v21, %v528_v20  ;;  %v1662_v43 = vld [vmem:[#allocation7 + $0x78] sm:$0xff]   ;;  %vm767_vm9 = vmand %vm765_vm4, %vm766_vm5  ;;  %v1667_v37 = vld [vmem:[#allocation7 + $0x10] sm:$0xff]  }
  0xb0   : > { %v1320_v53 = vld [vmem:[#allocation5] ss:$0 sm:$0xff]  ;;  %vm744_vm10 = vmor %vm742_vm6, %vm743_vm7 }
  0xb1   : > { %v538_v26 = vsel %vm526_vm1, %v533_v24, %v537_v25  ;;  %1482 = vmatpush3.bf16.msra.mxu0 %v1656_v36  ;;  %vm773_vm11 = vmand %vm772_vm8, %vm742_vm6  ;;  %v1666_v36 = vld [vmem:[#allocation7 + $0x8] sm:$0xff]  }
  0xb2   : > { %1426 = vmatpush3.bf16.msra.mxu1 %v1631_v4  ;;  %1483 = vmatprep.subr.bf16.mxu0 %v1882_v0 }
  0xb3   : > { %1427 = vmatprep.subr.bf16.mxu1 %v1882_v0 }
  0xb5   : > { %1484 = vmatpush3.bf16.msra.mxu0 %v1657_v38  ;;  %v1668_v38 = vld [vmem:[#allocation7 + $0x18] sm:$0xff]  }
  0xb6   : > { %1428 = vmatpush3.bf16.msra.mxu1 %v1632_v5  ;;  %1485 = vmatprep.subr.bf16.mxu0 %v1882_v0 }
  0xb7   : > { %1429 = vmatprep.subr.bf16.mxu1 %v1882_v0 }
  0xb9   : > { %1486 = vmatpush3.bf16.msra.mxu0 %v1658_v39  ;;  %v1669_v39 = vld [vmem:[#allocation7 + $0x20] sm:$0xff]  }
  0xba   : > { %1430 = vmatpush3.bf16.msra.mxu1 %v1633_v6  ;;  %1487 = vmatprep.subr.bf16.mxu0 %v1882_v0 }
  0xbb   : > { %1431 = vmatprep.subr.bf16.mxu1 %v1882_v0 }
  0xbd   : > { %1488 = vmatpush3.bf16.msra.mxu0 %v1659_v40  ;;  %v1670_v40 = vld [vmem:[#allocation7 + $0x28] sm:$0xff]  }
  0xbe   : > { %1432 = vmatpush3.bf16.msra.mxu1 %v1634_v7  ;;  %1489 = vmatprep.subr.bf16.mxu0 %v1882_v0 }
  0xbf   : > { %1433 = vmatprep.subr.bf16.mxu1 %v1882_v0 }
  0xc1   : > { %1490 = vmatpush3.bf16.msra.mxu0 %v1660_v41  ;;  %v1671_v41 = vld [vmem:[#allocation7 + $0x30] sm:$0xff]  }
  0xc2   : > { %1434 = vmatpush3.bf16.msra.mxu1 %v1635_v8  ;;  %1491 = vmatprep.subr.bf16.mxu0 %v1882_v0  ;;  %v768_v8 = vld [vmem:[#allocation2] sm:$0xf] }
  0xc3   : > { %1439 = vmatprep.subr.bf16.mxu1 %v1882_v0 }
  0xc5   : > { %1436 = vmatmul.mubr.bf16.vlgmr.msra.gmra.mrb[0].mxu1 %v2139_v9  ;;  %1492 = vmatpush3.bf16.msra.mxu0 %v1661_v42  ;;  %v1672_v42 = vld [vmem:[#allocation7 + $0x38] sm:$0xff]  }
  0xc6   : > { %1440 = vmatpush3.bf16.msra.mxu1 %v1637_v10  ;;  %1455 = vmatprep.mubr.msk.bf16.mxu1 %vm1883_vm0, %v1882_v0 }
  0xc7   : > { %1441 = vmatprep.subr.bf16.mxu1 %v1882_v0  ;;  %1493 = vmatprep.subr.bf16.mxu0 %v1882_v0 }
  0xc9   : > { %1494 = vmatpush3.bf16.msra.mxu0 %v1662_v43  ;;  %v1673_v43 = vld [vmem:[#allocation7 + $0x80] sm:$0xff]  }
  0xca   : > { %1442 = vmatpush3.bf16.msra.mxu1 %v1638_v11  ;;  %1499 = vmatprep.subr.bf16.mxu0 %v1882_v0 }
  0xcb   : > { %1443 = vmatprep.subr.bf16.mxu1 %v1882_v0 }
  0xce   : > { %1444 = vmatpush3.bf16.msra.mxu1 %v1639_v12  ;;  %v774_v12 = vld [vmem:[#allocation2 + $0x8] sm:$0x1] }
  0xcf   : > { %1445 = vmatprep.subr.bf16.mxu1 %v1882_v0 }
  0xd2   : > { %1446 = vmatpush3.bf16.msra.mxu1 %v1640_v13 }
  0xd3   : > { %1447 = vmatprep.subr.bf16.mxu1 %v1882_v0 }
  0xd6   : > { %1448 = vmatpush3.bf16.msra.mxu1 %v1641_v14 }
  0xd7   : > { %1449 = vmatprep.subr.bf16.mxu1 %v1882_v0 }
  0xda   : > { %1450 = vmatpush3.bf16.msra.mxu1 %v1642_v16 }
  0xdb   : > { %1451 = vmatprep.subr.bf16.mxu1 %v1882_v0 }
  0xde   : > { %1452 = vmatpush3.bf16.msra.mxu1 %v1643_v19 }
  0xdf   : > { %1453 = vmatprep.subr.bf16.mxu1 %v1882_v0 }
  0xe2   : > { %1454 = vmatpush3.bf16.msra.mxu1 %v1644_v23 }
  0xe3   : > { %1459 = vmatprep.subr.bf16.mxu1 %v1882_v0 }
  0xe5   : > { %1456 = vmatmul.mubr.bf16.vlgmr.msra.gmra.mrb[4].mxu1 %v538_v26 }
  0xe6   : > { %1460 = vmatpush3.bf16.msra.mxu1 %v1647_v27  ;;  %1475 = vmatprep.mubr.msk.bf16.mxu1 %vm1883_vm0, %v1882_v0 }
  0xe7   : > { %1461 = vmatprep.subr.bf16.mxu1 %v1882_v0 }
  0xea   : > { %1462 = vmatpush3.bf16.msra.mxu1 %v1648_v28 }
  0xeb   : > { %1463 = vmatprep.subr.bf16.mxu1 %v1882_v0 }
  0xee   : > { %1464 = vmatpush3.bf16.msra.mxu1 %v1649_v29 }
  0xef   : > { %1465 = vmatprep.subr.bf16.mxu1 %v1882_v0 }
  0xf2   : > { %1466 = vmatpush3.bf16.msra.mxu1 %v1650_v30 }
  0xf3   : > { %1467 = vmatprep.subr.bf16.mxu1 %v1882_v0 }
  0xf6   : > { %1468 = vmatpush3.bf16.msra.mxu1 %v1651_v31 }
  0xf7   : > { %1469 = vmatprep.subr.bf16.mxu1 %v1882_v0 }
  0xfa   : > { %1470 = vmatpush3.bf16.msra.mxu1 %v1652_v32 }
  0xfb   : > { %1471 = vmatprep.subr.bf16.mxu1 %v1882_v0 }
  0xfe   : > { %1472 = vmatpush3.bf16.msra.mxu1 %v1653_v33 }
  0xff   : > { %1473 = vmatprep.subr.bf16.mxu1 %v1882_v0 }
 0x102   : > { %1474 = vmatpush3.bf16.msra.mxu1 %v1654_v34  ;;  %v1665_v34 = vld [vmem:[#allocation7] sm:$0xff]  }
 0x105   : > { %1476 = vmatmul.mubr.bf16.vlgmr.msra.gmra.mrb[8].mxu1 %v2139_v9 }
 0x198   : > { %v2174_v44 = vpop.f32.mrb[0].mxu1 }
 0x199   : > { %v1437_v45 = vpop.f32.mrb[1].mxu1 }
 0x19a   : > { %v2176_v46 = vpop.f32.mrb[2].mxu1  ;;  %v1674_v45 = vld [vmem:[#allocation7 + $0x88] sm:$0xff]  }
 0x19b   : > { %v1438_v47 = vpop.f32.mrb[3].mxu1 }
 0x19c   : > { %v1675_v47 = vld [vmem:[#allocation7 + $0x90] sm:$0xff]  }
 0x1b8   : > { %v622_v48 = vpop.f32.mrb[4].mxu1 }
 0x1b9   : > { %v1457_v49 = vpop.f32.mrb[5].mxu1 }
 0x1ba   : > { %v625_v50 = vpop.f32.mrb[6].mxu1  ;;  %v1677_v49 = vld [vmem:[#allocation7 + $0xa0] sm:$0xff]  }
 0x1bb   : > { %v1458_v51 = vpop.f32.mrb[7].mxu1 }
 0x1bc   : > { %v1679_v51 = vld [vmem:[#allocation7 + $0xb0] sm:$0xff]  }
 0x1d8   : > { %v711_v52 = vpop.f32.mrb[8].mxu1 }
 0x1d9   : > { %v712_v54 = vadd.f32 %v711_v52, %v622_v48  ;;  %v1477_v55 = vpop.f32.mrb[9].mxu1  ;;  %v1676_v48 = vld [vmem:[#allocation7 + $0x98] sm:$0xff]  }
 0x1da   : > { %v714_v56 = vpop.f32.mrb[10].mxu1  ;;  %v1680_v52 = vld [vmem:[#allocation7 + $0xb8] sm:$0xff]  }
 0x1db   : > { %v725_v57 = vadd.f32 %v1320_v53, %v712_v54  ;;  %v715_v58 = vadd.f32 %v714_v56, %v625_v50  ;;  %v1478_v59 = vpop.f32.mrb[11].mxu1  ;;  %v1678_v50 = vld [vmem:[#allocation7 + $0xa8] sm:$0xff]   ;;  %v1350_v56 = vld [vmem:[#allocation8] ss:$0 sm:$0xff] }
 0x1dd   : > { %vm727_vm2 = vcmp.ge.f32.partialorder %v725_v57, 0.0  ;;  %v729_v60 = vmul.f32 0.01, %v725_v57  ;;  %v726_v61 = vadd.f32 %v1320_v53, %v715_v58  ;;  %v1292_v53 = vld [vmem:[#allocation11] ss:$0 sm:$0xff] }
 0x1de   : > { %v476_v54 = vadd.f32 %v1292_v53, %v2174_v44 }
 0x1df   : > { %v731_v62 = vsel %vm727_vm2, %v725_v57, %v729_v60  ;;  %vm728_vm3 = vcmp.ge.f32.partialorder %v726_v61, 0.0  ;;  %v730_v63 = vmul.f32 0.01, %v726_v61  ;;  %v479_v57 = vadd.f32 %v1292_v53, %v2176_v46 }
 0x1e0   : > { %v1356_v1 = vpack.c.bf16 %v731_v62, %v731_v62 }
 0x1e1   : > { %v732_v2 = vsel %vm728_vm3, %v726_v61, %v730_v63 }
 0x1e2   : > { %v746_v3 = vshrl.u32 %v1356_v1, 16  ;;  %v1357_v4 = vpack.c.bf16 %v732_v2, %v732_v2  ;;  %v749_v6 = vshll.u32 %v1356_v1, 16 }
 0x1e4   : > { %v748_v5 = vrot.slane %v746_v3, 7  ;;  %v754_v7 = vshrl.u32 %v1357_v4, 16  ;;  %v757_v11 = vshll.u32 %v1357_v4, 16 }
 0x1e6   : > { %v751_v9 = vor.u32 %v749_v6, %v748_v5  ;;  %v756_v10 = vrot.slane %v754_v7, 7  ;;  %v752_v13 = vrot.slane %v748_v5, 4 }
 0x1e8   : > { %v769_v14 = vsel %vm767_vm9, %v751_v9, %v768_v8  ;;  %v759_v15 = vor.u32 %v757_v11, %v756_v10  ;;  %v761_v16 = vrot.slane %v756_v10, 4 }
 0x1e9   : > { %770 = vst [vmem:[#allocation2] sm:$0xf] %v769_v14 }
 0x1ea   : > { %v760_v17 = vsel %vm744_vm10, %v752_v13, %v759_v15  ;;  %v775_v18 = vsel %vm773_vm11, %v761_v16, %v774_v12 }
 0x1eb   : > { %771 = vst [vmem:[#allocation2 + $0x4] sm:$0xf] %v760_v17  ;;  %776 = vst [vmem:[#allocation2 + $0x8] sm:$0x1] %v775_v18 }
 0x1f0   : > { %v777_v19 = vld [vmem:[#allocation2] sm:$0xf] }
 0x1f1   : > { %v1013_v21 = vld [vmem:[#allocation2] sm:$0xe] }
 0x1f2   : > { %v778_v20 = vld [vmem:[#allocation2 + $0x4] sm:$0xf]  ;;  %v1664_v23 = vld [vmem:[#allocation2 + $0x8] ss:$0 sps:$4 sm:$0x11]  }
 0x1f3   : > { %v1323_v22 = vcombine.low %v777_v19, %v778_v20  ;;  %v1341_v24 = vcombine.low %v1013_v21, %v778_v20  ;;  %v829_v26 = vshll.u32 %v1664_v23, 16  ;;  %v1036_v28 = vrot.slane %v1664_v23, 1 }
 0x1f5   : > { %v824_v25 = vshll.u32 %v1323_v22, 16  ;;  %v1035_v27 = vrot.slane %v1341_v24, 1  ;;  %v822_v29 = vshrl.u32 %v1323_v22, 16  ;;  %v831_v33 = vrot.slane %v829_v26, 1 }
 0x1f7   : > { %v826_v30 = vrot.slane %v824_v25, 1  ;;  %v1037_v31 = vsel %vm1034_vm12, %v1035_v27, %v1036_v28 }
 0x1f9   : > { %v827_v32 = vor.u32 %v826_v30, %v822_v29 }
 0x1fb   : > { %v832_v35 = vsel %vm526_vm1, %v827_v32, %v831_v33 }
 0x1fc   : > { %1496 = vmatmul.mubr.bf16.vlgmr.msra.gmra.mrb[0].mxu0 %v832_v35 }
 0x1fd   : > { %1500 = vmatpush3.bf16.msra.mxu0 %v1665_v34  ;;  %1515 = vmatprep.mubr.msk.bf16.mxu0 %vm1883_vm0, %v1882_v0 }
 0x1fe   : > { %1501 = vmatprep.subr.bf16.mxu0 %v1882_v0 }
 0x201   : > { %1502 = vmatpush3.bf16.msra.mxu0 %v1666_v36 }
 0x202   : > { %1503 = vmatprep.subr.bf16.mxu0 %v1882_v0 }
 0x205   : > { %1504 = vmatpush3.bf16.msra.mxu0 %v1667_v37 }
 0x206   : > { %1505 = vmatprep.subr.bf16.mxu0 %v1882_v0 }
 0x209   : > { %1506 = vmatpush3.bf16.msra.mxu0 %v1668_v38 }
 0x20a   : > { %1507 = vmatprep.subr.bf16.mxu0 %v1882_v0 }
 0x20d   : > { %1508 = vmatpush3.bf16.msra.mxu0 %v1669_v39 }
 0x20e   : > { %1509 = vmatprep.subr.bf16.mxu0 %v1882_v0 }
 0x211   : > { %1510 = vmatpush3.bf16.msra.mxu0 %v1670_v40 }
 0x212   : > { %1511 = vmatprep.subr.bf16.mxu0 %v1882_v0 }
 0x215   : > { %1512 = vmatpush3.bf16.msra.mxu0 %v1671_v41 }
 0x216   : > { %1513 = vmatprep.subr.bf16.mxu0 %v1882_v0 }
 0x219   : > { %1514 = vmatpush3.bf16.msra.mxu0 %v1672_v42 }
 0x21a   : > { %1519 = vmatprep.subr.bf16.mxu0 %v1882_v0 }
 0x21c   : > { %1516 = vmatmul.mubr.bf16.vlgmr.msra.gmra.mrb[0].mxu0 %v1323_v22 }
 0x21d   : > { %1520 = vmatpush3.bf16.msra.mxu0 %v1673_v43  ;;  %1535 = vmatprep.mubr.msk.bf16.mxu0 %vm1883_vm0, %v1882_v0 }
 0x21e   : > { %1521 = vmatprep.subr.bf16.mxu0 %v1882_v0 }
 0x221   : > { %1522 = vmatpush3.bf16.msra.mxu0 %v1674_v45 }
 0x222   : > { %1523 = vmatprep.subr.bf16.mxu0 %v1882_v0 }
 0x225   : > { %1524 = vmatpush3.bf16.msra.mxu0 %v1675_v47 }
 0x226   : > { %1525 = vmatprep.subr.bf16.mxu0 %v1882_v0 }
 0x229   : > { %1526 = vmatpush3.bf16.msra.mxu0 %v1676_v48 }
 0x22a   : > { %1527 = vmatprep.subr.bf16.mxu0 %v1882_v0 }
 0x22d   : > { %1528 = vmatpush3.bf16.msra.mxu0 %v1677_v49 }
 0x22e   : > { %1529 = vmatprep.subr.bf16.mxu0 %v1882_v0 }
 0x231   : > { %1530 = vmatpush3.bf16.msra.mxu0 %v1678_v50 }
 0x232   : > { %1531 = vmatprep.subr.bf16.mxu0 %v1882_v0 }
 0x235   : > { %1532 = vmatpush3.bf16.msra.mxu0 %v1679_v51 }
 0x236   : > { %1533 = vmatprep.subr.bf16.mxu0 %v1882_v0 }
 0x239   : > { %1534 = vmatpush3.bf16.msra.mxu0 %v1680_v52 }
 0x23c   : > { %1536 = vmatmul.mubr.bf16.vlgmr.msra.gmra.mrb[0].mxu0 %v1037_v31 }
 0x30f   : > { %v1121_v55 = vpop.f32.mrb[0].mxu0 }
 0x310   : > { %v1540_v58 = vadd.f32 %v1121_v55, %v476_v54  ;;  %v1537_v59 = vpop.f32.mrb[1].mxu0 }
 0x311   : > { %v1124_v60 = vpop.f32.mrb[2].mxu0 }
 0x312   : > { %v1541_v61 = vadd.f32 %v1540_v58, %v1350_v56  ;;  %v1543_v62 = vadd.f32 %v1124_v60, %v479_v57  ;;  %v1538_v63 = vpop.f32.mrb[3].mxu0 }
 0x314   : > { %v1143_v1 = vmul.f32 0.01, %v1541_v61  ;;  %v1544_v2 = vadd.f32 %v1543_v62, %v1350_v56  ;;  %vm1141_vm13 = vcmp.ge.f32.partialorder %v1541_v61, 0.0 }
 0x316   : > { %vm1142_vm14 = vcmp.ge.f32.partialorder %v1544_v2, 0.0  ;;  %v1144_v0 = vmul.f32 0.01, %v1544_v2  ;;  %v1145_v3 = vsel %vm1141_vm13, %v1541_v61, %v1143_v1 }
 0x318   : > { %v1146_v44 = vsel %vm1142_vm14, %v1544_v2, %v1144_v0 }
 0x319   : > { %v1363_v4 = vpack.c.bf16 %v1146_v44, %v1145_v3 }
 0x31b   : > { %1364 = vst [vmem:[%s360_s12] sm:$0xff] %v1363_v4  }
 0x31c PF: > { %s21_s24 = sadd.s32 1, %s1872_s24  }
 0x31d   : > { %p18_p9 = scmp.ge.s32.totalorder %s21_s24, 4  }
 0x31f   :  { %20 = sbr.rel (!%p18_p9) target bundleno = 4 (0x4), region = 106 }
 0x326   :  { %1178 = vsyncpa [#allocation4], 1 }
 0x327   :  { %1180 = vsyncpa [#allocation4 + $0x1], 1 }
 0x328   :  { %1181 = vsyncpa [#allocation6], 1 }
 0x329   :  { %1182 = vsyncpa [#allocation9], 1 }
 0x32a   :  { %1183 = vsyncpa [#allocation12], 1 }

// kernel: resnet1d_forward.9
= control target key start
LH: loop header
LB: loop body
LE: loop exit
PB: predicated region body
PF: predicated region fallthrough
CT: control target
= control target key end

     0   :  { %12 = vsyncpa [#allocation4], 0  ;;  %s3176_s0 = inlined_call_operand.vmem [shape: bf16[2,9,256], index: 0, kind: input, shape index: {}]   ;;  %s3177_s1 = inlined_call_operand.hbm [shape: bf16[2,256,256], index: 1, kind: input, shape index: {}]   ;;  %s3178_s2 = inlined_call_operand.hbm [shape: f32[1,256], index: 2, kind: input, shape index: {}]   ;;  %s3179_s3 = inlined_call_operand.hbm [shape: bf16[3,256,256], index: 3, kind: input, shape index: {}]   ;;  %s3180_s4 = inlined_call_operand.hbm [shape: f32[1,256], index: 4, kind: input, shape index: {}]   ;;  %s3181_s5 = inlined_call_operand.hbm [shape: bf16[256,256], index: 5, kind: input, shape index: {}]   ;;  %s3182_s6 = inlined_call_operand.hbm [shape: f32[1,256], index: 6, kind: input, shape index: {}]   ;;  %s3183_s7 = inlined_call_operand.vmem [shape: bf16[2,8,256], index: 7, kind: output, shape index: {}]  }
   0x1   :  { %13 = vsyncpa [#allocation6], 0 }
   0x2   :  { %14 = vsyncpa [#allocation9], 0 }
   0x3   :  { %15 = vsyncpa [#allocation12], 0  ;;  %s2908_s24 = smov 0  }
   0x4 LB: > { %s2859_s25 = smov [#allocation5]   ;;  %s2914_s27 = sadd.s32 4294967295, %s2857_s24   ;;  %s2857_s24 = sphi %s2908_s24, %s21_s24  }
   0x5   : > { %s230_s26 = sshll.u32 %s2859_s25, 4  ;;  %p2058_p0 = scmp.ge.s32.totalorder %s2857_s24, 1  ;;  %s2919_s26 = int_to_ptr.vmem [resolvable:$true] %s230_s26 }
   0x6   : > { %p204_p1 = scmp.lt.s32.totalorder %s2857_s24, 3  ;;  %p3184_p2 = scmp.eq.s32.totalorder %s2914_s27, 0 }
   0x7   : > { %s2860_s29 = smov [#allocation8]   ;;  %s2861_s8 = smov [#allocation3]  }
   0x8   : > { %p2921_p3 = pnand %p2058_p0, %p204_p1  ;;  %s254_s30 = sshll.u32 %s2860_s29, 4  ;;  %s2927_s30 = int_to_ptr.vmem [resolvable:$true] %s254_s30 }
   0x9   : > { %s216_s9 = sshll.u32 %s2861_s8, 4  ;;  %s2862_s11 = smov [#allocation7]   ;;  %s2935_s9 = int_to_ptr.vmem [resolvable:$true] %s216_s9 }
   0xa   : > { %s3186_s28 = scalar_select %p2921_p3, 1, 0 }
   0xb   : > { %p2325_p4 = pneg %p2921_p3  ;;  %s2937_s12 = sshll.u32 %s2862_s11, 4  ;;  %s241_s12 = int_to_ptr.vmem [resolvable:$true] %s2937_s12 }
   0xc   : > { %s2667_s15 = scalar_lea.hbm %s3178_s2, 32 }
   0xd   : > { %p2931_p5 = pnand %p3184_p2, %p2325_p4  ;;  %p2668_p6 = scmp.ne.s32.totalorder %s3178_s2, %s2667_s15 }
   0xe   : > { %p2674_p10 = scmp.lt.u32.totalorder %s2667_s15, %s3178_s2 }
   0xf   : > { %p2947_p7 = pneg %p2931_p5 }
  0x11   : > { %p2670_p8 = pnand %p2947_p7, %p2668_p6 }
  0x13   : > { %p2671_p9 = pneg %p2670_p8 }
  0x15   : > { %p2676_p11 = pnand %p2674_p10, %p2671_p9 }
  0x17   : > { %2679 = shalt.err (!%p2676_p11)
}
  0x18   : > { %s2680_s21 = scalar_lea.vmem %s2919_s26, 32  ;;  %p2688_p1 = scmp.lt.s32.totalorder %s2919_s26, %s2919_s26 }
  0x19   : > { %p2681_p12 = scmp.ne.s32.totalorder %s2919_s26, %s2680_s21  ;;  %p2689_p4 = scmp.lt.s32.totalorder %s2680_s21, %s2680_s21 }
  0x1b   : > { %p2683_p13 = pnand %p2681_p12, %p2947_p7  ;;  %p2690_p6 = por %p2689_p4, %p2688_p1 }
  0x1d   : > { %p2684_p0 = pneg %p2683_p13 }
  0x1f   : > { %p2691_p8 = pnand %p2690_p6, %p2684_p0 }
  0x21   : > { %2694 = shalt.err (!%p2691_p8)
}
  0x22   : > { %2331 = dma.hbm_to_vmem [thread:$0]  (!%p2931_p5), %s3178_s2, 32, %s2919_s26, [#allocation6]  }
  0x23   : > { %s2695_s8 = scalar_lea.hbm %s3180_s4, 32 }
  0x24   : > { %p2696_p9 = scmp.ne.s32.totalorder %s3180_s4, %s2695_s8  ;;  %p2702_p12 = scmp.lt.u32.totalorder %s2695_s8, %s3180_s4 }
  0x26   : > { %p2698_p10 = pnand %p2696_p9, %p2947_p7 }
  0x28   : > { %p2699_p11 = pneg %p2698_p10 }
  0x2a   : > { %p2704_p13 = pnand %p2702_p12, %p2699_p11 }
  0x2c   : > { %2707 = shalt.err (!%p2704_p13)
}
  0x2d   : > { %s2708_s26 = scalar_lea.vmem %s2927_s30, 32  ;;  %p2716_p6 = scmp.lt.s32.totalorder %s2927_s30, %s2927_s30 }
  0x2e   : > { %p2709_p0 = scmp.ne.s32.totalorder %s2927_s30, %s2708_s26  ;;  %p2717_p8 = scmp.lt.s32.totalorder %s2708_s26, %s2708_s26 }
  0x30   : > { %p2711_p1 = pnand %p2709_p0, %p2947_p7  ;;  %p2718_p9 = por %p2717_p8, %p2716_p6 }
  0x32   : > { %p2712_p4 = pneg %p2711_p1 }
  0x34   : > { %p2719_p10 = pnand %p2718_p9, %p2712_p4 }
  0x36   : > { %2722 = shalt.err (!%p2719_p10)
}
  0x37   : > { %2337 = dma.hbm_to_vmem [thread:$0]  (!%p2931_p5), %s3180_s4, 32, %s2927_s30, [#allocation9]  }
  0x38   : > { %s2723_s21 = scalar_lea.hbm %s3177_s1, 8192 }
  0x39   : > { %p2724_p11 = scmp.ne.s32.totalorder %s3177_s1, %s2723_s21  ;;  %p2730_p0 = scmp.lt.u32.totalorder %s2723_s21, %s3177_s1 }
  0x3b   : > { %p2726_p12 = pnand %p2724_p11, %p2947_p7 }
  0x3d   : > { %p2727_p13 = pneg %p2726_p12 }
  0x3f   : > { %p2732_p1 = pnand %p2730_p0, %p2727_p13 }
  0x41   : > { %2735 = shalt.err (!%p2732_p1)
}
  0x42   : > { %s2736_s30 = scalar_lea.vmem %s2935_s9, 8192  ;;  %p2744_p9 = scmp.lt.s32.totalorder %s2935_s9, %s2935_s9 }
  0x43   : > { %p2737_p4 = scmp.ne.s32.totalorder %s2935_s9, %s2736_s30  ;;  %p2745_p10 = scmp.lt.s32.totalorder %s2736_s30, %s2736_s30 }
  0x45   : > { %p2739_p6 = pnand %p2737_p4, %p2947_p7  ;;  %p2746_p11 = por %p2745_p10, %p2744_p9 }
  0x47   : > { %p2740_p8 = pneg %p2739_p6 }
  0x49   : > { %p2747_p12 = pnand %p2746_p11, %p2740_p8 }
  0x4b   : > { %2750 = shalt.err (!%p2747_p12)
}
  0x4c   : > { %s2863_s8 = smov 128   ;;  %s2864_s11 = smov 8  }
  0x4d   : > { %2328 = dma.hbm_to_vmem [thread:$0]  (!%p2931_p5), %s3177_s1, 8192, %s2935_s9, [#allocation4], %s2863_s8, %s2863_s8, %s2864_s11  }
  0x4e   : > { %s2751_s16 = scalar_lea.hbm %s3179_s3, 12288 }
  0x4f   : > { %p2752_p13 = scmp.ne.s32.totalorder %s3179_s3, %s2751_s16  ;;  %p2758_p4 = scmp.lt.u32.totalorder %s2751_s16, %s3179_s3 }
  0x51   : > { %p2754_p0 = pnand %p2752_p13, %p2947_p7 }
  0x53   : > { %p2755_p1 = pneg %p2754_p0 }
  0x55   : > { %p2760_p6 = pnand %p2758_p4, %p2755_p1 }
  0x57   : > { %2763 = shalt.err (!%p2760_p6)
}
  0x58   : > { %s2764_s22 = scalar_lea.vmem %s241_s12, 12288  ;;  %p2772_p11 = scmp.lt.s32.totalorder %s241_s12, %s241_s12 }
  0x59   : > { %p2765_p8 = scmp.ne.s32.totalorder %s241_s12, %s2764_s22  ;;  %p2773_p12 = scmp.lt.s32.totalorder %s2764_s22, %s2764_s22 }
  0x5b   : > { %p2767_p9 = pnand %p2765_p8, %p2947_p7  ;;  %p2774_p2 = por %p2773_p12, %p2772_p11 }
  0x5d   : > { %p2768_p10 = pneg %p2767_p9 }
  0x5f   : > { %p2775_p3 = pnand %p2774_p2, %p2768_p10 }
  0x61   : > { %2778 = shalt.err (!%p2775_p3)
}
  0x62   : > { %2334 = dma.hbm_to_vmem [thread:$0]  (!%p2931_p5), %s3179_s3, 12288, %s241_s12, [#allocation6], %s2863_s8, %s2863_s8, %s2864_s11  }
  0x63   : > { %s2865_s25 = smov [#allocation10]   ;;  %s2866_s30 = smov [#allocation11]  }
  0x64   : > { %s264_s29 = sshll.u32 %s2865_s25, 4  ;;  %s278_s13 = sshll.u32 %s2866_s30, 4  ;;  %s265_s29 = int_to_ptr.vmem [resolvable:$true] %s264_s29  ;;  %s279_s13 = int_to_ptr.vmem [resolvable:$true] %s278_s13 }
  0x65   : > { %s2779_s26 = scalar_lea.hbm %s3181_s5, 4096 }
  0x66   : > { %p2780_p2 = scmp.ne.s32.totalorder %s3181_s5, %s2779_s26  ;;  %p2786_p0 = scmp.lt.u32.totalorder %s2779_s26, %s3181_s5 }
  0x68   : > { %p2782_p3 = pnand %p2780_p2, %p2947_p7 }
  0x6a   : > { %p2783_p13 = pneg %p2782_p3 }
  0x6c   : > { %p2788_p1 = pnand %p2786_p0, %p2783_p13 }
  0x6e   : > { %2791 = shalt.err (!%p2788_p1)
}
  0x6f   : > { %s2792_s12 = scalar_lea.vmem %s265_s29, 4096  ;;  %p2800_p9 = scmp.lt.s32.totalorder %s265_s29, %s265_s29 }
  0x70   : > { %p2793_p4 = scmp.ne.s32.totalorder %s265_s29, %s2792_s12  ;;  %p2801_p10 = scmp.lt.s32.totalorder %s2792_s12, %s2792_s12 }
  0x72   : > { %p2795_p6 = pnand %p2793_p4, %p2947_p7  ;;  %p2802_p11 = por %p2801_p10, %p2800_p9 }
  0x74   : > { %p2796_p8 = pneg %p2795_p6 }
  0x76   : > { %p2803_p12 = pnand %p2802_p11, %p2796_p8 }
  0x78   : > { %2806 = shalt.err (!%p2803_p12)
}
  0x79   : > { %2340 = dma.hbm_to_vmem [thread:$0]  (!%p2931_p5), %s3181_s5, 4096, %s265_s29, [#allocation9], %s2863_s8, %s2863_s8, %s2864_s11  }
  0x7a   : > { %s2807_s25 = scalar_lea.hbm %s3182_s6, 32 }
  0x7b   : > { %p2808_p2 = scmp.ne.s32.totalorder %s3182_s6, %s2807_s25  ;;  %p2814_p0 = scmp.lt.u32.totalorder %s2807_s25, %s3182_s6 }
  0x7d   : > { %p2810_p3 = pnand %p2808_p2, %p2947_p7 }
  0x7f   : > { %p2811_p13 = pneg %p2810_p3 }
  0x81   : > { %p2816_p1 = pnand %p2814_p0, %p2811_p13 }
  0x83   : > { %2819 = shalt.err (!%p2816_p1)
}
  0x84   : > { %s2820_s16 = scalar_lea.vmem %s279_s13, 32  ;;  %p2828_p9 = scmp.lt.s32.totalorder %s279_s13, %s279_s13 }
  0x85   : > { %p2821_p4 = scmp.ne.s32.totalorder %s279_s13, %s2820_s16  ;;  %p2829_p10 = scmp.lt.s32.totalorder %s2820_s16, %s2820_s16 }
  0x87   : > { %p2823_p6 = pnand %p2821_p4, %p2947_p7  ;;  %p2830_p11 = por %p2829_p10, %p2828_p9 }
  0x89   : > { %p2824_p8 = pneg %p2823_p6 }
  0x8b   : > { %p2831_p12 = pnand %p2830_p11, %p2824_p8 }
  0x8d   : > { %2834 = shalt.err (!%p2831_p12)
}
  0x8e   : > { %2343 = dma.hbm_to_vmem [thread:$0]  (!%p2931_p5), %s3182_s6, 32, %s279_s13, [#allocation12]  }
  0x8f   : > { %p3189_p2 = scmp.ne.s32.totalorder %s3186_s28, 0 }
  0x90   : > { %p3190_p3 = scmp.eq.s32.totalorder (!%p3189_p2), %s2914_s27, 0 }
  0x91   : > { %299 = sbr.rel (%p3189_p2) target bundleno = 953 (0x3b9), region = 48 }
  0x98   : > { %2840 = dma.done.wait (%p3190_p3), [#allocation4], 8192   ;;  %p3191_p7 = pmov %p3190_p3 }
  0x99   : > { %p3192_p13 = pmov %p3190_p3 }
  0x9a   : > { %2842 = vsyncadd (%p3191_p7), [#allocation4], 4294959104 }
  0x9b   : > { %2844 = dma.done.wait (%p3192_p13), [#allocation6], 12320   ;;  %p3193_p0 = pmov %p3190_p3 }
  0x9d   : > { %2846 = vsyncadd (%p3193_p0), [#allocation6], 4294954976  ;;  %p3194_p1 = pmov %p3193_p0 }
  0x9e   : > { %p3195_p5 = pmov %p3193_p0 }
  0x9f   : > { %2848 = dma.done.wait (%p3194_p1), [#allocation9], 4128  }
  0xa0   : > { %2850 = vsyncadd (%p3195_p5), [#allocation9], 4294963168  ;;  %p3196_p4 = pmov %p3193_p0 }
  0xa1   : > { %p3197_p6 = pmov %p3193_p0 }
  0xa2   : > { %2852 = dma.done.wait (%p3196_p4), [#allocation12], 32  }
  0xa3   : > { %2854 = vsyncadd (%p3197_p6), [#allocation12], 4294967264  ;;  %v2373_v0 = vld [vmem:[#allocation10 + $0x4] ss:$8 sps:$4 sm:$0xff]   ;;  %v2375_v1 = vld [vmem:[#allocation10] ss:$8 sps:$4 sm:$0xff]  }
  0xa4   : > { %574 = vmatprep.subr.bf16.mxu1 %v2373_v0  ;;  %v2376_v2 = vld [vmem:[#allocation10 + $0x14] ss:$8 sps:$4 sm:$0xff]   ;;  %v2378_v3 = vld [vmem:[#allocation10 + $0x10] ss:$8 sps:$4 sm:$0xff]   ;;  %v2379_v4 = vld [vmem:[#allocation10 + $0x24] ss:$8 sps:$4 sm:$0xff]  }
  0xa5   : > { %575 = vmatpush1.bf16.msra.mxu1 %v2375_v1  ;;  %v2381_v5 = vld [vmem:[#allocation10 + $0x20] ss:$8 sps:$4 sm:$0xff]   ;;  %p351_p8 = scmp.lt.s32.totalorder %s2914_s27, 1  ;;  %v2382_v6 = vld [vmem:[#allocation10 + $0x34] ss:$8 sps:$4 sm:$0xff]   ;;  %vm1147_vm1 = vcmask 1043456  }
  0xa6   : > { %576 = vmatprep.subr.bf16.mxu1 %v2376_v2  ;;  %v2384_v7 = vld [vmem:[#allocation10 + $0x30] ss:$8 sps:$4 sm:$0xff]   ;;  %v2385_v8 = vld [vmem:[#allocation10 + $0x44] ss:$8 sps:$4 sm:$0xff]   ;;  %v2387_v9 = vld [vmem:[#allocation10 + $0x40] ss:$8 sps:$4 sm:$0xff]  }
  0xa7   : > { %s3201_s27 = smov (!%p351_p8, %s2914_s27), 1  ;;  %v2388_v10 = vld [vmem:[#allocation10 + $0x54] ss:$8 sps:$4 sm:$0xff]   ;;  %v2390_v11 = vld [vmem:[#allocation10 + $0x50] ss:$8 sps:$4 sm:$0xff]   ;;  %vm1150_vm4 = vcmask 1047556  }
  0xa8   : > { %s2283_s28 = sshll.u32 %s3201_s27, 4  ;;  %v2391_v12 = vld [vmem:[#allocation10 + $0x64] ss:$8 sps:$4 sm:$0xff]   ;;  %v2393_v15 = vld [vmem:[#allocation10 + $0x60] ss:$8 sps:$4 sm:$0xff]   ;;  %vm1157_vm6 = vcmask 1040384  }
  0xa9   : > { %577 = vmatpush1.bf16.msra.mxu1 %v2378_v3  ;;  %s3104_s29 = scalar_lea.vmem %s3176_s0, %s2283_s28  ;;  %v2394_v16 = vld [vmem:[#allocation10 + $0x74] ss:$8 sps:$4 sm:$0xff]   ;;  %v2396_v17 = vld [vmem:[#allocation10 + $0x70] ss:$8 sps:$4 sm:$0xff]   ;;  %v2397_v18 = vld [vmem:[#allocation10 + $0x84] ss:$8 sps:$4 sm:$0xff]  }
  0xaa   : > { %578 = vmatprep.subr.bf16.mxu1 %v2379_v4  ;;  %v3107_v13 = vld [vmem:[%s3104_s29] sm:$0xff]  ;;  %v2399_v19 = vld [vmem:[#allocation10 + $0x80] ss:$8 sps:$4 sm:$0xff]   ;;  %v2400_v20 = vld [vmem:[#allocation10 + $0x94] ss:$8 sps:$4 sm:$0xff]   ;;  %vm1160_vm9 = vcmask 1044484  }
  0xab   : > { %v3111_v14 = vcombine.high %v3107_v13, %v3107_v13  ;;  %v2402_v21 = vld [vmem:[#allocation10 + $0x90] ss:$8 sps:$4 sm:$0xff]   ;;  %v2403_v22 = vld [vmem:[#allocation10 + $0xa4] ss:$8 sps:$4 sm:$0xff]   ;;  %v2405_v23 = vld [vmem:[#allocation10 + $0xa0] ss:$8 sps:$4 sm:$0xff]   ;;  %v3121_v40 = vcombine.low %v3107_v13, %v3107_v13 }
  0xac   : > { %v2406_v24 = vld [vmem:[#allocation10 + $0xb4] ss:$8 sps:$4 sm:$0xff]   ;;  %v2408_v25 = vld [vmem:[#allocation10 + $0xb0] ss:$8 sps:$4 sm:$0xff]   ;;  %v2409_v26 = vld [vmem:[#allocation10 + $0xc4] ss:$8 sps:$4 sm:$0xff]  }
  0xad   : > { %579 = vmatpush1.bf16.msra.mxu1 %v2381_v5  ;;  %606 = vmatprep.mubr.bf16.mxu1 %v3111_v14  ;;  %v2411_v27 = vld [vmem:[#allocation10 + $0xc0] ss:$8 sps:$4 sm:$0xff]   ;;  %v2412_v28 = vld [vmem:[#allocation10 + $0xd4] ss:$8 sps:$4 sm:$0xff]   ;;  %v2414_v30 = vld [vmem:[#allocation10 + $0xd0] ss:$8 sps:$4 sm:$0xff]  }
  0xae   : > { %580 = vmatprep.subr.bf16.mxu1 %v2382_v6  ;;  %v3115_v29 = vld [vmem:[%s3104_s29 + $0x8] sm:$0x11]  ;;  %v2415_v32 = vld [vmem:[#allocation10 + $0xe4] ss:$8 sps:$4 sm:$0xff]   ;;  %v2417_v33 = vld [vmem:[#allocation10 + $0xe0] ss:$8 sps:$4 sm:$0xff]  }
  0xaf   : > { %v2112_v31 = vcombine.high %v3107_v13, %v3115_v29  ;;  %v2418_v35 = vld [vmem:[#allocation10 + $0xf4] ss:$8 sps:$4 sm:$0xff]   ;;  %v2420_v36 = vld [vmem:[#allocation10 + $0xf0] ss:$8 sps:$4 sm:$0xff]   ;;  %v2426_v39 = vld [vmem:[#allocation3 + $0x104] ss:$8 sps:$4 sm:$0xff]   ;;  %v2111_v4 = vcombine.low %v3107_v13, %v3115_v29 }
  0xb0   : > { %v2424_v41 = vld [vmem:[#allocation3 + $0x100] ss:$8 sps:$4 sm:$0xff]   ;;  %v2429_v43 = vld [vmem:[#allocation3 + $0x114] ss:$8 sps:$4 sm:$0xff]   ;;  %v2427_v44 = vld [vmem:[#allocation3 + $0x110] ss:$8 sps:$4 sm:$0xff]  }
  0xb1   : > { %581 = vmatpush1.bf16.msra.mxu1 %v2384_v7  ;;  %v700_v34 = vshll.u32 %v2112_v31, 16  ;;  %v698_v37 = vshrl.u32 %v2112_v31, 16  ;;  %v2432_v45 = vld [vmem:[#allocation3 + $0x124] ss:$8 sps:$4 sm:$0xff]   ;;  %v2430_v46 = vld [vmem:[#allocation3 + $0x120] ss:$8 sps:$4 sm:$0xff]  }
  0xb2   : > { %582 = vmatprep.subr.bf16.mxu1 %v2385_v8  ;;  %v2435_v47 = vld [vmem:[#allocation3 + $0x134] ss:$8 sps:$4 sm:$0xff]   ;;  %v2433_v48 = vld [vmem:[#allocation3 + $0x130] ss:$8 sps:$4 sm:$0xff]   ;;  %v2438_v49 = vld [vmem:[#allocation3 + $0x144] ss:$8 sps:$4 sm:$0xff]  }
  0xb3   : > { %v702_v38 = vrot.slane %v700_v34, 1  ;;  %v2436_v50 = vld [vmem:[#allocation3 + $0x140] ss:$8 sps:$4 sm:$0xff]   ;;  %v2441_v51 = vld [vmem:[#allocation3 + $0x154] ss:$8 sps:$4 sm:$0xff]   ;;  %v693_v7 = vshll.u32 %v2111_v4, 16 }
  0xb4   : > { %v2439_v52 = vld [vmem:[#allocation3 + $0x150] ss:$8 sps:$4 sm:$0xff]   ;;  %v2444_v53 = vld [vmem:[#allocation3 + $0x164] ss:$8 sps:$4 sm:$0xff]   ;;  %v2442_v54 = vld [vmem:[#allocation3 + $0x160] ss:$8 sps:$4 sm:$0xff]  }
  0xb5   : > { %583 = vmatpush1.bf16.msra.mxu1 %v2387_v9  ;;  %v703_v42 = vor.u32 %v702_v38, %v698_v37  ;;  %v2447_v55 = vld [vmem:[#allocation3 + $0x174] ss:$8 sps:$4 sm:$0xff]   ;;  %v2445_v56 = vld [vmem:[#allocation3 + $0x170] ss:$8 sps:$4 sm:$0xff]   ;;  %v2450_v57 = vld [vmem:[#allocation3 + $0x184] ss:$8 sps:$4 sm:$0xff]  }
  0xb6   : > { %584 = vmatprep.subr.bf16.mxu1 %v2388_v10  ;;  %v2448_v58 = vld [vmem:[#allocation3 + $0x180] ss:$8 sps:$4 sm:$0xff]   ;;  %v2453_v59 = vld [vmem:[#allocation3 + $0x194] ss:$8 sps:$4 sm:$0xff]   ;;  %v2451_v60 = vld [vmem:[#allocation3 + $0x190] ss:$8 sps:$4 sm:$0xff]  }
  0xb7   : > { %v2456_v61 = vld [vmem:[#allocation3 + $0x1a4] ss:$8 sps:$4 sm:$0xff]   ;;  %v2454_v62 = vld [vmem:[#allocation3 + $0x1a0] ss:$8 sps:$4 sm:$0xff]   ;;  %v2459_v63 = vld [vmem:[#allocation3 + $0x1b4] ss:$8 sps:$4 sm:$0xff]  }
  0xb8   : > { %v2457_v0 = vld [vmem:[#allocation3 + $0x1b0] ss:$8 sps:$4 sm:$0xff]   ;;  %v2462_v1 = vld [vmem:[#allocation3 + $0x1c4] ss:$8 sps:$4 sm:$0xff]   ;;  %v2460_v2 = vld [vmem:[#allocation3 + $0x1c0] ss:$8 sps:$4 sm:$0xff]  }
  0xb9   : > { %585 = vmatpush1.bf16.msra.mxu1 %v2390_v11  ;;  %v2465_v3 = vld [vmem:[#allocation3 + $0x1d4] ss:$8 sps:$4 sm:$0xff]   ;;  %v2463_v5 = vld [vmem:[#allocation3 + $0x1d0] ss:$8 sps:$4 sm:$0xff]   ;;  %v2468_v6 = vld [vmem:[#allocation3 + $0x1e4] ss:$8 sps:$4 sm:$0xff]  }
  0xba   : > { %586 = vmatprep.subr.bf16.mxu1 %v2391_v12  ;;  %v2466_v8 = vld [vmem:[#allocation3 + $0x1e0] ss:$8 sps:$4 sm:$0xff]   ;;  %v2471_v9 = vld [vmem:[#allocation3 + $0x1f4] ss:$8 sps:$4 sm:$0xff]   ;;  %v691_v10 = vshrl.u32 %v2111_v4, 16  ;;  %v695_v11 = vrot.slane %v693_v7, 1 }
  0xbb   : > { %v2469_v12 = vld [vmem:[#allocation3 + $0x1f0] ss:$8 sps:$4 sm:$0xff]   ;;  %v2478_v13 = vld [vmem:[#allocation3 + $0x14] ss:$8 sps:$4 sm:$0xff]   ;;  %v2497_v31 = vld [vmem:[#allocation3 + $0x80] ss:$8 sps:$4 sm:$0xff]  }
  0xbc   : > { %v2494_v29 = vld [vmem:[#allocation3 + $0x70] ss:$8 sps:$4 sm:$0xff]   ;;  %v2505_v34 = vld [vmem:[#allocation3 + $0xa4] ss:$8 sps:$4 sm:$0xff]   ;;  %v2867_v7 = vmov 0   ;;  %s2284_s13 = sshll.u32 %s3201_s27, 3 }
  0xbd   : > { %587 = vmatpush1.bf16.msra.mxu1 %v2393_v15  ;;  %v2475_v15 = vld [vmem:[#allocation3 + $0x4] ss:$8 sps:$4 sm:$0xff]   ;;  %v2506_v37 = vld [vmem:[#allocation3 + $0xb0] ss:$8 sps:$4 sm:$0xff]   ;;  %1129 = vst [vmem:[#allocation2 + $0x8] sm:$0x11] %v2867_v7  ;;  %s360_s20 = scalar_lea.vmem %s3183_s7, %s2284_s13 }
  0xbe   : > { %588 = vmatprep.subr.bf16.mxu1 %v2394_v16  ;;  %v696_v16 = vor.u32 %v695_v11, %v691_v10  ;;  %v2511_v38 = vld [vmem:[#allocation3 + $0xc4] ss:$8 sps:$4 sm:$0xff]   ;;  %v2548_v4 = vld [vmem:[#allocation7 + $0x194] ss:$8 sps:$4 sm:$0xff]   ;;  %v2556_v10 = vld [vmem:[#allocation7 + $0x1b0] ss:$8 sps:$4 sm:$0xff]  }
  0xbf   : > { %v2557_v11 = vld [vmem:[#allocation7 + $0x1c4] ss:$8 sps:$4 sm:$0xff]   ;;  %vm1148_vm2 = vsmask.f32 7938  ;;  %vm1151_vm5 = vsmask.f32 7954 }
  0xc0   : > { %vm1158_vm7 = vsmask.f32 256  ;;  %vm3138_vm8 = vmand %vm1147_vm1, %vm1148_vm2  ;;  %vm1161_vm10 = vsmask.f32 4352  ;;  %v2575_v7 = vld [vmem:[#allocation7 + $0x20] ss:$8 sps:$4 sm:$0xff]  }
  0xc1   : > { %589 = vmatpush1.bf16.msra.mxu1 %v2396_v17  ;;  %v2473_v17 = vld [vmem:[#allocation3] ss:$8 sps:$4 sm:$0xff]   ;;  %vm1152_vm11 = vmand %vm1150_vm4, %vm1151_vm5 }
  0xc2   : > { %590 = vmatprep.subr.bf16.mxu1 %v2397_v18  ;;  %v2476_v18 = vld [vmem:[#allocation3 + $0x10] ss:$8 sps:$4 sm:$0xff]   ;;  %vm1159_vm12 = vmand %vm1157_vm6, %vm1158_vm7 }
  0xc3   : > { %vm1162_vm13 = vmand %vm1160_vm9, %vm1161_vm10 }
  0xc4   : > { %vm1153_vm14 = vmor %vm1152_vm11, %vm3138_vm8 }
  0xc5   : > { %591 = vmatpush1.bf16.msra.mxu1 %v2399_v19  ;;  %v2481_v19 = vld [vmem:[#allocation3 + $0x24] ss:$8 sps:$4 sm:$0xff]   ;;  %vm1163_vm15 = vmor %vm1162_vm13, %vm1159_vm12 }
  0xc6   : > { %592 = vmatprep.subr.bf16.mxu1 %v2400_v20  ;;  %v2479_v20 = vld [vmem:[#allocation3 + $0x20] ss:$8 sps:$4 sm:$0xff]  }
  0xc9   : > { %593 = vmatpush1.bf16.msra.mxu1 %v2402_v21  ;;  %v2484_v21 = vld [vmem:[#allocation3 + $0x34] ss:$8 sps:$4 sm:$0xff]  }
  0xca   : > { %594 = vmatprep.subr.bf16.mxu1 %v2403_v22  ;;  %v2482_v22 = vld [vmem:[#allocation3 + $0x30] ss:$8 sps:$4 sm:$0xff]  }
  0xcd   : > { %595 = vmatpush1.bf16.msra.mxu1 %v2405_v23  ;;  %v2487_v23 = vld [vmem:[#allocation3 + $0x44] ss:$8 sps:$4 sm:$0xff]  }
  0xce   : > { %596 = vmatprep.subr.bf16.mxu1 %v2406_v24  ;;  %v2485_v24 = vld [vmem:[#allocation3 + $0x40] ss:$8 sps:$4 sm:$0xff]  }
  0xd1   : > { %597 = vmatpush1.bf16.msra.mxu1 %v2408_v25  ;;  %v2490_v25 = vld [vmem:[#allocation3 + $0x54] ss:$8 sps:$4 sm:$0xff]  }
  0xd2   : > { %598 = vmatprep.subr.bf16.mxu1 %v2409_v26  ;;  %v2488_v26 = vld [vmem:[#allocation3 + $0x50] ss:$8 sps:$4 sm:$0xff]  }
  0xd5   : > { %599 = vmatpush1.bf16.msra.mxu1 %v2411_v27  ;;  %v2493_v27 = vld [vmem:[#allocation3 + $0x64] ss:$8 sps:$4 sm:$0xff]  }
  0xd6   : > { %600 = vmatprep.subr.bf16.mxu1 %v2412_v28  ;;  %v2496_v28 = vld [vmem:[#allocation3 + $0x74] ss:$8 sps:$4 sm:$0xff]  }
  0xd9   : > { %601 = vmatpush1.bf16.msra.mxu1 %v2414_v30  ;;  %v2499_v30 = vld [vmem:[#allocation3 + $0x84] ss:$8 sps:$4 sm:$0xff]  }
  0xda   : > { %602 = vmatprep.subr.bf16.mxu1 %v2415_v32  ;;  %v2502_v32 = vld [vmem:[#allocation3 + $0x94] ss:$8 sps:$4 sm:$0xff]  }
  0xdd   : > { %603 = vmatpush1.bf16.msra.mxu1 %v2417_v33  ;;  %v2500_v33 = vld [vmem:[#allocation3 + $0x90] ss:$8 sps:$4 sm:$0xff]  }
  0xde   : > { %604 = vmatprep.subr.bf16.mxu1 %v2418_v35  ;;  %v2503_v35 = vld [vmem:[#allocation3 + $0xa0] ss:$8 sps:$4 sm:$0xff]  }
  0xe1   : > { %605 = vmatpush1.bf16.msra.mxu1 %v2420_v36  ;;  %v2508_v36 = vld [vmem:[#allocation3 + $0xb4] ss:$8 sps:$4 sm:$0xff]  }
  0xe2   : > { %866 = vmatprep.subr.bf16.mxu1 %v2426_v39  ;;  %v2509_v39 = vld [vmem:[#allocation3 + $0xc0] ss:$8 sps:$4 sm:$0xff]  }
  0xe4   : > { %607 = vmatmul.mubr.bf16.vlgmr.msra.gmra.mrb[0].mxu1 %v3121_v40 }
  0xe5   : > { %867 = vmatpush1.bf16.msra.mxu1 %v2424_v41  ;;  %898 = vmatprep.mubr.bf16.mxu1 %v703_v42  ;;  %v2514_v41 = vld [vmem:[#allocation3 + $0xd4] ss:$8 sps:$4 sm:$0xff]   ;;  %v2512_v42 = vld [vmem:[#allocation3 + $0xd0] ss:$8 sps:$4 sm:$0xff]  }
  0xe6   : > { %868 = vmatprep.subr.bf16.mxu1 %v2429_v43  ;;  %v2517_v43 = vld [vmem:[#allocation3 + $0xe4] ss:$8 sps:$4 sm:$0xff]  }
  0xe9   : > { %869 = vmatpush1.bf16.msra.mxu1 %v2427_v44  ;;  %v2515_v44 = vld [vmem:[#allocation3 + $0xe0] ss:$8 sps:$4 sm:$0xff]  }
  0xea   : > { %870 = vmatprep.subr.bf16.mxu1 %v2432_v45  ;;  %v2520_v45 = vld [vmem:[#allocation3 + $0xf4] ss:$8 sps:$4 sm:$0xff]  }
  0xed   : > { %871 = vmatpush1.bf16.msra.mxu1 %v2430_v46  ;;  %v2518_v46 = vld [vmem:[#allocation3 + $0xf0] ss:$8 sps:$4 sm:$0xff]  }
  0xee   : > { %872 = vmatprep.subr.bf16.mxu1 %v2435_v47  ;;  %v2521_v47 = vld [vmem:[#allocation7 + $0x104] ss:$8 sps:$4 sm:$0xff]  }
  0xef   : > { %1418 = vmatprep.subr.bf16.mxu0 %v2521_v47 }
  0xf1   : > { %873 = vmatpush1.bf16.msra.mxu1 %v2433_v48  ;;  %v2523_v48 = vld [vmem:[#allocation7 + $0x100] ss:$8 sps:$4 sm:$0xff]  }
  0xf2   : > { %874 = vmatprep.subr.bf16.mxu1 %v2438_v49  ;;  %v2524_v49 = vld [vmem:[#allocation7 + $0x114] ss:$8 sps:$4 sm:$0xff]   ;;  %1419 = vmatpush1.bf16.msra.mxu0 %v2523_v48 }
  0xf3   : > { %1420 = vmatprep.subr.bf16.mxu0 %v2524_v49  ;;  %v1164_v49 = vld [vmem:[#allocation2 + $0x8] sm:$0x11] }
  0xf5   : > { %875 = vmatpush1.bf16.msra.mxu1 %v2436_v50  ;;  %v2526_v50 = vld [vmem:[#allocation7 + $0x110] ss:$8 sps:$4 sm:$0xff]  }
  0xf6   : > { %876 = vmatprep.subr.bf16.mxu1 %v2441_v51  ;;  %v2527_v51 = vld [vmem:[#allocation7 + $0x124] ss:$8 sps:$4 sm:$0xff]   ;;  %1421 = vmatpush1.bf16.msra.mxu0 %v2526_v50 }
  0xf7   : > { %1422 = vmatprep.subr.bf16.mxu0 %v2527_v51 }
  0xf9   : > { %877 = vmatpush1.bf16.msra.mxu1 %v2439_v52  ;;  %v2529_v52 = vld [vmem:[#allocation7 + $0x120] ss:$8 sps:$4 sm:$0xff]  }
  0xfa   : > { %878 = vmatprep.subr.bf16.mxu1 %v2444_v53  ;;  %v2530_v53 = vld [vmem:[#allocation7 + $0x134] ss:$8 sps:$4 sm:$0xff]   ;;  %1423 = vmatpush1.bf16.msra.mxu0 %v2529_v52 }
  0xfb   : > { %1424 = vmatprep.subr.bf16.mxu0 %v2530_v53 }
  0xfd   : > { %879 = vmatpush1.bf16.msra.mxu1 %v2442_v54  ;;  %v2532_v54 = vld [vmem:[#allocation7 + $0x130] ss:$8 sps:$4 sm:$0xff]  }
  0xfe   : > { %880 = vmatprep.subr.bf16.mxu1 %v2447_v55  ;;  %v2533_v55 = vld [vmem:[#allocation7 + $0x144] ss:$8 sps:$4 sm:$0xff]   ;;  %1425 = vmatpush1.bf16.msra.mxu0 %v2532_v54 }
  0xff   : > { %1426 = vmatprep.subr.bf16.mxu0 %v2533_v55 }
 0x101   : > { %881 = vmatpush1.bf16.msra.mxu1 %v2445_v56  ;;  %v2535_v56 = vld [vmem:[#allocation7 + $0x140] ss:$8 sps:$4 sm:$0xff]  }
 0x102   : > { %882 = vmatprep.subr.bf16.mxu1 %v2450_v57  ;;  %1427 = vmatpush1.bf16.msra.mxu0 %v2535_v56  ;;  %v2538_v57 = vld [vmem:[#allocation7 + $0x150] ss:$8 sps:$4 sm:$0xff]  }
 0x105   : > { %883 = vmatpush1.bf16.msra.mxu1 %v2448_v58  ;;  %v2539_v58 = vld [vmem:[#allocation7 + $0x164] ss:$8 sps:$4 sm:$0xff]  }
 0x106   : > { %884 = vmatprep.subr.bf16.mxu1 %v2453_v59  ;;  %v2541_v59 = vld [vmem:[#allocation7 + $0x160] ss:$8 sps:$4 sm:$0xff]  }
 0x109   : > { %885 = vmatpush1.bf16.msra.mxu1 %v2451_v60  ;;  %v2542_v60 = vld [vmem:[#allocation7 + $0x174] ss:$8 sps:$4 sm:$0xff]  }
 0x10a   : > { %886 = vmatprep.subr.bf16.mxu1 %v2456_v61  ;;  %v2544_v61 = vld [vmem:[#allocation7 + $0x170] ss:$8 sps:$4 sm:$0xff]  }
 0x10d   : > { %887 = vmatpush1.bf16.msra.mxu1 %v2454_v62 }
 0x10e   : > { %888 = vmatprep.subr.bf16.mxu1 %v2459_v63  ;;  %v2545_v63 = vld [vmem:[#allocation7 + $0x184] ss:$8 sps:$4 sm:$0xff]  }
 0x111   : > { %889 = vmatpush1.bf16.msra.mxu1 %v2457_v0 }
 0x112   : > { %890 = vmatprep.subr.bf16.mxu1 %v2462_v1  ;;  %v2547_v1 = vld [vmem:[#allocation7 + $0x180] ss:$8 sps:$4 sm:$0xff]  }
 0x115   : > { %891 = vmatpush1.bf16.msra.mxu1 %v2460_v2 }
 0x116   : > { %892 = vmatprep.subr.bf16.mxu1 %v2465_v3 }
 0x119   : > { %893 = vmatpush1.bf16.msra.mxu1 %v2463_v5  ;;  %v2550_v5 = vld [vmem:[#allocation7 + $0x190] ss:$8 sps:$4 sm:$0xff]  }
 0x11a   : > { %894 = vmatprep.subr.bf16.mxu1 %v2468_v6  ;;  %v2551_v6 = vld [vmem:[#allocation7 + $0x1a4] ss:$8 sps:$4 sm:$0xff]  }
 0x11d   : > { %895 = vmatpush1.bf16.msra.mxu1 %v2466_v8  ;;  %v2553_v8 = vld [vmem:[#allocation7 + $0x1a0] ss:$8 sps:$4 sm:$0xff]  }
 0x11e   : > { %896 = vmatprep.subr.bf16.mxu1 %v2471_v9  ;;  %v2554_v9 = vld [vmem:[#allocation7 + $0x1b4] ss:$8 sps:$4 sm:$0xff]  }
 0x121   : > { %897 = vmatpush1.bf16.msra.mxu1 %v2469_v12  ;;  %v2559_v12 = vld [vmem:[#allocation7 + $0x1c0] ss:$8 sps:$4 sm:$0xff]  }
 0x122   : > { %1067 = vmatprep.subr.bf16.mxu1 %v2475_v15  ;;  %v2560_v15 = vld [vmem:[#allocation7 + $0x1d4] ss:$8 sps:$4 sm:$0xff]  }
 0x124   : > { %899 = vmatmul.mubr.bf16.vlgmr.msra.gmra.mrb[4].mxu1 %v696_v16  ;;  %v2562_v16 = vld [vmem:[#allocation7 + $0x1d0] ss:$8 sps:$4 sm:$0xff]  }
 0x125   : > { %1068 = vmatpush1.bf16.msra.mxu1 %v2473_v17  ;;  %1099 = vmatprep.mubr.bf16.mxu1 %v3111_v14  ;;  %v2491_v14 = vld [vmem:[#allocation3 + $0x60] ss:$8 sps:$4 sm:$0xff]  }
 0x126   : > { %1069 = vmatprep.subr.bf16.mxu1 %v2478_v13  ;;  %v2563_v17 = vld [vmem:[#allocation7 + $0x1e4] ss:$8 sps:$4 sm:$0xff]   ;;  %v2565_v13 = vld [vmem:[#allocation7 + $0x1e0] ss:$8 sps:$4 sm:$0xff]  }
 0x129   : > { %1070 = vmatpush1.bf16.msra.mxu1 %v2476_v18  ;;  %v2566_v18 = vld [vmem:[#allocation7 + $0x1f4] ss:$8 sps:$4 sm:$0xff]  }
 0x12a   : > { %1071 = vmatprep.subr.bf16.mxu1 %v2481_v19  ;;  %v2568_v19 = vld [vmem:[#allocation7 + $0x1f0] ss:$8 sps:$4 sm:$0xff]  }
 0x12d   : > { %1072 = vmatpush1.bf16.msra.mxu1 %v2479_v20  ;;  %v2571_v20 = vld [vmem:[#allocation7 + $0x4] ss:$8 sps:$4 sm:$0xff]  }
 0x12e   : > { %1073 = vmatprep.subr.bf16.mxu1 %v2484_v21 }
 0x131   : > { %1074 = vmatpush1.bf16.msra.mxu1 %v2482_v22 }
 0x132   : > { %1075 = vmatprep.subr.bf16.mxu1 %v2487_v23 }
 0x135   : > { %1076 = vmatpush1.bf16.msra.mxu1 %v2485_v24 }
 0x136   : > { %1077 = vmatprep.subr.bf16.mxu1 %v2490_v25  ;;  %v397_v25 = vlaneseq }
 0x139   : > { %1078 = vmatpush1.bf16.msra.mxu1 %v2488_v26  ;;  %v398_v26 = vshrl.u32 %v397_v25, 7  ;;  %v2604_v25 = vld [vmem:[#allocation7 + $0xb4] ss:$8 sps:$4 sm:$0xff]  }
 0x13a   : > { %1079 = vmatprep.subr.bf16.mxu1 %v2493_v27  ;;  %v1108_v27 = vld [vmem:[#allocation5] sm:$0x3] }
 0x13d   : > { %1080 = vmatpush1.bf16.msra.mxu1 %v2491_v14  ;;  %v3132_v14 = vsub.s32 0, %v398_v26 }
 0x13e   : > { %1081 = vmatprep.subr.bf16.mxu1 %v2496_v28  ;;  %v3134_v28 = vsub.s32 1, %v398_v26  ;;  %v2602_v26 = vld [vmem:[#allocation7 + $0xb0] ss:$8 sps:$4 sm:$0xff]  }
 0x141   : > { %1082 = vmatpush1.bf16.msra.mxu1 %v2494_v29  ;;  %v1113_v29 = vrot.slane %v1108_v27, %v3132_v14 }
 0x142   : > { %1083 = vmatprep.subr.bf16.mxu1 %v2499_v30 }
 0x145   : > { %1084 = vmatpush1.bf16.msra.mxu1 %v2497_v31  ;;  %v1117_v31 = vrot.slane %v1108_v27, %v3134_v28  ;;  %v2607_v27 = vld [vmem:[#allocation7 + $0xc4] ss:$8 sps:$4 sm:$0xff]  }
 0x146   : > { %1085 = vmatprep.subr.bf16.mxu1 %v2502_v32 }
 0x149   : > { %1086 = vmatpush1.bf16.msra.mxu1 %v2500_v33 }
 0x14a   : > { %1087 = vmatprep.subr.bf16.mxu1 %v2505_v34 }
 0x14d   : > { %1088 = vmatpush1.bf16.msra.mxu1 %v2503_v35 }
 0x14e   : > { %1089 = vmatprep.subr.bf16.mxu1 %v2508_v36 }
 0x151   : > { %1090 = vmatpush1.bf16.msra.mxu1 %v2506_v37 }
 0x152   : > { %1091 = vmatprep.subr.bf16.mxu1 %v2511_v38 }
 0x155   : > { %1092 = vmatpush1.bf16.msra.mxu1 %v2509_v39 }
 0x156   : > { %1093 = vmatprep.subr.bf16.mxu1 %v2514_v41 }
 0x159   : > { %1094 = vmatpush1.bf16.msra.mxu1 %v2512_v42 }
 0x15a   : > { %1095 = vmatprep.subr.bf16.mxu1 %v2517_v43 }
 0x15d   : > { %1096 = vmatpush1.bf16.msra.mxu1 %v2515_v44  ;;  %v2622_v44 = vld [vmem:[#allocation7 + $0x210] ss:$8 sps:$4 sm:$0xff]  }
 0x15e   : > { %1097 = vmatprep.subr.bf16.mxu1 %v2520_v45 }
 0x161   : > { %1098 = vmatpush1.bf16.msra.mxu1 %v2518_v46 }
 0x164   : > { %1100 = vmatmul.mubr.bf16.vlgmr.msra.gmra.mrb[8].mxu1 %v3121_v40  ;;  %v2536_v40 = vld [vmem:[#allocation7 + $0x154] ss:$8 sps:$4 sm:$0xff]  }
 0x165   : > { %1428 = vmatprep.subr.bf16.mxu0 %v2536_v40 }
 0x166   : > { %1429 = vmatpush1.bf16.msra.mxu0 %v2538_v57 }
 0x167   : > { %1430 = vmatprep.subr.bf16.mxu0 %v2539_v58 }
 0x16a   : > { %1431 = vmatpush1.bf16.msra.mxu0 %v2541_v59 }
 0x16b   : > { %1432 = vmatprep.subr.bf16.mxu0 %v2542_v60 }
 0x16e   : > { %1433 = vmatpush1.bf16.msra.mxu0 %v2544_v61 }
 0x16f   : > { %1434 = vmatprep.subr.bf16.mxu0 %v2545_v63 }
 0x172   : > { %1435 = vmatpush1.bf16.msra.mxu0 %v2547_v1  ;;  %v2569_v1 = vld [vmem:[#allocation7] ss:$8 sps:$4 sm:$0xff]  }
 0x173   : > { %1436 = vmatprep.subr.bf16.mxu0 %v2548_v4 }
 0x176   : > { %1437 = vmatpush1.bf16.msra.mxu0 %v2550_v5  ;;  %v2572_v5 = vld [vmem:[#allocation7 + $0x10] ss:$8 sps:$4 sm:$0xff]  }
 0x177   : > { %1438 = vmatprep.subr.bf16.mxu0 %v2551_v6  ;;  %v2577_v6 = vld [vmem:[#allocation7 + $0x24] ss:$8 sps:$4 sm:$0xff]  }
 0x17a   : > { %1439 = vmatpush1.bf16.msra.mxu0 %v2553_v8  ;;  %v2580_v8 = vld [vmem:[#allocation7 + $0x34] ss:$8 sps:$4 sm:$0xff]  }
 0x17b   : > { %1440 = vmatprep.subr.bf16.mxu0 %v2554_v9  ;;  %v2578_v9 = vld [vmem:[#allocation7 + $0x30] ss:$8 sps:$4 sm:$0xff]  }
 0x17e   : > { %1441 = vmatpush1.bf16.msra.mxu0 %v2556_v10  ;;  %v2583_v10 = vld [vmem:[#allocation7 + $0x44] ss:$8 sps:$4 sm:$0xff]  }
 0x17f   : > { %1442 = vmatprep.subr.bf16.mxu0 %v2557_v11  ;;  %v2581_v11 = vld [vmem:[#allocation7 + $0x40] ss:$8 sps:$4 sm:$0xff]  }
 0x182   : > { %1443 = vmatpush1.bf16.msra.mxu0 %v2559_v12  ;;  %v2586_v12 = vld [vmem:[#allocation7 + $0x54] ss:$8 sps:$4 sm:$0xff]  }
 0x183   : > { %1444 = vmatprep.subr.bf16.mxu0 %v2560_v15  ;;  %v2584_v15 = vld [vmem:[#allocation7 + $0x50] ss:$8 sps:$4 sm:$0xff]  }
 0x186   : > { %1445 = vmatpush1.bf16.msra.mxu0 %v2562_v16  ;;  %v2589_v16 = vld [vmem:[#allocation7 + $0x64] ss:$8 sps:$4 sm:$0xff]  }
 0x187   : > { %1446 = vmatprep.subr.bf16.mxu0 %v2563_v17  ;;  %v2587_v17 = vld [vmem:[#allocation7 + $0x60] ss:$8 sps:$4 sm:$0xff]  }
 0x18a   : > { %1447 = vmatpush1.bf16.msra.mxu0 %v2565_v13  ;;  %v2592_v13 = vld [vmem:[#allocation7 + $0x74] ss:$8 sps:$4 sm:$0xff]  }
 0x18b   : > { %1448 = vmatprep.subr.bf16.mxu0 %v2566_v18  ;;  %v2590_v18 = vld [vmem:[#allocation7 + $0x70] ss:$8 sps:$4 sm:$0xff]  }
 0x18e   : > { %1449 = vmatpush1.bf16.msra.mxu0 %v2568_v19  ;;  %v2595_v19 = vld [vmem:[#allocation7 + $0x84] ss:$8 sps:$4 sm:$0xff]  }
 0x18f   : > { %1623 = vmatprep.subr.bf16.mxu0 %v2571_v20  ;;  %v2593_v20 = vld [vmem:[#allocation7 + $0x80] ss:$8 sps:$4 sm:$0xff]  }
 0x1b7   : > { %v3128_v62 = vpop.f32.mrb[0].mxu1 }
 0x1b8   : > { %v3130_v0 = vpop.f32.mrb[1].mxu1 }
 0x1b9   : > { %v612_v2 = vpop.f32.mrb[2].mxu1 }
 0x1ba   : > { %v613_v3 = vpop.f32.mrb[3].mxu1 }
 0x1bb   : > { %v2574_v3 = vld [vmem:[#allocation7 + $0x14] ss:$8 sps:$4 sm:$0xff]  }
 0x1f7   : > { %v900_v21 = vpop.f32.mrb[4].mxu1 }
 0x1f8   : > { %v902_v22 = vpop.f32.mrb[5].mxu1 }
 0x1f9   : > { %v904_v23 = vpop.f32.mrb[6].mxu1 }
 0x1fa   : > { %v905_v24 = vpop.f32.mrb[7].mxu1  ;;  %v2601_v23 = vld [vmem:[#allocation7 + $0xa4] ss:$8 sps:$4 sm:$0xff]  }
 0x1fb   : > { %v2599_v24 = vld [vmem:[#allocation7 + $0xa0] ss:$8 sps:$4 sm:$0xff]  }
 0x237   : > { %v1101_v30 = vpop.f32.mrb[8].mxu1 }
 0x238   : > { %v1102_v32 = vadd.f32 %v1101_v30, %v900_v21  ;;  %v1103_v33 = vpop.f32.mrb[9].mxu1  ;;  %v2598_v21 = vld [vmem:[#allocation7 + $0x94] ss:$8 sps:$4 sm:$0xff]  }
 0x239   : > { %v1104_v34 = vadd.f32 %v1103_v33, %v902_v22  ;;  %v1105_v35 = vpop.f32.mrb[10].mxu1  ;;  %v2596_v22 = vld [vmem:[#allocation7 + $0x90] ss:$8 sps:$4 sm:$0xff]   ;;  %v2610_v30 = vld [vmem:[#allocation7 + $0xd4] ss:$8 sps:$4 sm:$0xff]  }
 0x23a   : > { %v1120_v36 = vadd.f32 %v1113_v29, %v1102_v32  ;;  %v1106_v37 = vpop.f32.mrb[11].mxu1  ;;  %v2605_v29 = vld [vmem:[#allocation7 + $0xc0] ss:$8 sps:$4 sm:$0xff]   ;;  %v2613_v32 = vld [vmem:[#allocation7 + $0xe4] ss:$8 sps:$4 sm:$0xff]  }
 0x23b   : > { %v1121_v38 = vadd.f32 %v1117_v31, %v1104_v34  ;;  %v2608_v31 = vld [vmem:[#allocation7 + $0xd0] ss:$8 sps:$4 sm:$0xff]   ;;  %v2611_v33 = vld [vmem:[#allocation7 + $0xe0] ss:$8 sps:$4 sm:$0xff]   ;;  %v2616_v34 = vld [vmem:[#allocation7 + $0xf4] ss:$8 sps:$4 sm:$0xff]  }
 0x23c   : > { %vm1122_vm0 = vcmp.ge.f32.partialorder %v1120_v36, 0.0  ;;  %v1124_v39 = vmul.f32 0.01, %v1120_v36  ;;  %v2619_v37 = vld [vmem:[#allocation7 + $0x204] ss:$8 sps:$4 sm:$0xff]  }
 0x23d   : > { %vm1123_vm3 = vcmp.ge.f32.partialorder %v1121_v38, 0.0  ;;  %v1125_v41 = vmul.f32 0.01, %v1121_v38 }
 0x23e   : > { %v1126_v42 = vsel %vm1122_vm0, %v1120_v36, %v1124_v39  ;;  %v2614_v36 = vld [vmem:[#allocation7 + $0xf0] ss:$8 sps:$4 sm:$0xff]   ;;  %v2617_v39 = vld [vmem:[#allocation7 + $0x200] ss:$8 sps:$4 sm:$0xff]  }
 0x23f   : > { %v1127_v43 = vsel %vm1123_vm3, %v1121_v38, %v1125_v41 }
 0x240   : > { %v2285_v45 = vpack.c.bf16 %v1127_v43, %v1126_v42  ;;  %v2624_v42 = vld [vmem:[#allocation7 + $0x214] ss:$8 sps:$4 sm:$0xff]  }
 0x242   : > { %v1138_v46 = vshrl.u32 %v2285_v45, 16  ;;  %v1141_v48 = vshll.u32 %v2285_v45, 16  ;;  %v2627_v45 = vld [vmem:[#allocation7 + $0x224] ss:$8 sps:$4 sm:$0xff]  }
 0x244   : > { %v1140_v47 = vrot.slane %v1138_v46, 7  ;;  %v2625_v46 = vld [vmem:[#allocation7 + $0x220] ss:$8 sps:$4 sm:$0xff]  }
 0x246   : > { %v1143_v50 = vor.u32 %v1141_v48, %v1140_v47  ;;  %v1144_v51 = vrot.slane %v1140_v47, 4  ;;  %v2630_v47 = vld [vmem:[#allocation7 + $0x234] ss:$8 sps:$4 sm:$0xff]   ;;  %v2628_v48 = vld [vmem:[#allocation7 + $0x230] ss:$8 sps:$4 sm:$0xff]  }
 0x248   : > { %v3144_v52 = vsel %vm1153_vm14, %v1143_v50, 0  ;;  %v1165_v53 = vsel %vm1163_vm15, %v1144_v51, %v1164_v49  ;;  %v2633_v49 = vld [vmem:[#allocation7 + $0x244] ss:$8 sps:$4 sm:$0xff]   ;;  %v2631_v50 = vld [vmem:[#allocation7 + $0x240] ss:$8 sps:$4 sm:$0xff]  }
 0x249   : > { %1156 = vst [vmem:[#allocation2] sm:$0xff] %v3144_v52  ;;  %1166 = vst [vmem:[#allocation2 + $0x8] sm:$0x11] %v1165_v53  ;;  %v2213_v4 = vcombine.high %v3144_v52, %v3144_v52  ;;  %v2212_v41 = vcombine.low %v3144_v52, %v3144_v52  ;;  %v2636_v51 = vld [vmem:[#allocation7 + $0x254] ss:$8 sps:$4 sm:$0xff]  }
 0x24a   : > { %v2639_v53 = vld [vmem:[#allocation7 + $0x264] ss:$8 sps:$4 sm:$0xff]  }
 0x250   : > { %v3147_v54 = vld [vmem:[#allocation2 + $0x8] sm:$0x11]  ;;  %v3155_v35 = vld [vmem:[#allocation2] sm:$0xee] }
 0x251   : > { %v2179_v55 = vcombine.high %v3144_v52, %v3147_v54  ;;  %v2178_v56 = vcombine.low %v3144_v52, %v3147_v54  ;;  %v2247_v38 = vcombine.high %v3155_v35, %v3147_v54  ;;  %v2634_v52 = vld [vmem:[#allocation7 + $0x250] ss:$8 sps:$4 sm:$0xff]  }
 0x253   : > { %v1252_v40 = vshll.u32 %v2179_v55, 16  ;;  %v1245_v57 = vshll.u32 %v2178_v56, 16  ;;  %v1250_v58 = vshrl.u32 %v2179_v55, 16  ;;  %v1243_v60 = vshrl.u32 %v2178_v56, 16  ;;  %v2637_v55 = vld [vmem:[#allocation7 + $0x260] ss:$8 sps:$4 sm:$0xff]  }
 0x254   : > { %v1704_v43 = vrot.slane %v2247_v38, 1  ;;  %v2642_v56 = vld [vmem:[#allocation7 + $0x274] ss:$8 sps:$4 sm:$0xff]  }
 0x255   : > { %v1254_v59 = vrot.slane %v1252_v40, 1  ;;  %v1247_v61 = vrot.slane %v1245_v57, 1  ;;  %v2640_v40 = vld [vmem:[#allocation7 + $0x270] ss:$8 sps:$4 sm:$0xff]   ;;  %v2645_v57 = vld [vmem:[#allocation7 + $0x284] ss:$8 sps:$4 sm:$0xff]  }
 0x257   : > { %v1255_v63 = vor.u32 %v1254_v59, %v1250_v58  ;;  %v1248_v2 = vor.u32 %v1247_v61, %v1243_v60  ;;  %v2643_v58 = vld [vmem:[#allocation7 + $0x280] ss:$8 sps:$4 sm:$0xff]   ;;  %v2648_v59 = vld [vmem:[#allocation7 + $0x294] ss:$8 sps:$4 sm:$0xff]   ;;  %v2646_v60 = vld [vmem:[#allocation7 + $0x290] ss:$8 sps:$4 sm:$0xff]  }
 0x258   : > { %v2651_v61 = vld [vmem:[#allocation7 + $0x2a4] ss:$8 sps:$4 sm:$0xff]  }
 0x259   : > { %1450 = vmatprep.mubr.bf16.mxu0 %v1255_v63  ;;  %v2649_v63 = vld [vmem:[#allocation7 + $0x2a0] ss:$8 sps:$4 sm:$0xff]  }
 0x25a   : > { %1451 = vmatmul.mubr.bf16.vlgmr.msra.gmra.mrb[0].mxu0 %v1248_v2  ;;  %v2652_v2 = vld [vmem:[#allocation7 + $0x2b0] ss:$8 sps:$4 sm:$0xff]  }
 0x25b   : > { %1624 = vmatpush1.bf16.msra.mxu0 %v2569_v1  ;;  %1655 = vmatprep.mubr.bf16.mxu0 %v2213_v4  ;;  %v2654_v1 = vld [vmem:[#allocation7 + $0x2b4] ss:$8 sps:$4 sm:$0xff]   ;;  %v2655_v4 = vld [vmem:[#allocation7 + $0x2c0] ss:$8 sps:$4 sm:$0xff]  }
 0x25c   : > { %1625 = vmatprep.subr.bf16.mxu0 %v2574_v3  ;;  %v2657_v3 = vld [vmem:[#allocation7 + $0x2c4] ss:$8 sps:$4 sm:$0xff]  }
 0x25f   : > { %1626 = vmatpush1.bf16.msra.mxu0 %v2572_v5  ;;  %v2660_v5 = vld [vmem:[#allocation7 + $0x2d4] ss:$8 sps:$4 sm:$0xff]  }
 0x260   : > { %1627 = vmatprep.subr.bf16.mxu0 %v2577_v6  ;;  %v2658_v6 = vld [vmem:[#allocation7 + $0x2d0] ss:$8 sps:$4 sm:$0xff]  }
 0x263   : > { %1628 = vmatpush1.bf16.msra.mxu0 %v2575_v7  ;;  %v2663_v7 = vld [vmem:[#allocation7 + $0x2e4] ss:$8 sps:$4 sm:$0xff]  }
 0x264   : > { %1629 = vmatprep.subr.bf16.mxu0 %v2580_v8  ;;  %v2661_v8 = vld [vmem:[#allocation7 + $0x2e0] ss:$8 sps:$4 sm:$0xff]  }
 0x267   : > { %1630 = vmatpush1.bf16.msra.mxu0 %v2578_v9  ;;  %v2666_v9 = vld [vmem:[#allocation7 + $0x2f4] ss:$8 sps:$4 sm:$0xff]  }
 0x268   : > { %1631 = vmatprep.subr.bf16.mxu0 %v2583_v10  ;;  %v2664_v10 = vld [vmem:[#allocation7 + $0x2f0] ss:$8 sps:$4 sm:$0xff]  }
 0x26b   : > { %1632 = vmatpush1.bf16.msra.mxu0 %v2581_v11  ;;  %v2246_v11 = vcombine.low %v3155_v35, %v3147_v54 }
 0x26c   : > { %1633 = vmatprep.subr.bf16.mxu0 %v2586_v12 }
 0x26d   : > { %v1703_v12 = vrot.slane %v2246_v11, 1 }
 0x26f   : > { %1634 = vmatpush1.bf16.msra.mxu0 %v2584_v15  ;;  %v395_v15 = vld [vmem:[#allocation11] sm:$0x3] }
 0x270   : > { %1635 = vmatprep.subr.bf16.mxu0 %v2589_v16  ;;  %v400_v16 = vrot.slane %v395_v15, %v3132_v14 }
 0x273   : > { %1636 = vmatpush1.bf16.msra.mxu0 %v2587_v17  ;;  %v404_v17 = vrot.slane %v395_v15, %v3134_v28 }
 0x274   : > { %1637 = vmatprep.subr.bf16.mxu0 %v2592_v13  ;;  %v1910_v13 = vld [vmem:[#allocation8] sm:$0x3] }
 0x275   : > { %v1919_v54 = vrot.slane %v1910_v13, %v3134_v28 }
 0x277   : > { %1638 = vmatpush1.bf16.msra.mxu0 %v2590_v18  ;;  %v609_v18 = vadd.f32 %v3128_v62, %v400_v16 }
 0x278   : > { %1639 = vmatprep.subr.bf16.mxu0 %v2595_v19  ;;  %v1915_v19 = vrot.slane %v1910_v13, %v3132_v14 }
 0x27b   : > { %1640 = vmatpush1.bf16.msra.mxu0 %v2593_v20  ;;  %v611_v20 = vadd.f32 %v3130_v0, %v404_v17 }
 0x27c   : > { %1641 = vmatprep.subr.bf16.mxu0 %v2598_v21 }
 0x27f   : > { %1642 = vmatpush1.bf16.msra.mxu0 %v2596_v22 }
 0x280   : > { %1643 = vmatprep.subr.bf16.mxu0 %v2601_v23 }
 0x283   : > { %1644 = vmatpush1.bf16.msra.mxu0 %v2599_v24 }
 0x284   : > { %1645 = vmatprep.subr.bf16.mxu0 %v2604_v25 }
 0x287   : > { %1646 = vmatpush1.bf16.msra.mxu0 %v2602_v26 }
 0x288   : > { %1647 = vmatprep.subr.bf16.mxu0 %v2607_v27 }
 0x28b   : > { %1648 = vmatpush1.bf16.msra.mxu0 %v2605_v29 }
 0x28c   : > { %1649 = vmatprep.subr.bf16.mxu0 %v2610_v30 }
 0x28f   : > { %1650 = vmatpush1.bf16.msra.mxu0 %v2608_v31 }
 0x290   : > { %1651 = vmatprep.subr.bf16.mxu0 %v2613_v32 }
 0x293   : > { %1652 = vmatpush1.bf16.msra.mxu0 %v2611_v33 }
 0x294   : > { %1653 = vmatprep.subr.bf16.mxu0 %v2616_v34 }
 0x297   : > { %1654 = vmatpush1.bf16.msra.mxu0 %v2614_v36 }
 0x298   : > { %1867 = vmatprep.subr.bf16.mxu0 %v2619_v37 }
 0x29a   : > { %1656 = vmatmul.mubr.bf16.vlgmr.msra.gmra.mrb[0].mxu0 %v2212_v41 }
 0x29b   : > { %1868 = vmatpush1.bf16.msra.mxu0 %v2617_v39  ;;  %1899 = vmatprep.mubr.bf16.mxu0 %v1704_v43 }
 0x29c   : > { %1869 = vmatprep.subr.bf16.mxu0 %v2624_v42 }
 0x29f   : > { %1870 = vmatpush1.bf16.msra.mxu0 %v2622_v44 }
 0x2a0   : > { %1871 = vmatprep.subr.bf16.mxu0 %v2627_v45 }
 0x2a3   : > { %1872 = vmatpush1.bf16.msra.mxu0 %v2625_v46 }
 0x2a4   : > { %1873 = vmatprep.subr.bf16.mxu0 %v2630_v47 }
 0x2a7   : > { %1874 = vmatpush1.bf16.msra.mxu0 %v2628_v48 }
 0x2a8   : > { %1875 = vmatprep.subr.bf16.mxu0 %v2633_v49 }
 0x2ab   : > { %1876 = vmatpush1.bf16.msra.mxu0 %v2631_v50 }
 0x2ac   : > { %1877 = vmatprep.subr.bf16.mxu0 %v2636_v51 }
 0x2af   : > { %1878 = vmatpush1.bf16.msra.mxu0 %v2634_v52 }
 0x2b0   : > { %1879 = vmatprep.subr.bf16.mxu0 %v2639_v53 }
 0x2b3   : > { %1880 = vmatpush1.bf16.msra.mxu0 %v2637_v55 }
 0x2b4   : > { %1881 = vmatprep.subr.bf16.mxu0 %v2642_v56 }
 0x2b7   : > { %1882 = vmatpush1.bf16.msra.mxu0 %v2640_v40 }
 0x2b8   : > { %1883 = vmatprep.subr.bf16.mxu0 %v2645_v57 }
 0x2bb   : > { %1884 = vmatpush1.bf16.msra.mxu0 %v2643_v58 }
 0x2bc   : > { %1885 = vmatprep.subr.bf16.mxu0 %v2648_v59 }
 0x2bf   : > { %1886 = vmatpush1.bf16.msra.mxu0 %v2646_v60 }
 0x2c0   : > { %1887 = vmatprep.subr.bf16.mxu0 %v2651_v61 }
 0x2c3   : > { %1888 = vmatpush1.bf16.msra.mxu0 %v2649_v63 }
 0x2c4   : > { %1889 = vmatprep.subr.bf16.mxu0 %v2654_v1 }
 0x2c7   : > { %1890 = vmatpush1.bf16.msra.mxu0 %v2652_v2 }
 0x2c8   : > { %1891 = vmatprep.subr.bf16.mxu0 %v2657_v3 }
 0x2cb   : > { %1892 = vmatpush1.bf16.msra.mxu0 %v2655_v4 }
 0x2cc   : > { %1893 = vmatprep.subr.bf16.mxu0 %v2660_v5 }
 0x2cf   : > { %1894 = vmatpush1.bf16.msra.mxu0 %v2658_v6 }
 0x2d0   : > { %1895 = vmatprep.subr.bf16.mxu0 %v2663_v7 }
 0x2d3   : > { %1896 = vmatpush1.bf16.msra.mxu0 %v2661_v8 }
 0x2d4   : > { %1897 = vmatprep.subr.bf16.mxu0 %v2666_v9 }
 0x2d7   : > { %1898 = vmatpush1.bf16.msra.mxu0 %v2664_v10 }
 0x2da   : > { %1900 = vmatmul.mubr.bf16.vlgmr.msra.gmra.mrb[0].mxu0 %v1703_v12 }
 0x3ad   : > { %v1901_v21 = vpop.f32.mrb[0].mxu0 }
 0x3ae   : > { %v2288_v22 = vadd.f32 %v1901_v21, %v609_v18  ;;  %v1903_v23 = vpop.f32.mrb[1].mxu0 }
 0x3af   : > { %v2291_v24 = vadd.f32 %v1903_v23, %v611_v20  ;;  %v1905_v25 = vpop.f32.mrb[2].mxu0 }
 0x3b0   : > { %v2289_v26 = vadd.f32 %v2288_v22, %v1915_v19  ;;  %v1906_v27 = vpop.f32.mrb[3].mxu0 }
 0x3b1   : > { %v2292_v29 = vadd.f32 %v2291_v24, %v1919_v54 }
 0x3b2   : > { %vm1926_vm0 = vcmp.ge.f32.partialorder %v2289_v26, 0.0  ;;  %v1928_v30 = vmul.f32 0.01, %v2289_v26 }
 0x3b3   : > { %vm1927_vm1 = vcmp.ge.f32.partialorder %v2292_v29, 0.0  ;;  %v1929_v31 = vmul.f32 0.01, %v2292_v29 }
 0x3b4   : > { %v1930_v62 = vsel %vm1926_vm0, %v2289_v26, %v1928_v30 }
 0x3b5   : > { %v1931_v0 = vsel %vm1927_vm1, %v2292_v29, %v1929_v31 }
 0x3b6   : > { %v2286_v14 = vpack.c.bf16 %v1931_v0, %v1930_v62 }
 0x3b8   : > { %1940 = vst [vmem:[%s360_s20] sm:$0xff] %v2286_v14 }
 0x3b9 PF: > { %s21_s24 = sadd.s32 1, %s2857_s24  }
 0x3ba   : > { %p18_p9 = scmp.ge.s32.totalorder %s21_s24, 4  }
 0x3bc   :  { %20 = sbr.rel (!%p18_p9) target bundleno = 4 (0x4), region = 106 }
 0x3c3   :  { %1962 = vsyncpa [#allocation4], 1 }
 0x3c4   :  { %1964 = vsyncpa [#allocation4 + $0x1], 1 }
 0x3c5   :  { %1965 = vsyncpa [#allocation6], 1 }
 0x3c6   :  { %1966 = vsyncpa [#allocation9], 1 }
 0x3c7   :  { %1967 = vsyncpa [#allocation12], 1 }

// kernel: resnet1d_forward.11
= control target key start
LH: loop header
LB: loop body
LE: loop exit
PB: predicated region body
PF: predicated region fallthrough
CT: control target
= control target key end

     0   :  { %vm33_vm0 = vcmask 1043456   ;;  %s757_s0 = inlined_call_operand.vmem [shape: bf16[2,4,512], index: 0, kind: input, shape index: {}]   ;;  %s758_s1 = inlined_call_operand.vmem [shape: f32[512,128], index: 1, kind: input, shape index: {}]   ;;  %s759_s2 = inlined_call_operand.vmem [shape: f32[1,128], index: 2, kind: input, shape index: {}]   ;;  %s760_s3 = inlined_call_operand.hbm [shape: f32[2,128], index: 3, kind: output, shape index: {}]  }
   0x1   :  { %v115_v0 = vld [vmem:[%s758_s1 + $0x80] sm:$0xff]  ;;  %v116_v1 = vld [vmem:[%s758_s1 + $0x88] sm:$0xff]  ;;  %v117_v11 = vld [vmem:[%s758_s1 + $0x90] sm:$0xff] }
   0x2   :  { %v99_v2 = vld [vmem:[%s758_s1] sm:$0xff]  ;;  %v413_v3 = vpack.c.bf16 %v116_v1, %v115_v0  ;;  %v100_v4 = vld [vmem:[%s758_s1 + $0x8] sm:$0xff]  ;;  %v118_v13 = vld [vmem:[%s758_s1 + $0x98] sm:$0xff] }
   0x3   :  { %v147_v5 = vld [vmem:[%s758_s1 + $0x180] sm:$0xff]  ;;  %v148_v6 = vld [vmem:[%s758_s1 + $0x188] sm:$0xff]  ;;  %v415_v7 = vpack.c.bf16 %v100_v4, %v99_v2  ;;  %v101_v14 = vld [vmem:[%s758_s1 + $0x10] sm:$0xff]  ;;  %v417_v16 = vpack.c.bf16 %v118_v13, %v117_v11 }
   0x4   :  { %v445_v8 = vpack.c.bf16 %v148_v6, %v147_v5  ;;  %v131_v9 = vld [vmem:[%s758_s1 + $0x100] sm:$0xff]  ;;  %v132_v10 = vld [vmem:[%s758_s1 + $0x108] sm:$0xff]  ;;  %414 = vmatprep.subr.bf16.mxu0 %v413_v3  ;;  %v102_v15 = vld [vmem:[%s758_s1 + $0x18] sm:$0xff] }
   0x5   :  { %v447_v12 = vpack.c.bf16 %v132_v10, %v131_v9  ;;  %416 = vmatpush3.bf16.msra.mxu0 %v415_v7  ;;  %v419_v17 = vpack.c.bf16 %v102_v15, %v101_v14  ;;  %v149_v18 = vld [vmem:[%s758_s1 + $0x190] sm:$0xff]  ;;  %v150_v19 = vld [vmem:[%s758_s1 + $0x198] sm:$0xff]  ;;  %v119_v23 = vld [vmem:[%s758_s1 + $0xa0] sm:$0xff] }
   0x6   :  { %446 = vmatprep.subr.bf16.mxu1 %v445_v8  ;;  %v133_v20 = vld [vmem:[%s758_s1 + $0x110] sm:$0xff]  ;;  %v449_v21 = vpack.c.bf16 %v150_v19, %v149_v18  ;;  %v134_v22 = vld [vmem:[%s758_s1 + $0x118] sm:$0xff]  ;;  %v120_v24 = vld [vmem:[%s758_s1 + $0xa8] sm:$0xff]  ;;  %418 = vmatprep.subr.bf16.mxu0 %v417_v16 }
   0x7   :  { %448 = vmatpush3.bf16.msra.mxu1 %v447_v12  ;;  %v451_v25 = vpack.c.bf16 %v134_v22, %v133_v20  ;;  %v421_v26 = vpack.c.bf16 %v120_v24, %v119_v23  ;;  %v103_v27 = vld [vmem:[%s758_s1 + $0x20] sm:$0xff]  ;;  %v104_v28 = vld [vmem:[%s758_s1 + $0x28] sm:$0xff]  ;;  %v121_v35 = vld [vmem:[%s758_s1 + $0xb0] sm:$0xff] }
   0x8   :  { %v151_v29 = vld [vmem:[%s758_s1 + $0x1a0] sm:$0xff]  ;;  %450 = vmatprep.subr.bf16.mxu1 %v449_v21  ;;  %v152_v30 = vld [vmem:[%s758_s1 + $0x1a8] sm:$0xff]  ;;  %v423_v33 = vpack.c.bf16 %v104_v28, %v103_v27  ;;  %v122_v36 = vld [vmem:[%s758_s1 + $0xb8] sm:$0xff] }
   0x9   :  { %v135_v31 = vld [vmem:[%s758_s1 + $0x120] sm:$0xff]  ;;  %v136_v32 = vld [vmem:[%s758_s1 + $0x128] sm:$0xff]  ;;  %420 = vmatpush3.bf16.msra.mxu0 %v419_v17  ;;  %v453_v34 = vpack.c.bf16 %v152_v30, %v151_v29  ;;  %v105_v37 = vld [vmem:[%s758_s1 + $0x30] sm:$0xff]  ;;  %v425_v39 = vpack.c.bf16 %v122_v36, %v121_v35 }
   0xa   :  { %422 = vmatprep.subr.bf16.mxu0 %v421_v26  ;;  %v455_v38 = vpack.c.bf16 %v136_v32, %v135_v31  ;;  %v106_v40 = vld [vmem:[%s758_s1 + $0x38] sm:$0xff]  ;;  %v153_v41 = vld [vmem:[%s758_s1 + $0x1b0] sm:$0xff]  ;;  %v123_v46 = vld [vmem:[%s758_s1 + $0xc0] sm:$0xff] }
   0xb   :  { %452 = vmatpush3.bf16.msra.mxu1 %v451_v25  ;;  %v154_v42 = vld [vmem:[%s758_s1 + $0x1b8] sm:$0xff]  ;;  %v137_v44 = vld [vmem:[%s758_s1 + $0x130] sm:$0xff]  ;;  %v124_v47 = vld [vmem:[%s758_s1 + $0xc8] sm:$0xff]  ;;  %v427_v48 = vpack.c.bf16 %v106_v40, %v105_v37 }
   0xc   :  { %454 = vmatprep.subr.bf16.mxu1 %v453_v34  ;;  %v457_v43 = vpack.c.bf16 %v154_v42, %v153_v41  ;;  %v138_v45 = vld [vmem:[%s758_s1 + $0x138] sm:$0xff]  ;;  %v107_v49 = vld [vmem:[%s758_s1 + $0x40] sm:$0xff]  ;;  %v156_v51 = vld [vmem:[%s758_s1 + $0x1c8] sm:$0xff]  ;;  %v429_v53 = vpack.c.bf16 %v124_v47, %v123_v46 }
   0xd   :  { %424 = vmatpush3.bf16.msra.mxu0 %v423_v33  ;;  %v155_v50 = vld [vmem:[%s758_s1 + $0x1c0] sm:$0xff]  ;;  %v459_v52 = vpack.c.bf16 %v138_v45, %v137_v44  ;;  %v108_v54 = vld [vmem:[%s758_s1 + $0x48] sm:$0xff]  ;;  %v125_v58 = vld [vmem:[%s758_s1 + $0xd0] sm:$0xff] }
   0xe   :  { %426 = vmatprep.subr.bf16.mxu0 %v425_v39  ;;  %v139_v55 = vld [vmem:[%s758_s1 + $0x140] sm:$0xff]  ;;  %v140_v56 = vld [vmem:[%s758_s1 + $0x148] sm:$0xff]  ;;  %v461_v57 = vpack.c.bf16 %v156_v51, %v155_v50  ;;  %v126_v59 = vld [vmem:[%s758_s1 + $0xd8] sm:$0xff]  ;;  %v431_v2 = vpack.c.bf16 %v108_v54, %v107_v49 }
   0xf   :  { %456 = vmatpush3.bf16.msra.mxu1 %v455_v38  ;;  %v157_v60 = vld [vmem:[%s758_s1 + $0x1d0] sm:$0xff]  ;;  %v110_v62 = vld [vmem:[%s758_s1 + $0x58] sm:$0xff]  ;;  %v127_v3 = vld [vmem:[%s758_s1 + $0xe0] sm:$0xff]  ;;  %v463_v6 = vpack.c.bf16 %v140_v56, %v139_v55  ;;  %v433_v7 = vpack.c.bf16 %v126_v59, %v125_v58 }
  0x10   :  { %458 = vmatprep.subr.bf16.mxu1 %v457_v43  ;;  %v109_v61 = vld [vmem:[%s758_s1 + $0x50] sm:$0xff]  ;;  %v158_v63 = vld [vmem:[%s758_s1 + $0x1d8] sm:$0xff]  ;;  %v128_v4 = vld [vmem:[%s758_s1 + $0xe8] sm:$0xff] }
  0x11   :  { %v141_v0 = vld [vmem:[%s758_s1 + $0x150] sm:$0xff]  ;;  %v142_v1 = vld [vmem:[%s758_s1 + $0x158] sm:$0xff]  ;;  %428 = vmatpush3.bf16.msra.mxu0 %v427_v48  ;;  %v111_v5 = vld [vmem:[%s758_s1 + $0x60] sm:$0xff]  ;;  %v465_v11 = vpack.c.bf16 %v158_v63, %v157_v60  ;;  %v435_v18 = vpack.c.bf16 %v110_v62, %v109_v61  ;;  %v437_v20 = vpack.c.bf16 %v128_v4, %v127_v3 }
  0x12   :  { %430 = vmatprep.subr.bf16.mxu0 %v429_v53  ;;  %v112_v8 = vld [vmem:[%s758_s1 + $0x68] sm:$0xff]  ;;  %v159_v9 = vld [vmem:[%s758_s1 + $0x1e0] sm:$0xff]  ;;  %v129_v14 = vld [vmem:[%s758_s1 + $0xf0] sm:$0xff]  ;;  %v467_v19 = vpack.c.bf16 %v142_v1, %v141_v0 }
  0x13   :  { %460 = vmatpush3.bf16.msra.mxu1 %v459_v52  ;;  %v160_v10 = vld [vmem:[%s758_s1 + $0x1e8] sm:$0xff]  ;;  %v143_v12 = vld [vmem:[%s758_s1 + $0x160] sm:$0xff]  ;;  %v130_v15 = vld [vmem:[%s758_s1 + $0xf8] sm:$0xff]  ;;  %v439_v24 = vpack.c.bf16 %v112_v8, %v111_v5 }
  0x14   :  { %462 = vmatprep.subr.bf16.mxu1 %v461_v57  ;;  %v144_v13 = vld [vmem:[%s758_s1 + $0x168] sm:$0xff]  ;;  %v700_v16 = vld [vmem:[%s758_s1 + $0x70] sm:$0xff]  ;;  %v705_v17 = vld [vmem:[%s758_s1 + $0x78] sm:$0xff]  ;;  %v469_v25 = vpack.c.bf16 %v160_v10, %v159_v9  ;;  %v441_v30 = vpack.c.bf16 %v130_v15, %v129_v14 }
  0x15   :  { %432 = vmatpush3.bf16.msra.mxu0 %v431_v2  ;;  %v161_v21 = vld [vmem:[%s758_s1 + $0x1f0] sm:$0xff]  ;;  %v162_v22 = vld [vmem:[%s758_s1 + $0x1f8] sm:$0xff]  ;;  %v471_v26 = vpack.c.bf16 %v144_v13, %v143_v12  ;;  %v15_v28 = vld [vmem:[%s757_s0] sm:$0xff] }
  0x16   :  { %v716_v23 = vld [vmem:[%s758_s1 + $0x170] sm:$0xff]  ;;  %434 = vmatprep.subr.bf16.mxu0 %v433_v7  ;;  %v146_v27 = vld [vmem:[%s758_s1 + $0x178] sm:$0xff]  ;;  %v16_v29 = vld [vmem:[%s757_s0 + $0x8] sm:$0xff]  ;;  %v17_v31 = vunpack.c.l.bf16 %v15_v28  ;;  %v18_v33 = vunpack.c.h.bf16 %v15_v28 }
  0x17   :  { %464 = vmatpush3.bf16.msra.mxu1 %v463_v6  ;;  %v19_v32 = vunpack.c.l.bf16 %v16_v29 }
  0x18   :  { %466 = vmatprep.subr.bf16.mxu1 %v465_v11 }
  0x19   :  { %8 = vsyncpa [#allocation3], 0  ;;  %v443_v34 = vpack.c.bf16 %v705_v17, %v700_v16  ;;  %v473_v35 = vpack.c.bf16 %v162_v22, %v161_v21  ;;  %v475_v36 = vpack.c.bf16 %v146_v27, %v716_v23  ;;  %v20_v37 = vunpack.c.h.bf16 %v16_v29  ;;  %436 = vmatpush3.bf16.msra.mxu0 %v435_v18  ;;  %s502_s9 = smov [#allocation2]  }
  0x1a   :  { %v25_v38 = vcombine.high %v17_v31, %v17_v31  ;;  %v27_v39 = vcombine.high %v19_v32, %v19_v32  ;;  %v34_v40 = vsel %vm33_vm0, %v17_v31, 0.0  ;;  %v62_v41 = vsel %vm33_vm0, %v19_v32, 0.0  ;;  %438 = vmatprep.subr.bf16.mxu0 %v437_v20  ;;  %s334_s10 = sshll.u32 %s502_s9, 4  ;;  %s335_s10 = int_to_ptr.vmem [resolvable:$true] %s334_s10 }
  0x1b   :  { %468 = vmatpush3.bf16.msra.mxu1 %v467_v19  ;;  %v35_v42 = vrot.slane %v34_v40, 4  ;;  %v63_v43 = vrot.slane %v62_v41, 4  ;;  %v26_v44 = vcombine.high %v18_v33, %v18_v33  ;;  %v28_v45 = vcombine.high %v20_v37, %v20_v37  ;;  %s478_s11 = scalar_lea.vmem %s335_s10, 32  ;;  %p483_p1 = scmp.lt.s32.totalorder %s335_s10, %s335_s10 }
  0x1c   :  { %470 = vmatprep.subr.bf16.mxu1 %v469_v25  ;;  %v41_v46 = vsel %vm33_vm0, %v25_v38, 0.0  ;;  %v69_v47 = vsel %vm33_vm0, %v27_v39, 0.0  ;;  %v48_v48 = vsel %vm33_vm0, %v18_v33, 0.0  ;;  %v76_v49 = vsel %vm33_vm0, %v20_v37, 0.0  ;;  %p479_p0 = scmp.ne.s32.totalorder %s335_s10, %s478_s11  ;;  %p484_p2 = scmp.lt.s32.totalorder %s478_s11, %s478_s11 }
  0x1d   :  { %v42_v50 = vrot.slane %v41_v46, 4  ;;  %v70_v51 = vrot.slane %v69_v47, 4  ;;  %v36_v52 = vadd.f32 %v35_v42, %v34_v40  ;;  %v64_v53 = vadd.f32 %v63_v43, %v62_v41  ;;  %440 = vmatpush3.bf16.msra.mxu0 %v439_v24 }
  0x1e   :  { %vm178_vm1 = vcmask 1041409   ;;  %v55_v54 = vsel %vm33_vm0, %v26_v44, 0.0  ;;  %v83_v55 = vsel %vm33_vm0, %v28_v45, 0.0  ;;  %v49_v56 = vrot.slane %v48_v48, 4  ;;  %442 = vmatprep.subr.bf16.mxu0 %v441_v30  ;;  %p485_p3 = por %p484_p2, %p483_p1 }
  0x1f   :  { %v77_v57 = vrot.slane %v76_v49, 4  ;;  %472 = vmatpush3.bf16.msra.mxu1 %v471_v26  ;;  %v43_v58 = vadd.f32 %v42_v50, %v41_v46  ;;  %v71_v59 = vadd.f32 %v70_v51, %v69_v47  ;;  %v37_v60 = vrot.slane %v36_v52, 2  ;;  %v342_v47 = vld [vmem:[%s759_s2] ss:$0 sm:$0xff] }
  0x20   :  { %v65_v61 = vrot.slane %v64_v53, 2  ;;  %474 = vmatprep.subr.bf16.mxu1 %v473_v35  ;;  %v56_v62 = vrot.slane %v55_v54, 4  ;;  %v84_v63 = vrot.slane %v83_v55, 4  ;;  %v50_v0 = vadd.f32 %v49_v56, %v48_v48  ;;  %p486_p4 = pnand %p485_p3, %p479_p0 }
  0x21   :  { %v78_v1 = vadd.f32 %v77_v57, %v76_v49  ;;  %v44_v2 = vrot.slane %v43_v58, 2  ;;  %v72_v3 = vrot.slane %v71_v59, 2  ;;  %v38_v4 = vadd.f32 %v37_v60, %v36_v52  ;;  %444 = vmatpush3.bf16.msra.mxu0 %v443_v34 }
  0x22   :  { %v66_v5 = vadd.f32 %v65_v61, %v64_v53  ;;  %v57_v6 = vadd.f32 %v56_v62, %v55_v54  ;;  %v85_v7 = vadd.f32 %v84_v63, %v83_v55  ;;  %v51_v8 = vrot.slane %v50_v0, 2 }
  0x23   :  { %v79_v9 = vrot.slane %v78_v1, 2  ;;  %476 = vmatpush3.bf16.msra.mxu1 %v475_v36  ;;  %v45_v10 = vadd.f32 %v44_v2, %v43_v58  ;;  %v73_v11 = vadd.f32 %v72_v3, %v71_v59  ;;  %v39_v12 = vrot.slane %v38_v4, 1 }
  0x24   :  { %v67_v13 = vrot.slane %v66_v5, 1  ;;  %v58_v14 = vrot.slane %v57_v6, 2  ;;  %v86_v15 = vrot.slane %v85_v7, 2  ;;  %v52_v16 = vadd.f32 %v51_v8, %v50_v0 }
  0x25   :  { %v80_v17 = vadd.f32 %v79_v9, %v78_v1  ;;  %v46_v18 = vrot.slane %v45_v10, 1  ;;  %v74_v19 = vrot.slane %v73_v11, 1  ;;  %v40_v20 = vadd.f32 %v39_v12, %v38_v4 }
  0x26   :  { %v68_v21 = vadd.f32 %v67_v13, %v66_v5  ;;  %v59_v22 = vadd.f32 %v58_v14, %v57_v6  ;;  %v87_v23 = vadd.f32 %v86_v15, %v85_v7  ;;  %v53_v24 = vrot.slane %v52_v16, 1 }
  0x27   :  { %v81_v25 = vrot.slane %v80_v17, 1  ;;  %v47_v26 = vadd.f32 %v46_v18, %v45_v10  ;;  %v75_v27 = vadd.f32 %v74_v19, %v73_v11  ;;  %v91_v28 = vmul.f32 0.25, %v40_v20 }
  0x28   :  { %v95_v29 = vmul.f32 0.25, %v68_v21  ;;  %v60_v30 = vrot.slane %v59_v22, 1  ;;  %v88_v31 = vrot.slane %v87_v23, 1  ;;  %v54_v32 = vadd.f32 %v53_v24, %v52_v16 }
  0x29   :  { %v82_v33 = vadd.f32 %v81_v25, %v80_v17  ;;  %v92_v34 = vmul.f32 0.25, %v47_v26  ;;  %v96_v35 = vmul.f32 0.25, %v75_v27 }
  0x2a   :  { %v179_v36 = vsel %vm178_vm1, %v95_v29, %v91_v28  ;;  %v61_v37 = vadd.f32 %v60_v30, %v59_v22  ;;  %v89_v38 = vadd.f32 %v88_v31, %v87_v23  ;;  %v93_v39 = vmul.f32 0.25, %v54_v32 }
  0x2b   :  { %v97_v40 = vmul.f32 0.25, %v82_v33  ;;  %v180_v41 = vsel %vm178_vm1, %v96_v35, %v92_v34 }
  0x2c   :  { %251 = vmatprep.mubr.f32.mxu0 %v180_v41  ;;  %v94_v42 = vmul.f32 0.25, %v61_v37  ;;  %v98_v43 = vmul.f32 0.25, %v89_v38 }
  0x2d   :  { %252 = vmatmul.mubr.f32.vlgmr.msra.gmra.mrb[0].mxu0 %v179_v36  ;;  %v181_v44 = vsel %vm178_vm1, %v97_v40, %v93_v39 }
  0x2e   :  { %v182_v45 = vsel %vm178_vm1, %v98_v43, %v94_v42 }
  0x2f   :  { %321 = vmatprep.mubr.f32.mxu1 %v182_v45 }
  0x30   :  { %322 = vmatmul.mubr.f32.vlgmr.msra.gmra.mrb[0].mxu1 %v181_v44 }
 0x100   :  { %v375_v46 = vpop.f32.mrb[0].mxu0 }
 0x101   :  { %v376_v48 = vpop.f32.mrb[1].mxu0 }
 0x102   :  { %v377_v49 = vadd.f32 %v376_v48, %v375_v46 }
 0x103   :  { %v410_v50 = vpop.f32.mrb[0].mxu1 }
 0x104   :  { %v254_v51 = vadd.f32 %v377_v49, %v342_v47  ;;  %v411_v52 = vpop.f32.mrb[1].mxu1 }
 0x105   :  { %v412_v53 = vadd.f32 %v411_v52, %v410_v50 }
 0x107   :  { %v324_v54 = vadd.f32 %v412_v53, %v254_v51 }
 0x109   :  { %327 = vst [vmem:[#allocation2] sm:$0x3] %v324_v54 }
 0x10a   :  { %489 = shalt.err (!%p486_p4)
}
 0x10b   :  { %s490_s13 = scalar_lea.hbm %s760_s3, 32 }
 0x10c   :  { %p491_p5 = scmp.ne.s32.totalorder %s760_s3, %s490_s13  ;;  %p494_p6 = scmp.lt.u32.totalorder %s490_s13, %s760_s3 }
 0x10e   :  { %p496_p7 = pnand %p494_p6, %p491_p5 }
 0x110   :  { %499 = shalt.err (!%p496_p7)
}
 0x111   :  { %337 = dma.vmem_to_hbm [thread:$0]  %s335_s10, 32, %s760_s3, [#allocation3]  }
 0x112   :  { %500 = dma.done.wait [#allocation3], 32  }
 0x113   :  { %501 = vsyncadd [#allocation3], 4294967264 }
 0x114   :  { %341 = vsyncpa [#allocation3], 1 }

// kernel: resnet1d_forward.10
= control target key start
LH: loop header
LB: loop body
LE: loop exit
PB: predicated region body
PF: predicated region fallthrough
CT: control target
= control target key end

     0   :  { %12 = vsyncpa [#allocation4], 0  ;;  %s10167_s0 = inlined_call_operand.vmem [shape: bf16[2,5,512], index: 0, kind: input, shape index: {}]   ;;  %s10168_s1 = inlined_call_operand.hbm [shape: bf16[2,512,512], index: 1, kind: input, shape index: {}]   ;;  %s10169_s2 = inlined_call_operand.vmem [shape: f32[1,512], index: 2, kind: input, shape index: {}]   ;;  %s10170_s3 = inlined_call_operand.vmem [shape: bf16[3,512,512], index: 3, kind: input, shape index: {}]   ;;  %s10171_s4 = inlined_call_operand.vmem [shape: f32[1,512], index: 4, kind: input, shape index: {}]   ;;  %s10172_s5 = inlined_call_operand.hbm [shape: bf16[512,512], index: 5, kind: input, shape index: {}]   ;;  %s10173_s6 = inlined_call_operand.vmem [shape: f32[1,512], index: 6, kind: input, shape index: {}]   ;;  %s10174_s7 = inlined_call_operand.vmem [shape: bf16[2,4,512], index: 7, kind: output, shape index: {}]  }
   0x1   :  { %13 = vsyncpa [#allocation6], 0  ;;  %s8754_s24 = smov 0  }
   0x2 LB: > { %s8760_s25 = sadd.s32 4294967295, %s8706_s24   ;;  %p6302_p0 = scmp.ge.s32.totalorder %s8706_s24, 1  ;;  %s8706_s24 = sphi %s8754_s24, %s19_s24  }
   0x3   : > { %p202_p1 = scmp.lt.s32.totalorder %s8706_s24, 3  ;;  %s8708_s26 = smov [#allocation3]  }
   0x4   : > { %s214_s27 = sshll.u32 %s8708_s26, 4  ;;  %p10175_p3 = scmp.eq.s32.totalorder %s8760_s25, 0  ;;  %s215_s27 = int_to_ptr.vmem [resolvable:$true] %s214_s27 }
   0x5   : > { %p8764_p2 = pnand %p6302_p0, %p202_p1  ;;  %s8709_s29 = smov [#allocation5]  }
   0x6   : > { %s236_s30 = sshll.u32 %s8709_s29, 4  ;;  %s8636_s11 = scalar_lea.hbm %s10168_s1, 32768  ;;  %s8777_s30 = int_to_ptr.vmem [resolvable:$true] %s236_s30 }
   0x7   : > { %s10177_s28 = scalar_select %p8764_p2, 1, 0 }
   0x8   : > { %p7439_p4 = pneg %p8764_p2  ;;  %p8637_p6 = scmp.ne.s32.totalorder %s10168_s1, %s8636_s11 }
   0x9   : > { %p8643_p10 = scmp.lt.u32.totalorder %s8636_s11, %s10168_s1 }
   0xa   : > { %p8773_p5 = pnand %p10175_p3, %p7439_p4 }
   0xc   : > { %p8638_p7 = pneg %p8773_p5 }
   0xe   : > { %p8639_p8 = pnand %p8638_p7, %p8637_p6 }
  0x10   : > { %p8640_p9 = pneg %p8639_p8 }
  0x12   : > { %p8645_p11 = pnand %p8643_p10, %p8640_p9 }
  0x14   : > { %8648 = shalt.err (!%p8645_p11)
}
  0x15   : > { %s8649_s16 = scalar_lea.vmem %s215_s27, 32768  ;;  %p8657_p1 = scmp.lt.s32.totalorder %s215_s27, %s215_s27 }
  0x16   : > { %p8650_p12 = scmp.ne.s32.totalorder %s215_s27, %s8649_s16  ;;  %p8658_p4 = scmp.lt.s32.totalorder %s8649_s16, %s8649_s16 }
  0x18   : > { %p8652_p13 = pnand %p8650_p12, %p8638_p7  ;;  %p8659_p3 = por %p8658_p4, %p8657_p1 }
  0x1a   : > { %p8653_p0 = pneg %p8652_p13 }
  0x1c   : > { %p8660_p2 = pnand %p8659_p3, %p8653_p0 }
  0x1e   : > { %8663 = shalt.err (!%p8660_p2)
}
  0x1f   : > { %s8710_s17 = smov 256   ;;  %s8711_s18 = smov 16  }
  0x20   : > { %7442 = dma.hbm_to_vmem [thread:$0]  (!%p8773_p5), %s10168_s1, 32768, %s215_s27, [#allocation4], %s8710_s17, %s8710_s17, %s8711_s18  }
  0x21   : > { %s8664_s23 = scalar_lea.hbm %s10172_s5, 16384 }
  0x22   : > { %p8665_p6 = scmp.ne.s32.totalorder %s10172_s5, %s8664_s23  ;;  %p8671_p8 = scmp.lt.u32.totalorder %s8664_s23, %s10172_s5 }
  0x24   : > { %p8667_p2 = pnand %p8665_p6, %p8638_p7 }
  0x26   : > { %p8668_p3 = pneg %p8667_p2 }
  0x28   : > { %p8673_p9 = pnand %p8671_p8, %p8668_p3 }
  0x2a   : > { %8676 = shalt.err (!%p8673_p9)
}
  0x2b   : > { %s8677_s27 = scalar_lea.vmem %s8777_s30, 16384  ;;  %p8685_p13 = scmp.lt.s32.totalorder %s8777_s30, %s8777_s30 }
  0x2c   : > { %p8678_p10 = scmp.ne.s32.totalorder %s8777_s30, %s8677_s27  ;;  %p8686_p0 = scmp.lt.s32.totalorder %s8677_s27, %s8677_s27 }
  0x2e   : > { %p8680_p11 = pnand %p8678_p10, %p8638_p7  ;;  %p8687_p1 = por %p8686_p0, %p8685_p13 }
  0x30   : > { %p8681_p12 = pneg %p8680_p11 }
  0x32   : > { %p8688_p4 = pnand %p8687_p1, %p8681_p12 }
  0x34   : > { %8691 = shalt.err (!%p8688_p4)
}
  0x35   : > { %7445 = dma.hbm_to_vmem [thread:$0]  (!%p8773_p5), %s10172_s5, 16384, %s8777_s30, [#allocation6], %s8710_s17, %s8710_s17, %s8711_s18  }
  0x36   : > { %p10179_p6 = scmp.ne.s32.totalorder %s10177_s28, 0 }
  0x37   : > { %p10180_p2 = scmp.eq.s32.totalorder (!%p10179_p6), %s8760_s25, 0 }
  0x38   : > { %263 = sbr.rel (%p10179_p6) target bundleno = 1184 (0x4a0), region = 48 }
  0x3f   : > { %8697 = dma.done.wait (%p10180_p2), [#allocation4], 32768   ;;  %p10181_p7 = pmov %p10180_p2 }
  0x40   : > { %p10182_p3 = pmov %p10180_p2 }
  0x41   : > { %8699 = vsyncadd (%p10181_p7), [#allocation4], 4294934528 }
  0x42   : > { %8701 = dma.done.wait (%p10182_p3), [#allocation6], 16384   ;;  %p10183_p8 = pmov %p10180_p2 }
  0x43   : > { %v7464_v0 = vld [vmem:[#allocation5 + $0x4] ss:$16 sps:$4 sm:$0xff]   ;;  %v7466_v1 = vld [vmem:[#allocation5 + $0xc] ss:$16 sps:$4 sm:$0xff]   ;;  %v7468_v2 = vld [vmem:[#allocation5] ss:$16 sps:$4 sm:$0xff]  }
  0x44   : > { %8703 = vsyncadd (%p10183_p8), [#allocation6], 4294950912  ;;  %1116 = vmatprep.subr.bf16.mxu0 %v7464_v0  ;;  %v7469_v3 = vld [vmem:[#allocation5 + $0x8] ss:$16 sps:$4 sm:$0xff]   ;;  %1198 = vmatprep.subr.bf16.mxu1 %v7466_v1  ;;  %v7470_v4 = vld [vmem:[#allocation5 + $0x24] ss:$16 sps:$4 sm:$0xff]  }
  0x45   : > { %1117 = vmatpush1.bf16.msra.mxu0 %v7468_v2  ;;  %1199 = vmatpush1.bf16.msra.mxu1 %v7469_v3  ;;  %v7472_v5 = vld [vmem:[#allocation5 + $0x2c] ss:$16 sps:$4 sm:$0xff]   ;;  %v7474_v6 = vld [vmem:[#allocation5 + $0x20] ss:$16 sps:$4 sm:$0xff]   ;;  %v7475_v7 = vld [vmem:[#allocation5 + $0x28] ss:$16 sps:$4 sm:$0xff]  }
  0x46   : > { %1118 = vmatprep.subr.bf16.mxu0 %v7470_v4  ;;  %1200 = vmatprep.subr.bf16.mxu1 %v7472_v5  ;;  %v7476_v8 = vld [vmem:[#allocation5 + $0x44] ss:$16 sps:$4 sm:$0xff]   ;;  %v7478_v9 = vld [vmem:[#allocation5 + $0x4c] ss:$16 sps:$4 sm:$0xff]   ;;  %v7480_v10 = vld [vmem:[#allocation5 + $0x40] ss:$16 sps:$4 sm:$0xff]  }
  0x47   : > { %v7481_v11 = vld [vmem:[#allocation5 + $0x48] ss:$16 sps:$4 sm:$0xff]   ;;  %v7482_v12 = vld [vmem:[#allocation5 + $0x64] ss:$16 sps:$4 sm:$0xff]   ;;  %v7484_v13 = vld [vmem:[#allocation5 + $0x6c] ss:$16 sps:$4 sm:$0xff]  }
  0x48   : > { %v7486_v14 = vld [vmem:[#allocation5 + $0x60] ss:$16 sps:$4 sm:$0xff]   ;;  %v7487_v15 = vld [vmem:[#allocation5 + $0x68] ss:$16 sps:$4 sm:$0xff]   ;;  %v7488_v16 = vld [vmem:[#allocation5 + $0x84] ss:$16 sps:$4 sm:$0xff]  }
  0x49   : > { %1119 = vmatpush1.bf16.msra.mxu0 %v7474_v6  ;;  %1201 = vmatpush1.bf16.msra.mxu1 %v7475_v7  ;;  %v7490_v17 = vld [vmem:[#allocation5 + $0x8c] ss:$16 sps:$4 sm:$0xff]   ;;  %v7492_v18 = vld [vmem:[#allocation5 + $0x80] ss:$16 sps:$4 sm:$0xff]   ;;  %v7493_v19 = vld [vmem:[#allocation5 + $0x88] ss:$16 sps:$4 sm:$0xff]  }
  0x4a   : > { %1120 = vmatprep.subr.bf16.mxu0 %v7476_v8  ;;  %1202 = vmatprep.subr.bf16.mxu1 %v7478_v9  ;;  %v7494_v20 = vld [vmem:[#allocation5 + $0xa4] ss:$16 sps:$4 sm:$0xff]   ;;  %v7496_v21 = vld [vmem:[#allocation5 + $0xac] ss:$16 sps:$4 sm:$0xff]   ;;  %v7498_v22 = vld [vmem:[#allocation5 + $0xa0] ss:$16 sps:$4 sm:$0xff]  }
  0x4b   : > { %v7499_v23 = vld [vmem:[#allocation5 + $0xa8] ss:$16 sps:$4 sm:$0xff]   ;;  %v7500_v24 = vld [vmem:[#allocation5 + $0xc4] ss:$16 sps:$4 sm:$0xff]   ;;  %v7502_v25 = vld [vmem:[#allocation5 + $0xcc] ss:$16 sps:$4 sm:$0xff]  }
  0x4c   : > { %v7504_v26 = vld [vmem:[#allocation5 + $0xc0] ss:$16 sps:$4 sm:$0xff]   ;;  %v7505_v27 = vld [vmem:[#allocation5 + $0xc8] ss:$16 sps:$4 sm:$0xff]   ;;  %v7506_v28 = vld [vmem:[#allocation5 + $0xe4] ss:$16 sps:$4 sm:$0xff]  }
  0x4d   : > { %1121 = vmatpush1.bf16.msra.mxu0 %v7480_v10  ;;  %1203 = vmatpush1.bf16.msra.mxu1 %v7481_v11  ;;  %v7508_v29 = vld [vmem:[#allocation5 + $0xec] ss:$16 sps:$4 sm:$0xff]   ;;  %v7510_v30 = vld [vmem:[#allocation5 + $0xe0] ss:$16 sps:$4 sm:$0xff]   ;;  %v7511_v31 = vld [vmem:[#allocation5 + $0xe8] ss:$16 sps:$4 sm:$0xff]  }
  0x4e   : > { %1122 = vmatprep.subr.bf16.mxu0 %v7482_v12  ;;  %1204 = vmatprep.subr.bf16.mxu1 %v7484_v13  ;;  %v7512_v32 = vld [vmem:[#allocation5 + $0x104] ss:$16 sps:$4 sm:$0xff]   ;;  %p299_p5 = scmp.lt.s32.totalorder %s8760_s25, 1  ;;  %v7514_v33 = vld [vmem:[#allocation5 + $0x10c] ss:$16 sps:$4 sm:$0xff]   ;;  %vm3259_vm2 = vcmask 1042432  }
  0x4f   : > { %v7516_v34 = vld [vmem:[#allocation5 + $0x100] ss:$16 sps:$4 sm:$0xff]   ;;  %v7517_v35 = vld [vmem:[#allocation5 + $0x108] ss:$16 sps:$4 sm:$0xff]   ;;  %v7518_v36 = vld [vmem:[#allocation5 + $0x124] ss:$16 sps:$4 sm:$0xff]  }
  0x50   : > { %s10189_s25 = smov (!%p299_p5, %s8760_s25), 1  ;;  %v7520_v37 = vld [vmem:[#allocation5 + $0x12c] ss:$16 sps:$4 sm:$0xff]   ;;  %v7522_v38 = vld [vmem:[#allocation5 + $0x120] ss:$16 sps:$4 sm:$0xff]   ;;  %vm3262_vm4 = vcmask 1046532  }
  0x51   : > { %1123 = vmatpush1.bf16.msra.mxu0 %v7486_v14  ;;  %1205 = vmatpush1.bf16.msra.mxu1 %v7487_v15  ;;  %v7523_v39 = vld [vmem:[#allocation5 + $0x128] ss:$16 sps:$4 sm:$0xff]   ;;  %v7524_v40 = vld [vmem:[#allocation5 + $0x144] ss:$16 sps:$4 sm:$0xff]   ;;  %s7363_s28 = sshll.u32 %s10189_s25, 4  ;;  %s7364_s30 = sshll.u32 %s10189_s25, 3 }
  0x52   : > { %1124 = vmatprep.subr.bf16.mxu0 %v7488_v16  ;;  %1206 = vmatprep.subr.bf16.mxu1 %v7490_v17  ;;  %v7526_v41 = vld [vmem:[#allocation5 + $0x14c] ss:$16 sps:$4 sm:$0xff]   ;;  %v7528_v42 = vld [vmem:[#allocation5 + $0x140] ss:$16 sps:$4 sm:$0xff]   ;;  %v7529_v43 = vld [vmem:[#allocation5 + $0x148] ss:$16 sps:$4 sm:$0xff]   ;;  %s8844_s13 = scalar_lea.vmem %s10167_s0, %s7363_s28  ;;  %s308_s14 = scalar_lea.vmem %s10174_s7, %s7364_s30 }
  0x53   : > { %v7530_v44 = vld [vmem:[#allocation5 + $0x164] ss:$16 sps:$4 sm:$0xff]   ;;  %v7532_v45 = vld [vmem:[#allocation5 + $0x16c] ss:$16 sps:$4 sm:$0xff]   ;;  %v7534_v47 = vld [vmem:[#allocation5 + $0x160] ss:$16 sps:$4 sm:$0xff]  }
  0x54   : > { %v310_v46 = vld [vmem:[%s8844_s13] sm:$0x33]  ;;  %v7535_v49 = vld [vmem:[#allocation5 + $0x168] ss:$16 sps:$4 sm:$0xff]   ;;  %v7538_v51 = vld [vmem:[#allocation5 + $0x18c] ss:$16 sps:$4 sm:$0xff]  }
  0x55   : > { %1125 = vmatpush1.bf16.msra.mxu0 %v7492_v18  ;;  %1207 = vmatpush1.bf16.msra.mxu1 %v7493_v19  ;;  %v8847_v48 = vcombine.high %v310_v46, %v310_v46  ;;  %v7536_v50 = vld [vmem:[#allocation5 + $0x184] ss:$16 sps:$4 sm:$0xff]   ;;  %v7540_v52 = vld [vmem:[#allocation5 + $0x180] ss:$16 sps:$4 sm:$0xff]   ;;  %v7541_v53 = vld [vmem:[#allocation5 + $0x188] ss:$16 sps:$4 sm:$0xff]   ;;  %v8851_v5 = vcombine.low %v310_v46, %v310_v46 }
  0x56   : > { %1126 = vmatprep.subr.bf16.mxu0 %v7494_v20  ;;  %1208 = vmatprep.subr.bf16.mxu1 %v7496_v21  ;;  %v7542_v54 = vld [vmem:[#allocation5 + $0x1a4] ss:$16 sps:$4 sm:$0xff]   ;;  %v7544_v55 = vld [vmem:[#allocation5 + $0x1ac] ss:$16 sps:$4 sm:$0xff]   ;;  %v7546_v56 = vld [vmem:[#allocation5 + $0x1a0] ss:$16 sps:$4 sm:$0xff]  }
  0x57   : > { %1148 = vmatprep.mubr.bf16.mxu0 %v8847_v48  ;;  %1230 = vmatprep.mubr.bf16.mxu1 %v8847_v48  ;;  %v7547_v57 = vld [vmem:[#allocation5 + $0x1a8] ss:$16 sps:$4 sm:$0xff]   ;;  %v7548_v58 = vld [vmem:[#allocation5 + $0x1c4] ss:$16 sps:$4 sm:$0xff]   ;;  %v7550_v59 = vld [vmem:[#allocation5 + $0x1cc] ss:$16 sps:$4 sm:$0xff]  }
  0x58   : > { %v7552_v60 = vld [vmem:[#allocation5 + $0x1c0] ss:$16 sps:$4 sm:$0xff]   ;;  %v7553_v61 = vld [vmem:[#allocation5 + $0x1c8] ss:$16 sps:$4 sm:$0xff]   ;;  %v7554_v62 = vld [vmem:[#allocation5 + $0x1e4] ss:$16 sps:$4 sm:$0xff]  }
  0x59   : > { %1127 = vmatpush1.bf16.msra.mxu0 %v7498_v22  ;;  %1209 = vmatpush1.bf16.msra.mxu1 %v7499_v23  ;;  %v7556_v63 = vld [vmem:[#allocation5 + $0x1ec] ss:$16 sps:$4 sm:$0xff]   ;;  %v7558_v0 = vld [vmem:[#allocation5 + $0x1e0] ss:$16 sps:$4 sm:$0xff]   ;;  %v7559_v1 = vld [vmem:[#allocation5 + $0x1e8] ss:$16 sps:$4 sm:$0xff]  }
  0x5a   : > { %1128 = vmatprep.subr.bf16.mxu0 %v7500_v24  ;;  %1210 = vmatprep.subr.bf16.mxu1 %v7502_v25  ;;  %v7563_v2 = vld [vmem:[#allocation5 + $0x204] ss:$16 sps:$4 sm:$0xff]   ;;  %v7566_v3 = vld [vmem:[#allocation5 + $0x20c] ss:$16 sps:$4 sm:$0xff]   ;;  %v7561_v4 = vld [vmem:[#allocation5 + $0x200] ss:$16 sps:$4 sm:$0xff]  }
  0x5b   : > { %v7564_v6 = vld [vmem:[#allocation5 + $0x208] ss:$16 sps:$4 sm:$0xff]   ;;  %v7570_v7 = vld [vmem:[#allocation5 + $0x224] ss:$16 sps:$4 sm:$0xff]   ;;  %v7573_v8 = vld [vmem:[#allocation5 + $0x22c] ss:$16 sps:$4 sm:$0xff]  }
  0x5c   : > { %v7568_v9 = vld [vmem:[#allocation5 + $0x220] ss:$16 sps:$4 sm:$0xff]   ;;  %v7571_v10 = vld [vmem:[#allocation5 + $0x228] ss:$16 sps:$4 sm:$0xff]   ;;  %v7576_v11 = vld [vmem:[#allocation5 + $0x244] ss:$16 sps:$4 sm:$0xff]  }
  0x5d   : > { %1129 = vmatpush1.bf16.msra.mxu0 %v7504_v26  ;;  %1211 = vmatpush1.bf16.msra.mxu1 %v7505_v27  ;;  %v7579_v12 = vld [vmem:[#allocation5 + $0x24c] ss:$16 sps:$4 sm:$0xff]   ;;  %v7574_v13 = vld [vmem:[#allocation5 + $0x240] ss:$16 sps:$4 sm:$0xff]   ;;  %v7577_v14 = vld [vmem:[#allocation5 + $0x248] ss:$16 sps:$4 sm:$0xff]  }
  0x5e   : > { %1130 = vmatprep.subr.bf16.mxu0 %v7506_v28  ;;  %1212 = vmatprep.subr.bf16.mxu1 %v7508_v29  ;;  %v7582_v15 = vld [vmem:[#allocation5 + $0x264] ss:$16 sps:$4 sm:$0xff]   ;;  %v7585_v16 = vld [vmem:[#allocation5 + $0x26c] ss:$16 sps:$4 sm:$0xff]   ;;  %v7580_v17 = vld [vmem:[#allocation5 + $0x260] ss:$16 sps:$4 sm:$0xff]  }
  0x5f   : > { %v7583_v18 = vld [vmem:[#allocation5 + $0x268] ss:$16 sps:$4 sm:$0xff]   ;;  %v7588_v19 = vld [vmem:[#allocation5 + $0x284] ss:$16 sps:$4 sm:$0xff]   ;;  %v7591_v20 = vld [vmem:[#allocation5 + $0x28c] ss:$16 sps:$4 sm:$0xff]  }
  0x60   : > { %v7586_v21 = vld [vmem:[#allocation5 + $0x280] ss:$16 sps:$4 sm:$0xff]   ;;  %v7589_v22 = vld [vmem:[#allocation5 + $0x288] ss:$16 sps:$4 sm:$0xff]   ;;  %v7594_v23 = vld [vmem:[#allocation5 + $0x2a4] ss:$16 sps:$4 sm:$0xff]  }
  0x61   : > { %1131 = vmatpush1.bf16.msra.mxu0 %v7510_v30  ;;  %1213 = vmatpush1.bf16.msra.mxu1 %v7511_v31  ;;  %v7597_v24 = vld [vmem:[#allocation5 + $0x2ac] ss:$16 sps:$4 sm:$0xff]   ;;  %v7592_v25 = vld [vmem:[#allocation5 + $0x2a0] ss:$16 sps:$4 sm:$0xff]   ;;  %v7595_v26 = vld [vmem:[#allocation5 + $0x2a8] ss:$16 sps:$4 sm:$0xff]  }
  0x62   : > { %1132 = vmatprep.subr.bf16.mxu0 %v7512_v32  ;;  %1214 = vmatprep.subr.bf16.mxu1 %v7514_v33  ;;  %v7600_v27 = vld [vmem:[#allocation5 + $0x2c4] ss:$16 sps:$4 sm:$0xff]   ;;  %v7603_v28 = vld [vmem:[#allocation5 + $0x2cc] ss:$16 sps:$4 sm:$0xff]   ;;  %v7598_v31 = vld [vmem:[#allocation5 + $0x2c0] ss:$16 sps:$4 sm:$0xff]  }
  0x63   : > { %v8856_v29 = vld [vmem:[%s8844_s13 + $0x8] sm:$0x33]  ;;  %v7606_v33 = vld [vmem:[#allocation5 + $0x2e4] ss:$16 sps:$4 sm:$0xff]   ;;  %vm3260_vm3 = vsmask.f32 2306 }
  0x64   : > { %v8860_v30 = vcombine.high %v8856_v29, %v8856_v29  ;;  %v7601_v32 = vld [vmem:[#allocation5 + $0x2c8] ss:$16 sps:$4 sm:$0xff]   ;;  %v7627_v46 = vld [vmem:[#allocation5 + $0x34c] ss:$16 sps:$4 sm:$0xff]   ;;  %vm3263_vm5 = vsmask.f32 6418  ;;  %vm9133_vm6 = vmand %vm3259_vm2, %vm3260_vm3 }
  0x65   : > { %1133 = vmatpush1.bf16.msra.mxu0 %v7516_v34  ;;  %1215 = vmatpush1.bf16.msra.mxu1 %v7517_v35  ;;  %v7609_v34 = vld [vmem:[#allocation5 + $0x2ec] ss:$16 sps:$4 sm:$0xff]   ;;  %v7604_v35 = vld [vmem:[#allocation5 + $0x2e0] ss:$16 sps:$4 sm:$0xff]   ;;  %vm9137_vm7 = vmand %vm3262_vm4, %vm3263_vm5 }
  0x66   : > { %1134 = vmatprep.subr.bf16.mxu0 %v7518_v36  ;;  %1216 = vmatprep.subr.bf16.mxu1 %v7520_v37  ;;  %v7607_v36 = vld [vmem:[#allocation5 + $0x2e8] ss:$16 sps:$4 sm:$0xff]   ;;  %v7612_v37 = vld [vmem:[#allocation5 + $0x304] ss:$16 sps:$4 sm:$0xff]   ;;  %vm3265_vm8 = vmor %vm9137_vm7, %vm9133_vm6 }
  0x69   : > { %1135 = vmatpush1.bf16.msra.mxu0 %v7522_v38  ;;  %1217 = vmatpush1.bf16.msra.mxu1 %v7523_v39  ;;  %v7615_v38 = vld [vmem:[#allocation5 + $0x30c] ss:$16 sps:$4 sm:$0xff]   ;;  %v7610_v39 = vld [vmem:[#allocation5 + $0x300] ss:$16 sps:$4 sm:$0xff]  }
  0x6a   : > { %1136 = vmatprep.subr.bf16.mxu0 %v7524_v40  ;;  %1218 = vmatprep.subr.bf16.mxu1 %v7526_v41  ;;  %v7613_v40 = vld [vmem:[#allocation5 + $0x308] ss:$16 sps:$4 sm:$0xff]   ;;  %v7618_v41 = vld [vmem:[#allocation5 + $0x324] ss:$16 sps:$4 sm:$0xff]  }
  0x6d   : > { %1137 = vmatpush1.bf16.msra.mxu0 %v7528_v42  ;;  %1219 = vmatpush1.bf16.msra.mxu1 %v7529_v43  ;;  %v7621_v42 = vld [vmem:[#allocation5 + $0x32c] ss:$16 sps:$4 sm:$0xff]   ;;  %v7616_v43 = vld [vmem:[#allocation5 + $0x320] ss:$16 sps:$4 sm:$0xff]  }
  0x6e   : > { %1138 = vmatprep.subr.bf16.mxu0 %v7530_v44  ;;  %1220 = vmatprep.subr.bf16.mxu1 %v7532_v45  ;;  %v7619_v44 = vld [vmem:[#allocation5 + $0x328] ss:$16 sps:$4 sm:$0xff]   ;;  %v7624_v45 = vld [vmem:[#allocation5 + $0x344] ss:$16 sps:$4 sm:$0xff]  }
  0x71   : > { %1139 = vmatpush1.bf16.msra.mxu0 %v7534_v47  ;;  %1221 = vmatpush1.bf16.msra.mxu1 %v7535_v49  ;;  %v7622_v47 = vld [vmem:[#allocation5 + $0x340] ss:$16 sps:$4 sm:$0xff]   ;;  %v7625_v49 = vld [vmem:[#allocation5 + $0x348] ss:$16 sps:$4 sm:$0xff]  }
  0x72   : > { %1140 = vmatprep.subr.bf16.mxu0 %v7536_v50  ;;  %1222 = vmatprep.subr.bf16.mxu1 %v7538_v51  ;;  %v7630_v50 = vld [vmem:[#allocation5 + $0x364] ss:$16 sps:$4 sm:$0xff]   ;;  %v7633_v51 = vld [vmem:[#allocation5 + $0x36c] ss:$16 sps:$4 sm:$0xff]  }
  0x75   : > { %1141 = vmatpush1.bf16.msra.mxu0 %v7540_v52  ;;  %1223 = vmatpush1.bf16.msra.mxu1 %v7541_v53  ;;  %v7628_v52 = vld [vmem:[#allocation5 + $0x360] ss:$16 sps:$4 sm:$0xff]   ;;  %v7631_v53 = vld [vmem:[#allocation5 + $0x368] ss:$16 sps:$4 sm:$0xff]  }
  0x76   : > { %1142 = vmatprep.subr.bf16.mxu0 %v7542_v54  ;;  %1224 = vmatprep.subr.bf16.mxu1 %v7544_v55  ;;  %v7636_v54 = vld [vmem:[#allocation5 + $0x384] ss:$16 sps:$4 sm:$0xff]   ;;  %v7639_v55 = vld [vmem:[#allocation5 + $0x38c] ss:$16 sps:$4 sm:$0xff]  }
  0x79   : > { %1143 = vmatpush1.bf16.msra.mxu0 %v7546_v56  ;;  %1225 = vmatpush1.bf16.msra.mxu1 %v7547_v57  ;;  %v7634_v56 = vld [vmem:[#allocation5 + $0x380] ss:$16 sps:$4 sm:$0xff]   ;;  %v7637_v57 = vld [vmem:[#allocation5 + $0x388] ss:$16 sps:$4 sm:$0xff]  }
  0x7a   : > { %1144 = vmatprep.subr.bf16.mxu0 %v7548_v58  ;;  %1226 = vmatprep.subr.bf16.mxu1 %v7550_v59  ;;  %v7642_v58 = vld [vmem:[#allocation5 + $0x3a4] ss:$16 sps:$4 sm:$0xff]   ;;  %v7645_v59 = vld [vmem:[#allocation5 + $0x3ac] ss:$16 sps:$4 sm:$0xff]  }
  0x7d   : > { %1145 = vmatpush1.bf16.msra.mxu0 %v7552_v60  ;;  %1227 = vmatpush1.bf16.msra.mxu1 %v7553_v61  ;;  %v7640_v60 = vld [vmem:[#allocation5 + $0x3a0] ss:$16 sps:$4 sm:$0xff]   ;;  %v7643_v61 = vld [vmem:[#allocation5 + $0x3a8] ss:$16 sps:$4 sm:$0xff]  }
  0x7e   : > { %1146 = vmatprep.subr.bf16.mxu0 %v7554_v62  ;;  %1228 = vmatprep.subr.bf16.mxu1 %v7556_v63  ;;  %v7648_v62 = vld [vmem:[#allocation5 + $0x3c4] ss:$16 sps:$4 sm:$0xff]   ;;  %v7651_v63 = vld [vmem:[#allocation5 + $0x3cc] ss:$16 sps:$4 sm:$0xff]  }
  0x81   : > { %1147 = vmatpush1.bf16.msra.mxu0 %v7558_v0  ;;  %1229 = vmatpush1.bf16.msra.mxu1 %v7559_v1  ;;  %v7646_v0 = vld [vmem:[#allocation5 + $0x3c0] ss:$16 sps:$4 sm:$0xff]   ;;  %v7649_v1 = vld [vmem:[#allocation5 + $0x3c8] ss:$16 sps:$4 sm:$0xff]  }
  0x82   : > { %1157 = vmatprep.subr.bf16.mxu0 %v7563_v2  ;;  %1239 = vmatprep.subr.bf16.mxu1 %v7566_v3  ;;  %v7654_v2 = vld [vmem:[#allocation5 + $0x3e4] ss:$16 sps:$4 sm:$0xff]   ;;  %v7657_v3 = vld [vmem:[#allocation5 + $0x3ec] ss:$16 sps:$4 sm:$0xff]  }
  0x84   : > { %1149 = vmatmul.mubr.bf16.vlgmr.msra.gmra.mrb[0].mxu0 %v8851_v5  ;;  %1231 = vmatmul.mubr.bf16.vlgmr.msra.gmra.mrb[0].mxu1 %v8851_v5 }
  0x85   : > { %1158 = vmatpush1.bf16.msra.mxu0 %v7561_v4  ;;  %1240 = vmatpush1.bf16.msra.mxu1 %v7564_v6  ;;  %v7652_v4 = vld [vmem:[#allocation5 + $0x3e0] ss:$16 sps:$4 sm:$0xff]   ;;  %v7655_v6 = vld [vmem:[#allocation5 + $0x3e8] ss:$16 sps:$4 sm:$0xff]  }
  0x86   : > { %1159 = vmatprep.subr.bf16.mxu0 %v7570_v7  ;;  %1241 = vmatprep.subr.bf16.mxu1 %v7573_v8  ;;  %v7661_v7 = vld [vmem:[#allocation3 + $0x404] ss:$16 sps:$4 sm:$0xff]  }
  0x87   : > { %1189 = vmatprep.mubr.bf16.mxu0 %v8860_v30  ;;  %1271 = vmatprep.mubr.bf16.mxu1 %v8860_v30  ;;  %v7664_v8 = vld [vmem:[#allocation3 + $0x604] ss:$16 sps:$4 sm:$0xff]  }
  0x89   : > { %1160 = vmatpush1.bf16.msra.mxu0 %v7568_v9  ;;  %1242 = vmatpush1.bf16.msra.mxu1 %v7571_v10  ;;  %v7659_v9 = vld [vmem:[#allocation3 + $0x400] ss:$16 sps:$4 sm:$0xff]  }
  0x8a   : > { %1161 = vmatprep.subr.bf16.mxu0 %v7576_v11  ;;  %1243 = vmatprep.subr.bf16.mxu1 %v7579_v12  ;;  %v7662_v10 = vld [vmem:[#allocation3 + $0x600] ss:$16 sps:$4 sm:$0xff]   ;;  %v8866_v11 = vcombine.low %v8856_v29, %v8856_v29  ;;  %v7668_v12 = vld [vmem:[#allocation3 + $0x424] ss:$16 sps:$4 sm:$0xff]  }
  0x8b   : > { %v7675_v29 = vld [vmem:[#allocation3 + $0x640] ss:$16 sps:$4 sm:$0xff]  }
  0x8d   : > { %1162 = vmatpush1.bf16.msra.mxu0 %v7574_v13  ;;  %1244 = vmatpush1.bf16.msra.mxu1 %v7577_v14  ;;  %v7671_v13 = vld [vmem:[#allocation3 + $0x624] ss:$16 sps:$4 sm:$0xff]  }
  0x8e   : > { %1163 = vmatprep.subr.bf16.mxu0 %v7582_v15  ;;  %1245 = vmatprep.subr.bf16.mxu1 %v7585_v16  ;;  %v8869_v14 = vld [vmem:[%s8844_s13] sm:$0x77]  ;;  %v8874_v16 = vld [vmem:[%s8844_s13 + $0x8] sm:$0x77] }
  0x8f   : > { %v6446_v15 = vcombine.high %v8869_v14, %v8869_v14 }
  0x91   : > { %1164 = vmatpush1.bf16.msra.mxu0 %v7580_v17  ;;  %1246 = vmatpush1.bf16.msra.mxu1 %v7583_v18  ;;  %v6448_v17 = vcombine.high %v8874_v16, %v8874_v16  ;;  %v7666_v18 = vld [vmem:[#allocation3 + $0x420] ss:$16 sps:$4 sm:$0xff]  }
  0x92   : > { %1165 = vmatprep.subr.bf16.mxu0 %v7588_v19  ;;  %1247 = vmatprep.subr.bf16.mxu1 %v7591_v20  ;;  %v1557_v19 = vshrl.u32 %v6446_v15, 16  ;;  %v1559_v20 = vshll.u32 %v6446_v15, 16  ;;  %v7738_v15 = vld [vmem:[#allocation3 + $0x5a0] ss:$16 sps:$4 sm:$0xff]  }
  0x95   : > { %1166 = vmatpush1.bf16.msra.mxu0 %v7586_v21  ;;  %1248 = vmatpush1.bf16.msra.mxu1 %v7589_v22  ;;  %v7669_v21 = vld [vmem:[#allocation3 + $0x620] ss:$16 sps:$4 sm:$0xff]   ;;  %v7674_v22 = vld [vmem:[#allocation3 + $0x444] ss:$16 sps:$4 sm:$0xff]  }
  0x96   : > { %1167 = vmatprep.subr.bf16.mxu0 %v7594_v23  ;;  %1249 = vmatprep.subr.bf16.mxu1 %v7597_v24  ;;  %v1571_v23 = vshrl.u32 %v6448_v17, 16  ;;  %v1573_v24 = vshll.u32 %v6448_v17, 16  ;;  %v7741_v17 = vld [vmem:[#allocation3 + $0x7a0] ss:$16 sps:$4 sm:$0xff]  }
  0x99   : > { %1168 = vmatpush1.bf16.msra.mxu0 %v7592_v25  ;;  %1250 = vmatpush1.bf16.msra.mxu1 %v7595_v26  ;;  %v7677_v25 = vld [vmem:[#allocation3 + $0x644] ss:$16 sps:$4 sm:$0xff]   ;;  %v1561_v26 = vrot.slane %v1559_v20, 1 }
  0x9a   : > { %1169 = vmatprep.subr.bf16.mxu0 %v7600_v27  ;;  %1251 = vmatprep.subr.bf16.mxu1 %v7603_v28  ;;  %v1575_v27 = vrot.slane %v1573_v24, 1  ;;  %v7672_v28 = vld [vmem:[#allocation3 + $0x440] ss:$16 sps:$4 sm:$0xff]   ;;  %v7746_v20 = vld [vmem:[#allocation3 + $0x5c4] ss:$16 sps:$4 sm:$0xff]  }
  0x9d   : > { %1170 = vmatpush1.bf16.msra.mxu0 %v7598_v31  ;;  %1252 = vmatpush1.bf16.msra.mxu1 %v7601_v32  ;;  %v8880_v31 = vor.u32 %v1561_v26, %v1557_v19  ;;  %v7680_v32 = vld [vmem:[#allocation3 + $0x464] ss:$16 sps:$4 sm:$0xff]   ;;  %v6447_v19 = vcombine.low %v8874_v16, %v8874_v16 }
  0x9e   : > { %1171 = vmatprep.subr.bf16.mxu0 %v7606_v33  ;;  %1253 = vmatprep.subr.bf16.mxu1 %v7609_v34  ;;  %v8882_v33 = vor.u32 %v1575_v27, %v1571_v23  ;;  %v7683_v34 = vld [vmem:[#allocation3 + $0x664] ss:$16 sps:$4 sm:$0xff]   ;;  %v7747_v23 = vld [vmem:[#allocation3 + $0x7c0] ss:$16 sps:$4 sm:$0xff]  }
  0x9f   : > { %v7752_v26 = vld [vmem:[#allocation3 + $0x5e4] ss:$16 sps:$4 sm:$0xff]  }
  0xa0   : > { %v7755_v27 = vld [vmem:[#allocation3 + $0x7e4] ss:$16 sps:$4 sm:$0xff]  }
  0xa1   : > { %1172 = vmatpush1.bf16.msra.mxu0 %v7604_v35  ;;  %1254 = vmatpush1.bf16.msra.mxu1 %v7607_v36  ;;  %v7678_v35 = vld [vmem:[#allocation3 + $0x460] ss:$16 sps:$4 sm:$0xff]  }
  0xa2   : > { %1173 = vmatprep.subr.bf16.mxu0 %v7612_v37  ;;  %1255 = vmatprep.subr.bf16.mxu1 %v7615_v38  ;;  %v7681_v36 = vld [vmem:[#allocation3 + $0x660] ss:$16 sps:$4 sm:$0xff]   ;;  %v7686_v37 = vld [vmem:[#allocation3 + $0x484] ss:$16 sps:$4 sm:$0xff]  }
  0xa3   : > { %v7689_v38 = vld [vmem:[#allocation3 + $0x684] ss:$16 sps:$4 sm:$0xff]  }
  0xa5   : > { %1174 = vmatpush1.bf16.msra.mxu0 %v7610_v39  ;;  %1256 = vmatpush1.bf16.msra.mxu1 %v7613_v40  ;;  %v7684_v39 = vld [vmem:[#allocation3 + $0x480] ss:$16 sps:$4 sm:$0xff]  }
  0xa6   : > { %1175 = vmatprep.subr.bf16.mxu0 %v7618_v41  ;;  %1257 = vmatprep.subr.bf16.mxu1 %v7621_v42  ;;  %v7687_v40 = vld [vmem:[#allocation3 + $0x680] ss:$16 sps:$4 sm:$0xff]   ;;  %v7692_v41 = vld [vmem:[#allocation3 + $0x4a4] ss:$16 sps:$4 sm:$0xff]  }
  0xa7   : > { %v7695_v42 = vld [vmem:[#allocation3 + $0x6a4] ss:$16 sps:$4 sm:$0xff]  }
  0xa9   : > { %1176 = vmatpush1.bf16.msra.mxu0 %v7616_v43  ;;  %1258 = vmatpush1.bf16.msra.mxu1 %v7619_v44  ;;  %v7690_v43 = vld [vmem:[#allocation3 + $0x4a0] ss:$16 sps:$4 sm:$0xff]  }
  0xaa   : > { %1177 = vmatprep.subr.bf16.mxu0 %v7624_v45  ;;  %1259 = vmatprep.subr.bf16.mxu1 %v7627_v46  ;;  %v7693_v44 = vld [vmem:[#allocation3 + $0x6a0] ss:$16 sps:$4 sm:$0xff]   ;;  %v7698_v45 = vld [vmem:[#allocation3 + $0x4c4] ss:$16 sps:$4 sm:$0xff]  }
  0xab   : > { %v7701_v46 = vld [vmem:[#allocation3 + $0x6c4] ss:$16 sps:$4 sm:$0xff]  }
  0xad   : > { %1178 = vmatpush1.bf16.msra.mxu0 %v7622_v47  ;;  %1260 = vmatpush1.bf16.msra.mxu1 %v7625_v49  ;;  %v7696_v47 = vld [vmem:[#allocation3 + $0x4c0] ss:$16 sps:$4 sm:$0xff]  }
  0xae   : > { %1179 = vmatprep.subr.bf16.mxu0 %v7630_v50  ;;  %1261 = vmatprep.subr.bf16.mxu1 %v7633_v51  ;;  %v7699_v49 = vld [vmem:[#allocation3 + $0x6c0] ss:$16 sps:$4 sm:$0xff]   ;;  %v7704_v50 = vld [vmem:[#allocation3 + $0x4e4] ss:$16 sps:$4 sm:$0xff]  }
  0xaf   : > { %v7707_v51 = vld [vmem:[#allocation3 + $0x6e4] ss:$16 sps:$4 sm:$0xff]  }
  0xb1   : > { %1180 = vmatpush1.bf16.msra.mxu0 %v7628_v52  ;;  %1262 = vmatpush1.bf16.msra.mxu1 %v7631_v53  ;;  %v7702_v52 = vld [vmem:[#allocation3 + $0x4e0] ss:$16 sps:$4 sm:$0xff]  }
  0xb2   : > { %1181 = vmatprep.subr.bf16.mxu0 %v7636_v54  ;;  %1263 = vmatprep.subr.bf16.mxu1 %v7639_v55  ;;  %v7705_v53 = vld [vmem:[#allocation3 + $0x6e0] ss:$16 sps:$4 sm:$0xff]   ;;  %v7710_v54 = vld [vmem:[#allocation3 + $0x504] ss:$16 sps:$4 sm:$0xff]  }
  0xb3   : > { %v7713_v55 = vld [vmem:[#allocation3 + $0x704] ss:$16 sps:$4 sm:$0xff]  }
  0xb5   : > { %1182 = vmatpush1.bf16.msra.mxu0 %v7634_v56  ;;  %1264 = vmatpush1.bf16.msra.mxu1 %v7637_v57  ;;  %v7708_v56 = vld [vmem:[#allocation3 + $0x500] ss:$16 sps:$4 sm:$0xff]  }
  0xb6   : > { %1183 = vmatprep.subr.bf16.mxu0 %v7642_v58  ;;  %1265 = vmatprep.subr.bf16.mxu1 %v7645_v59  ;;  %v7711_v57 = vld [vmem:[#allocation3 + $0x700] ss:$16 sps:$4 sm:$0xff]   ;;  %v7716_v58 = vld [vmem:[#allocation3 + $0x524] ss:$16 sps:$4 sm:$0xff]  }
  0xb7   : > { %v7719_v59 = vld [vmem:[#allocation3 + $0x724] ss:$16 sps:$4 sm:$0xff]  }
  0xb9   : > { %1184 = vmatpush1.bf16.msra.mxu0 %v7640_v60  ;;  %1266 = vmatpush1.bf16.msra.mxu1 %v7643_v61  ;;  %v7714_v60 = vld [vmem:[#allocation3 + $0x520] ss:$16 sps:$4 sm:$0xff]  }
  0xba   : > { %1185 = vmatprep.subr.bf16.mxu0 %v7648_v62  ;;  %1267 = vmatprep.subr.bf16.mxu1 %v7651_v63  ;;  %v7717_v61 = vld [vmem:[#allocation3 + $0x720] ss:$16 sps:$4 sm:$0xff]   ;;  %v7722_v62 = vld [vmem:[#allocation3 + $0x544] ss:$16 sps:$4 sm:$0xff]  }
  0xbb   : > { %v7725_v63 = vld [vmem:[#allocation3 + $0x744] ss:$16 sps:$4 sm:$0xff]  }
  0xbd   : > { %1186 = vmatpush1.bf16.msra.mxu0 %v7646_v0  ;;  %1268 = vmatpush1.bf16.msra.mxu1 %v7649_v1  ;;  %v7720_v0 = vld [vmem:[#allocation3 + $0x540] ss:$16 sps:$4 sm:$0xff]  }
  0xbe   : > { %1187 = vmatprep.subr.bf16.mxu0 %v7654_v2  ;;  %1269 = vmatprep.subr.bf16.mxu1 %v7657_v3  ;;  %v7723_v1 = vld [vmem:[#allocation3 + $0x740] ss:$16 sps:$4 sm:$0xff]   ;;  %v7728_v2 = vld [vmem:[#allocation3 + $0x564] ss:$16 sps:$4 sm:$0xff]  }
  0xbf   : > { %v7731_v3 = vld [vmem:[#allocation3 + $0x764] ss:$16 sps:$4 sm:$0xff]  }
  0xc1   : > { %1188 = vmatpush1.bf16.msra.mxu0 %v7652_v4  ;;  %1270 = vmatpush1.bf16.msra.mxu1 %v7655_v6  ;;  %v7726_v4 = vld [vmem:[#allocation3 + $0x560] ss:$16 sps:$4 sm:$0xff]  }
  0xc2   : > { %2221 = vmatprep.subr.bf16.mxu0 %v7661_v7  ;;  %2262 = vmatprep.subr.bf16.mxu1 %v7664_v8  ;;  %v7729_v6 = vld [vmem:[#allocation3 + $0x760] ss:$16 sps:$4 sm:$0xff]   ;;  %v7734_v7 = vld [vmem:[#allocation3 + $0x584] ss:$16 sps:$4 sm:$0xff]  }
  0xc3   : > { %v7737_v8 = vld [vmem:[#allocation3 + $0x784] ss:$16 sps:$4 sm:$0xff]  }
  0xc4   : > { %1190 = vmatmul.mubr.bf16.vlgmr.msra.gmra.mrb[0].mxu0 %v8866_v11  ;;  %1272 = vmatmul.mubr.bf16.vlgmr.msra.gmra.mrb[0].mxu1 %v8866_v11 }
  0xc5   : > { %2222 = vmatpush1.bf16.msra.mxu0 %v7659_v9  ;;  %2263 = vmatpush1.bf16.msra.mxu1 %v7662_v10  ;;  %v7732_v9 = vld [vmem:[#allocation3 + $0x580] ss:$16 sps:$4 sm:$0xff]  }
  0xc6   : > { %2223 = vmatprep.subr.bf16.mxu0 %v7668_v12  ;;  %2264 = vmatprep.subr.bf16.mxu1 %v7671_v13  ;;  %v7735_v10 = vld [vmem:[#allocation3 + $0x780] ss:$16 sps:$4 sm:$0xff]   ;;  %v7740_v12 = vld [vmem:[#allocation3 + $0x5a4] ss:$16 sps:$4 sm:$0xff]  }
  0xc7   : > { %2253 = vmatprep.mubr.bf16.mxu0 %v8880_v31  ;;  %2294 = vmatprep.mubr.bf16.mxu1 %v8882_v33  ;;  %v7743_v13 = vld [vmem:[#allocation3 + $0x7a4] ss:$16 sps:$4 sm:$0xff]  }
  0xc9   : > { %2224 = vmatpush1.bf16.msra.mxu0 %v7666_v18  ;;  %2265 = vmatpush1.bf16.msra.mxu1 %v7669_v21  ;;  %v6445_v18 = vcombine.low %v8869_v14, %v8869_v14  ;;  %v7749_v21 = vld [vmem:[#allocation3 + $0x7c4] ss:$16 sps:$4 sm:$0xff]   ;;  %v7750_v14 = vld [vmem:[#allocation3 + $0x5e0] ss:$16 sps:$4 sm:$0xff]  }
  0xca   : > { %2225 = vmatprep.subr.bf16.mxu0 %v7674_v22  ;;  %2266 = vmatprep.subr.bf16.mxu1 %v7677_v25  ;;  %v7744_v22 = vld [vmem:[#allocation3 + $0x5c0] ss:$16 sps:$4 sm:$0xff]   ;;  %v1566_v25 = vshll.u32 %v6447_v19, 16 }
  0xcb   : > { %v1552_v24 = vshll.u32 %v6445_v18, 16 }
  0xcd   : > { %2226 = vmatpush1.bf16.msra.mxu0 %v7672_v28  ;;  %2267 = vmatpush1.bf16.msra.mxu1 %v7675_v29  ;;  %v7753_v28 = vld [vmem:[#allocation3 + $0x7e0] ss:$16 sps:$4 sm:$0xff]   ;;  %v1550_v29 = vshrl.u32 %v6445_v18, 16  ;;  %v1554_v16 = vrot.slane %v1552_v24, 1  ;;  %v7820_v18 = vld [vmem:[#allocation3 + $0x548] ss:$16 sps:$4 sm:$0xff]  }
  0xce   : > { %2227 = vmatprep.subr.bf16.mxu0 %v7680_v32  ;;  %2268 = vmatprep.subr.bf16.mxu1 %v7683_v34  ;;  %v1564_v32 = vshrl.u32 %v6447_v19, 16  ;;  %v1568_v34 = vrot.slane %v1566_v25, 1  ;;  %v7823_v19 = vld [vmem:[#allocation3 + $0x748] ss:$16 sps:$4 sm:$0xff]   ;;  %v7834_v24 = vld [vmem:[#allocation3 + $0x58c] ss:$16 sps:$4 sm:$0xff]  }
  0xcf   : > { %v7837_v25 = vld [vmem:[#allocation3 + $0x78c] ss:$16 sps:$4 sm:$0xff]  }
  0xd1   : > { %2228 = vmatpush1.bf16.msra.mxu0 %v7678_v35  ;;  %2269 = vmatpush1.bf16.msra.mxu1 %v7681_v36  ;;  %v7762_v35 = vld [vmem:[#allocation3 + $0x40c] ss:$16 sps:$4 sm:$0xff]  }
  0xd2   : > { %2229 = vmatprep.subr.bf16.mxu0 %v7686_v37  ;;  %2270 = vmatprep.subr.bf16.mxu1 %v7689_v38  ;;  %v7765_v36 = vld [vmem:[#allocation3 + $0x60c] ss:$16 sps:$4 sm:$0xff]   ;;  %v8890_v37 = vor.u32 %v1554_v16, %v1550_v29  ;;  %v8892_v38 = vor.u32 %v1568_v34, %v1564_v32  ;;  %v7838_v29 = vld [vmem:[#allocation3 + $0x5a8] ss:$16 sps:$4 sm:$0xff]  }
  0xd3   : > { %v7841_v16 = vld [vmem:[#allocation3 + $0x7a8] ss:$16 sps:$4 sm:$0xff]   ;;  %v7846_v32 = vld [vmem:[#allocation3 + $0x5cc] ss:$16 sps:$4 sm:$0xff]  }
  0xd4   : > { %v7849_v34 = vld [vmem:[#allocation3 + $0x7cc] ss:$16 sps:$4 sm:$0xff]  }
  0xd5   : > { %2230 = vmatpush1.bf16.msra.mxu0 %v7684_v39  ;;  %2271 = vmatpush1.bf16.msra.mxu1 %v7687_v40  ;;  %v7760_v39 = vld [vmem:[#allocation3 + $0x408] ss:$16 sps:$4 sm:$0xff]  }
  0xd6   : > { %2231 = vmatprep.subr.bf16.mxu0 %v7692_v41  ;;  %2272 = vmatprep.subr.bf16.mxu1 %v7695_v42  ;;  %v7763_v40 = vld [vmem:[#allocation3 + $0x608] ss:$16 sps:$4 sm:$0xff]   ;;  %v7768_v41 = vld [vmem:[#allocation3 + $0x42c] ss:$16 sps:$4 sm:$0xff]  }
  0xd7   : > { %v7771_v42 = vld [vmem:[#allocation3 + $0x62c] ss:$16 sps:$4 sm:$0xff]  }
  0xd9   : > { %2232 = vmatpush1.bf16.msra.mxu0 %v7690_v43  ;;  %2273 = vmatpush1.bf16.msra.mxu1 %v7693_v44  ;;  %v7766_v43 = vld [vmem:[#allocation3 + $0x428] ss:$16 sps:$4 sm:$0xff]  }
  0xda   : > { %2233 = vmatprep.subr.bf16.mxu0 %v7698_v45  ;;  %2274 = vmatprep.subr.bf16.mxu1 %v7701_v46  ;;  %v7769_v44 = vld [vmem:[#allocation3 + $0x628] ss:$16 sps:$4 sm:$0xff]   ;;  %v7774_v45 = vld [vmem:[#allocation3 + $0x44c] ss:$16 sps:$4 sm:$0xff]  }
  0xdb   : > { %v7777_v46 = vld [vmem:[#allocation3 + $0x64c] ss:$16 sps:$4 sm:$0xff]  }
  0xdd   : > { %2234 = vmatpush1.bf16.msra.mxu0 %v7696_v47  ;;  %2275 = vmatpush1.bf16.msra.mxu1 %v7699_v49  ;;  %v7772_v47 = vld [vmem:[#allocation3 + $0x448] ss:$16 sps:$4 sm:$0xff]  }
  0xde   : > { %2235 = vmatprep.subr.bf16.mxu0 %v7704_v50  ;;  %2276 = vmatprep.subr.bf16.mxu1 %v7707_v51  ;;  %v7775_v49 = vld [vmem:[#allocation3 + $0x648] ss:$16 sps:$4 sm:$0xff]   ;;  %v7780_v50 = vld [vmem:[#allocation3 + $0x46c] ss:$16 sps:$4 sm:$0xff]  }
  0xdf   : > { %v7783_v51 = vld [vmem:[#allocation3 + $0x66c] ss:$16 sps:$4 sm:$0xff]  }
  0xe1   : > { %2236 = vmatpush1.bf16.msra.mxu0 %v7702_v52  ;;  %2277 = vmatpush1.bf16.msra.mxu1 %v7705_v53  ;;  %v7778_v52 = vld [vmem:[#allocation3 + $0x468] ss:$16 sps:$4 sm:$0xff]  }
  0xe2   : > { %2237 = vmatprep.subr.bf16.mxu0 %v7710_v54  ;;  %2278 = vmatprep.subr.bf16.mxu1 %v7713_v55  ;;  %v7781_v53 = vld [vmem:[#allocation3 + $0x668] ss:$16 sps:$4 sm:$0xff]   ;;  %v7786_v54 = vld [vmem:[#allocation3 + $0x48c] ss:$16 sps:$4 sm:$0xff]  }
  0xe3   : > { %v7789_v55 = vld [vmem:[#allocation3 + $0x68c] ss:$16 sps:$4 sm:$0xff]  }
  0xe5   : > { %2238 = vmatpush1.bf16.msra.mxu0 %v7708_v56  ;;  %2279 = vmatpush1.bf16.msra.mxu1 %v7711_v57  ;;  %v7784_v56 = vld [vmem:[#allocation3 + $0x488] ss:$16 sps:$4 sm:$0xff]   ;;  %v7795_v57 = vld [vmem:[#allocation3 + $0x6ac] ss:$16 sps:$4 sm:$0xff]  }
  0xe6   : > { %2239 = vmatprep.subr.bf16.mxu0 %v7716_v58  ;;  %2280 = vmatprep.subr.bf16.mxu1 %v7719_v59  ;;  %v7790_v58 = vld [vmem:[#allocation3 + $0x4a8] ss:$16 sps:$4 sm:$0xff]  }
  0xe7   : > { %v7793_v59 = vld [vmem:[#allocation3 + $0x6a8] ss:$16 sps:$4 sm:$0xff]  }
  0xe9   : > { %2240 = vmatpush1.bf16.msra.mxu0 %v7714_v60  ;;  %2281 = vmatpush1.bf16.msra.mxu1 %v7717_v61  ;;  %v7798_v60 = vld [vmem:[#allocation3 + $0x4cc] ss:$16 sps:$4 sm:$0xff]  }
  0xea   : > { %2241 = vmatprep.subr.bf16.mxu0 %v7722_v62  ;;  %2282 = vmatprep.subr.bf16.mxu1 %v7725_v63  ;;  %v7801_v61 = vld [vmem:[#allocation3 + $0x6cc] ss:$16 sps:$4 sm:$0xff]   ;;  %v7796_v62 = vld [vmem:[#allocation3 + $0x4c8] ss:$16 sps:$4 sm:$0xff]  }
  0xeb   : > { %v7799_v63 = vld [vmem:[#allocation3 + $0x6c8] ss:$16 sps:$4 sm:$0xff]  }
  0xed   : > { %2242 = vmatpush1.bf16.msra.mxu0 %v7720_v0  ;;  %2283 = vmatpush1.bf16.msra.mxu1 %v7723_v1  ;;  %v7804_v0 = vld [vmem:[#allocation3 + $0x4ec] ss:$16 sps:$4 sm:$0xff]  }
  0xee   : > { %2243 = vmatprep.subr.bf16.mxu0 %v7728_v2  ;;  %2284 = vmatprep.subr.bf16.mxu1 %v7731_v3  ;;  %v7807_v1 = vld [vmem:[#allocation3 + $0x6ec] ss:$16 sps:$4 sm:$0xff]   ;;  %v7802_v2 = vld [vmem:[#allocation3 + $0x4e8] ss:$16 sps:$4 sm:$0xff]  }
  0xef   : > { %v7805_v3 = vld [vmem:[#allocation3 + $0x6e8] ss:$16 sps:$4 sm:$0xff]  }
  0xf1   : > { %2244 = vmatpush1.bf16.msra.mxu0 %v7726_v4  ;;  %2285 = vmatpush1.bf16.msra.mxu1 %v7729_v6  ;;  %v7810_v4 = vld [vmem:[#allocation3 + $0x50c] ss:$16 sps:$4 sm:$0xff]  }
  0xf2   : > { %2245 = vmatprep.subr.bf16.mxu0 %v7734_v7  ;;  %2286 = vmatprep.subr.bf16.mxu1 %v7737_v8  ;;  %v7813_v6 = vld [vmem:[#allocation3 + $0x70c] ss:$16 sps:$4 sm:$0xff]   ;;  %v7808_v7 = vld [vmem:[#allocation3 + $0x508] ss:$16 sps:$4 sm:$0xff]  }
  0xf3   : > { %v7811_v8 = vld [vmem:[#allocation3 + $0x708] ss:$16 sps:$4 sm:$0xff]  }
  0xf5   : > { %2246 = vmatpush1.bf16.msra.mxu0 %v7732_v9  ;;  %2287 = vmatpush1.bf16.msra.mxu1 %v7735_v10  ;;  %v7816_v9 = vld [vmem:[#allocation3 + $0x52c] ss:$16 sps:$4 sm:$0xff]  }
  0xf6   : > { %2247 = vmatprep.subr.bf16.mxu0 %v7740_v12  ;;  %2288 = vmatprep.subr.bf16.mxu1 %v7743_v13  ;;  %v7819_v10 = vld [vmem:[#allocation3 + $0x72c] ss:$16 sps:$4 sm:$0xff]   ;;  %v7814_v12 = vld [vmem:[#allocation3 + $0x528] ss:$16 sps:$4 sm:$0xff]  }
  0xf7   : > { %v7817_v13 = vld [vmem:[#allocation3 + $0x728] ss:$16 sps:$4 sm:$0xff]  }
  0xf9   : > { %2248 = vmatpush1.bf16.msra.mxu0 %v7738_v15  ;;  %2289 = vmatpush1.bf16.msra.mxu1 %v7741_v17  ;;  %v7822_v15 = vld [vmem:[#allocation3 + $0x54c] ss:$16 sps:$4 sm:$0xff]  }
  0xfa   : > { %2249 = vmatprep.subr.bf16.mxu0 %v7746_v20  ;;  %2290 = vmatprep.subr.bf16.mxu1 %v7749_v21  ;;  %v7825_v17 = vld [vmem:[#allocation3 + $0x74c] ss:$16 sps:$4 sm:$0xff]  }
  0xfb   : > { %v7828_v20 = vld [vmem:[#allocation3 + $0x56c] ss:$16 sps:$4 sm:$0xff]  }
  0xfc   : > { %v7831_v21 = vld [vmem:[#allocation3 + $0x76c] ss:$16 sps:$4 sm:$0xff]  }
  0xfd   : > { %2250 = vmatpush1.bf16.msra.mxu0 %v7744_v22  ;;  %2291 = vmatpush1.bf16.msra.mxu1 %v7747_v23  ;;  %v7826_v22 = vld [vmem:[#allocation3 + $0x568] ss:$16 sps:$4 sm:$0xff]  }
  0xfe   : > { %2251 = vmatprep.subr.bf16.mxu0 %v7752_v26  ;;  %2292 = vmatprep.subr.bf16.mxu1 %v7755_v27  ;;  %v7829_v23 = vld [vmem:[#allocation3 + $0x768] ss:$16 sps:$4 sm:$0xff]  }
  0xff   : > { %v7832_v26 = vld [vmem:[#allocation3 + $0x588] ss:$16 sps:$4 sm:$0xff]  }
 0x100   : > { %v7835_v27 = vld [vmem:[#allocation3 + $0x788] ss:$16 sps:$4 sm:$0xff]  }
 0x101   : > { %2252 = vmatpush1.bf16.msra.mxu0 %v7750_v14  ;;  %2293 = vmatpush1.bf16.msra.mxu1 %v7753_v28  ;;  %v7840_v14 = vld [vmem:[#allocation3 + $0x5ac] ss:$16 sps:$4 sm:$0xff]  }
 0x102   : > { %2303 = vmatprep.subr.bf16.mxu0 %v7762_v35  ;;  %2344 = vmatprep.subr.bf16.mxu1 %v7765_v36  ;;  %v7843_v28 = vld [vmem:[#allocation3 + $0x7ac] ss:$16 sps:$4 sm:$0xff]   ;;  %v7844_v35 = vld [vmem:[#allocation3 + $0x5c8] ss:$16 sps:$4 sm:$0xff]  }
 0x103   : > { %v7847_v36 = vld [vmem:[#allocation3 + $0x7c8] ss:$16 sps:$4 sm:$0xff]  }
 0x104   : > { %2254 = vmatmul.mubr.bf16.vlgmr.msra.gmra.mrb[4].mxu0 %v8890_v37  ;;  %2295 = vmatmul.mubr.bf16.vlgmr.msra.gmra.mrb[4].mxu1 %v8892_v38 }
 0x105   : > { %2304 = vmatpush1.bf16.msra.mxu0 %v7760_v39  ;;  %2345 = vmatpush1.bf16.msra.mxu1 %v7763_v40  ;;  %v7852_v39 = vld [vmem:[#allocation3 + $0x5ec] ss:$16 sps:$4 sm:$0xff]  }
 0x106   : > { %2305 = vmatprep.subr.bf16.mxu0 %v7768_v41  ;;  %2346 = vmatprep.subr.bf16.mxu1 %v7771_v42  ;;  %v7855_v40 = vld [vmem:[#allocation3 + $0x7ec] ss:$16 sps:$4 sm:$0xff]   ;;  %v7850_v41 = vld [vmem:[#allocation3 + $0x5e8] ss:$16 sps:$4 sm:$0xff]  }
 0x107   : > { %2335 = vmatprep.mubr.bf16.mxu0 %v8880_v31  ;;  %2376 = vmatprep.mubr.bf16.mxu1 %v8882_v33  ;;  %v7787_v31 = vld [vmem:[#allocation3 + $0x688] ss:$16 sps:$4 sm:$0xff]   ;;  %v7792_v33 = vld [vmem:[#allocation3 + $0x4ac] ss:$16 sps:$4 sm:$0xff]  }
 0x108   : > { %v7853_v42 = vld [vmem:[#allocation3 + $0x7e8] ss:$16 sps:$4 sm:$0xff]  }
 0x109   : > { %2306 = vmatpush1.bf16.msra.mxu0 %v7766_v43  ;;  %2347 = vmatpush1.bf16.msra.mxu1 %v7769_v44  ;;  %v7858_v43 = vld [vmem:[#allocation3 + $0x4] ss:$16 sps:$4 sm:$0xff]  }
 0x10a   : > { %2307 = vmatprep.subr.bf16.mxu0 %v7774_v45  ;;  %2348 = vmatprep.subr.bf16.mxu1 %v7777_v46  ;;  %v7861_v44 = vld [vmem:[#allocation3 + $0x204] ss:$16 sps:$4 sm:$0xff]   ;;  %v7856_v45 = vld [vmem:[#allocation3] ss:$16 sps:$4 sm:$0xff]  }
 0x10b   : > { %v7859_v46 = vld [vmem:[#allocation3 + $0x200] ss:$16 sps:$4 sm:$0xff]  }
 0x10d   : > { %2308 = vmatpush1.bf16.msra.mxu0 %v7772_v47  ;;  %2349 = vmatpush1.bf16.msra.mxu1 %v7775_v49  ;;  %v7864_v47 = vld [vmem:[#allocation3 + $0x24] ss:$16 sps:$4 sm:$0xff]  }
 0x10e   : > { %2309 = vmatprep.subr.bf16.mxu0 %v7780_v50  ;;  %2350 = vmatprep.subr.bf16.mxu1 %v7783_v51  ;;  %v7867_v49 = vld [vmem:[#allocation3 + $0x224] ss:$16 sps:$4 sm:$0xff]   ;;  %v7862_v50 = vld [vmem:[#allocation3 + $0x20] ss:$16 sps:$4 sm:$0xff]  }
 0x10f   : > { %v7865_v51 = vld [vmem:[#allocation3 + $0x220] ss:$16 sps:$4 sm:$0xff]  }
 0x111   : > { %2310 = vmatpush1.bf16.msra.mxu0 %v7778_v52  ;;  %2351 = vmatpush1.bf16.msra.mxu1 %v7781_v53  ;;  %v7870_v52 = vld [vmem:[#allocation3 + $0x44] ss:$16 sps:$4 sm:$0xff]  }
 0x112   : > { %2311 = vmatprep.subr.bf16.mxu0 %v7786_v54  ;;  %2352 = vmatprep.subr.bf16.mxu1 %v7789_v55  ;;  %v7873_v53 = vld [vmem:[#allocation3 + $0x244] ss:$16 sps:$4 sm:$0xff]   ;;  %v7868_v54 = vld [vmem:[#allocation3 + $0x40] ss:$16 sps:$4 sm:$0xff]  }
 0x113   : > { %v7871_v55 = vld [vmem:[#allocation3 + $0x240] ss:$16 sps:$4 sm:$0xff]  }
 0x115   : > { %2312 = vmatpush1.bf16.msra.mxu0 %v7784_v56  ;;  %2353 = vmatpush1.bf16.msra.mxu1 %v7787_v31  ;;  %v7876_v56 = vld [vmem:[#allocation3 + $0x64] ss:$16 sps:$4 sm:$0xff]  }
 0x116   : > { %2313 = vmatprep.subr.bf16.mxu0 %v7792_v33  ;;  %2354 = vmatprep.subr.bf16.mxu1 %v7795_v57  ;;  %v7879_v31 = vld [vmem:[#allocation3 + $0x264] ss:$16 sps:$4 sm:$0xff]  }
 0x117   : > { %v7882_v33 = vld [vmem:[#allocation3 + $0x84] ss:$16 sps:$4 sm:$0xff]  }
 0x118   : > { %v7885_v57 = vld [vmem:[#allocation3 + $0x284] ss:$16 sps:$4 sm:$0xff]  }
 0x119   : > { %2314 = vmatpush1.bf16.msra.mxu0 %v7790_v58  ;;  %2355 = vmatpush1.bf16.msra.mxu1 %v7793_v59  ;;  %v7880_v58 = vld [vmem:[#allocation3 + $0x80] ss:$16 sps:$4 sm:$0xff]  }
 0x11a   : > { %2315 = vmatprep.subr.bf16.mxu0 %v7798_v60  ;;  %2356 = vmatprep.subr.bf16.mxu1 %v7801_v61  ;;  %v7883_v59 = vld [vmem:[#allocation3 + $0x280] ss:$16 sps:$4 sm:$0xff]   ;;  %v7888_v60 = vld [vmem:[#allocation3 + $0xa4] ss:$16 sps:$4 sm:$0xff]  }
 0x11b   : > { %v7891_v61 = vld [vmem:[#allocation3 + $0x2a4] ss:$16 sps:$4 sm:$0xff]  }
 0x11d   : > { %2316 = vmatpush1.bf16.msra.mxu0 %v7796_v62  ;;  %2357 = vmatpush1.bf16.msra.mxu1 %v7799_v63  ;;  %v7886_v62 = vld [vmem:[#allocation3 + $0xa0] ss:$16 sps:$4 sm:$0xff]  }
 0x11e   : > { %2317 = vmatprep.subr.bf16.mxu0 %v7804_v0  ;;  %2358 = vmatprep.subr.bf16.mxu1 %v7807_v1  ;;  %v7889_v63 = vld [vmem:[#allocation3 + $0x2a0] ss:$16 sps:$4 sm:$0xff]   ;;  %v7894_v0 = vld [vmem:[#allocation3 + $0xc4] ss:$16 sps:$4 sm:$0xff]  }
 0x11f   : > { %v7897_v1 = vld [vmem:[#allocation3 + $0x2c4] ss:$16 sps:$4 sm:$0xff]  }
 0x121   : > { %2318 = vmatpush1.bf16.msra.mxu0 %v7802_v2  ;;  %2359 = vmatpush1.bf16.msra.mxu1 %v7805_v3  ;;  %v7892_v2 = vld [vmem:[#allocation3 + $0xc0] ss:$16 sps:$4 sm:$0xff]  }
 0x122   : > { %2319 = vmatprep.subr.bf16.mxu0 %v7810_v4  ;;  %2360 = vmatprep.subr.bf16.mxu1 %v7813_v6  ;;  %v7895_v3 = vld [vmem:[#allocation3 + $0x2c0] ss:$16 sps:$4 sm:$0xff]   ;;  %v7900_v4 = vld [vmem:[#allocation3 + $0xe4] ss:$16 sps:$4 sm:$0xff]  }
 0x123   : > { %v7903_v6 = vld [vmem:[#allocation3 + $0x2e4] ss:$16 sps:$4 sm:$0xff]  }
 0x125   : > { %2320 = vmatpush1.bf16.msra.mxu0 %v7808_v7  ;;  %2361 = vmatpush1.bf16.msra.mxu1 %v7811_v8  ;;  %v7898_v7 = vld [vmem:[#allocation3 + $0xe0] ss:$16 sps:$4 sm:$0xff]  }
 0x126   : > { %2321 = vmatprep.subr.bf16.mxu0 %v7816_v9  ;;  %2362 = vmatprep.subr.bf16.mxu1 %v7819_v10  ;;  %v7901_v8 = vld [vmem:[#allocation3 + $0x2e0] ss:$16 sps:$4 sm:$0xff]   ;;  %v7906_v9 = vld [vmem:[#allocation3 + $0x104] ss:$16 sps:$4 sm:$0xff]  }
 0x127   : > { %v7909_v10 = vld [vmem:[#allocation3 + $0x304] ss:$16 sps:$4 sm:$0xff]  }
 0x129   : > { %2322 = vmatpush1.bf16.msra.mxu0 %v7814_v12  ;;  %2363 = vmatpush1.bf16.msra.mxu1 %v7817_v13  ;;  %v7904_v12 = vld [vmem:[#allocation3 + $0x100] ss:$16 sps:$4 sm:$0xff]  }
 0x12a   : > { %2323 = vmatprep.subr.bf16.mxu0 %v7822_v15  ;;  %2364 = vmatprep.subr.bf16.mxu1 %v7825_v17  ;;  %v7907_v13 = vld [vmem:[#allocation3 + $0x300] ss:$16 sps:$4 sm:$0xff]   ;;  %v7912_v15 = vld [vmem:[#allocation3 + $0x124] ss:$16 sps:$4 sm:$0xff]  }
 0x12b   : > { %v7915_v17 = vld [vmem:[#allocation3 + $0x324] ss:$16 sps:$4 sm:$0xff]  }
 0x12d   : > { %2324 = vmatpush1.bf16.msra.mxu0 %v7820_v18  ;;  %2365 = vmatpush1.bf16.msra.mxu1 %v7823_v19  ;;  %v7910_v18 = vld [vmem:[#allocation3 + $0x120] ss:$16 sps:$4 sm:$0xff]  }
 0x12e   : > { %2325 = vmatprep.subr.bf16.mxu0 %v7828_v20  ;;  %2366 = vmatprep.subr.bf16.mxu1 %v7831_v21  ;;  %v7913_v19 = vld [vmem:[#allocation3 + $0x320] ss:$16 sps:$4 sm:$0xff]   ;;  %v7918_v20 = vld [vmem:[#allocation3 + $0x144] ss:$16 sps:$4 sm:$0xff]  }
 0x12f   : > { %v7921_v21 = vld [vmem:[#allocation3 + $0x344] ss:$16 sps:$4 sm:$0xff]  }
 0x131   : > { %2326 = vmatpush1.bf16.msra.mxu0 %v7826_v22  ;;  %2367 = vmatpush1.bf16.msra.mxu1 %v7829_v23  ;;  %v7916_v22 = vld [vmem:[#allocation3 + $0x140] ss:$16 sps:$4 sm:$0xff]  }
 0x132   : > { %2327 = vmatprep.subr.bf16.mxu0 %v7834_v24  ;;  %2368 = vmatprep.subr.bf16.mxu1 %v7837_v25  ;;  %v7919_v23 = vld [vmem:[#allocation3 + $0x340] ss:$16 sps:$4 sm:$0xff]   ;;  %v7924_v24 = vld [vmem:[#allocation3 + $0x164] ss:$16 sps:$4 sm:$0xff]  }
 0x133   : > { %v7927_v25 = vld [vmem:[#allocation3 + $0x364] ss:$16 sps:$4 sm:$0xff]  }
 0x135   : > { %2328 = vmatpush1.bf16.msra.mxu0 %v7832_v26  ;;  %2369 = vmatpush1.bf16.msra.mxu1 %v7835_v27  ;;  %v7922_v26 = vld [vmem:[#allocation3 + $0x160] ss:$16 sps:$4 sm:$0xff]  }
 0x136   : > { %2329 = vmatprep.subr.bf16.mxu0 %v7840_v14  ;;  %2370 = vmatprep.subr.bf16.mxu1 %v7843_v28  ;;  %v7925_v27 = vld [vmem:[#allocation3 + $0x360] ss:$16 sps:$4 sm:$0xff]   ;;  %v7930_v14 = vld [vmem:[#allocation3 + $0x184] ss:$16 sps:$4 sm:$0xff]  }
 0x137   : > { %v7933_v28 = vld [vmem:[#allocation3 + $0x384] ss:$16 sps:$4 sm:$0xff]  }
 0x139   : > { %2330 = vmatpush1.bf16.msra.mxu0 %v7838_v29  ;;  %2371 = vmatpush1.bf16.msra.mxu1 %v7841_v16  ;;  %v7928_v29 = vld [vmem:[#allocation3 + $0x180] ss:$16 sps:$4 sm:$0xff]  }
 0x13a   : > { %2331 = vmatprep.subr.bf16.mxu0 %v7846_v32  ;;  %2372 = vmatprep.subr.bf16.mxu1 %v7849_v34  ;;  %v7931_v16 = vld [vmem:[#allocation3 + $0x380] ss:$16 sps:$4 sm:$0xff]   ;;  %v7936_v32 = vld [vmem:[#allocation3 + $0x1a4] ss:$16 sps:$4 sm:$0xff]  }
 0x13b   : > { %v7939_v34 = vld [vmem:[#allocation3 + $0x3a4] ss:$16 sps:$4 sm:$0xff]  }
 0x13d   : > { %2332 = vmatpush1.bf16.msra.mxu0 %v7844_v35  ;;  %2373 = vmatpush1.bf16.msra.mxu1 %v7847_v36  ;;  %v7934_v35 = vld [vmem:[#allocation3 + $0x1a0] ss:$16 sps:$4 sm:$0xff]  }
 0x13e   : > { %2333 = vmatprep.subr.bf16.mxu0 %v7852_v39  ;;  %2374 = vmatprep.subr.bf16.mxu1 %v7855_v40  ;;  %v7937_v36 = vld [vmem:[#allocation3 + $0x3a0] ss:$16 sps:$4 sm:$0xff]   ;;  %v7942_v39 = vld [vmem:[#allocation3 + $0x1c4] ss:$16 sps:$4 sm:$0xff]  }
 0x13f   : > { %v7945_v40 = vld [vmem:[#allocation3 + $0x3c4] ss:$16 sps:$4 sm:$0xff]  }
 0x141   : > { %2334 = vmatpush1.bf16.msra.mxu0 %v7850_v41  ;;  %2375 = vmatpush1.bf16.msra.mxu1 %v7853_v42  ;;  %v7940_v41 = vld [vmem:[#allocation3 + $0x1c0] ss:$16 sps:$4 sm:$0xff]  }
 0x142   : > { %3025 = vmatprep.subr.bf16.mxu0 %v7858_v43  ;;  %3066 = vmatprep.subr.bf16.mxu1 %v7861_v44  ;;  %v7943_v42 = vld [vmem:[#allocation3 + $0x3c0] ss:$16 sps:$4 sm:$0xff]   ;;  %v7948_v43 = vld [vmem:[#allocation3 + $0x1e4] ss:$16 sps:$4 sm:$0xff]  }
 0x143   : > { %v7951_v44 = vld [vmem:[#allocation3 + $0x3e4] ss:$16 sps:$4 sm:$0xff]  }
 0x144   : > { %2336 = vmatmul.mubr.bf16.vlgmr.msra.gmra.mrb[8].mxu0 %v8890_v37  ;;  %2377 = vmatmul.mubr.bf16.vlgmr.msra.gmra.mrb[8].mxu1 %v8892_v38  ;;  %v7874_v37 = vld [vmem:[#allocation3 + $0x60] ss:$16 sps:$4 sm:$0xff]  }
 0x145   : > { %3026 = vmatpush1.bf16.msra.mxu0 %v7856_v45  ;;  %3067 = vmatpush1.bf16.msra.mxu1 %v7859_v46  ;;  %v7877_v38 = vld [vmem:[#allocation3 + $0x260] ss:$16 sps:$4 sm:$0xff]  }
 0x146   : > { %3027 = vmatprep.subr.bf16.mxu0 %v7864_v47  ;;  %3068 = vmatprep.subr.bf16.mxu1 %v7867_v49  ;;  %v7946_v45 = vld [vmem:[#allocation3 + $0x1e0] ss:$16 sps:$4 sm:$0xff]   ;;  %v7954_v47 = vld [vmem:[#allocation3 + $0xc] ss:$16 sps:$4 sm:$0xff]  }
 0x147   : > { %3057 = vmatprep.mubr.bf16.mxu0 %v8847_v48  ;;  %3098 = vmatprep.mubr.bf16.mxu1 %v8860_v30  ;;  %v7949_v46 = vld [vmem:[#allocation3 + $0x3e0] ss:$16 sps:$4 sm:$0xff]   ;;  %v7957_v49 = vld [vmem:[#allocation3 + $0x20c] ss:$16 sps:$4 sm:$0xff]  }
 0x149   : > { %3028 = vmatpush1.bf16.msra.mxu0 %v7862_v50  ;;  %3069 = vmatpush1.bf16.msra.mxu1 %v7865_v51  ;;  %v7952_v50 = vld [vmem:[#allocation3 + $0x8] ss:$16 sps:$4 sm:$0xff]  }
 0x14a   : > { %3029 = vmatprep.subr.bf16.mxu0 %v7870_v52  ;;  %3070 = vmatprep.subr.bf16.mxu1 %v7873_v53  ;;  %v7955_v51 = vld [vmem:[#allocation3 + $0x208] ss:$16 sps:$4 sm:$0xff]   ;;  %v7960_v52 = vld [vmem:[#allocation3 + $0x2c] ss:$16 sps:$4 sm:$0xff]  }
 0x14b   : > { %v7963_v53 = vld [vmem:[#allocation3 + $0x22c] ss:$16 sps:$4 sm:$0xff]  }
 0x14d   : > { %3030 = vmatpush1.bf16.msra.mxu0 %v7868_v54  ;;  %3071 = vmatpush1.bf16.msra.mxu1 %v7871_v55  ;;  %v7958_v54 = vld [vmem:[#allocation3 + $0x28] ss:$16 sps:$4 sm:$0xff]  }
 0x14e   : > { %3031 = vmatprep.subr.bf16.mxu0 %v7876_v56  ;;  %3072 = vmatprep.subr.bf16.mxu1 %v7879_v31  ;;  %v7961_v55 = vld [vmem:[#allocation3 + $0x228] ss:$16 sps:$4 sm:$0xff]   ;;  %v7966_v56 = vld [vmem:[#allocation3 + $0x4c] ss:$16 sps:$4 sm:$0xff]  }
 0x14f   : > { %v7969_v31 = vld [vmem:[#allocation3 + $0x24c] ss:$16 sps:$4 sm:$0xff]  }
 0x151   : > { %3032 = vmatpush1.bf16.msra.mxu0 %v7874_v37  ;;  %3073 = vmatpush1.bf16.msra.mxu1 %v7877_v38  ;;  %v7964_v37 = vld [vmem:[#allocation3 + $0x48] ss:$16 sps:$4 sm:$0xff]  }
 0x152   : > { %3033 = vmatprep.subr.bf16.mxu0 %v7882_v33  ;;  %3074 = vmatprep.subr.bf16.mxu1 %v7885_v57  ;;  %v7967_v38 = vld [vmem:[#allocation3 + $0x248] ss:$16 sps:$4 sm:$0xff]   ;;  %v7972_v33 = vld [vmem:[#allocation3 + $0x6c] ss:$16 sps:$4 sm:$0xff]  }
 0x153   : > { %v7975_v57 = vld [vmem:[#allocation3 + $0x26c] ss:$16 sps:$4 sm:$0xff]  }
 0x155   : > { %3034 = vmatpush1.bf16.msra.mxu0 %v7880_v58  ;;  %3075 = vmatpush1.bf16.msra.mxu1 %v7883_v59  ;;  %v7970_v58 = vld [vmem:[#allocation3 + $0x68] ss:$16 sps:$4 sm:$0xff]  }
 0x156   : > { %3035 = vmatprep.subr.bf16.mxu0 %v7888_v60  ;;  %3076 = vmatprep.subr.bf16.mxu1 %v7891_v61  ;;  %v7973_v59 = vld [vmem:[#allocation3 + $0x268] ss:$16 sps:$4 sm:$0xff]   ;;  %v7978_v60 = vld [vmem:[#allocation3 + $0x8c] ss:$16 sps:$4 sm:$0xff]  }
 0x157   : > { %v7981_v61 = vld [vmem:[#allocation3 + $0x28c] ss:$16 sps:$4 sm:$0xff]  }
 0x159   : > { %3036 = vmatpush1.bf16.msra.mxu0 %v7886_v62  ;;  %3077 = vmatpush1.bf16.msra.mxu1 %v7889_v63  ;;  %v7976_v62 = vld [vmem:[#allocation3 + $0x88] ss:$16 sps:$4 sm:$0xff]  }
 0x15a   : > { %3037 = vmatprep.subr.bf16.mxu0 %v7894_v0  ;;  %3078 = vmatprep.subr.bf16.mxu1 %v7897_v1  ;;  %v7979_v63 = vld [vmem:[#allocation3 + $0x288] ss:$16 sps:$4 sm:$0xff]   ;;  %v7984_v0 = vld [vmem:[#allocation3 + $0xac] ss:$16 sps:$4 sm:$0xff]  }
 0x15b   : > { %v7985_v1 = vld [vmem:[#allocation3 + $0x2a8] ss:$16 sps:$4 sm:$0xff]  }
 0x15d   : > { %3038 = vmatpush1.bf16.msra.mxu0 %v7892_v2  ;;  %3079 = vmatpush1.bf16.msra.mxu1 %v7895_v3  ;;  %v7990_v2 = vld [vmem:[#allocation3 + $0xcc] ss:$16 sps:$4 sm:$0xff]  }
 0x15e   : > { %3039 = vmatprep.subr.bf16.mxu0 %v7900_v4  ;;  %3080 = vmatprep.subr.bf16.mxu1 %v7903_v6  ;;  %v7993_v3 = vld [vmem:[#allocation3 + $0x2cc] ss:$16 sps:$4 sm:$0xff]   ;;  %v7988_v4 = vld [vmem:[#allocation3 + $0xc8] ss:$16 sps:$4 sm:$0xff]  }
 0x15f   : > { %v7991_v6 = vld [vmem:[#allocation3 + $0x2c8] ss:$16 sps:$4 sm:$0xff]  }
 0x161   : > { %3040 = vmatpush1.bf16.msra.mxu0 %v7898_v7  ;;  %3081 = vmatpush1.bf16.msra.mxu1 %v7901_v8  ;;  %v7996_v7 = vld [vmem:[#allocation3 + $0xec] ss:$16 sps:$4 sm:$0xff]  }
 0x162   : > { %3041 = vmatprep.subr.bf16.mxu0 %v7906_v9  ;;  %3082 = vmatprep.subr.bf16.mxu1 %v7909_v10  ;;  %v7999_v8 = vld [vmem:[#allocation3 + $0x2ec] ss:$16 sps:$4 sm:$0xff]   ;;  %v7994_v9 = vld [vmem:[#allocation3 + $0xe8] ss:$16 sps:$4 sm:$0xff]  }
 0x163   : > { %v7997_v10 = vld [vmem:[#allocation3 + $0x2e8] ss:$16 sps:$4 sm:$0xff]  }
 0x165   : > { %3042 = vmatpush1.bf16.msra.mxu0 %v7904_v12  ;;  %3083 = vmatpush1.bf16.msra.mxu1 %v7907_v13  ;;  %v8002_v12 = vld [vmem:[#allocation3 + $0x10c] ss:$16 sps:$4 sm:$0xff]  }
 0x166   : > { %3043 = vmatprep.subr.bf16.mxu0 %v7912_v15  ;;  %3084 = vmatprep.subr.bf16.mxu1 %v7915_v17  ;;  %v8005_v13 = vld [vmem:[#allocation3 + $0x30c] ss:$16 sps:$4 sm:$0xff]   ;;  %v8000_v15 = vld [vmem:[#allocation3 + $0x108] ss:$16 sps:$4 sm:$0xff]  }
 0x167   : > { %v8003_v17 = vld [vmem:[#allocation3 + $0x308] ss:$16 sps:$4 sm:$0xff]  }
 0x169   : > { %3044 = vmatpush1.bf16.msra.mxu0 %v7910_v18  ;;  %3085 = vmatpush1.bf16.msra.mxu1 %v7913_v19  ;;  %v8008_v18 = vld [vmem:[#allocation3 + $0x12c] ss:$16 sps:$4 sm:$0xff]  }
 0x16a   : > { %3045 = vmatprep.subr.bf16.mxu0 %v7918_v20  ;;  %3086 = vmatprep.subr.bf16.mxu1 %v7921_v21  ;;  %v8011_v19 = vld [vmem:[#allocation3 + $0x32c] ss:$16 sps:$4 sm:$0xff]   ;;  %v8006_v20 = vld [vmem:[#allocation3 + $0x128] ss:$16 sps:$4 sm:$0xff]  }
 0x16b   : > { %v8009_v21 = vld [vmem:[#allocation3 + $0x328] ss:$16 sps:$4 sm:$0xff]  }
 0x16d   : > { %3046 = vmatpush1.bf16.msra.mxu0 %v7916_v22  ;;  %3087 = vmatpush1.bf16.msra.mxu1 %v7919_v23  ;;  %v8014_v22 = vld [vmem:[#allocation3 + $0x14c] ss:$16 sps:$4 sm:$0xff]  }
 0x16e   : > { %3047 = vmatprep.subr.bf16.mxu0 %v7924_v24  ;;  %3088 = vmatprep.subr.bf16.mxu1 %v7927_v25  ;;  %v8017_v23 = vld [vmem:[#allocation3 + $0x34c] ss:$16 sps:$4 sm:$0xff]   ;;  %v8012_v24 = vld [vmem:[#allocation3 + $0x148] ss:$16 sps:$4 sm:$0xff]  }
 0x16f   : > { %v8015_v25 = vld [vmem:[#allocation3 + $0x348] ss:$16 sps:$4 sm:$0xff]  }
 0x171   : > { %3048 = vmatpush1.bf16.msra.mxu0 %v7922_v26  ;;  %3089 = vmatpush1.bf16.msra.mxu1 %v7925_v27  ;;  %v8020_v26 = vld [vmem:[#allocation3 + $0x16c] ss:$16 sps:$4 sm:$0xff]  }
 0x172   : > { %3049 = vmatprep.subr.bf16.mxu0 %v7930_v14  ;;  %3090 = vmatprep.subr.bf16.mxu1 %v7933_v28  ;;  %v8023_v27 = vld [vmem:[#allocation3 + $0x36c] ss:$16 sps:$4 sm:$0xff]   ;;  %v8018_v14 = vld [vmem:[#allocation3 + $0x168] ss:$16 sps:$4 sm:$0xff]  }
 0x173   : > { %v8021_v28 = vld [vmem:[#allocation3 + $0x368] ss:$16 sps:$4 sm:$0xff]  }
 0x175   : > { %3050 = vmatpush1.bf16.msra.mxu0 %v7928_v29  ;;  %3091 = vmatpush1.bf16.msra.mxu1 %v7931_v16  ;;  %v8026_v29 = vld [vmem:[#allocation3 + $0x18c] ss:$16 sps:$4 sm:$0xff]  }
 0x176   : > { %3051 = vmatprep.subr.bf16.mxu0 %v7936_v32  ;;  %3092 = vmatprep.subr.bf16.mxu1 %v7939_v34  ;;  %v8029_v16 = vld [vmem:[#allocation3 + $0x38c] ss:$16 sps:$4 sm:$0xff]   ;;  %v8024_v32 = vld [vmem:[#allocation3 + $0x188] ss:$16 sps:$4 sm:$0xff]  }
 0x177   : > { %v8027_v34 = vld [vmem:[#allocation3 + $0x388] ss:$16 sps:$4 sm:$0xff]  }
 0x179   : > { %3052 = vmatpush1.bf16.msra.mxu0 %v7934_v35  ;;  %3093 = vmatpush1.bf16.msra.mxu1 %v7937_v36  ;;  %v8032_v35 = vld [vmem:[#allocation3 + $0x1ac] ss:$16 sps:$4 sm:$0xff]  }
 0x17a   : > { %3053 = vmatprep.subr.bf16.mxu0 %v7942_v39  ;;  %3094 = vmatprep.subr.bf16.mxu1 %v7945_v40  ;;  %v8035_v36 = vld [vmem:[#allocation3 + $0x3ac] ss:$16 sps:$4 sm:$0xff]   ;;  %v8030_v39 = vld [vmem:[#allocation3 + $0x1a8] ss:$16 sps:$4 sm:$0xff]  }
 0x17b   : > { %v8033_v40 = vld [vmem:[#allocation3 + $0x3a8] ss:$16 sps:$4 sm:$0xff]  }
 0x17d   : > { %3054 = vmatpush1.bf16.msra.mxu0 %v7940_v41  ;;  %3095 = vmatpush1.bf16.msra.mxu1 %v7943_v42  ;;  %v8038_v41 = vld [vmem:[#allocation3 + $0x1cc] ss:$16 sps:$4 sm:$0xff]  }
 0x17e   : > { %3055 = vmatprep.subr.bf16.mxu0 %v7948_v43  ;;  %3096 = vmatprep.subr.bf16.mxu1 %v7951_v44  ;;  %v8041_v42 = vld [vmem:[#allocation3 + $0x3cc] ss:$16 sps:$4 sm:$0xff]   ;;  %v8036_v43 = vld [vmem:[#allocation3 + $0x1c8] ss:$16 sps:$4 sm:$0xff]  }
 0x17f   : > { %v8039_v44 = vld [vmem:[#allocation3 + $0x3c8] ss:$16 sps:$4 sm:$0xff]  }
 0x181   : > { %3056 = vmatpush1.bf16.msra.mxu0 %v7946_v45  ;;  %3097 = vmatpush1.bf16.msra.mxu1 %v7949_v46  ;;  %v8044_v45 = vld [vmem:[#allocation3 + $0x1ec] ss:$16 sps:$4 sm:$0xff]  }
 0x182   : > { %3107 = vmatprep.subr.bf16.mxu0 %v7954_v47  ;;  %3148 = vmatprep.subr.bf16.mxu1 %v7957_v49  ;;  %v8047_v46 = vld [vmem:[#allocation3 + $0x3ec] ss:$16 sps:$4 sm:$0xff]   ;;  %v8042_v47 = vld [vmem:[#allocation3 + $0x1e8] ss:$16 sps:$4 sm:$0xff]  }
 0x183   : > { %v8045_v49 = vld [vmem:[#allocation3 + $0x3e8] ss:$16 sps:$4 sm:$0xff]  }
 0x184   : > { %3058 = vmatmul.mubr.bf16.vlgmr.msra.gmra.mrb[12].mxu0 %v8851_v5  ;;  %3099 = vmatmul.mubr.bf16.vlgmr.msra.gmra.mrb[12].mxu1 %v8866_v11 }
 0x185   : > { %3108 = vmatpush1.bf16.msra.mxu0 %v7952_v50  ;;  %3149 = vmatpush1.bf16.msra.mxu1 %v7955_v51  ;;  %v8050_v50 = vld [vmem:[%s10170_s3 + $0x404] ss:$16 sps:$4 sm:$0xff]   ;;  %v8053_v51 = vld [vmem:[%s10170_s3 + $0x40c] ss:$16 sps:$4 sm:$0xff]  }
 0x186   : > { %3109 = vmatprep.subr.bf16.mxu0 %v7960_v52  ;;  %3150 = vmatprep.subr.bf16.mxu1 %v7963_v53  ;;  %v8048_v52 = vld [vmem:[%s10170_s3 + $0x400] ss:$16 sps:$4 sm:$0xff]   ;;  %v8051_v53 = vld [vmem:[%s10170_s3 + $0x408] ss:$16 sps:$4 sm:$0xff]  }
 0x187   : > { %3139 = vmatprep.mubr.bf16.mxu0 %v8847_v48  ;;  %3180 = vmatprep.mubr.bf16.mxu1 %v8860_v30  ;;  %v7987_v48 = vld [vmem:[#allocation3 + $0x2ac] ss:$16 sps:$4 sm:$0xff]   ;;  %v7982_v30 = vld [vmem:[#allocation3 + $0xa8] ss:$16 sps:$4 sm:$0xff]  }
 0x189   : > { %3110 = vmatpush1.bf16.msra.mxu0 %v7958_v54  ;;  %3151 = vmatpush1.bf16.msra.mxu1 %v7961_v55  ;;  %v8056_v54 = vld [vmem:[%s10170_s3 + $0x424] ss:$16 sps:$4 sm:$0xff]   ;;  %v8059_v55 = vld [vmem:[%s10170_s3 + $0x42c] ss:$16 sps:$4 sm:$0xff]  }
 0x18a   : > { %3111 = vmatprep.subr.bf16.mxu0 %v7966_v56  ;;  %3152 = vmatprep.subr.bf16.mxu1 %v7969_v31  ;;  %v8054_v56 = vld [vmem:[%s10170_s3 + $0x420] ss:$16 sps:$4 sm:$0xff]   ;;  %v8057_v31 = vld [vmem:[%s10170_s3 + $0x428] ss:$16 sps:$4 sm:$0xff]  }
 0x18d   : > { %3112 = vmatpush1.bf16.msra.mxu0 %v7964_v37  ;;  %3153 = vmatpush1.bf16.msra.mxu1 %v7967_v38  ;;  %v8062_v37 = vld [vmem:[%s10170_s3 + $0x444] ss:$16 sps:$4 sm:$0xff]   ;;  %v8065_v38 = vld [vmem:[%s10170_s3 + $0x44c] ss:$16 sps:$4 sm:$0xff]  }
 0x18e   : > { %3113 = vmatprep.subr.bf16.mxu0 %v7972_v33  ;;  %3154 = vmatprep.subr.bf16.mxu1 %v7975_v57  ;;  %v8060_v33 = vld [vmem:[%s10170_s3 + $0x440] ss:$16 sps:$4 sm:$0xff]   ;;  %v8071_v57 = vld [vmem:[%s10170_s3 + $0x46c] ss:$16 sps:$4 sm:$0xff]  }
 0x191   : > { %3114 = vmatpush1.bf16.msra.mxu0 %v7970_v58  ;;  %3155 = vmatpush1.bf16.msra.mxu1 %v7973_v59  ;;  %v8066_v58 = vld [vmem:[%s10170_s3 + $0x460] ss:$16 sps:$4 sm:$0xff]   ;;  %v8069_v59 = vld [vmem:[%s10170_s3 + $0x468] ss:$16 sps:$4 sm:$0xff]  }
 0x192   : > { %3115 = vmatprep.subr.bf16.mxu0 %v7978_v60  ;;  %3156 = vmatprep.subr.bf16.mxu1 %v7981_v61  ;;  %v8074_v60 = vld [vmem:[%s10170_s3 + $0x484] ss:$16 sps:$4 sm:$0xff]   ;;  %v8077_v61 = vld [vmem:[%s10170_s3 + $0x48c] ss:$16 sps:$4 sm:$0xff]  }
 0x195   : > { %3116 = vmatpush1.bf16.msra.mxu0 %v7976_v62  ;;  %3157 = vmatpush1.bf16.msra.mxu1 %v7979_v63  ;;  %v8072_v62 = vld [vmem:[%s10170_s3 + $0x480] ss:$16 sps:$4 sm:$0xff]   ;;  %v8075_v63 = vld [vmem:[%s10170_s3 + $0x488] ss:$16 sps:$4 sm:$0xff]  }
 0x196   : > { %3117 = vmatprep.subr.bf16.mxu0 %v7984_v0  ;;  %3158 = vmatprep.subr.bf16.mxu1 %v7987_v48  ;;  %v8080_v0 = vld [vmem:[%s10170_s3 + $0x4a4] ss:$16 sps:$4 sm:$0xff]   ;;  %v8083_v48 = vld [vmem:[%s10170_s3 + $0x4ac] ss:$16 sps:$4 sm:$0xff]  }
 0x199   : > { %3118 = vmatpush1.bf16.msra.mxu0 %v7982_v30  ;;  %3159 = vmatpush1.bf16.msra.mxu1 %v7985_v1  ;;  %v8078_v30 = vld [vmem:[%s10170_s3 + $0x4a0] ss:$16 sps:$4 sm:$0xff]   ;;  %v8081_v1 = vld [vmem:[%s10170_s3 + $0x4a8] ss:$16 sps:$4 sm:$0xff]  }
 0x19a   : > { %3119 = vmatprep.subr.bf16.mxu0 %v7990_v2  ;;  %3160 = vmatprep.subr.bf16.mxu1 %v7993_v3  ;;  %v8086_v2 = vld [vmem:[%s10170_s3 + $0x4c4] ss:$16 sps:$4 sm:$0xff]   ;;  %v8089_v3 = vld [vmem:[%s10170_s3 + $0x4cc] ss:$16 sps:$4 sm:$0xff]  }
 0x19d   : > { %3120 = vmatpush1.bf16.msra.mxu0 %v7988_v4  ;;  %3161 = vmatpush1.bf16.msra.mxu1 %v7991_v6 }
 0x19e   : > { %3121 = vmatprep.subr.bf16.mxu0 %v7996_v7  ;;  %3162 = vmatprep.subr.bf16.mxu1 %v7999_v8 }
 0x1a1   : > { %3122 = vmatpush1.bf16.msra.mxu0 %v7994_v9  ;;  %3163 = vmatpush1.bf16.msra.mxu1 %v7997_v10 }
 0x1a2   : > { %3123 = vmatprep.subr.bf16.mxu0 %v8002_v12  ;;  %3164 = vmatprep.subr.bf16.mxu1 %v8005_v13 }
 0x1a5   : > { %3124 = vmatpush1.bf16.msra.mxu0 %v8000_v15  ;;  %3165 = vmatpush1.bf16.msra.mxu1 %v8003_v17  ;;  %v8084_v15 = vld [vmem:[%s10170_s3 + $0x4c0] ss:$16 sps:$4 sm:$0xff]   ;;  %v8087_v17 = vld [vmem:[%s10170_s3 + $0x4c8] ss:$16 sps:$4 sm:$0xff]  }
 0x1a6   : > { %3125 = vmatprep.subr.bf16.mxu0 %v8008_v18  ;;  %3166 = vmatprep.subr.bf16.mxu1 %v8011_v19 }
 0x1a9   : > { %3126 = vmatpush1.bf16.msra.mxu0 %v8006_v20  ;;  %3167 = vmatpush1.bf16.msra.mxu1 %v8009_v21  ;;  %v8092_v20 = vld [vmem:[%s10170_s3 + $0x4e4] ss:$16 sps:$4 sm:$0xff]   ;;  %v8095_v21 = vld [vmem:[%s10170_s3 + $0x4ec] ss:$16 sps:$4 sm:$0xff]  }
 0x1aa   : > { %3127 = vmatprep.subr.bf16.mxu0 %v8014_v22  ;;  %3168 = vmatprep.subr.bf16.mxu1 %v8017_v23  ;;  %v8090_v22 = vld [vmem:[%s10170_s3 + $0x4e0] ss:$16 sps:$4 sm:$0xff]   ;;  %v8093_v23 = vld [vmem:[%s10170_s3 + $0x4e8] ss:$16 sps:$4 sm:$0xff]  }
 0x1ad   : > { %3128 = vmatpush1.bf16.msra.mxu0 %v8012_v24  ;;  %3169 = vmatpush1.bf16.msra.mxu1 %v8015_v25  ;;  %v8098_v24 = vld [vmem:[%s10170_s3 + $0x504] ss:$16 sps:$4 sm:$0xff]   ;;  %v8101_v25 = vld [vmem:[%s10170_s3 + $0x50c] ss:$16 sps:$4 sm:$0xff]  }
 0x1ae   : > { %3129 = vmatprep.subr.bf16.mxu0 %v8020_v26  ;;  %3170 = vmatprep.subr.bf16.mxu1 %v8023_v27  ;;  %v8096_v26 = vld [vmem:[%s10170_s3 + $0x500] ss:$16 sps:$4 sm:$0xff]   ;;  %v8099_v27 = vld [vmem:[%s10170_s3 + $0x508] ss:$16 sps:$4 sm:$0xff]  }
 0x1b1   : > { %3130 = vmatpush1.bf16.msra.mxu0 %v8018_v14  ;;  %3171 = vmatpush1.bf16.msra.mxu1 %v8021_v28  ;;  %v8712_v14 = vmov 0   ;;  %v8104_v28 = vld [vmem:[%s10170_s3 + $0x524] ss:$16 sps:$4 sm:$0xff]  }
 0x1b2   : > { %3131 = vmatprep.subr.bf16.mxu0 %v8026_v29  ;;  %3172 = vmatprep.subr.bf16.mxu1 %v8029_v16  ;;  %3227 = vst [vmem:[#allocation2] sm:$0x77] %v8712_v14  ;;  %3228 = vst [vmem:[#allocation2 + $0x8] sm:$0x77] %v8712_v14  ;;  %v8107_v29 = vld [vmem:[%s10170_s3 + $0x52c] ss:$16 sps:$4 sm:$0xff]  }
 0x1b3   : > { %v8102_v16 = vld [vmem:[%s10170_s3 + $0x520] ss:$16 sps:$4 sm:$0xff]  }
 0x1b5   : > { %3132 = vmatpush1.bf16.msra.mxu0 %v8024_v32  ;;  %3173 = vmatpush1.bf16.msra.mxu1 %v8027_v34  ;;  %v8105_v32 = vld [vmem:[%s10170_s3 + $0x528] ss:$16 sps:$4 sm:$0xff]   ;;  %v8110_v34 = vld [vmem:[%s10170_s3 + $0x544] ss:$16 sps:$4 sm:$0xff]  }
 0x1b6   : > { %3133 = vmatprep.subr.bf16.mxu0 %v8032_v35  ;;  %3174 = vmatprep.subr.bf16.mxu1 %v8035_v36  ;;  %v8113_v35 = vld [vmem:[%s10170_s3 + $0x54c] ss:$16 sps:$4 sm:$0xff]   ;;  %v8108_v36 = vld [vmem:[%s10170_s3 + $0x540] ss:$16 sps:$4 sm:$0xff]  }
 0x1b9   : > { %3134 = vmatpush1.bf16.msra.mxu0 %v8030_v39  ;;  %3175 = vmatpush1.bf16.msra.mxu1 %v8033_v40  ;;  %v8111_v39 = vld [vmem:[%s10170_s3 + $0x548] ss:$16 sps:$4 sm:$0xff]   ;;  %v8116_v40 = vld [vmem:[%s10170_s3 + $0x564] ss:$16 sps:$4 sm:$0xff]  }
 0x1ba   : > { %3135 = vmatprep.subr.bf16.mxu0 %v8038_v41  ;;  %3176 = vmatprep.subr.bf16.mxu1 %v8041_v42  ;;  %v8119_v41 = vld [vmem:[%s10170_s3 + $0x56c] ss:$16 sps:$4 sm:$0xff]   ;;  %v8114_v42 = vld [vmem:[%s10170_s3 + $0x560] ss:$16 sps:$4 sm:$0xff]  }
 0x1bd   : > { %3136 = vmatpush1.bf16.msra.mxu0 %v8036_v43  ;;  %3177 = vmatpush1.bf16.msra.mxu1 %v8039_v44  ;;  %v8117_v43 = vld [vmem:[%s10170_s3 + $0x568] ss:$16 sps:$4 sm:$0xff]   ;;  %v8122_v44 = vld [vmem:[%s10170_s3 + $0x584] ss:$16 sps:$4 sm:$0xff]  }
 0x1be   : > { %3137 = vmatprep.subr.bf16.mxu0 %v8044_v45  ;;  %3178 = vmatprep.subr.bf16.mxu1 %v8047_v46  ;;  %v8125_v45 = vld [vmem:[%s10170_s3 + $0x58c] ss:$16 sps:$4 sm:$0xff]   ;;  %v8120_v46 = vld [vmem:[%s10170_s3 + $0x580] ss:$16 sps:$4 sm:$0xff]  }
 0x1c1   : > { %3138 = vmatpush1.bf16.msra.mxu0 %v8042_v47  ;;  %3179 = vmatpush1.bf16.msra.mxu1 %v8045_v49  ;;  %v8123_v47 = vld [vmem:[%s10170_s3 + $0x588] ss:$16 sps:$4 sm:$0xff]   ;;  %v8128_v49 = vld [vmem:[%s10170_s3 + $0x5a4] ss:$16 sps:$4 sm:$0xff]  }
 0x1c2   : > { %4215 = vmatprep.subr.bf16.mxu0 %v8050_v50  ;;  %4297 = vmatprep.subr.bf16.mxu1 %v8053_v51  ;;  %v8131_v50 = vld [vmem:[%s10170_s3 + $0x5ac] ss:$16 sps:$4 sm:$0xff]   ;;  %v8126_v51 = vld [vmem:[%s10170_s3 + $0x5a0] ss:$16 sps:$4 sm:$0xff]  }
 0x1c4   : > { %3140 = vmatmul.mubr.bf16.vlgmr.msra.gmra.mrb[16].mxu0 %v8851_v5  ;;  %3181 = vmatmul.mubr.bf16.vlgmr.msra.gmra.mrb[16].mxu1 %v8866_v11  ;;  %v8063_v5 = vld [vmem:[%s10170_s3 + $0x448] ss:$16 sps:$4 sm:$0xff]   ;;  %v8068_v11 = vld [vmem:[%s10170_s3 + $0x464] ss:$16 sps:$4 sm:$0xff]  }
 0x1c5   : > { %4216 = vmatpush1.bf16.msra.mxu0 %v8048_v52  ;;  %4298 = vmatpush1.bf16.msra.mxu1 %v8051_v53  ;;  %v8129_v52 = vld [vmem:[%s10170_s3 + $0x5a8] ss:$16 sps:$4 sm:$0xff]   ;;  %v8134_v53 = vld [vmem:[%s10170_s3 + $0x5c4] ss:$16 sps:$4 sm:$0xff]  }
 0x1c6   : > { %4217 = vmatprep.subr.bf16.mxu0 %v8056_v54  ;;  %4299 = vmatprep.subr.bf16.mxu1 %v8059_v55  ;;  %v8137_v54 = vld [vmem:[%s10170_s3 + $0x5cc] ss:$16 sps:$4 sm:$0xff]   ;;  %v8132_v55 = vld [vmem:[%s10170_s3 + $0x5c0] ss:$16 sps:$4 sm:$0xff]  }
 0x1c9   : > { %4218 = vmatpush1.bf16.msra.mxu0 %v8054_v56  ;;  %4300 = vmatpush1.bf16.msra.mxu1 %v8057_v31  ;;  %v8135_v56 = vld [vmem:[%s10170_s3 + $0x5c8] ss:$16 sps:$4 sm:$0xff]   ;;  %v8140_v31 = vld [vmem:[%s10170_s3 + $0x5e4] ss:$16 sps:$4 sm:$0xff]  }
 0x1ca   : > { %4219 = vmatprep.subr.bf16.mxu0 %v8062_v37  ;;  %4301 = vmatprep.subr.bf16.mxu1 %v8065_v38  ;;  %v8143_v37 = vld [vmem:[%s10170_s3 + $0x5ec] ss:$16 sps:$4 sm:$0xff]   ;;  %v8138_v38 = vld [vmem:[%s10170_s3 + $0x5e0] ss:$16 sps:$4 sm:$0xff]  }
 0x1cd   : > { %4220 = vmatpush1.bf16.msra.mxu0 %v8060_v33  ;;  %4302 = vmatpush1.bf16.msra.mxu1 %v8063_v5  ;;  %v8141_v33 = vld [vmem:[%s10170_s3 + $0x5e8] ss:$16 sps:$4 sm:$0xff]   ;;  %v8148_v5 = vld [vmem:[%s10170_s3 + $0x604] ss:$16 sps:$4 sm:$0xff]  }
 0x1ce   : > { %4221 = vmatprep.subr.bf16.mxu0 %v8068_v11  ;;  %4303 = vmatprep.subr.bf16.mxu1 %v8071_v57  ;;  %v8151_v11 = vld [vmem:[%s10170_s3 + $0x60c] ss:$16 sps:$4 sm:$0xff]  }
 0x1d1   : > { %4222 = vmatpush1.bf16.msra.mxu0 %v8066_v58  ;;  %4304 = vmatpush1.bf16.msra.mxu1 %v8069_v59 }
 0x1d2   : > { %4223 = vmatprep.subr.bf16.mxu0 %v8074_v60  ;;  %4305 = vmatprep.subr.bf16.mxu1 %v8077_v61 }
 0x1d5   : > { %4224 = vmatpush1.bf16.msra.mxu0 %v8072_v62  ;;  %4306 = vmatpush1.bf16.msra.mxu1 %v8075_v63 }
 0x1d6   : > { %4225 = vmatprep.subr.bf16.mxu0 %v8080_v0  ;;  %4307 = vmatprep.subr.bf16.mxu1 %v8083_v48 }
 0x1d7   : > { %v2255_v4 = vpop.f32.mrb[4].mxu0  ;;  %v2296_v6 = vpop.f32.mrb[4].mxu1 }
 0x1d8   : > { %v8986_v7 = vadd.f32 %v2296_v6, %v2255_v4  ;;  %v2257_v8 = vpop.f32.mrb[5].mxu0  ;;  %v2298_v9 = vpop.f32.mrb[5].mxu1  ;;  %v9122_v4 = vld [vmem:[%s10169_s2] sm:$0xf] }
 0x1d9   : > { %v8988_v10 = vadd.f32 %v2298_v9, %v2257_v8  ;;  %v2259_v12 = vpop.f32.mrb[6].mxu0  ;;  %v2300_v13 = vpop.f32.mrb[6].mxu1  ;;  %4226 = vmatpush1.bf16.msra.mxu0 %v8078_v30  ;;  %4308 = vmatpush1.bf16.msra.mxu1 %v8081_v1  ;;  %v442_v1 = vlaneseq }
 0x1da   : > { %v2260_v18 = vpop.f32.mrb[7].mxu0  ;;  %v2301_v19 = vpop.f32.mrb[7].mxu1  ;;  %4227 = vmatprep.subr.bf16.mxu0 %v8086_v2  ;;  %4309 = vmatprep.subr.bf16.mxu1 %v8089_v3 }
 0x1db   : > { %v9114_v2 = vshrl.u32 %v442_v1, 7  ;;  %v8173_v1 = vld [vmem:[%s10170_s3 + $0x688] ss:$16 sps:$4 sm:$0xff]  }
 0x1dd   : > { %4228 = vmatpush1.bf16.msra.mxu0 %v8084_v15  ;;  %4310 = vmatpush1.bf16.msra.mxu1 %v8087_v17  ;;  %v9117_v3 = vsub.s32 0, %v9114_v2  ;;  %v9125_v6 = vsub.s32 1, %v9114_v2 }
 0x1de   : > { %4229 = vmatprep.subr.bf16.mxu0 %v8092_v20  ;;  %4311 = vmatprep.subr.bf16.mxu1 %v8095_v21 }
 0x1df   : > { %v3194_v13 = vrot.slane %v9122_v4, %v9117_v3  ;;  %v3198_v19 = vrot.slane %v9122_v4, %v9125_v6 }
 0x1e1   : > { %4230 = vmatpush1.bf16.msra.mxu0 %v8090_v22  ;;  %4312 = vmatpush1.bf16.msra.mxu1 %v8093_v23 }
 0x1e2   : > { %4231 = vmatprep.subr.bf16.mxu0 %v8098_v24  ;;  %4313 = vmatprep.subr.bf16.mxu1 %v8101_v25 }
 0x1e5   : > { %4232 = vmatpush1.bf16.msra.mxu0 %v8096_v26  ;;  %4314 = vmatpush1.bf16.msra.mxu1 %v8099_v27 }
 0x1e6   : > { %4233 = vmatprep.subr.bf16.mxu0 %v8104_v28  ;;  %4315 = vmatprep.subr.bf16.mxu1 %v8107_v29 }
 0x1e9   : > { %4234 = vmatpush1.bf16.msra.mxu0 %v8102_v16  ;;  %4316 = vmatpush1.bf16.msra.mxu1 %v8105_v32  ;;  %v8227_v16 = vld [vmem:[%s10170_s3 + $0x7a8] ss:$16 sps:$4 sm:$0xff]  }
 0x1ea   : > { %4235 = vmatprep.subr.bf16.mxu0 %v8110_v34  ;;  %4317 = vmatprep.subr.bf16.mxu1 %v8113_v35  ;;  %v8224_v34 = vld [vmem:[%s10170_s3 + $0x7a0] ss:$16 sps:$4 sm:$0xff]  }
 0x1ed   : > { %4236 = vmatpush1.bf16.msra.mxu0 %v8108_v36  ;;  %4318 = vmatpush1.bf16.msra.mxu1 %v8111_v39  ;;  %v3266_v39 = vld [vmem:[#allocation2] sm:$0x77] }
 0x1ee   : > { %4237 = vmatprep.subr.bf16.mxu0 %v8116_v40  ;;  %4319 = vmatprep.subr.bf16.mxu1 %v8119_v41 }
 0x1f1   : > { %4238 = vmatpush1.bf16.msra.mxu0 %v8114_v42  ;;  %4320 = vmatpush1.bf16.msra.mxu1 %v8117_v43 }
 0x1f2   : > { %4239 = vmatprep.subr.bf16.mxu0 %v8122_v44  ;;  %4321 = vmatprep.subr.bf16.mxu1 %v8125_v45 }
 0x1f5   : > { %4240 = vmatpush1.bf16.msra.mxu0 %v8120_v46  ;;  %4322 = vmatpush1.bf16.msra.mxu1 %v8123_v47 }
 0x1f6   : > { %4241 = vmatprep.subr.bf16.mxu0 %v8128_v49  ;;  %4323 = vmatprep.subr.bf16.mxu1 %v8131_v50 }
 0x1f9   : > { %4242 = vmatpush1.bf16.msra.mxu0 %v8126_v51  ;;  %4324 = vmatpush1.bf16.msra.mxu1 %v8129_v52 }
 0x1fa   : > { %4243 = vmatprep.subr.bf16.mxu0 %v8134_v53  ;;  %4325 = vmatprep.subr.bf16.mxu1 %v8137_v54  ;;  %v8146_v53 = vld [vmem:[%s10170_s3 + $0x600] ss:$16 sps:$4 sm:$0xff]   ;;  %v8149_v54 = vld [vmem:[%s10170_s3 + $0x608] ss:$16 sps:$4 sm:$0xff]  }
 0x1fd   : > { %4244 = vmatpush1.bf16.msra.mxu0 %v8132_v55  ;;  %4326 = vmatpush1.bf16.msra.mxu1 %v8135_v56  ;;  %v8154_v56 = vld [vmem:[%s10170_s3 + $0x624] ss:$16 sps:$4 sm:$0xff]  }
 0x1fe   : > { %4245 = vmatprep.subr.bf16.mxu0 %v8140_v31  ;;  %4327 = vmatprep.subr.bf16.mxu1 %v8143_v37  ;;  %v8157_v31 = vld [vmem:[%s10170_s3 + $0x62c] ss:$16 sps:$4 sm:$0xff]   ;;  %v8152_v37 = vld [vmem:[%s10170_s3 + $0x620] ss:$16 sps:$4 sm:$0xff]  }
 0x201   : > { %4246 = vmatpush1.bf16.msra.mxu0 %v8138_v38  ;;  %4328 = vmatpush1.bf16.msra.mxu1 %v8141_v33  ;;  %v8155_v38 = vld [vmem:[%s10170_s3 + $0x628] ss:$16 sps:$4 sm:$0xff]   ;;  %v8160_v33 = vld [vmem:[%s10170_s3 + $0x644] ss:$16 sps:$4 sm:$0xff]  }
 0x202   : > { %4256 = vmatprep.subr.bf16.mxu0 %v8148_v5  ;;  %4338 = vmatprep.subr.bf16.mxu1 %v8151_v11  ;;  %v8163_v5 = vld [vmem:[%s10170_s3 + $0x64c] ss:$16 sps:$4 sm:$0xff]   ;;  %v8158_v11 = vld [vmem:[%s10170_s3 + $0x640] ss:$16 sps:$4 sm:$0xff]  }
 0x217   : > { %v2337_v57 = vpop.f32.mrb[8].mxu0  ;;  %v2378_v58 = vpop.f32.mrb[8].mxu1 }
 0x218   : > { %v9110_v59 = vadd.f32 %v2378_v58, %v2337_v57  ;;  %v2339_v60 = vpop.f32.mrb[9].mxu0  ;;  %v2380_v61 = vpop.f32.mrb[9].mxu1  ;;  %v8161_v57 = vld [vmem:[%s10170_s3 + $0x648] ss:$16 sps:$4 sm:$0xff]   ;;  %v8166_v58 = vld [vmem:[%s10170_s3 + $0x664] ss:$16 sps:$4 sm:$0xff]  }
 0x219   : > { %v9112_v62 = vadd.f32 %v2380_v61, %v2339_v60  ;;  %v2341_v63 = vpop.f32.mrb[10].mxu0  ;;  %v2382_v0 = vpop.f32.mrb[10].mxu1  ;;  %v8169_v60 = vld [vmem:[%s10170_s3 + $0x66c] ss:$16 sps:$4 sm:$0xff]   ;;  %v8164_v61 = vld [vmem:[%s10170_s3 + $0x660] ss:$16 sps:$4 sm:$0xff]  }
 0x21a   : > { %v2342_v48 = vpop.f32.mrb[11].mxu0  ;;  %v2383_v30 = vpop.f32.mrb[11].mxu1  ;;  %v8167_v63 = vld [vmem:[%s10170_s3 + $0x668] ss:$16 sps:$4 sm:$0xff]   ;;  %v8172_v0 = vld [vmem:[%s10170_s3 + $0x684] ss:$16 sps:$4 sm:$0xff]  }
 0x21b   : > { %v8175_v48 = vld [vmem:[%s10170_s3 + $0x68c] ss:$16 sps:$4 sm:$0xff]   ;;  %v8170_v30 = vld [vmem:[%s10170_s3 + $0x680] ss:$16 sps:$4 sm:$0xff]  }
 0x257   : > { %v3059_v8 = vpop.f32.mrb[12].mxu0  ;;  %v3100_v9 = vpop.f32.mrb[12].mxu1 }
 0x258   : > { %v3060_v12 = vadd.f32 %v3059_v8, %v8986_v7  ;;  %v3061_v15 = vpop.f32.mrb[13].mxu0  ;;  %v3102_v17 = vpop.f32.mrb[13].mxu1  ;;  %v8178_v8 = vld [vmem:[%s10170_s3 + $0x6a4] ss:$16 sps:$4 sm:$0xff]  }
 0x259   : > { %v3062_v18 = vadd.f32 %v3061_v15, %v8988_v10  ;;  %v3063_v20 = vpop.f32.mrb[14].mxu0  ;;  %v3104_v21 = vpop.f32.mrb[14].mxu1  ;;  %v8184_v15 = vld [vmem:[%s10170_s3 + $0x6c4] ss:$16 sps:$4 sm:$0xff]  }
 0x25a   : > { %v3101_v22 = vadd.f32 %v3100_v9, %v3060_v12  ;;  %v3064_v23 = vpop.f32.mrb[15].mxu0  ;;  %v3105_v24 = vpop.f32.mrb[15].mxu1  ;;  %v8181_v9 = vld [vmem:[%s10170_s3 + $0x6ac] ss:$16 sps:$4 sm:$0xff]   ;;  %v8176_v12 = vld [vmem:[%s10170_s3 + $0x6a0] ss:$16 sps:$4 sm:$0xff]  }
 0x25b   : > { %v3103_v25 = vadd.f32 %v3102_v17, %v3062_v18  ;;  %v8187_v17 = vld [vmem:[%s10170_s3 + $0x6cc] ss:$16 sps:$4 sm:$0xff]   ;;  %v8182_v18 = vld [vmem:[%s10170_s3 + $0x6c0] ss:$16 sps:$4 sm:$0xff]   ;;  %v8190_v20 = vld [vmem:[%s10170_s3 + $0x6e4] ss:$16 sps:$4 sm:$0xff]  }
 0x25c   : > { %v3211_v26 = vadd.f32 %v3194_v13, %v3101_v22  ;;  %v8179_v13 = vld [vmem:[%s10170_s3 + $0x6a8] ss:$16 sps:$4 sm:$0xff]   ;;  %v8193_v21 = vld [vmem:[%s10170_s3 + $0x6ec] ss:$16 sps:$4 sm:$0xff]   ;;  %v9235_v22 = vsub.s32 2, %v9114_v2 }
 0x25d   : > { %v3212_v27 = vadd.f32 %v3198_v19, %v3103_v25  ;;  %v8185_v19 = vld [vmem:[%s10170_s3 + $0x6c8] ss:$16 sps:$4 sm:$0xff]   ;;  %v8188_v23 = vld [vmem:[%s10170_s3 + $0x6e0] ss:$16 sps:$4 sm:$0xff]   ;;  %v9244_v25 = vsub.s32 3, %v9114_v2 }
 0x25e   : > { %vm3215_vm0 = vcmp.ge.f32.partialorder %v3211_v26, 0.0  ;;  %v3219_v7 = vmul.f32 0.01, %v3211_v26  ;;  %v8191_v24 = vld [vmem:[%s10170_s3 + $0x6e8] ss:$16 sps:$4 sm:$0xff]  }
 0x25f   : > { %vm3216_vm1 = vcmp.ge.f32.partialorder %v3212_v27, 0.0  ;;  %v3220_v14 = vmul.f32 0.01, %v3212_v27 }
 0x260   : > { %v3223_v28 = vsel %vm3215_vm0, %v3211_v26, %v3219_v7  ;;  %v8196_v26 = vld [vmem:[%s10170_s3 + $0x704] ss:$16 sps:$4 sm:$0xff]  }
 0x261   : > { %v3224_v29 = vsel %vm3216_vm1, %v3212_v27, %v3220_v14  ;;  %v8199_v27 = vld [vmem:[%s10170_s3 + $0x70c] ss:$16 sps:$4 sm:$0xff]  }
 0x262   : > { %v7365_v10 = vpack.c.bf16 %v3224_v29, %v3223_v28  ;;  %v3202_v29 = vrot.slane %v9122_v4, %v9235_v22 }
 0x264   : > { %v3244_v32 = vshrl.u32 %v7365_v10, 16  ;;  %v3247_v36 = vshll.u32 %v7365_v10, 16 }
 0x266   : > { %v3246_v35 = vrot.slane %v3244_v32, 7 }
 0x268   : > { %v3249_v40 = vor.u32 %v3247_v36, %v3246_v35  ;;  %v3206_v36 = vrot.slane %v9122_v4, %v9244_v25  ;;  %v8205_v4 = vld [vmem:[%s10170_s3 + $0x72c] ss:$16 sps:$4 sm:$0xff]  }
 0x26a   : > { %v3267_v41 = vsel %vm3265_vm8, %v3249_v40, %v3266_v39 }
 0x26b   : > { %3268 = vst [vmem:[#allocation2] sm:$0x77] %v3267_v41  ;;  %v8194_v41 = vld [vmem:[%s10170_s3 + $0x700] ss:$16 sps:$4 sm:$0xff]  }
 0x272   : > { %v3402_v42 = vld [vmem:[#allocation2] sm:$0x77] }
 0x273   : > { %v6835_v43 = vcombine.low %v3402_v42, %v3402_v42  ;;  %v6836_v44 = vcombine.high %v3402_v42, %v3402_v42 }
 0x275   : > { %v3553_v45 = vshll.u32 %v6836_v44, 16  ;;  %v3546_v46 = vshll.u32 %v6835_v43, 16  ;;  %v3551_v47 = vshrl.u32 %v6836_v44, 16  ;;  %v3544_v50 = vshrl.u32 %v6835_v43, 16 }
 0x277   : > { %v3555_v49 = vrot.slane %v3553_v45, 1  ;;  %v3548_v51 = vrot.slane %v3546_v46, 1 }
 0x279   : > { %v3556_v52 = vor.u32 %v3555_v49, %v3551_v47  ;;  %v3549_v55 = vor.u32 %v3548_v51, %v3544_v50  ;;  %v8200_v49 = vld [vmem:[%s10170_s3 + $0x720] ss:$16 sps:$4 sm:$0xff]   ;;  %v8203_v50 = vld [vmem:[%s10170_s3 + $0x728] ss:$16 sps:$4 sm:$0xff]   ;;  %v8208_v51 = vld [vmem:[%s10170_s3 + $0x744] ss:$16 sps:$4 sm:$0xff]  }
 0x27b   : > { %4247 = vmatprep.mubr.bf16.mxu0 %v3556_v52  ;;  %4329 = vmatprep.mubr.bf16.mxu1 %v3556_v52 }
 0x27c   : > { %4248 = vmatmul.mubr.bf16.vlgmr.msra.gmra.mrb[0].mxu0 %v3549_v55  ;;  %4330 = vmatmul.mubr.bf16.vlgmr.msra.gmra.mrb[0].mxu1 %v3549_v55 }
 0x27d   : > { %4257 = vmatpush1.bf16.msra.mxu0 %v8146_v53  ;;  %4339 = vmatpush1.bf16.msra.mxu1 %v8149_v54  ;;  %v8211_v53 = vld [vmem:[%s10170_s3 + $0x74c] ss:$16 sps:$4 sm:$0xff]  }
 0x27e   : > { %4258 = vmatprep.subr.bf16.mxu0 %v8154_v56  ;;  %4340 = vmatprep.subr.bf16.mxu1 %v8157_v31  ;;  %v8206_v31 = vld [vmem:[%s10170_s3 + $0x740] ss:$16 sps:$4 sm:$0xff]  }
 0x281   : > { %4259 = vmatpush1.bf16.msra.mxu0 %v8152_v37  ;;  %4341 = vmatpush1.bf16.msra.mxu1 %v8155_v38  ;;  %v8209_v37 = vld [vmem:[%s10170_s3 + $0x748] ss:$16 sps:$4 sm:$0xff]  }
 0x282   : > { %4260 = vmatprep.subr.bf16.mxu0 %v8160_v33  ;;  %4342 = vmatprep.subr.bf16.mxu1 %v8163_v5  ;;  %v8214_v33 = vld [vmem:[%s10170_s3 + $0x764] ss:$16 sps:$4 sm:$0xff]   ;;  %v8217_v5 = vld [vmem:[%s10170_s3 + $0x76c] ss:$16 sps:$4 sm:$0xff]  }
 0x285   : > { %4261 = vmatpush1.bf16.msra.mxu0 %v8158_v11  ;;  %4343 = vmatpush1.bf16.msra.mxu1 %v8161_v57  ;;  %v8212_v57 = vld [vmem:[%s10170_s3 + $0x760] ss:$16 sps:$4 sm:$0xff]  }
 0x286   : > { %4262 = vmatprep.subr.bf16.mxu0 %v8166_v58  ;;  %4344 = vmatprep.subr.bf16.mxu1 %v8169_v60  ;;  %v8215_v58 = vld [vmem:[%s10170_s3 + $0x768] ss:$16 sps:$4 sm:$0xff]  }
 0x289   : > { %4263 = vmatpush1.bf16.msra.mxu0 %v8164_v61  ;;  %4345 = vmatpush1.bf16.msra.mxu1 %v8167_v63  ;;  %v8220_v63 = vld [vmem:[%s10170_s3 + $0x784] ss:$16 sps:$4 sm:$0xff]  }
 0x28a   : > { %4264 = vmatprep.subr.bf16.mxu0 %v8172_v0  ;;  %4346 = vmatprep.subr.bf16.mxu1 %v8175_v48  ;;  %v8223_v0 = vld [vmem:[%s10170_s3 + $0x78c] ss:$16 sps:$4 sm:$0xff]  }
 0x28b   : > { %v3269_v48 = vld [vmem:[#allocation2 + $0x8] sm:$0x77] }
 0x28d   : > { %4265 = vmatpush1.bf16.msra.mxu0 %v8170_v30  ;;  %4347 = vmatpush1.bf16.msra.mxu1 %v8173_v1  ;;  %v8218_v1 = vld [vmem:[%s10170_s3 + $0x780] ss:$16 sps:$4 sm:$0xff]  }
 0x28e   : > { %4266 = vmatprep.subr.bf16.mxu0 %v8178_v8  ;;  %4348 = vmatprep.subr.bf16.mxu1 %v8181_v9  ;;  %v8221_v8 = vld [vmem:[%s10170_s3 + $0x788] ss:$16 sps:$4 sm:$0xff]  }
 0x291   : > { %4267 = vmatpush1.bf16.msra.mxu0 %v8176_v12  ;;  %4349 = vmatpush1.bf16.msra.mxu1 %v8179_v13  ;;  %v8226_v12 = vld [vmem:[%s10170_s3 + $0x7a4] ss:$16 sps:$4 sm:$0xff]   ;;  %v8229_v13 = vld [vmem:[%s10170_s3 + $0x7ac] ss:$16 sps:$4 sm:$0xff]  }
 0x292   : > { %4268 = vmatprep.subr.bf16.mxu0 %v8184_v15  ;;  %4350 = vmatprep.subr.bf16.mxu1 %v8187_v17  ;;  %v8232_v15 = vld [vmem:[%s10170_s3 + $0x7c4] ss:$16 sps:$4 sm:$0xff]   ;;  %v8235_v17 = vld [vmem:[%s10170_s3 + $0x7cc] ss:$16 sps:$4 sm:$0xff]  }
 0x295   : > { %4269 = vmatpush1.bf16.msra.mxu0 %v8182_v18  ;;  %4351 = vmatpush1.bf16.msra.mxu1 %v8185_v19  ;;  %v8230_v18 = vld [vmem:[%s10170_s3 + $0x7c0] ss:$16 sps:$4 sm:$0xff]   ;;  %v8233_v19 = vld [vmem:[%s10170_s3 + $0x7c8] ss:$16 sps:$4 sm:$0xff]  }
 0x296   : > { %4270 = vmatprep.subr.bf16.mxu0 %v8190_v20  ;;  %4352 = vmatprep.subr.bf16.mxu1 %v8193_v21  ;;  %v8238_v20 = vld [vmem:[%s10170_s3 + $0x7e4] ss:$16 sps:$4 sm:$0xff]   ;;  %v8241_v21 = vld [vmem:[%s10170_s3 + $0x7ec] ss:$16 sps:$4 sm:$0xff]  }
 0x297   : > { %v3141_v7 = vpop.f32.mrb[16].mxu0  ;;  %v3182_v14 = vpop.f32.mrb[16].mxu1 }
 0x298   : > { %v3142_v28 = vadd.f32 %v3141_v7, %v9110_v59  ;;  %v3143_v10 = vpop.f32.mrb[17].mxu0  ;;  %v3184_v32 = vpop.f32.mrb[17].mxu1  ;;  %v8197_v59 = vld [vmem:[%s10170_s3 + $0x708] ss:$16 sps:$4 sm:$0xff]  }
 0x299   : > { %v3144_v35 = vadd.f32 %v3143_v10, %v9112_v62  ;;  %4271 = vmatpush1.bf16.msra.mxu0 %v8188_v23  ;;  %4353 = vmatpush1.bf16.msra.mxu1 %v8191_v24  ;;  %v3145_v39 = vpop.f32.mrb[18].mxu0  ;;  %v3186_v40 = vpop.f32.mrb[18].mxu1  ;;  %v8202_v62 = vld [vmem:[%s10170_s3 + $0x724] ss:$16 sps:$4 sm:$0xff]   ;;  %v8239_v7 = vld [vmem:[%s10170_s3 + $0x7e8] ss:$16 sps:$4 sm:$0xff]  }
 0x29a   : > { %v3183_v42 = vadd.f32 %v3182_v14, %v3142_v28  ;;  %v3146_v43 = vpop.f32.mrb[19].mxu0  ;;  %v3187_v44 = vpop.f32.mrb[19].mxu1  ;;  %4272 = vmatprep.subr.bf16.mxu0 %v8196_v26  ;;  %4354 = vmatprep.subr.bf16.mxu1 %v8199_v27  ;;  %v8236_v27 = vld [vmem:[%s10170_s3 + $0x7e0] ss:$16 sps:$4 sm:$0xff]   ;;  %v8249_v10 = vld [vmem:[%s10170_s3 + $0xc] ss:$16 sps:$4 sm:$0xff]  }
 0x29b   : > { %v3185_v45 = vadd.f32 %v3184_v32, %v3144_v35  ;;  %v9365_v43 = vld [vmem:[#allocation2] sm:$0x33] }
 0x29c   : > { %v3213_v46 = vadd.f32 %v3202_v29, %v3183_v42  ;;  %v8246_v29 = vld [vmem:[%s10170_s3 + $0x4] ss:$16 sps:$4 sm:$0xff]  }
 0x29d   : > { %v3214_v47 = vadd.f32 %v3206_v36, %v3185_v45  ;;  %4273 = vmatpush1.bf16.msra.mxu0 %v8194_v41  ;;  %4355 = vmatpush1.bf16.msra.mxu1 %v8197_v59  ;;  %v8244_v41 = vld [vmem:[%s10170_s3] ss:$16 sps:$4 sm:$0xff]   ;;  %v8247_v59 = vld [vmem:[%s10170_s3 + $0x8] ss:$16 sps:$4 sm:$0xff]   ;;  %v8254_v44 = vld [vmem:[%s10170_s3 + $0x24] ss:$16 sps:$4 sm:$0xff]  }
 0x29e   : > { %vm3217_vm9 = vcmp.ge.f32.partialorder %v3213_v46, 0.0  ;;  %v3221_v52 = vmul.f32 0.01, %v3213_v46  ;;  %4274 = vmatprep.subr.bf16.mxu0 %v8202_v62  ;;  %4356 = vmatprep.subr.bf16.mxu1 %v8205_v4  ;;  %v8257_v62 = vld [vmem:[%s10170_s3 + $0x2c] ss:$16 sps:$4 sm:$0xff]   ;;  %v6968_v4 = vcombine.high %v9365_v43, %v9365_v43 }
 0x29f   : > { %vm3218_vm10 = vcmp.ge.f32.partialorder %v3214_v47, 0.0  ;;  %v3222_v54 = vmul.f32 0.01, %v3214_v47  ;;  %v8252_v45 = vld [vmem:[%s10170_s3 + $0x20] ss:$16 sps:$4 sm:$0xff]  }
 0x2a0   : > { %v3225_v55 = vsel %vm3217_vm9, %v3213_v46, %v3221_v52  ;;  %v8255_v46 = vld [vmem:[%s10170_s3 + $0x28] ss:$16 sps:$4 sm:$0xff]   ;;  %v8266_v52 = vld [vmem:[%s10170_s3 + $0x64] ss:$16 sps:$4 sm:$0xff]  }
 0x2a1   : > { %v3226_v56 = vsel %vm3218_vm10, %v3214_v47, %v3222_v54  ;;  %4275 = vmatpush1.bf16.msra.mxu0 %v8200_v49  ;;  %4357 = vmatpush1.bf16.msra.mxu1 %v8203_v50  ;;  %v8260_v47 = vld [vmem:[%s10170_s3 + $0x44] ss:$16 sps:$4 sm:$0xff]   ;;  %v8263_v49 = vld [vmem:[%s10170_s3 + $0x4c] ss:$16 sps:$4 sm:$0xff]   ;;  %v8258_v50 = vld [vmem:[%s10170_s3 + $0x40] ss:$16 sps:$4 sm:$0xff]  }
 0x2a2   : > { %v7366_v38 = vpack.c.bf16 %v3226_v56, %v3225_v55  ;;  %4276 = vmatprep.subr.bf16.mxu0 %v8208_v51  ;;  %4358 = vmatprep.subr.bf16.mxu1 %v8211_v53  ;;  %v8261_v51 = vld [vmem:[%s10170_s3 + $0x48] ss:$16 sps:$4 sm:$0xff]   ;;  %v8269_v53 = vld [vmem:[%s10170_s3 + $0x6c] ss:$16 sps:$4 sm:$0xff]   ;;  %v8264_v54 = vld [vmem:[%s10170_s3 + $0x60] ss:$16 sps:$4 sm:$0xff]  }
 0x2a3   : > { %v8267_v55 = vld [vmem:[%s10170_s3 + $0x68] ss:$16 sps:$4 sm:$0xff]   ;;  %v8272_v56 = vld [vmem:[%s10170_s3 + $0x84] ss:$16 sps:$4 sm:$0xff]  }
 0x2a4   : > { %v3251_v11 = vshrl.u32 %v7366_v38, 16  ;;  %v3254_v61 = vshll.u32 %v7366_v38, 16  ;;  %v8273_v38 = vld [vmem:[%s10170_s3 + $0x88] ss:$16 sps:$4 sm:$0xff]  }
 0x2a5   : > { %4277 = vmatpush1.bf16.msra.mxu0 %v8206_v31  ;;  %4359 = vmatpush1.bf16.msra.mxu1 %v8209_v37  ;;  %v8275_v31 = vld [vmem:[%s10170_s3 + $0x8c] ss:$16 sps:$4 sm:$0xff]   ;;  %v8270_v37 = vld [vmem:[%s10170_s3 + $0x80] ss:$16 sps:$4 sm:$0xff]  }
 0x2a6   : > { %v3253_v60 = vrot.slane %v3251_v11, 7  ;;  %4278 = vmatprep.subr.bf16.mxu0 %v8214_v33  ;;  %4360 = vmatprep.subr.bf16.mxu1 %v8217_v5  ;;  %v8278_v33 = vld [vmem:[%s10170_s3 + $0xa4] ss:$16 sps:$4 sm:$0xff]   ;;  %v8281_v5 = vld [vmem:[%s10170_s3 + $0xac] ss:$16 sps:$4 sm:$0xff]  }
 0x2a7   : > { %v8276_v11 = vld [vmem:[%s10170_s3 + $0xa0] ss:$16 sps:$4 sm:$0xff]  }
 0x2a8   : > { %v3256_v30 = vor.u32 %v3254_v61, %v3253_v60  ;;  %v8287_v60 = vld [vmem:[%s10170_s3 + $0xcc] ss:$16 sps:$4 sm:$0xff]   ;;  %v8282_v61 = vld [vmem:[%s10170_s3 + $0xc0] ss:$16 sps:$4 sm:$0xff]  }
 0x2a9   : > { %4279 = vmatpush1.bf16.msra.mxu0 %v8212_v57  ;;  %4361 = vmatpush1.bf16.msra.mxu1 %v8215_v58  ;;  %v8279_v57 = vld [vmem:[%s10170_s3 + $0xa8] ss:$16 sps:$4 sm:$0xff]   ;;  %v8284_v58 = vld [vmem:[%s10170_s3 + $0xc4] ss:$16 sps:$4 sm:$0xff]  }
 0x2aa   : > { %v3270_v9 = vsel %vm3265_vm8, %v3256_v30, %v3269_v48  ;;  %4280 = vmatprep.subr.bf16.mxu0 %v8220_v63  ;;  %4362 = vmatprep.subr.bf16.mxu1 %v8223_v0  ;;  %v8285_v63 = vld [vmem:[%s10170_s3 + $0xc8] ss:$16 sps:$4 sm:$0xff]   ;;  %v8290_v0 = vld [vmem:[%s10170_s3 + $0xe4] ss:$16 sps:$4 sm:$0xff]   ;;  %v8293_v48 = vld [vmem:[%s10170_s3 + $0xec] ss:$16 sps:$4 sm:$0xff]  }
 0x2ab   : > { %3271 = vst [vmem:[#allocation2 + $0x8] sm:$0x77] %v3270_v9  ;;  %v8288_v30 = vld [vmem:[%s10170_s3 + $0xe0] ss:$16 sps:$4 sm:$0xff]   ;;  %v8299_v9 = vld [vmem:[%s10170_s3 + $0x10c] ss:$16 sps:$4 sm:$0xff]  }
 0x2ad   : > { %4281 = vmatpush1.bf16.msra.mxu0 %v8218_v1  ;;  %4363 = vmatpush1.bf16.msra.mxu1 %v8221_v8  ;;  %v8291_v1 = vld [vmem:[%s10170_s3 + $0xe8] ss:$16 sps:$4 sm:$0xff]   ;;  %v8296_v8 = vld [vmem:[%s10170_s3 + $0x104] ss:$16 sps:$4 sm:$0xff]  }
 0x2ae   : > { %4282 = vmatprep.subr.bf16.mxu0 %v8226_v12  ;;  %4364 = vmatprep.subr.bf16.mxu1 %v8229_v13  ;;  %v8294_v12 = vld [vmem:[%s10170_s3 + $0x100] ss:$16 sps:$4 sm:$0xff]   ;;  %v8297_v13 = vld [vmem:[%s10170_s3 + $0x108] ss:$16 sps:$4 sm:$0xff]  }
 0x2b1   : > { %4283 = vmatpush1.bf16.msra.mxu0 %v8224_v34  ;;  %4365 = vmatpush1.bf16.msra.mxu1 %v8227_v16  ;;  %v8302_v34 = vld [vmem:[%s10170_s3 + $0x124] ss:$16 sps:$4 sm:$0xff]   ;;  %v8305_v16 = vld [vmem:[%s10170_s3 + $0x12c] ss:$16 sps:$4 sm:$0xff]  }
 0x2b2   : > { %4284 = vmatprep.subr.bf16.mxu0 %v8232_v15  ;;  %4366 = vmatprep.subr.bf16.mxu1 %v8235_v17  ;;  %v3403_v23 = vld [vmem:[#allocation2 + $0x8] sm:$0x77]  ;;  %v8300_v15 = vld [vmem:[%s10170_s3 + $0x120] ss:$16 sps:$4 sm:$0xff]  }
 0x2b3   : > { %v6837_v24 = vcombine.low %v3403_v23, %v3403_v23  ;;  %v6838_v26 = vcombine.high %v3403_v23, %v3403_v23  ;;  %v8303_v17 = vld [vmem:[%s10170_s3 + $0x128] ss:$16 sps:$4 sm:$0xff]   ;;  %v8314_v23 = vld [vmem:[%s10170_s3 + $0x164] ss:$16 sps:$4 sm:$0xff]  }
 0x2b5   : > { %4285 = vmatpush1.bf16.msra.mxu0 %v8230_v18  ;;  %4367 = vmatpush1.bf16.msra.mxu1 %v8233_v19  ;;  %v3567_v14 = vshll.u32 %v6838_v26, 16  ;;  %v3560_v28 = vshll.u32 %v6837_v24, 16  ;;  %v3565_v32 = vshrl.u32 %v6838_v26, 16  ;;  %v3558_v36 = vshrl.u32 %v6837_v24, 16  ;;  %v8308_v18 = vld [vmem:[%s10170_s3 + $0x144] ss:$16 sps:$4 sm:$0xff]  }
 0x2b6   : > { %4286 = vmatprep.subr.bf16.mxu0 %v8238_v20  ;;  %4368 = vmatprep.subr.bf16.mxu1 %v8241_v21  ;;  %v8311_v19 = vld [vmem:[%s10170_s3 + $0x14c] ss:$16 sps:$4 sm:$0xff]   ;;  %v8306_v20 = vld [vmem:[%s10170_s3 + $0x140] ss:$16 sps:$4 sm:$0xff]   ;;  %v8309_v21 = vld [vmem:[%s10170_s3 + $0x148] ss:$16 sps:$4 sm:$0xff]  }
 0x2b7   : > { %v3569_v35 = vrot.slane %v3567_v14, 1  ;;  %v3562_v39 = vrot.slane %v3560_v28, 1  ;;  %v8317_v24 = vld [vmem:[%s10170_s3 + $0x16c] ss:$16 sps:$4 sm:$0xff]   ;;  %v8312_v26 = vld [vmem:[%s10170_s3 + $0x160] ss:$16 sps:$4 sm:$0xff]  }
 0x2b8   : > { %v8323_v14 = vld [vmem:[%s10170_s3 + $0x18c] ss:$16 sps:$4 sm:$0xff]   ;;  %v8318_v28 = vld [vmem:[%s10170_s3 + $0x180] ss:$16 sps:$4 sm:$0xff]  }
 0x2b9   : > { %4287 = vmatpush1.bf16.msra.mxu0 %v8236_v27  ;;  %4369 = vmatpush1.bf16.msra.mxu1 %v8239_v7  ;;  %v3570_v40 = vor.u32 %v3569_v35, %v3565_v32  ;;  %v3563_v42 = vor.u32 %v3562_v39, %v3558_v36  ;;  %v8315_v27 = vld [vmem:[%s10170_s3 + $0x168] ss:$16 sps:$4 sm:$0xff]   ;;  %v8320_v7 = vld [vmem:[%s10170_s3 + $0x184] ss:$16 sps:$4 sm:$0xff]   ;;  %v8329_v32 = vld [vmem:[%s10170_s3 + $0x1ac] ss:$16 sps:$4 sm:$0xff]  }
 0x2ba   : > { %5033 = vmatprep.subr.bf16.mxu0 %v8246_v29  ;;  %5115 = vmatprep.subr.bf16.mxu1 %v8249_v10  ;;  %v8321_v29 = vld [vmem:[%s10170_s3 + $0x188] ss:$16 sps:$4 sm:$0xff]   ;;  %v8326_v10 = vld [vmem:[%s10170_s3 + $0x1a4] ss:$16 sps:$4 sm:$0xff]   ;;  %v8324_v35 = vld [vmem:[%s10170_s3 + $0x1a0] ss:$16 sps:$4 sm:$0xff]  }
 0x2bb   : > { %4288 = vmatprep.mubr.bf16.mxu0 %v3570_v40  ;;  %4370 = vmatprep.mubr.bf16.mxu1 %v3570_v40  ;;  %v8327_v36 = vld [vmem:[%s10170_s3 + $0x1a8] ss:$16 sps:$4 sm:$0xff]   ;;  %v8332_v39 = vld [vmem:[%s10170_s3 + $0x1c4] ss:$16 sps:$4 sm:$0xff]   ;;  %v8335_v40 = vld [vmem:[%s10170_s3 + $0x1cc] ss:$16 sps:$4 sm:$0xff]  }
 0x2bc   : > { %4289 = vmatmul.mubr.bf16.vlgmr.msra.gmra.mrb[0].mxu0 %v3563_v42  ;;  %4371 = vmatmul.mubr.bf16.vlgmr.msra.gmra.mrb[0].mxu1 %v3563_v42  ;;  %v8338_v42 = vld [vmem:[%s10170_s3 + $0x1e4] ss:$16 sps:$4 sm:$0xff]  }
 0x2bd   : > { %5034 = vmatpush1.bf16.msra.mxu0 %v8244_v41  ;;  %5116 = vmatpush1.bf16.msra.mxu1 %v8247_v59  ;;  %v8330_v41 = vld [vmem:[%s10170_s3 + $0x1c0] ss:$16 sps:$4 sm:$0xff]   ;;  %v8333_v59 = vld [vmem:[%s10170_s3 + $0x1c8] ss:$16 sps:$4 sm:$0xff]  }
 0x2be   : > { %5065 = vmatprep.mubr.bf16.mxu0 %v6968_v4  ;;  %5147 = vmatprep.mubr.bf16.mxu1 %v6968_v4  ;;  %v8339_v4 = vld [vmem:[%s10170_s3 + $0x1e8] ss:$16 sps:$4 sm:$0xff]  }
 0x2bf   : > { %5035 = vmatprep.subr.bf16.mxu0 %v8254_v44  ;;  %5117 = vmatprep.subr.bf16.mxu1 %v8257_v62  ;;  %v8341_v44 = vld [vmem:[%s10170_s3 + $0x1ec] ss:$16 sps:$4 sm:$0xff]   ;;  %v8336_v62 = vld [vmem:[%s10170_s3 + $0x1e0] ss:$16 sps:$4 sm:$0xff]  }
 0x2c1   : > { %5036 = vmatpush1.bf16.msra.mxu0 %v8252_v45  ;;  %5118 = vmatpush1.bf16.msra.mxu1 %v8255_v46  ;;  %v8344_v45 = vld [vmem:[%s10170_s3 + $0x204] ss:$16 sps:$4 sm:$0xff]   ;;  %v8347_v46 = vld [vmem:[%s10170_s3 + $0x20c] ss:$16 sps:$4 sm:$0xff]  }
 0x2c2   : > { %5037 = vmatprep.subr.bf16.mxu0 %v8260_v47  ;;  %5119 = vmatprep.subr.bf16.mxu1 %v8263_v49  ;;  %v9555_v47 = vld [vmem:[#allocation2 + $0x8] sm:$0x33]  ;;  %v8342_v49 = vld [vmem:[%s10170_s3 + $0x200] ss:$16 sps:$4 sm:$0xff]  }
 0x2c5   : > { %5038 = vmatpush1.bf16.msra.mxu0 %v8258_v50  ;;  %5120 = vmatpush1.bf16.msra.mxu1 %v8261_v51  ;;  %v6967_v50 = vcombine.low %v9365_v43, %v9365_v43  ;;  %v8345_v51 = vld [vmem:[%s10170_s3 + $0x208] ss:$16 sps:$4 sm:$0xff]   ;;  %v8350_v43 = vld [vmem:[%s10170_s3 + $0x220] ss:$16 sps:$4 sm:$0xff]  }
 0x2c6   : > { %5039 = vmatprep.subr.bf16.mxu0 %v8266_v52  ;;  %5121 = vmatprep.subr.bf16.mxu1 %v8269_v53  ;;  %v6970_v52 = vcombine.high %v9555_v47, %v9555_v47  ;;  %v8352_v53 = vld [vmem:[%s10170_s3 + $0x224] ss:$16 sps:$4 sm:$0xff]  }
 0x2c9   : > { %5040 = vmatpush1.bf16.msra.mxu0 %v8264_v54  ;;  %5122 = vmatpush1.bf16.msra.mxu1 %v8267_v55  ;;  %v8355_v54 = vld [vmem:[%s10170_s3 + $0x22c] ss:$16 sps:$4 sm:$0xff]   ;;  %v8353_v55 = vld [vmem:[%s10170_s3 + $0x228] ss:$16 sps:$4 sm:$0xff]  }
 0x2ca   : > { %5041 = vmatprep.subr.bf16.mxu0 %v8272_v56  ;;  %5123 = vmatprep.subr.bf16.mxu1 %v8275_v31  ;;  %v8358_v56 = vld [vmem:[%s10170_s3 + $0x244] ss:$16 sps:$4 sm:$0xff]   ;;  %v8361_v31 = vld [vmem:[%s10170_s3 + $0x24c] ss:$16 sps:$4 sm:$0xff]  }
 0x2cd   : > { %5042 = vmatpush1.bf16.msra.mxu0 %v8270_v37  ;;  %5124 = vmatpush1.bf16.msra.mxu1 %v8273_v38  ;;  %v8356_v37 = vld [vmem:[%s10170_s3 + $0x240] ss:$16 sps:$4 sm:$0xff]   ;;  %v8359_v38 = vld [vmem:[%s10170_s3 + $0x248] ss:$16 sps:$4 sm:$0xff]  }
 0x2ce   : > { %5043 = vmatprep.subr.bf16.mxu0 %v8278_v33  ;;  %5125 = vmatprep.subr.bf16.mxu1 %v8281_v5  ;;  %v8364_v33 = vld [vmem:[%s10170_s3 + $0x264] ss:$16 sps:$4 sm:$0xff]   ;;  %v8367_v5 = vld [vmem:[%s10170_s3 + $0x26c] ss:$16 sps:$4 sm:$0xff]  }
 0x2d1   : > { %5044 = vmatpush1.bf16.msra.mxu0 %v8276_v11  ;;  %5126 = vmatpush1.bf16.msra.mxu1 %v8279_v57  ;;  %v8362_v11 = vld [vmem:[%s10170_s3 + $0x260] ss:$16 sps:$4 sm:$0xff]   ;;  %v8365_v57 = vld [vmem:[%s10170_s3 + $0x268] ss:$16 sps:$4 sm:$0xff]  }
 0x2d2   : > { %5045 = vmatprep.subr.bf16.mxu0 %v8284_v58  ;;  %5127 = vmatprep.subr.bf16.mxu1 %v8287_v60  ;;  %v8370_v58 = vld [vmem:[%s10170_s3 + $0x284] ss:$16 sps:$4 sm:$0xff]   ;;  %v8373_v60 = vld [vmem:[%s10170_s3 + $0x28c] ss:$16 sps:$4 sm:$0xff]  }
 0x2d5   : > { %5046 = vmatpush1.bf16.msra.mxu0 %v8282_v61  ;;  %5128 = vmatpush1.bf16.msra.mxu1 %v8285_v63  ;;  %v8368_v61 = vld [vmem:[%s10170_s3 + $0x280] ss:$16 sps:$4 sm:$0xff]   ;;  %v8371_v63 = vld [vmem:[%s10170_s3 + $0x288] ss:$16 sps:$4 sm:$0xff]  }
 0x2d6   : > { %5047 = vmatprep.subr.bf16.mxu0 %v8290_v0  ;;  %5129 = vmatprep.subr.bf16.mxu1 %v8293_v48  ;;  %v8376_v0 = vld [vmem:[%s10170_s3 + $0x2a4] ss:$16 sps:$4 sm:$0xff]   ;;  %v8379_v48 = vld [vmem:[%s10170_s3 + $0x2ac] ss:$16 sps:$4 sm:$0xff]  }
 0x2d9   : > { %5048 = vmatpush1.bf16.msra.mxu0 %v8288_v30  ;;  %5130 = vmatpush1.bf16.msra.mxu1 %v8291_v1  ;;  %v8374_v30 = vld [vmem:[%s10170_s3 + $0x2a0] ss:$16 sps:$4 sm:$0xff]   ;;  %v8377_v1 = vld [vmem:[%s10170_s3 + $0x2a8] ss:$16 sps:$4 sm:$0xff]  }
 0x2da   : > { %5049 = vmatprep.subr.bf16.mxu0 %v8296_v8  ;;  %5131 = vmatprep.subr.bf16.mxu1 %v8299_v9  ;;  %v8382_v8 = vld [vmem:[%s10170_s3 + $0x2c4] ss:$16 sps:$4 sm:$0xff]   ;;  %v8385_v9 = vld [vmem:[%s10170_s3 + $0x2cc] ss:$16 sps:$4 sm:$0xff]  }
 0x2dd   : > { %5050 = vmatpush1.bf16.msra.mxu0 %v8294_v12  ;;  %5132 = vmatpush1.bf16.msra.mxu1 %v8297_v13  ;;  %v8380_v12 = vld [vmem:[%s10170_s3 + $0x2c0] ss:$16 sps:$4 sm:$0xff]   ;;  %v8383_v13 = vld [vmem:[%s10170_s3 + $0x2c8] ss:$16 sps:$4 sm:$0xff]  }
 0x2de   : > { %5051 = vmatprep.subr.bf16.mxu0 %v8302_v34  ;;  %5133 = vmatprep.subr.bf16.mxu1 %v8305_v16  ;;  %v8388_v34 = vld [vmem:[%s10170_s3 + $0x2e4] ss:$16 sps:$4 sm:$0xff]   ;;  %v8391_v16 = vld [vmem:[%s10170_s3 + $0x2ec] ss:$16 sps:$4 sm:$0xff]  }
 0x2e1   : > { %5052 = vmatpush1.bf16.msra.mxu0 %v8300_v15  ;;  %5134 = vmatpush1.bf16.msra.mxu1 %v8303_v17  ;;  %v8386_v15 = vld [vmem:[%s10170_s3 + $0x2e0] ss:$16 sps:$4 sm:$0xff]   ;;  %v8389_v17 = vld [vmem:[%s10170_s3 + $0x2e8] ss:$16 sps:$4 sm:$0xff]  }
 0x2e2   : > { %5053 = vmatprep.subr.bf16.mxu0 %v8308_v18  ;;  %5135 = vmatprep.subr.bf16.mxu1 %v8311_v19  ;;  %v8394_v18 = vld [vmem:[%s10170_s3 + $0x304] ss:$16 sps:$4 sm:$0xff]   ;;  %v8397_v19 = vld [vmem:[%s10170_s3 + $0x30c] ss:$16 sps:$4 sm:$0xff]  }
 0x2e5   : > { %5054 = vmatpush1.bf16.msra.mxu0 %v8306_v20  ;;  %5136 = vmatpush1.bf16.msra.mxu1 %v8309_v21  ;;  %v8392_v20 = vld [vmem:[%s10170_s3 + $0x300] ss:$16 sps:$4 sm:$0xff]   ;;  %v8395_v21 = vld [vmem:[%s10170_s3 + $0x308] ss:$16 sps:$4 sm:$0xff]  }
 0x2e6   : > { %5055 = vmatprep.subr.bf16.mxu0 %v8314_v23  ;;  %5137 = vmatprep.subr.bf16.mxu1 %v8317_v24  ;;  %v8400_v23 = vld [vmem:[%s10170_s3 + $0x324] ss:$16 sps:$4 sm:$0xff]   ;;  %v8403_v24 = vld [vmem:[%s10170_s3 + $0x32c] ss:$16 sps:$4 sm:$0xff]  }
 0x2e9   : > { %5056 = vmatpush1.bf16.msra.mxu0 %v8312_v26  ;;  %5138 = vmatpush1.bf16.msra.mxu1 %v8315_v27  ;;  %v8398_v26 = vld [vmem:[%s10170_s3 + $0x320] ss:$16 sps:$4 sm:$0xff]   ;;  %v8401_v27 = vld [vmem:[%s10170_s3 + $0x328] ss:$16 sps:$4 sm:$0xff]  }
 0x2ea   : > { %5057 = vmatprep.subr.bf16.mxu0 %v8320_v7  ;;  %5139 = vmatprep.subr.bf16.mxu1 %v8323_v14  ;;  %v8406_v7 = vld [vmem:[%s10170_s3 + $0x344] ss:$16 sps:$4 sm:$0xff]   ;;  %v8409_v14 = vld [vmem:[%s10170_s3 + $0x34c] ss:$16 sps:$4 sm:$0xff]  }
 0x2ed   : > { %5058 = vmatpush1.bf16.msra.mxu0 %v8318_v28  ;;  %5140 = vmatpush1.bf16.msra.mxu1 %v8321_v29  ;;  %v8404_v28 = vld [vmem:[%s10170_s3 + $0x340] ss:$16 sps:$4 sm:$0xff]   ;;  %v8407_v29 = vld [vmem:[%s10170_s3 + $0x348] ss:$16 sps:$4 sm:$0xff]  }
 0x2ee   : > { %5059 = vmatprep.subr.bf16.mxu0 %v8326_v10  ;;  %5141 = vmatprep.subr.bf16.mxu1 %v8329_v32  ;;  %v8412_v10 = vld [vmem:[%s10170_s3 + $0x364] ss:$16 sps:$4 sm:$0xff]   ;;  %v8415_v32 = vld [vmem:[%s10170_s3 + $0x36c] ss:$16 sps:$4 sm:$0xff]  }
 0x2f1   : > { %5060 = vmatpush1.bf16.msra.mxu0 %v8324_v35  ;;  %5142 = vmatpush1.bf16.msra.mxu1 %v8327_v36  ;;  %v8410_v35 = vld [vmem:[%s10170_s3 + $0x360] ss:$16 sps:$4 sm:$0xff]   ;;  %v8413_v36 = vld [vmem:[%s10170_s3 + $0x368] ss:$16 sps:$4 sm:$0xff]  }
 0x2f2   : > { %5061 = vmatprep.subr.bf16.mxu0 %v8332_v39  ;;  %5143 = vmatprep.subr.bf16.mxu1 %v8335_v40  ;;  %v8418_v39 = vld [vmem:[%s10170_s3 + $0x384] ss:$16 sps:$4 sm:$0xff]   ;;  %v8421_v40 = vld [vmem:[%s10170_s3 + $0x38c] ss:$16 sps:$4 sm:$0xff]  }
 0x2f5   : > { %5062 = vmatpush1.bf16.msra.mxu0 %v8330_v41  ;;  %5144 = vmatpush1.bf16.msra.mxu1 %v8333_v59  ;;  %v8416_v41 = vld [vmem:[%s10170_s3 + $0x380] ss:$16 sps:$4 sm:$0xff]   ;;  %v8419_v59 = vld [vmem:[%s10170_s3 + $0x388] ss:$16 sps:$4 sm:$0xff]  }
 0x2f6   : > { %5063 = vmatprep.subr.bf16.mxu0 %v8338_v42  ;;  %5145 = vmatprep.subr.bf16.mxu1 %v8341_v44  ;;  %v8424_v42 = vld [vmem:[%s10170_s3 + $0x3a4] ss:$16 sps:$4 sm:$0xff]   ;;  %v8427_v44 = vld [vmem:[%s10170_s3 + $0x3ac] ss:$16 sps:$4 sm:$0xff]  }
 0x2f9   : > { %5064 = vmatpush1.bf16.msra.mxu0 %v8336_v62  ;;  %5146 = vmatpush1.bf16.msra.mxu1 %v8339_v4  ;;  %v8422_v62 = vld [vmem:[%s10170_s3 + $0x3a0] ss:$16 sps:$4 sm:$0xff]   ;;  %v8425_v4 = vld [vmem:[%s10170_s3 + $0x3a8] ss:$16 sps:$4 sm:$0xff]  }
 0x2fa   : > { %5074 = vmatprep.subr.bf16.mxu0 %v8344_v45  ;;  %5156 = vmatprep.subr.bf16.mxu1 %v8347_v46  ;;  %v8430_v45 = vld [vmem:[%s10170_s3 + $0x3c4] ss:$16 sps:$4 sm:$0xff]   ;;  %v8433_v46 = vld [vmem:[%s10170_s3 + $0x3cc] ss:$16 sps:$4 sm:$0xff]  }
 0x2fc   : > { %5066 = vmatmul.mubr.bf16.vlgmr.msra.gmra.mrb[0].mxu0 %v6967_v50  ;;  %5148 = vmatmul.mubr.bf16.vlgmr.msra.gmra.mrb[0].mxu1 %v6967_v50  ;;  %v8431_v50 = vld [vmem:[%s10170_s3 + $0x3c8] ss:$16 sps:$4 sm:$0xff]  }
 0x2fd   : > { %5075 = vmatpush1.bf16.msra.mxu0 %v8342_v49  ;;  %5106 = vmatprep.mubr.bf16.mxu0 %v6970_v52  ;;  %v8428_v49 = vld [vmem:[%s10170_s3 + $0x3c0] ss:$16 sps:$4 sm:$0xff]  }
 0x2fe   : > { %5157 = vmatpush1.bf16.msra.mxu1 %v8345_v51  ;;  %5188 = vmatprep.mubr.bf16.mxu1 %v6970_v52  ;;  %v8436_v51 = vld [vmem:[%s10170_s3 + $0x3e4] ss:$16 sps:$4 sm:$0xff]   ;;  %v8439_v52 = vld [vmem:[%s10170_s3 + $0x3ec] ss:$16 sps:$4 sm:$0xff]  }
 0x2ff   : > { %5076 = vmatprep.subr.bf16.mxu0 %v8352_v53  ;;  %5158 = vmatprep.subr.bf16.mxu1 %v8355_v54  ;;  %v8434_v53 = vld [vmem:[%s10170_s3 + $0x3e0] ss:$16 sps:$4 sm:$0xff]  }
 0x300   : > { %v9744_v54 = vld [vmem:[#allocation2] sm:$0x66] }
 0x301   : > { %5077 = vmatpush1.bf16.msra.mxu0 %v8350_v43  ;;  %v8437_v43 = vld [vmem:[%s10170_s3 + $0x3e8] ss:$16 sps:$4 sm:$0xff]  }
 0x302   : > { %5159 = vmatpush1.bf16.msra.mxu1 %v8353_v55  ;;  %5078 = vmatprep.subr.bf16.mxu0 %v8358_v56  ;;  %v8442_v55 = vld [vmem:[%s10170_s3 + $0x804] ss:$16 sps:$4 sm:$0xff]   ;;  %v8445_v56 = vld [vmem:[%s10170_s3 + $0x80c] ss:$16 sps:$4 sm:$0xff]  }
 0x303   : > { %5160 = vmatprep.subr.bf16.mxu1 %v8361_v31  ;;  %v7228_v31 = vcombine.high %v9744_v54, %v9744_v54 }
 0x305   : > { %5079 = vmatpush1.bf16.msra.mxu0 %v8356_v37  ;;  %v8440_v37 = vld [vmem:[%s10170_s3 + $0x800] ss:$16 sps:$4 sm:$0xff]  }
 0x306   : > { %5161 = vmatpush1.bf16.msra.mxu1 %v8359_v38  ;;  %5080 = vmatprep.subr.bf16.mxu0 %v8364_v33  ;;  %v6969_v38 = vcombine.low %v9555_v47, %v9555_v47  ;;  %v8443_v33 = vld [vmem:[%s10170_s3 + $0x808] ss:$16 sps:$4 sm:$0xff]   ;;  %v8448_v47 = vld [vmem:[%s10170_s3 + $0x820] ss:$16 sps:$4 sm:$0xff]  }
 0x307   : > { %5162 = vmatprep.subr.bf16.mxu1 %v8367_v5  ;;  %v8450_v5 = vld [vmem:[%s10170_s3 + $0x824] ss:$16 sps:$4 sm:$0xff]  }
 0x309   : > { %5081 = vmatpush1.bf16.msra.mxu0 %v8362_v11  ;;  %v5339_v11 = vrot.slane %v7228_v31, 1  ;;  %v8531_v31 = vld [vmem:[%s10170_s3 + $0x9cc] ss:$16 sps:$4 sm:$0xff]  }
 0x30a   : > { %5163 = vmatpush1.bf16.msra.mxu1 %v8365_v57  ;;  %5082 = vmatprep.subr.bf16.mxu0 %v8370_v58  ;;  %v8453_v57 = vld [vmem:[%s10170_s3 + $0x82c] ss:$16 sps:$4 sm:$0xff]   ;;  %v8451_v58 = vld [vmem:[%s10170_s3 + $0x828] ss:$16 sps:$4 sm:$0xff]  }
 0x30b   : > { %5164 = vmatprep.subr.bf16.mxu1 %v8373_v60  ;;  %v8456_v60 = vld [vmem:[%s10170_s3 + $0x844] ss:$16 sps:$4 sm:$0xff]  }
 0x30d   : > { %5083 = vmatpush1.bf16.msra.mxu0 %v8368_v61  ;;  %v8459_v61 = vld [vmem:[%s10170_s3 + $0x84c] ss:$16 sps:$4 sm:$0xff]  }
 0x30e   : > { %5165 = vmatpush1.bf16.msra.mxu1 %v8371_v63  ;;  %5084 = vmatprep.subr.bf16.mxu0 %v8376_v0  ;;  %v8454_v63 = vld [vmem:[%s10170_s3 + $0x840] ss:$16 sps:$4 sm:$0xff]   ;;  %v8457_v0 = vld [vmem:[%s10170_s3 + $0x848] ss:$16 sps:$4 sm:$0xff]  }
 0x30f   : > { %5166 = vmatprep.subr.bf16.mxu1 %v8379_v48  ;;  %v8462_v48 = vld [vmem:[%s10170_s3 + $0x864] ss:$16 sps:$4 sm:$0xff]  }
 0x311   : > { %5085 = vmatpush1.bf16.msra.mxu0 %v8374_v30  ;;  %v8465_v30 = vld [vmem:[%s10170_s3 + $0x86c] ss:$16 sps:$4 sm:$0xff]  }
 0x312   : > { %5167 = vmatpush1.bf16.msra.mxu1 %v8377_v1  ;;  %5086 = vmatprep.subr.bf16.mxu0 %v8382_v8  ;;  %v8460_v1 = vld [vmem:[%s10170_s3 + $0x860] ss:$16 sps:$4 sm:$0xff]   ;;  %v8463_v8 = vld [vmem:[%s10170_s3 + $0x868] ss:$16 sps:$4 sm:$0xff]  }
 0x313   : > { %5168 = vmatprep.subr.bf16.mxu1 %v8385_v9  ;;  %v8468_v9 = vld [vmem:[%s10170_s3 + $0x884] ss:$16 sps:$4 sm:$0xff]  }
 0x315   : > { %5087 = vmatpush1.bf16.msra.mxu0 %v8380_v12  ;;  %v8471_v12 = vld [vmem:[%s10170_s3 + $0x88c] ss:$16 sps:$4 sm:$0xff]  }
 0x316   : > { %5169 = vmatpush1.bf16.msra.mxu1 %v8383_v13  ;;  %5088 = vmatprep.subr.bf16.mxu0 %v8388_v34  ;;  %v8466_v13 = vld [vmem:[%s10170_s3 + $0x880] ss:$16 sps:$4 sm:$0xff]   ;;  %v8469_v34 = vld [vmem:[%s10170_s3 + $0x888] ss:$16 sps:$4 sm:$0xff]  }
 0x317   : > { %5170 = vmatprep.subr.bf16.mxu1 %v8391_v16  ;;  %v8474_v16 = vld [vmem:[%s10170_s3 + $0x8a4] ss:$16 sps:$4 sm:$0xff]  }
 0x319   : > { %5089 = vmatpush1.bf16.msra.mxu0 %v8386_v15  ;;  %v8477_v15 = vld [vmem:[%s10170_s3 + $0x8ac] ss:$16 sps:$4 sm:$0xff]  }
 0x31a   : > { %5171 = vmatpush1.bf16.msra.mxu1 %v8389_v17  ;;  %5090 = vmatprep.subr.bf16.mxu0 %v8394_v18  ;;  %v8472_v17 = vld [vmem:[%s10170_s3 + $0x8a0] ss:$16 sps:$4 sm:$0xff]   ;;  %v8475_v18 = vld [vmem:[%s10170_s3 + $0x8a8] ss:$16 sps:$4 sm:$0xff]  }
 0x31b   : > { %5172 = vmatprep.subr.bf16.mxu1 %v8397_v19  ;;  %v8480_v19 = vld [vmem:[%s10170_s3 + $0x8c4] ss:$16 sps:$4 sm:$0xff]  }
 0x31d   : > { %5091 = vmatpush1.bf16.msra.mxu0 %v8392_v20  ;;  %v8483_v20 = vld [vmem:[%s10170_s3 + $0x8cc] ss:$16 sps:$4 sm:$0xff]  }
 0x31e   : > { %5173 = vmatpush1.bf16.msra.mxu1 %v8395_v21  ;;  %5092 = vmatprep.subr.bf16.mxu0 %v8400_v23  ;;  %v8478_v21 = vld [vmem:[%s10170_s3 + $0x8c0] ss:$16 sps:$4 sm:$0xff]   ;;  %v8481_v23 = vld [vmem:[%s10170_s3 + $0x8c8] ss:$16 sps:$4 sm:$0xff]  }
 0x31f   : > { %5174 = vmatprep.subr.bf16.mxu1 %v8403_v24  ;;  %v8486_v24 = vld [vmem:[%s10170_s3 + $0x8e4] ss:$16 sps:$4 sm:$0xff]  }
 0x321   : > { %5093 = vmatpush1.bf16.msra.mxu0 %v8398_v26  ;;  %v8489_v26 = vld [vmem:[%s10170_s3 + $0x8ec] ss:$16 sps:$4 sm:$0xff]  }
 0x322   : > { %5175 = vmatpush1.bf16.msra.mxu1 %v8401_v27  ;;  %5094 = vmatprep.subr.bf16.mxu0 %v8406_v7  ;;  %v8484_v27 = vld [vmem:[%s10170_s3 + $0x8e0] ss:$16 sps:$4 sm:$0xff]   ;;  %v8487_v7 = vld [vmem:[%s10170_s3 + $0x8e8] ss:$16 sps:$4 sm:$0xff]  }
 0x323   : > { %5176 = vmatprep.subr.bf16.mxu1 %v8409_v14  ;;  %v8492_v14 = vld [vmem:[%s10170_s3 + $0x904] ss:$16 sps:$4 sm:$0xff]  }
 0x325   : > { %5095 = vmatpush1.bf16.msra.mxu0 %v8404_v28  ;;  %v8495_v28 = vld [vmem:[%s10170_s3 + $0x90c] ss:$16 sps:$4 sm:$0xff]  }
 0x326   : > { %5177 = vmatpush1.bf16.msra.mxu1 %v8407_v29  ;;  %5096 = vmatprep.subr.bf16.mxu0 %v8412_v10  ;;  %v8490_v29 = vld [vmem:[%s10170_s3 + $0x900] ss:$16 sps:$4 sm:$0xff]   ;;  %v8493_v10 = vld [vmem:[%s10170_s3 + $0x908] ss:$16 sps:$4 sm:$0xff]  }
 0x327   : > { %5178 = vmatprep.subr.bf16.mxu1 %v8415_v32  ;;  %v8498_v32 = vld [vmem:[%s10170_s3 + $0x924] ss:$16 sps:$4 sm:$0xff]  }
 0x329   : > { %5097 = vmatpush1.bf16.msra.mxu0 %v8410_v35  ;;  %v8501_v35 = vld [vmem:[%s10170_s3 + $0x92c] ss:$16 sps:$4 sm:$0xff]  }
 0x32a   : > { %5179 = vmatpush1.bf16.msra.mxu1 %v8413_v36  ;;  %5098 = vmatprep.subr.bf16.mxu0 %v8418_v39  ;;  %v8496_v36 = vld [vmem:[%s10170_s3 + $0x920] ss:$16 sps:$4 sm:$0xff]   ;;  %v8499_v39 = vld [vmem:[%s10170_s3 + $0x928] ss:$16 sps:$4 sm:$0xff]  }
 0x32b   : > { %5180 = vmatprep.subr.bf16.mxu1 %v8421_v40  ;;  %v8504_v40 = vld [vmem:[%s10170_s3 + $0x944] ss:$16 sps:$4 sm:$0xff]  }
 0x32d   : > { %5099 = vmatpush1.bf16.msra.mxu0 %v8416_v41  ;;  %v8507_v41 = vld [vmem:[%s10170_s3 + $0x94c] ss:$16 sps:$4 sm:$0xff]  }
 0x32e   : > { %5181 = vmatpush1.bf16.msra.mxu1 %v8419_v59  ;;  %5100 = vmatprep.subr.bf16.mxu0 %v8424_v42  ;;  %v8502_v59 = vld [vmem:[%s10170_s3 + $0x940] ss:$16 sps:$4 sm:$0xff]   ;;  %v8505_v42 = vld [vmem:[%s10170_s3 + $0x948] ss:$16 sps:$4 sm:$0xff]  }
 0x32f   : > { %5182 = vmatprep.subr.bf16.mxu1 %v8427_v44  ;;  %v8510_v44 = vld [vmem:[%s10170_s3 + $0x964] ss:$16 sps:$4 sm:$0xff]  }
 0x331   : > { %5101 = vmatpush1.bf16.msra.mxu0 %v8422_v62  ;;  %v8513_v62 = vld [vmem:[%s10170_s3 + $0x96c] ss:$16 sps:$4 sm:$0xff]  }
 0x332   : > { %5183 = vmatpush1.bf16.msra.mxu1 %v8425_v4  ;;  %5102 = vmatprep.subr.bf16.mxu0 %v8430_v45  ;;  %v8508_v4 = vld [vmem:[%s10170_s3 + $0x960] ss:$16 sps:$4 sm:$0xff]   ;;  %v8511_v45 = vld [vmem:[%s10170_s3 + $0x968] ss:$16 sps:$4 sm:$0xff]  }
 0x333   : > { %5184 = vmatprep.subr.bf16.mxu1 %v8433_v46  ;;  %v8516_v46 = vld [vmem:[%s10170_s3 + $0x984] ss:$16 sps:$4 sm:$0xff]  }
 0x335   : > { %5103 = vmatpush1.bf16.msra.mxu0 %v8428_v49  ;;  %v8519_v49 = vld [vmem:[%s10170_s3 + $0x98c] ss:$16 sps:$4 sm:$0xff]  }
 0x336   : > { %5185 = vmatpush1.bf16.msra.mxu1 %v8431_v50  ;;  %5104 = vmatprep.subr.bf16.mxu0 %v8436_v51  ;;  %v8514_v50 = vld [vmem:[%s10170_s3 + $0x980] ss:$16 sps:$4 sm:$0xff]   ;;  %v8517_v51 = vld [vmem:[%s10170_s3 + $0x988] ss:$16 sps:$4 sm:$0xff]  }
 0x337   : > { %5186 = vmatprep.subr.bf16.mxu1 %v8439_v52  ;;  %v8522_v52 = vld [vmem:[%s10170_s3 + $0x9a4] ss:$16 sps:$4 sm:$0xff]  }
 0x339   : > { %5105 = vmatpush1.bf16.msra.mxu0 %v8434_v53  ;;  %v8525_v53 = vld [vmem:[%s10170_s3 + $0x9ac] ss:$16 sps:$4 sm:$0xff]  }
 0x33a   : > { %5187 = vmatpush1.bf16.msra.mxu1 %v8437_v43  ;;  %5986 = vmatprep.subr.bf16.mxu0 %v8442_v55  ;;  %v8520_v43 = vld [vmem:[%s10170_s3 + $0x9a0] ss:$16 sps:$4 sm:$0xff]   ;;  %v8523_v55 = vld [vmem:[%s10170_s3 + $0x9a8] ss:$16 sps:$4 sm:$0xff]  }
 0x33b   : > { %6068 = vmatprep.subr.bf16.mxu1 %v8445_v56  ;;  %v8528_v56 = vld [vmem:[%s10170_s3 + $0x9c4] ss:$16 sps:$4 sm:$0xff]  }
 0x33c   : > { %5107 = vmatmul.mubr.bf16.vlgmr.msra.gmra.mrb[0].mxu0 %v6969_v38 }
 0x33d   : > { %5189 = vmatmul.mubr.bf16.vlgmr.msra.gmra.mrb[0].mxu1 %v6969_v38  ;;  %5987 = vmatpush1.bf16.msra.mxu0 %v8440_v37  ;;  %v8526_v37 = vld [vmem:[%s10170_s3 + $0x9c0] ss:$16 sps:$4 sm:$0xff]   ;;  %v8529_v38 = vld [vmem:[%s10170_s3 + $0x9c8] ss:$16 sps:$4 sm:$0xff]  }
 0x33e   : > { %6018 = vmatprep.mubr.bf16.mxu0 %v5339_v11  ;;  %6069 = vmatpush1.bf16.msra.mxu1 %v8443_v33  ;;  %v8534_v33 = vld [vmem:[%s10170_s3 + $0x9e4] ss:$16 sps:$4 sm:$0xff]  }
 0x33f   : > { %6100 = vmatprep.mubr.bf16.mxu1 %v5339_v11  ;;  %5988 = vmatprep.subr.bf16.mxu0 %v8450_v5  ;;  %v8537_v5 = vld [vmem:[%s10170_s3 + $0x9ec] ss:$16 sps:$4 sm:$0xff]   ;;  %v8532_v11 = vld [vmem:[%s10170_s3 + $0x9e0] ss:$16 sps:$4 sm:$0xff]  }
 0x340   : > { %6070 = vmatprep.subr.bf16.mxu1 %v8453_v57  ;;  %v9942_v57 = vld [vmem:[#allocation2 + $0x8] sm:$0x66] }
 0x341   : > { %5989 = vmatpush1.bf16.msra.mxu0 %v8448_v47  ;;  %v7227_v47 = vcombine.low %v9744_v54, %v9744_v54  ;;  %v8538_v54 = vld [vmem:[%s10170_s3 + $0xa00] ss:$16 sps:$4 sm:$0xff]  }
 0x342   : > { %6071 = vmatpush1.bf16.msra.mxu1 %v8451_v58  ;;  %5990 = vmatprep.subr.bf16.mxu0 %v8456_v60  ;;  %v8535_v58 = vld [vmem:[%s10170_s3 + $0x9e8] ss:$16 sps:$4 sm:$0xff]   ;;  %v8540_v60 = vld [vmem:[%s10170_s3 + $0xa04] ss:$16 sps:$4 sm:$0xff]  }
 0x343   : > { %6072 = vmatprep.subr.bf16.mxu1 %v8459_v61  ;;  %v8543_v61 = vld [vmem:[%s10170_s3 + $0xa0c] ss:$16 sps:$4 sm:$0xff]  }
 0x345   : > { %5991 = vmatpush1.bf16.msra.mxu0 %v8454_v63  ;;  %v7230_v63 = vcombine.high %v9942_v57, %v9942_v57 }
 0x346   : > { %6073 = vmatpush1.bf16.msra.mxu1 %v8457_v0  ;;  %5992 = vmatprep.subr.bf16.mxu0 %v8462_v48  ;;  %v5338_v0 = vrot.slane %v7227_v47, 1  ;;  %v8541_v48 = vld [vmem:[%s10170_s3 + $0xa08] ss:$16 sps:$4 sm:$0xff]   ;;  %v8623_v47 = vld [vmem:[%s10170_s3 + $0xbac] ss:$16 sps:$4 sm:$0xff]  }
 0x347   : > { %6074 = vmatprep.subr.bf16.mxu1 %v8465_v30  ;;  %v8548_v30 = vld [vmem:[%s10170_s3 + $0xa24] ss:$16 sps:$4 sm:$0xff]  }
 0x349   : > { %5993 = vmatpush1.bf16.msra.mxu0 %v8460_v1  ;;  %v5341_v1 = vrot.slane %v7230_v63, 1  ;;  %v8629_v63 = vld [vmem:[%s10170_s3 + $0xbcc] ss:$16 sps:$4 sm:$0xff]  }
 0x34a   : > { %6075 = vmatpush1.bf16.msra.mxu1 %v8463_v8  ;;  %5994 = vmatprep.subr.bf16.mxu0 %v8468_v9  ;;  %v8551_v8 = vld [vmem:[%s10170_s3 + $0xa2c] ss:$16 sps:$4 sm:$0xff]   ;;  %v8546_v9 = vld [vmem:[%s10170_s3 + $0xa20] ss:$16 sps:$4 sm:$0xff]  }
 0x34b   : > { %6076 = vmatprep.subr.bf16.mxu1 %v8471_v12  ;;  %v8549_v12 = vld [vmem:[%s10170_s3 + $0xa28] ss:$16 sps:$4 sm:$0xff]  }
 0x34d   : > { %5995 = vmatpush1.bf16.msra.mxu0 %v8466_v13  ;;  %v8554_v13 = vld [vmem:[%s10170_s3 + $0xa44] ss:$16 sps:$4 sm:$0xff]  }
 0x34e   : > { %6077 = vmatpush1.bf16.msra.mxu1 %v8469_v34  ;;  %5996 = vmatprep.subr.bf16.mxu0 %v8474_v16  ;;  %v8557_v34 = vld [vmem:[%s10170_s3 + $0xa4c] ss:$16 sps:$4 sm:$0xff]   ;;  %v8552_v16 = vld [vmem:[%s10170_s3 + $0xa40] ss:$16 sps:$4 sm:$0xff]  }
 0x34f   : > { %6078 = vmatprep.subr.bf16.mxu1 %v8477_v15  ;;  %v8555_v15 = vld [vmem:[%s10170_s3 + $0xa48] ss:$16 sps:$4 sm:$0xff]  }
 0x351   : > { %5997 = vmatpush1.bf16.msra.mxu0 %v8472_v17  ;;  %v8560_v17 = vld [vmem:[%s10170_s3 + $0xa64] ss:$16 sps:$4 sm:$0xff]  }
 0x352   : > { %6079 = vmatpush1.bf16.msra.mxu1 %v8475_v18  ;;  %5998 = vmatprep.subr.bf16.mxu0 %v8480_v19  ;;  %v8563_v18 = vld [vmem:[%s10170_s3 + $0xa6c] ss:$16 sps:$4 sm:$0xff]   ;;  %v8558_v19 = vld [vmem:[%s10170_s3 + $0xa60] ss:$16 sps:$4 sm:$0xff]  }
 0x353   : > { %6080 = vmatprep.subr.bf16.mxu1 %v8483_v20  ;;  %v8561_v20 = vld [vmem:[%s10170_s3 + $0xa68] ss:$16 sps:$4 sm:$0xff]  }
 0x355   : > { %5999 = vmatpush1.bf16.msra.mxu0 %v8478_v21  ;;  %v8566_v21 = vld [vmem:[%s10170_s3 + $0xa84] ss:$16 sps:$4 sm:$0xff]  }
 0x356   : > { %6081 = vmatpush1.bf16.msra.mxu1 %v8481_v23  ;;  %6000 = vmatprep.subr.bf16.mxu0 %v8486_v24  ;;  %v8569_v23 = vld [vmem:[%s10170_s3 + $0xa8c] ss:$16 sps:$4 sm:$0xff]   ;;  %v8564_v24 = vld [vmem:[%s10170_s3 + $0xa80] ss:$16 sps:$4 sm:$0xff]  }
 0x357   : > { %6082 = vmatprep.subr.bf16.mxu1 %v8489_v26  ;;  %v8567_v26 = vld [vmem:[%s10170_s3 + $0xa88] ss:$16 sps:$4 sm:$0xff]  }
 0x359   : > { %6001 = vmatpush1.bf16.msra.mxu0 %v8484_v27  ;;  %v8572_v27 = vld [vmem:[%s10170_s3 + $0xaa4] ss:$16 sps:$4 sm:$0xff]  }
 0x35a   : > { %6083 = vmatpush1.bf16.msra.mxu1 %v8487_v7  ;;  %6002 = vmatprep.subr.bf16.mxu0 %v8492_v14  ;;  %v8575_v7 = vld [vmem:[%s10170_s3 + $0xaac] ss:$16 sps:$4 sm:$0xff]   ;;  %v8570_v14 = vld [vmem:[%s10170_s3 + $0xaa0] ss:$16 sps:$4 sm:$0xff]  }
 0x35b   : > { %6084 = vmatprep.subr.bf16.mxu1 %v8495_v28  ;;  %v8573_v28 = vld [vmem:[%s10170_s3 + $0xaa8] ss:$16 sps:$4 sm:$0xff]  }
 0x35d   : > { %6003 = vmatpush1.bf16.msra.mxu0 %v8490_v29  ;;  %v8578_v29 = vld [vmem:[%s10170_s3 + $0xac4] ss:$16 sps:$4 sm:$0xff]  }
 0x35e   : > { %6085 = vmatpush1.bf16.msra.mxu1 %v8493_v10  ;;  %6004 = vmatprep.subr.bf16.mxu0 %v8498_v32  ;;  %v8581_v10 = vld [vmem:[%s10170_s3 + $0xacc] ss:$16 sps:$4 sm:$0xff]   ;;  %v8576_v32 = vld [vmem:[%s10170_s3 + $0xac0] ss:$16 sps:$4 sm:$0xff]  }
 0x35f   : > { %6086 = vmatprep.subr.bf16.mxu1 %v8501_v35  ;;  %v8579_v35 = vld [vmem:[%s10170_s3 + $0xac8] ss:$16 sps:$4 sm:$0xff]  }
 0x361   : > { %6005 = vmatpush1.bf16.msra.mxu0 %v8496_v36  ;;  %v8584_v36 = vld [vmem:[%s10170_s3 + $0xae4] ss:$16 sps:$4 sm:$0xff]  }
 0x362   : > { %6087 = vmatpush1.bf16.msra.mxu1 %v8499_v39  ;;  %6006 = vmatprep.subr.bf16.mxu0 %v8504_v40  ;;  %v8587_v39 = vld [vmem:[%s10170_s3 + $0xaec] ss:$16 sps:$4 sm:$0xff]   ;;  %v8582_v40 = vld [vmem:[%s10170_s3 + $0xae0] ss:$16 sps:$4 sm:$0xff]  }
 0x363   : > { %6088 = vmatprep.subr.bf16.mxu1 %v8507_v41  ;;  %v8585_v41 = vld [vmem:[%s10170_s3 + $0xae8] ss:$16 sps:$4 sm:$0xff]  }
 0x365   : > { %6007 = vmatpush1.bf16.msra.mxu0 %v8502_v59  ;;  %v8590_v59 = vld [vmem:[%s10170_s3 + $0xb04] ss:$16 sps:$4 sm:$0xff]  }
 0x366   : > { %6089 = vmatpush1.bf16.msra.mxu1 %v8505_v42  ;;  %6008 = vmatprep.subr.bf16.mxu0 %v8510_v44  ;;  %v8593_v42 = vld [vmem:[%s10170_s3 + $0xb0c] ss:$16 sps:$4 sm:$0xff]   ;;  %v8588_v44 = vld [vmem:[%s10170_s3 + $0xb00] ss:$16 sps:$4 sm:$0xff]  }
 0x367   : > { %6090 = vmatprep.subr.bf16.mxu1 %v8513_v62  ;;  %v8591_v62 = vld [vmem:[%s10170_s3 + $0xb08] ss:$16 sps:$4 sm:$0xff]  }
 0x369   : > { %6009 = vmatpush1.bf16.msra.mxu0 %v8508_v4  ;;  %v8596_v4 = vld [vmem:[%s10170_s3 + $0xb24] ss:$16 sps:$4 sm:$0xff]  }
 0x36a   : > { %6091 = vmatpush1.bf16.msra.mxu1 %v8511_v45  ;;  %6010 = vmatprep.subr.bf16.mxu0 %v8516_v46  ;;  %v8599_v45 = vld [vmem:[%s10170_s3 + $0xb2c] ss:$16 sps:$4 sm:$0xff]   ;;  %v8594_v46 = vld [vmem:[%s10170_s3 + $0xb20] ss:$16 sps:$4 sm:$0xff]  }
 0x36b   : > { %6092 = vmatprep.subr.bf16.mxu1 %v8519_v49  ;;  %v8597_v49 = vld [vmem:[%s10170_s3 + $0xb28] ss:$16 sps:$4 sm:$0xff]  }
 0x36d   : > { %6011 = vmatpush1.bf16.msra.mxu0 %v8514_v50  ;;  %v8602_v50 = vld [vmem:[%s10170_s3 + $0xb44] ss:$16 sps:$4 sm:$0xff]  }
 0x36e   : > { %6093 = vmatpush1.bf16.msra.mxu1 %v8517_v51  ;;  %6012 = vmatprep.subr.bf16.mxu0 %v8522_v52  ;;  %v8605_v51 = vld [vmem:[%s10170_s3 + $0xb4c] ss:$16 sps:$4 sm:$0xff]   ;;  %v8600_v52 = vld [vmem:[%s10170_s3 + $0xb40] ss:$16 sps:$4 sm:$0xff]  }
 0x36f   : > { %6094 = vmatprep.subr.bf16.mxu1 %v8525_v53  ;;  %v8603_v53 = vld [vmem:[%s10170_s3 + $0xb48] ss:$16 sps:$4 sm:$0xff]  }
 0x371   : > { %6013 = vmatpush1.bf16.msra.mxu0 %v8520_v43  ;;  %v8608_v43 = vld [vmem:[%s10170_s3 + $0xb64] ss:$16 sps:$4 sm:$0xff]  }
 0x372   : > { %6095 = vmatpush1.bf16.msra.mxu1 %v8523_v55  ;;  %6014 = vmatprep.subr.bf16.mxu0 %v8528_v56  ;;  %v8611_v55 = vld [vmem:[%s10170_s3 + $0xb6c] ss:$16 sps:$4 sm:$0xff]   ;;  %v8606_v56 = vld [vmem:[%s10170_s3 + $0xb60] ss:$16 sps:$4 sm:$0xff]  }
 0x373   : > { %6096 = vmatprep.subr.bf16.mxu1 %v8531_v31  ;;  %v8609_v31 = vld [vmem:[%s10170_s3 + $0xb68] ss:$16 sps:$4 sm:$0xff]  }
 0x375   : > { %6015 = vmatpush1.bf16.msra.mxu0 %v8526_v37  ;;  %v8614_v37 = vld [vmem:[%s10170_s3 + $0xb84] ss:$16 sps:$4 sm:$0xff]  }
 0x376   : > { %6097 = vmatpush1.bf16.msra.mxu1 %v8529_v38  ;;  %6016 = vmatprep.subr.bf16.mxu0 %v8534_v33  ;;  %v8617_v38 = vld [vmem:[%s10170_s3 + $0xb8c] ss:$16 sps:$4 sm:$0xff]   ;;  %v8612_v33 = vld [vmem:[%s10170_s3 + $0xb80] ss:$16 sps:$4 sm:$0xff]  }
 0x377   : > { %6098 = vmatprep.subr.bf16.mxu1 %v8537_v5  ;;  %v8615_v5 = vld [vmem:[%s10170_s3 + $0xb88] ss:$16 sps:$4 sm:$0xff]  }
 0x379   : > { %6017 = vmatpush1.bf16.msra.mxu0 %v8532_v11  ;;  %v8620_v11 = vld [vmem:[%s10170_s3 + $0xba4] ss:$16 sps:$4 sm:$0xff]  }
 0x37a   : > { %6099 = vmatpush1.bf16.msra.mxu1 %v8535_v58  ;;  %6027 = vmatprep.subr.bf16.mxu0 %v8540_v60  ;;  %v8618_v58 = vld [vmem:[%s10170_s3 + $0xba0] ss:$16 sps:$4 sm:$0xff]   ;;  %v8621_v60 = vld [vmem:[%s10170_s3 + $0xba8] ss:$16 sps:$4 sm:$0xff]  }
 0x37b   : > { %6109 = vmatprep.subr.bf16.mxu1 %v8543_v61  ;;  %v8626_v61 = vld [vmem:[%s10170_s3 + $0xbc4] ss:$16 sps:$4 sm:$0xff]  }
 0x37c   : > { %6019 = vmatmul.mubr.bf16.vlgmr.msra.gmra.mrb[0].mxu0 %v5338_v0 }
 0x37d   : > { %6101 = vmatmul.mubr.bf16.vlgmr.msra.gmra.mrb[0].mxu1 %v5338_v0  ;;  %6028 = vmatpush1.bf16.msra.mxu0 %v8538_v54  ;;  %v8624_v54 = vld [vmem:[%s10170_s3 + $0xbc0] ss:$16 sps:$4 sm:$0xff]   ;;  %v8627_v0 = vld [vmem:[%s10170_s3 + $0xbc8] ss:$16 sps:$4 sm:$0xff]  }
 0x37e   : > { %6059 = vmatprep.mubr.bf16.mxu0 %v5341_v1  ;;  %6110 = vmatpush1.bf16.msra.mxu1 %v8541_v48  ;;  %v8632_v48 = vld [vmem:[%s10170_s3 + $0xbe4] ss:$16 sps:$4 sm:$0xff]  }
 0x37f   : > { %6141 = vmatprep.mubr.bf16.mxu1 %v5341_v1  ;;  %6029 = vmatprep.subr.bf16.mxu0 %v8548_v30  ;;  %v8635_v30 = vld [vmem:[%s10170_s3 + $0xbec] ss:$16 sps:$4 sm:$0xff]   ;;  %v8630_v1 = vld [vmem:[%s10170_s3 + $0xbe0] ss:$16 sps:$4 sm:$0xff]  }
 0x380   : > { %6111 = vmatprep.subr.bf16.mxu1 %v8551_v8  ;;  %v7229_v8 = vcombine.low %v9942_v57, %v9942_v57  ;;  %v6154_v57 = vld [vmem:[%s10171_s4] sm:$0xf] }
 0x381   : > { %6030 = vmatpush1.bf16.msra.mxu0 %v8546_v9  ;;  %v8633_v9 = vld [vmem:[%s10170_s3 + $0xbe8] ss:$16 sps:$4 sm:$0xff]  }
 0x382   : > { %6112 = vmatpush1.bf16.msra.mxu1 %v8549_v12  ;;  %6031 = vmatprep.subr.bf16.mxu0 %v8554_v13  ;;  %v5340_v12 = vrot.slane %v7229_v8, 1  ;;  %v440_v13 = vld [vmem:[%s10173_s6] sm:$0xf] }
 0x383   : > { %6113 = vmatprep.subr.bf16.mxu1 %v8557_v34  ;;  %v445_v34 = vrot.slane %v440_v13, %v9117_v3 }
 0x385   : > { %6032 = vmatpush1.bf16.msra.mxu0 %v8552_v16  ;;  %v453_v16 = vrot.slane %v440_v13, %v9235_v22 }
 0x386   : > { %6114 = vmatpush1.bf16.msra.mxu1 %v8555_v15  ;;  %6033 = vmatprep.subr.bf16.mxu0 %v8560_v17  ;;  %v449_v15 = vrot.slane %v440_v13, %v9125_v6  ;;  %v6159_v17 = vrot.slane %v6154_v57, %v9117_v3 }
 0x387   : > { %6115 = vmatprep.subr.bf16.mxu1 %v8563_v18  ;;  %v8713_v18 = vmov 1983009808  }
 0x389   : > { %6034 = vmatpush1.bf16.msra.mxu0 %v8558_v19  ;;  %v6207_v19 = vunpack.c.l.s4 %v8713_v18 }
 0x38a   : > { %6116 = vmatpush1.bf16.msra.mxu1 %v8561_v20  ;;  %6035 = vmatprep.subr.bf16.mxu0 %v8566_v21  ;;  %v457_v20 = vrot.slane %v440_v13, %v9244_v25 }
 0x38b   : > { %6117 = vmatprep.subr.bf16.mxu1 %v8569_v23  ;;  %v6167_v23 = vrot.slane %v6154_v57, %v9235_v22  ;;  %v6208_v3 = vunpack.c.0.s8 %v6207_v19 }
 0x38d   : > { %6036 = vmatpush1.bf16.msra.mxu0 %v8564_v24  ;;  %v6163_v24 = vrot.slane %v6154_v57, %v9125_v6 }
 0x38e   : > { %6118 = vmatpush1.bf16.msra.mxu1 %v8567_v26  ;;  %6037 = vmatprep.subr.bf16.mxu0 %v8572_v27 }
 0x38f   : > { %6119 = vmatprep.subr.bf16.mxu1 %v8575_v7 }
 0x391   : > { %6038 = vmatpush1.bf16.msra.mxu0 %v8570_v14  ;;  %v6171_v14 = vrot.slane %v6154_v57, %v9244_v25 }
 0x392   : > { %6120 = vmatpush1.bf16.msra.mxu1 %v8573_v28  ;;  %6039 = vmatprep.subr.bf16.mxu0 %v8578_v29 }
 0x393   : > { %6121 = vmatprep.subr.bf16.mxu1 %v8581_v10 }
 0x395   : > { %6040 = vmatpush1.bf16.msra.mxu0 %v8576_v32 }
 0x396   : > { %6122 = vmatpush1.bf16.msra.mxu1 %v8579_v35  ;;  %6041 = vmatprep.subr.bf16.mxu0 %v8584_v36 }
 0x397   : > { %6123 = vmatprep.subr.bf16.mxu1 %v8587_v39 }
 0x399   : > { %6042 = vmatpush1.bf16.msra.mxu0 %v8582_v40 }
 0x39a   : > { %6124 = vmatpush1.bf16.msra.mxu1 %v8585_v41  ;;  %6043 = vmatprep.subr.bf16.mxu0 %v8590_v59 }
 0x39b   : > { %6125 = vmatprep.subr.bf16.mxu1 %v8593_v42 }
 0x39d   : > { %6044 = vmatpush1.bf16.msra.mxu0 %v8588_v44 }
 0x39e   : > { %6126 = vmatpush1.bf16.msra.mxu1 %v8591_v62  ;;  %6045 = vmatprep.subr.bf16.mxu0 %v8596_v4  ;;  %v6211_v4 = vsub.s32 %v6208_v3, %v9114_v2 }
 0x39f   : > { %6127 = vmatprep.subr.bf16.mxu1 %v8599_v45 }
 0x3a1   : > { %6046 = vmatpush1.bf16.msra.mxu0 %v8594_v46 }
 0x3a2   : > { %6128 = vmatpush1.bf16.msra.mxu1 %v8597_v49  ;;  %6047 = vmatprep.subr.bf16.mxu0 %v8602_v50 }
 0x3a3   : > { %6129 = vmatprep.subr.bf16.mxu1 %v8605_v51 }
 0x3a5   : > { %6048 = vmatpush1.bf16.msra.mxu0 %v8600_v52 }
 0x3a6   : > { %6130 = vmatpush1.bf16.msra.mxu1 %v8603_v53  ;;  %6049 = vmatprep.subr.bf16.mxu0 %v8608_v43 }
 0x3a7   : > { %6131 = vmatprep.subr.bf16.mxu1 %v8611_v55 }
 0x3a9   : > { %6050 = vmatpush1.bf16.msra.mxu0 %v8606_v56 }
 0x3aa   : > { %6132 = vmatpush1.bf16.msra.mxu1 %v8609_v31  ;;  %6051 = vmatprep.subr.bf16.mxu0 %v8614_v37 }
 0x3ab   : > { %6133 = vmatprep.subr.bf16.mxu1 %v8617_v38 }
 0x3ad   : > { %6052 = vmatpush1.bf16.msra.mxu0 %v8612_v33 }
 0x3ae   : > { %6134 = vmatpush1.bf16.msra.mxu1 %v8615_v5  ;;  %6053 = vmatprep.subr.bf16.mxu0 %v8620_v11 }
 0x3af   : > { %6135 = vmatprep.subr.bf16.mxu1 %v8623_v47 }
 0x3b1   : > { %6054 = vmatpush1.bf16.msra.mxu0 %v8618_v58 }
 0x3b2   : > { %6136 = vmatpush1.bf16.msra.mxu1 %v8621_v60  ;;  %6055 = vmatprep.subr.bf16.mxu0 %v8626_v61 }
 0x3b3   : > { %6137 = vmatprep.subr.bf16.mxu1 %v8629_v63 }
 0x3b5   : > { %6056 = vmatpush1.bf16.msra.mxu0 %v8624_v54 }
 0x3b6   : > { %6138 = vmatpush1.bf16.msra.mxu1 %v8627_v0  ;;  %6057 = vmatprep.subr.bf16.mxu0 %v8632_v48 }
 0x3b7   : > { %6139 = vmatprep.subr.bf16.mxu1 %v8635_v30 }
 0x3b9   : > { %6058 = vmatpush1.bf16.msra.mxu0 %v8630_v1 }
 0x3ba   : > { %6140 = vmatpush1.bf16.msra.mxu1 %v8633_v9 }
 0x3bc   : > { %6060 = vmatmul.mubr.bf16.vlgmr.msra.gmra.mrb[0].mxu0 %v5340_v12 }
 0x3bd   : > { %6142 = vmatmul.mubr.bf16.vlgmr.msra.gmra.mrb[0].mxu1 %v5340_v12 }
 0x48f   : > { %v6061_v21 = vpop.f32.mrb[0].mxu0 }
 0x490   : > { %v7367_v26 = vadd.f32 %v6061_v21, %v445_v34  ;;  %v6143_v27 = vpop.f32.mrb[0].mxu1  ;;  %v6063_v7 = vpop.f32.mrb[1].mxu0 }
 0x491   : > { %v7371_v28 = vadd.f32 %v6143_v27, %v453_v16  ;;  %v7369_v29 = vadd.f32 %v6063_v7, %v449_v15  ;;  %v6145_v10 = vpop.f32.mrb[1].mxu1  ;;  %v6065_v32 = vpop.f32.mrb[2].mxu0 }
 0x492   : > { %v7368_v35 = vadd.f32 %v7367_v26, %v6159_v17  ;;  %v7373_v36 = vadd.f32 %v6145_v10, %v457_v20  ;;  %v6147_v39 = vpop.f32.mrb[2].mxu1  ;;  %v6066_v40 = vpop.f32.mrb[3].mxu0 }
 0x493   : > { %v7372_v41 = vadd.f32 %v7371_v28, %v6167_v23  ;;  %v7370_v59 = vadd.f32 %v7369_v29, %v6163_v24  ;;  %v6148_v42 = vpop.f32.mrb[3].mxu1 }
 0x494   : > { %vm6184_vm11 = vcmp.ge.f32.partialorder %v7368_v35, 0.0  ;;  %v6188_v6 = vmul.f32 0.01, %v7368_v35  ;;  %v7374_v22 = vadd.f32 %v7373_v36, %v6171_v14 }
 0x495   : > { %vm6186_vm12 = vcmp.ge.f32.partialorder %v7372_v41, 0.0  ;;  %v6190_v44 = vmul.f32 0.01, %v7372_v41  ;;  %vm6185_vm13 = vcmp.ge.f32.partialorder %v7370_v59, 0.0  ;;  %v6189_v25 = vmul.f32 0.01, %v7370_v59 }
 0x496   : > { %v6192_v62 = vsel %vm6184_vm11, %v7368_v35, %v6188_v6  ;;  %vm6187_vm14 = vcmp.ge.f32.partialorder %v7374_v22, 0.0  ;;  %v6191_v45 = vmul.f32 0.01, %v7374_v22 }
 0x497   : > { %v6194_v46 = vsel %vm6186_vm12, %v7372_v41, %v6190_v44  ;;  %v6193_v49 = vsel %vm6185_vm13, %v7370_v59, %v6189_v25 }
 0x498   : > { %v7359_v50 = vpack.c.bf16 %v6193_v49, %v6192_v62  ;;  %v6195_v51 = vsel %vm6187_vm14, %v7374_v22, %v6191_v45 }
 0x499   : > { %v7360_v52 = vpack.c.bf16 %v6195_v51, %v6194_v46 }
 0x49a   : > { %v6212_v53 = vrot.slane %v7359_v50, %v6211_v4 }
 0x49b   : > { %v6219_v43 = vrot.slane %v7360_v52, %v6211_v4 }
 0x49d   : > { %v6220_v55 = vcombine.low %v6212_v53, %v6219_v43 }
 0x49f   : > { %6222 = vst [vmem:[%s308_s14] sm:$0xff] %v6220_v55 }
 0x4a0 PF: > { %s19_s24 = sadd.s32 1, %s8706_s24  }
 0x4a1   : > { %p16_p9 = scmp.ge.s32.totalorder %s19_s24, 4  }
 0x4a3   :  { %18 = sbr.rel (!%p16_p9) target bundleno = 2 (0x2), region = 90 }
 0x4aa   :  { %6244 = vsyncpa [#allocation4], 1 }
 0x4ab   :  { %6246 = vsyncpa [#allocation4 + $0x1], 1 }
 0x4ac   :  { %6247 = vsyncpa [#allocation6], 1 }

</bundles_post_ra>
